<compile_context>
chip_gen: v7x
topology: tpu7x:2x2x1
jax: 0.10.0
libtpu: 0.0.40
codegen_flags: <defaults>
</compile_context>

<pallas_src>
import numpy as np

import jax
import jax.numpy as jnp
from jax import lax
from jax.experimental import pallas as pl
from jax.experimental.pallas import tpu as pltpu

KH = 5                       # conv kernel size (kernel_size=5, padding=2)
C1, C2, NCLS = 16, 32, 10
PH1, PH2 = 14, 7             # pooled spatial sizes after conv1 / conv2
N1 = 256                     # lane-padded conv1 output width (14*16 = 224 -> 256)
N2 = 256                     # lane-padded conv2 output width (7*32  = 224 -> 256)


# ------------------------------- fused kernel --------------------------------

def _make_fused_kernel(tb):
    """conv1+pool1 -> conv2+pool2 -> Linear -> log_softmax for `tb` images per grid step."""

    def kernel(x_ref, w1_ref, b1_ref, w2_ref, b2_ref, wl_ref, bl_ref,
               out_ref, xe_s, xo_s, ye_s, yo_s):
        f32 = jnp.float32

        # ---- stage padded input rows into row-parity-split 2-D scratch (rows = (h, t)) --
        for h in range(16):
            xe_s[h * tb:(h + 1) * tb, :] = x_ref[2 * h]          # even padded rows
            xo_s[h * tb:(h + 1) * tb, :] = x_ref[2 * h + 1]      # odd  padded rows

        # ---- conv1(1->16, 5x5, pad 2) + bias + ReLU + 2x2 maxpool ------------------------
        # pre-pool row parity p handled by row selection, col parity q folded into weights,
        # H taps folded into K (K = 5*32 = 160).  Pool = elementwise max of 4 accumulators.
        xpar = (xe_s, xo_s)
        best1 = None
        for p in range(2):
            pieces = []
            for ki in range(KH):
                r = p + ki
                pieces.append(xpar[r % 2][(r // 2) * tb:(r // 2 + PH1) * tb, :])
            lhs = jnp.concatenate(pieces, axis=1)                 # [14*tb, 160] bf16
            for q in range(2):
                acc = jnp.dot(lhs, w1_ref[q], preferred_element_type=f32)   # [14*tb, 256]
                best1 = acc if best1 is None else jnp.maximum(best1, acc)
        # max(ReLU(acc+b)) == ReLU(max(acc)+b) (shared bias, monotone ops)
        res1 = jnp.maximum(best1 + b1_ref[...], 0.0)              # [14*tb, 256] f32, pooled

        # ---- scatter pooled rows into H-padded, row-parity-split scratch for conv2 -------
        zblk = jnp.zeros((tb, N1), jnp.bfloat16)
        ye_s[0:tb, :] = zblk
        ye_s[8 * tb:9 * tb, :] = zblk
        yo_s[0:tb, :] = zblk
        yo_s[8 * tb:9 * tb, :] = zblk
        for r1 in range(PH1):                                     # padded row = r1 + 2
            blk = res1[r1 * tb:(r1 + 1) * tb, :].astype(jnp.bfloat16)
            dst = ye_s if (r1 % 2 == 0) else yo_s
            dst[(r1 // 2 + 1) * tb:(r1 // 2 + 2) * tb, :] = blk

        # ---- conv2(16->32, 5x5, pad 2) + bias + ReLU + 2x2 maxpool -----------------------
        # W-padding of conv2's input is absorbed into the banded weights (out-of-range taps
        # dropped), H-padding comes from the zeroed boundary rows of ye_s/yo_s.
        ypar = (ye_s, yo_s)
        best2 = None
        for p in range(2):
            taps = []
            for ki in range(KH):
                r = p + ki
                taps.append(ypar[r % 2][(r // 2) * tb:(r // 2 + PH2) * tb, :])  # [7*tb,256]
            for q in range(2):
                acc = None
                for ki in range(KH):
                    d = jnp.dot(taps[ki], w2_ref[q, ki], preferred_element_type=f32)
                    acc = d if acc is None else acc + d
                best2 = acc if best2 is None else jnp.maximum(best2, acc)
        res2 = jnp.maximum(best2 + b2_ref[...], 0.0)              # [7*tb, 256] f32, pooled

        # ---- Linear(32*7*7 -> 10) + log_softmax, batched over the tb images --------------
        acc_l = None
        for h in range(PH2):
            d = jnp.dot(res2[h * tb:(h + 1) * tb, :], wl_ref[h],
                        preferred_element_type=f32)                # [tb, 10]
            acc_l = d if acc_l is None else acc_l + d
        logits = acc_l + bl_ref[...]                               # [tb, 10] f32
        mx = jnp.max(logits, axis=-1, keepdims=True)
        s = logits - mx
        lse = jnp.log(jnp.sum(jnp.exp(s), axis=-1, keepdims=True))
        out_ref[...] = (s - lse).astype(out_ref.dtype)

    return kernel


# ------------------------------ pallas_call wrapper ---------------------------

def _choose_tb(b):
    # Multiples of 8 keep every block/slice sublane-aligned; >=2 grid steps whenever
    # b > tb so ("parallel",) can shard the grid across both v7x TensorCores.
    return 8 if b <= 32 else 32


def my_awesome_model_forward(packed, x_nchw):
    """MyAwesomeModel(kernel_size=5) forward. x_nchw: [B, 1, 28, 28] -> [B, 10] log-probs."""
    b = x_nchw.shape[0]
    tb = _choose_tb(b)
    bp = ((b + tb - 1) // tb) * tb
    steps = bp // tb

    # Input prep (only XLA glue in the whole forward): cast, pad, put batch in the middle.
    x = x_nchw.reshape(b, 28, 28).astype(jnp.bfloat16)
    if bp != b:
        x = jnp.pad(x, ((0, bp - b), (0, 0), (0, 0)))
    xp = jnp.pad(x, ((0, 0), (2, 2), (2, 2)))                     # [bp, 32, 32]
    xpt = jnp.transpose(xp, (1, 0, 2))                            # [32, bp, 32] H-major

    flops = bp * (4 * 2 * PH1 * (KH * 32) * N1           # conv1 (4 matmuls, K folded)
                  + 20 * 2 * PH2 * N1 * N2               # conv2 (20 matmuls)
                  + PH2 * 2 * N2 * NCLS)                 # linear head
    bytes_acc = (xpt.size * 2 + packed["w1"].size * 2 + packed["w2"].size * 2
                 + packed["wl"].size * 4
                 + (packed["b1"].size + packed["b2"].size + packed["bl"].size) * 4
                 + bp * NCLS * 4)

    out = pl.pallas_call(
        _make_fused_kernel(tb),
        out_shape=jax.ShapeDtypeStruct((bp, NCLS), jnp.float32),
        grid=(steps,),
        in_specs=[
            pl.BlockSpec((32, tb, 32), lambda i: (0, i, 0)),          # padded images
            pl.BlockSpec((2, KH * 32, N1), lambda i: (0, 0, 0)),      # conv1 banded w (bf16)
            pl.BlockSpec((1, N1), lambda i: (0, 0)),                  # conv1 bias row (f32)
            pl.BlockSpec((2, KH, N1, N2), lambda i: (0, 0, 0, 0)),    # conv2 banded w (bf16)
            pl.BlockSpec((1, N2), lambda i: (0, 0)),                  # conv2 bias row (f32)
            pl.BlockSpec((PH2, N2, NCLS), lambda i: (0, 0, 0)),       # linear w (f32)
            pl.BlockSpec((1, NCLS), lambda i: (0, 0)),                # linear bias (f32)
        ],
        out_specs=pl.BlockSpec((tb, NCLS), lambda i: (i, 0)),
        scratch_shapes=[
            pltpu.VMEM((16 * tb, 32), jnp.bfloat16),                  # even padded input rows
            pltpu.VMEM((16 * tb, 32), jnp.bfloat16),                  # odd  padded input rows
            pltpu.VMEM((9 * tb, N1), jnp.bfloat16),                   # conv1 out, even padded rows
            pltpu.VMEM((9 * tb, N1), jnp.bfloat16),                   # conv1 out, odd  padded rows
        ],
        compiler_params=pltpu.CompilerParams(
            dimension_semantics=("parallel",),
            vmem_limit_bytes=32 * 1024 * 1024),
        cost_estimate=pl.CostEstimate(flops=int(flops),
                                      transcendentals=int(bp * (NCLS + 1)),
                                      bytes_accessed=int(bytes_acc)),
    )(xpt, packed["w1"], packed["b1"], packed["w2"], packed["b2"],
      packed["wl"], packed["bl"])
    return out[:b]


# ------------------------- one-time parameter packing -------------------------

def _conv1_banded(w_pt):
    """[16,1,5,5] -> [2(q), 5*32, 256]: W-conv + W-pool parity q folded into the matmul,
    H taps folded into the contraction dim; output lanes (pw*16 + co), padded to 256."""
    w = np.asarray(w_pt, np.float32)
    m = np.zeros((2, KH * 32, N1), np.float32)
    for q in range(2):
        for ki in range(KH):
            for kj in range(KH):
                for pw in range(PH1):
                    wcol = 2 * pw + q + kj                       # padded-W input column 0..31
                    m[q, ki * 32 + wcol, pw * C1:(pw + 1) * C1] = w[:, 0, ki, kj]
    return m


def _conv2_banded(w_pt):
    """[32,16,5,5] -> [2(q), 5(ki), 256, 256]: K rows indexed by (w, c1) of the *unpadded*
    conv1 output (out-of-range taps dropped == zero W-padding); output lanes (pw*32 + c2)."""
    w = np.asarray(w_pt, np.float32)
    m = np.zeros((2, KH, N1, N2), np.float32)
    for q in range(2):
        for ki in range(KH):
            for kj in range(KH):
                for pw in range(PH2):
                    wi = 2 * pw + q + kj - 2                      # conv1-output column
                    if 0 <= wi < PH1:
                        m[q, ki, wi * C1:(wi + 1) * C1,
                          pw * C2:(pw + 1) * C2] = w[:, :, ki, kj].T
    return m


def pack_params(params):
    """One-time repack of PyTorch-layout params into kernel-ready tensors."""
    w1 = _conv1_banded(params["conv1_w"])
    w2 = _conv2_banded(params["conv2_w"])
    b1 = np.zeros((1, N1), np.float32)
    b1[0, :PH1 * C1] = np.tile(np.asarray(params["conv1_b"], np.float32), PH1)
    b2 = np.zeros((1, N2), np.float32)
    b2[0, :PH2 * C2] = np.tile(np.asarray(params["conv2_b"], np.float32), PH2)
    # PyTorch flattens NCHW (c,h,w); kernel lane order is (h rows) x (w, c) lanes.
    ow = np.asarray(params["out_w"], np.float32)                  # [10, 1568]
    wl = np.zeros((PH2, N2, NCLS), np.float32)
    wl[:, :PH2 * C2, :] = ow.reshape(NCLS, C2, PH2, PH2).transpose(2, 3, 1, 0).reshape(
        PH2, PH2 * C2, NCLS)
    bl = np.asarray(params["out_b"], np.float32)[None, :]
    return {
        "w1": jnp.asarray(w1, jnp.bfloat16), "b1": jnp.asarray(b1, jnp.float32),
        "w2": jnp.asarray(w2, jnp.bfloat16), "b2": jnp.asarray(b2, jnp.float32),
        "wl": jnp.asarray(wl, jnp.float32),  "bl": jnp.asarray(bl, jnp.float32),
    }


def init_params(kernel_size=5, key=jax.random.PRNGKey(42)):
    """Deterministic init mimicking PyTorch defaults (uniform(+-1/sqrt(fan_in)))."""
    ks = jax.random.split(key, 6)

    def u(k, shape, fan_in):
        bound = 1.0 / jnp.sqrt(float(fan_in))
        return jax.random.uniform(k, shape, jnp.float32, -bound, bound)

    k = kernel_size
    return {
        "conv1_w": u(ks[0], (16, 1, k, k), 1 * k * k),
        "conv1_b": u(ks[1], (16,), 1 * k * k),
        "conv2_w": u(ks[2], (32, 16, 5, 5), 16 * 5 * 5),
        "conv2_b": u(ks[3], (32,), 16 * 5 * 5),
        "out_w":   u(ks[4], (10, 32 * 7 * 7), 32 * 7 * 7),        # PyTorch layout [out, in]
        "out_b":   u(ks[5], (10,), 32 * 7 * 7),
    }


# ------------------------------ pure-JAX reference ----------------------------

def reference_forward(params, x):
    def block(h, w, bias):
        y = lax.conv_general_dilated(h, w, window_strides=(1, 1),
                                     padding=((2, 2), (2, 2)),
                                     dimension_numbers=("NCHW", "OIHW", "NCHW"))
        y = jnp.maximum(y + bias[None, :, None, None], 0.0)
        return lax.reduce_window(y, -jnp.inf, lax.max,
                                 (1, 1, 2, 2), (1, 1, 2, 2), "VALID")

    h = block(x, params["conv1_w"], params["conv1_b"])
    h = block(h, params["conv2_w"], params["conv2_b"])
    h = h.reshape(x.shape[0], -1)
    logits = h @ params["out_w"].T + params["out_b"]
    return jax.nn.log_softmax(logits, axis=-1)


# ----------------------------------- driver -----------------------------------

if __name__ == "__main__":
    # Linear(32*7*7, 10) fixes the pipeline: 28x28 input, kernel_size=5, padding=2.
    B = 2
    x = jax.random.normal(jax.random.PRNGKey(0), (B, 1, 28, 28), jnp.float32)

    params = init_params(kernel_size=5)
    packed = pack_params(params)

    fwd = jax.jit(my_awesome_model_forward)
    out = fwd(packed, x)
    jax.block_until_ready(out)

    assert out.shape == (B, NCLS) and out.dtype == jnp.float32
    # log_softmax rows must sum to ~1 in prob space
    assert bool(jnp.all(jnp.abs(jnp.sum(jnp.exp(out), axis=1) - 1.0) < 1e-4))

    # loose parity vs. a float32 XLA reference (kernel uses bf16 conv operands)
    ref = reference_forward(params, x)
    max_err = float(jnp.max(jnp.abs(out - ref)))
    assert max_err < 0.1, f"mismatch vs reference: {max_err}"

    print("KERNEL_OK")
</pallas_src>

<mosaic_0001>
module attributes {stable_mosaic.version = 11 : i64} {
  func.func @kernel(%arg0: i32, %arg1: memref<32x8x32xbf16, #tpu.memory_space<vmem>>, %arg2: memref<2x160x256xbf16, #tpu.memory_space<vmem>>, %arg3: memref<1x256xf32, #tpu.memory_space<vmem>>, %arg4: memref<2x5x256x256xbf16, #tpu.memory_space<vmem>>, %arg5: memref<1x256xf32, #tpu.memory_space<vmem>>, %arg6: memref<7x256x10xf32, #tpu.memory_space<vmem>>, %arg7: memref<1x10xf32, #tpu.memory_space<vmem>>, %arg8: memref<8x10xf32, #tpu.memory_space<vmem>>, %arg9: memref<128x32xbf16, #tpu.memory_space<vmem>>, %arg10: memref<128x32xbf16, #tpu.memory_space<vmem>>, %arg11: memref<72x256xbf16, #tpu.memory_space<vmem>>, %arg12: memref<72x256xbf16, #tpu.memory_space<vmem>>) attributes {dimension_semantics = [#tpu.dimension_semantics<parallel>], iteration_bounds = array<i64: 1>, scalar_prefetch = 0 : i64, scratch_operands = 4 : i64, tpu.core_type = #tpu.core_type<tc>, window_params = [{transform_indices = @transform_0, window_bounds = array<i64: 32, 8, 32>}, {pipeline_mode = #tpu.pipeline_mode<synchronous>, transform_indices = @transform_1, window_bounds = array<i64: 2, 160, 256>}, {pipeline_mode = #tpu.pipeline_mode<synchronous>, transform_indices = @transform_2, window_bounds = array<i64: 1, 256>}, {pipeline_mode = #tpu.pipeline_mode<synchronous>, transform_indices = @transform_3, window_bounds = array<i64: 2, 5, 256, 256>}, {pipeline_mode = #tpu.pipeline_mode<synchronous>, transform_indices = @transform_4, window_bounds = array<i64: 1, 256>}, {pipeline_mode = #tpu.pipeline_mode<synchronous>, transform_indices = @transform_5, window_bounds = array<i64: 7, 256, 10>}, {pipeline_mode = #tpu.pipeline_mode<synchronous>, transform_indices = @transform_6, window_bounds = array<i64: 1, 10>}, {transform_indices = @transform_7, window_bounds = array<i64: 8, 10>}]} {
    %c0 = arith.constant 0 : index
    %c0_0 = arith.constant 0 : index
    %c0_1 = arith.constant 0 : index
    %0 = vector.load %arg1[%c0, %c0_0, %c0_1] : memref<32x8x32xbf16, #tpu.memory_space<vmem>>, vector<1x8x32xbf16>
    %1 = vector.shape_cast %0 : vector<1x8x32xbf16> to vector<8x32xbf16>
    %c0_2 = arith.constant 0 : index
    %c0_3 = arith.constant 0 : index
    %2 = vector.load %arg9[%c0_2, %c0_3] : memref<128x32xbf16, #tpu.memory_space<vmem>>, vector<8x32xbf16>
    tpu.vector_store %arg9[%c0_2, %c0_3], %1 {strides = array<i32>} : memref<128x32xbf16, #tpu.memory_space<vmem>>, vector<8x32xbf16>,
    %c1 = arith.constant 1 : index
    %c0_4 = arith.constant 0 : index
    %c0_5 = arith.constant 0 : index
    %3 = vector.load %arg1[%c1, %c0_4, %c0_5] : memref<32x8x32xbf16, #tpu.memory_space<vmem>>, vector<1x8x32xbf16>
    %4 = vector.shape_cast %3 : vector<1x8x32xbf16> to vector<8x32xbf16>
    %c0_6 = arith.constant 0 : index
    %c0_7 = arith.constant 0 : index
    %5 = vector.load %arg10[%c0_6, %c0_7] : memref<128x32xbf16, #tpu.memory_space<vmem>>, vector<8x32xbf16>
    tpu.vector_store %arg10[%c0_6, %c0_7], %4 {strides = array<i32>} : memref<128x32xbf16, #tpu.memory_space<vmem>>, vector<8x32xbf16>,
    %c2 = arith.constant 2 : index
    %c0_8 = arith.constant 0 : index
    %c0_9 = arith.constant 0 : index
    %6 = vector.load %arg1[%c2, %c0_8, %c0_9] : memref<32x8x32xbf16, #tpu.memory_space<vmem>>, vector<1x8x32xbf16>
    %7 = vector.shape_cast %6 : vector<1x8x32xbf16> to vector<8x32xbf16>
    %c8 = arith.constant 8 : index
    %c0_10 = arith.constant 0 : index
    %8 = vector.load %arg9[%c8, %c0_10] : memref<128x32xbf16, #tpu.memory_space<vmem>>, vector<8x32xbf16>
    tpu.vector_store %arg9[%c8, %c0_10], %7 {strides = array<i32>} : memref<128x32xbf16, #tpu.memory_space<vmem>>, vector<8x32xbf16>,
    %c3 = arith.constant 3 : index
    %c0_11 = arith.constant 0 : index
    %c0_12 = arith.constant 0 : index
    %9 = vector.load %arg1[%c3, %c0_11, %c0_12] : memref<32x8x32xbf16, #tpu.memory_space<vmem>>, vector<1x8x32xbf16>
    %10 = vector.shape_cast %9 : vector<1x8x32xbf16> to vector<8x32xbf16>
    %c8_13 = arith.constant 8 : index
    %c0_14 = arith.constant 0 : index
    %11 = vector.load %arg10[%c8_13, %c0_14] : memref<128x32xbf16, #tpu.memory_space<vmem>>, vector<8x32xbf16>
    tpu.vector_store %arg10[%c8_13, %c0_14], %10 {strides = array<i32>} : memref<128x32xbf16, #tpu.memory_space<vmem>>, vector<8x32xbf16>,
    %c4 = arith.constant 4 : index
    %c0_15 = arith.constant 0 : index
    %c0_16 = arith.constant 0 : index
    %12 = vector.load %arg1[%c4, %c0_15, %c0_16] : memref<32x8x32xbf16, #tpu.memory_space<vmem>>, vector<1x8x32xbf16>
    %13 = vector.shape_cast %12 : vector<1x8x32xbf16> to vector<8x32xbf16>
    %c16 = arith.constant 16 : index
    %c0_17 = arith.constant 0 : index
    %14 = vector.load %arg9[%c16, %c0_17] : memref<128x32xbf16, #tpu.memory_space<vmem>>, vector<8x32xbf16>
    tpu.vector_store %arg9[%c16, %c0_17], %13 {strides = array<i32>} : memref<128x32xbf16, #tpu.memory_space<vmem>>, vector<8x32xbf16>,
    %c5 = arith.constant 5 : index
    %c0_18 = arith.constant 0 : index
    %c0_19 = arith.constant 0 : index
    %15 = vector.load %arg1[%c5, %c0_18, %c0_19] : memref<32x8x32xbf16, #tpu.memory_space<vmem>>, vector<1x8x32xbf16>
    %16 = vector.shape_cast %15 : vector<1x8x32xbf16> to vector<8x32xbf16>
    %c16_20 = arith.constant 16 : index
    %c0_21 = arith.constant 0 : index
    %17 = vector.load %arg10[%c16_20, %c0_21] : memref<128x32xbf16, #tpu.memory_space<vmem>>, vector<8x32xbf16>
    tpu.vector_store %arg10[%c16_20, %c0_21], %16 {strides = array<i32>} : memref<128x32xbf16, #tpu.memory_space<vmem>>, vector<8x32xbf16>,
    %c6 = arith.constant 6 : index
    %c0_22 = arith.constant 0 : index
    %c0_23 = arith.constant 0 : index
    %18 = vector.load %arg1[%c6, %c0_22, %c0_23] : memref<32x8x32xbf16, #tpu.memory_space<vmem>>, vector<1x8x32xbf16>
    %19 = vector.shape_cast %18 : vector<1x8x32xbf16> to vector<8x32xbf16>
    %c24 = arith.constant 24 : index
    %c0_24 = arith.constant 0 : index
    %20 = vector.load %arg9[%c24, %c0_24] : memref<128x32xbf16, #tpu.memory_space<vmem>>, vector<8x32xbf16>
    tpu.vector_store %arg9[%c24, %c0_24], %19 {strides = array<i32>} : memref<128x32xbf16, #tpu.memory_space<vmem>>, vector<8x32xbf16>,
    %c7 = arith.constant 7 : index
    %c0_25 = arith.constant 0 : index
    %c0_26 = arith.constant 0 : index
    %21 = vector.load %arg1[%c7, %c0_25, %c0_26] : memref<32x8x32xbf16, #tpu.memory_space<vmem>>, vector<1x8x32xbf16>
    %22 = vector.shape_cast %21 : vector<1x8x32xbf16> to vector<8x32xbf16>
    %c24_27 = arith.constant 24 : index
    %c0_28 = arith.constant 0 : index
    %23 = vector.load %arg10[%c24_27, %c0_28] : memref<128x32xbf16, #tpu.memory_space<vmem>>, vector<8x32xbf16>
    tpu.vector_store %arg10[%c24_27, %c0_28], %22 {strides = array<i32>} : memref<128x32xbf16, #tpu.memory_space<vmem>>, vector<8x32xbf16>,
    %c8_29 = arith.constant 8 : index
    %c0_30 = arith.constant 0 : index
    %c0_31 = arith.constant 0 : index
    %24 = vector.load %arg1[%c8_29, %c0_30, %c0_31] : memref<32x8x32xbf16, #tpu.memory_space<vmem>>, vector<1x8x32xbf16>
    %25 = vector.shape_cast %24 : vector<1x8x32xbf16> to vector<8x32xbf16>
    %c32 = arith.constant 32 : index
    %c0_32 = arith.constant 0 : index
    %26 = vector.load %arg9[%c32, %c0_32] : memref<128x32xbf16, #tpu.memory_space<vmem>>, vector<8x32xbf16>
    tpu.vector_store %arg9[%c32, %c0_32], %25 {strides = array<i32>} : memref<128x32xbf16, #tpu.memory_space<vmem>>, vector<8x32xbf16>,
    %c9 = arith.constant 9 : index
    %c0_33 = arith.constant 0 : index
    %c0_34 = arith.constant 0 : index
    %27 = vector.load %arg1[%c9, %c0_33, %c0_34] : memref<32x8x32xbf16, #tpu.memory_space<vmem>>, vector<1x8x32xbf16>
    %28 = vector.shape_cast %27 : vector<1x8x32xbf16> to vector<8x32xbf16>
    %c32_35 = arith.constant 32 : index
    %c0_36 = arith.constant 0 : index
    %29 = vector.load %arg10[%c32_35, %c0_36] : memref<128x32xbf16, #tpu.memory_space<vmem>>, vector<8x32xbf16>
    tpu.vector_store %arg10[%c32_35, %c0_36], %28 {strides = array<i32>} : memref<128x32xbf16, #tpu.memory_space<vmem>>, vector<8x32xbf16>,
    %c10 = arith.constant 10 : index
    %c0_37 = arith.constant 0 : index
    %c0_38 = arith.constant 0 : index
    %30 = vector.load %arg1[%c10, %c0_37, %c0_38] : memref<32x8x32xbf16, #tpu.memory_space<vmem>>, vector<1x8x32xbf16>
    %31 = vector.shape_cast %30 : vector<1x8x32xbf16> to vector<8x32xbf16>
    %c40 = arith.constant 40 : index
    %c0_39 = arith.constant 0 : index
    %32 = vector.load %arg9[%c40, %c0_39] : memref<128x32xbf16, #tpu.memory_space<vmem>>, vector<8x32xbf16>
    tpu.vector_store %arg9[%c40, %c0_39], %31 {strides = array<i32>} : memref<128x32xbf16, #tpu.memory_space<vmem>>, vector<8x32xbf16>,
    %c11 = arith.constant 11 : index
    %c0_40 = arith.constant 0 : index
    %c0_41 = arith.constant 0 : index
    %33 = vector.load %arg1[%c11, %c0_40, %c0_41] : memref<32x8x32xbf16, #tpu.memory_space<vmem>>, vector<1x8x32xbf16>
    %34 = vector.shape_cast %33 : vector<1x8x32xbf16> to vector<8x32xbf16>
    %c40_42 = arith.constant 40 : index
    %c0_43 = arith.constant 0 : index
    %35 = vector.load %arg10[%c40_42, %c0_43] : memref<128x32xbf16, #tpu.memory_space<vmem>>, vector<8x32xbf16>
    tpu.vector_store %arg10[%c40_42, %c0_43], %34 {strides = array<i32>} : memref<128x32xbf16, #tpu.memory_space<vmem>>, vector<8x32xbf16>,
    %c12 = arith.constant 12 : index
    %c0_44 = arith.constant 0 : index
    %c0_45 = arith.constant 0 : index
    %36 = vector.load %arg1[%c12, %c0_44, %c0_45] : memref<32x8x32xbf16, #tpu.memory_space<vmem>>, vector<1x8x32xbf16>
    %37 = vector.shape_cast %36 : vector<1x8x32xbf16> to vector<8x32xbf16>
    %c48 = arith.constant 48 : index
    %c0_46 = arith.constant 0 : index
    %38 = vector.load %arg9[%c48, %c0_46] : memref<128x32xbf16, #tpu.memory_space<vmem>>, vector<8x32xbf16>
    tpu.vector_store %arg9[%c48, %c0_46], %37 {strides = array<i32>} : memref<128x32xbf16, #tpu.memory_space<vmem>>, vector<8x32xbf16>,
    %c13 = arith.constant 13 : index
    %c0_47 = arith.constant 0 : index
    %c0_48 = arith.constant 0 : index
    %39 = vector.load %arg1[%c13, %c0_47, %c0_48] : memref<32x8x32xbf16, #tpu.memory_space<vmem>>, vector<1x8x32xbf16>
    %40 = vector.shape_cast %39 : vector<1x8x32xbf16> to vector<8x32xbf16>
    %c48_49 = arith.constant 48 : index
    %c0_50 = arith.constant 0 : index
    %41 = vector.load %arg10[%c48_49, %c0_50] : memref<128x32xbf16, #tpu.memory_space<vmem>>, vector<8x32xbf16>
    tpu.vector_store %arg10[%c48_49, %c0_50], %40 {strides = array<i32>} : memref<128x32xbf16, #tpu.memory_space<vmem>>, vector<8x32xbf16>,
    %c14 = arith.constant 14 : index
    %c0_51 = arith.constant 0 : index
    %c0_52 = arith.constant 0 : index
    %42 = vector.load %arg1[%c14, %c0_51, %c0_52] : memref<32x8x32xbf16, #tpu.memory_space<vmem>>, vector<1x8x32xbf16>
    %43 = vector.shape_cast %42 : vector<1x8x32xbf16> to vector<8x32xbf16>
    %c56 = arith.constant 56 : index
    %c0_53 = arith.constant 0 : index
    %44 = vector.load %arg9[%c56, %c0_53] : memref<128x32xbf16, #tpu.memory_space<vmem>>, vector<8x32xbf16>
    tpu.vector_store %arg9[%c56, %c0_53], %43 {strides = array<i32>} : memref<128x32xbf16, #tpu.memory_space<vmem>>, vector<8x32xbf16>,
    %c15 = arith.constant 15 : index
    %c0_54 = arith.constant 0 : index
    %c0_55 = arith.constant 0 : index
    %45 = vector.load %arg1[%c15, %c0_54, %c0_55] : memref<32x8x32xbf16, #tpu.memory_space<vmem>>, vector<1x8x32xbf16>
    %46 = vector.shape_cast %45 : vector<1x8x32xbf16> to vector<8x32xbf16>
    %c56_56 = arith.constant 56 : index
    %c0_57 = arith.constant 0 : index
    %47 = vector.load %arg10[%c56_56, %c0_57] : memref<128x32xbf16, #tpu.memory_space<vmem>>, vector<8x32xbf16>
    tpu.vector_store %arg10[%c56_56, %c0_57], %46 {strides = array<i32>} : memref<128x32xbf16, #tpu.memory_space<vmem>>, vector<8x32xbf16>,
    %c16_58 = arith.constant 16 : index
    %c0_59 = arith.constant 0 : index
    %c0_60 = arith.constant 0 : index
    %48 = vector.load %arg1[%c16_58, %c0_59, %c0_60] : memref<32x8x32xbf16, #tpu.memory_space<vmem>>, vector<1x8x32xbf16>
    %49 = vector.shape_cast %48 : vector<1x8x32xbf16> to vector<8x32xbf16>
    %c64 = arith.constant 64 : index
    %c0_61 = arith.constant 0 : index
    %50 = vector.load %arg9[%c64, %c0_61] : memref<128x32xbf16, #tpu.memory_space<vmem>>, vector<8x32xbf16>
    tpu.vector_store %arg9[%c64, %c0_61], %49 {strides = array<i32>} : memref<128x32xbf16, #tpu.memory_space<vmem>>, vector<8x32xbf16>,
    %c17 = arith.constant 17 : index
    %c0_62 = arith.constant 0 : index
    %c0_63 = arith.constant 0 : index
    %51 = vector.load %arg1[%c17, %c0_62, %c0_63] : memref<32x8x32xbf16, #tpu.memory_space<vmem>>, vector<1x8x32xbf16>
    %52 = vector.shape_cast %51 : vector<1x8x32xbf16> to vector<8x32xbf16>
    %c64_64 = arith.constant 64 : index
    %c0_65 = arith.constant 0 : index
    %53 = vector.load %arg10[%c64_64, %c0_65] : memref<128x32xbf16, #tpu.memory_space<vmem>>, vector<8x32xbf16>
    tpu.vector_store %arg10[%c64_64, %c0_65], %52 {strides = array<i32>} : memref<128x32xbf16, #tpu.memory_space<vmem>>, vector<8x32xbf16>,
    %c18 = arith.constant 18 : index
    %c0_66 = arith.constant 0 : index
    %c0_67 = arith.constant 0 : index
    %54 = vector.load %arg1[%c18, %c0_66, %c0_67] : memref<32x8x32xbf16, #tpu.memory_space<vmem>>, vector<1x8x32xbf16>
    %55 = vector.shape_cast %54 : vector<1x8x32xbf16> to vector<8x32xbf16>
    %c72 = arith.constant 72 : index
    %c0_68 = arith.constant 0 : index
    %56 = vector.load %arg9[%c72, %c0_68] : memref<128x32xbf16, #tpu.memory_space<vmem>>, vector<8x32xbf16>
    tpu.vector_store %arg9[%c72, %c0_68], %55 {strides = array<i32>} : memref<128x32xbf16, #tpu.memory_space<vmem>>, vector<8x32xbf16>,
    %c19 = arith.constant 19 : index
    %c0_69 = arith.constant 0 : index
    %c0_70 = arith.constant 0 : index
    %57 = vector.load %arg1[%c19, %c0_69, %c0_70] : memref<32x8x32xbf16, #tpu.memory_space<vmem>>, vector<1x8x32xbf16>
    %58 = vector.shape_cast %57 : vector<1x8x32xbf16> to vector<8x32xbf16>
    %c72_71 = arith.constant 72 : index
    %c0_72 = arith.constant 0 : index
    %59 = vector.load %arg10[%c72_71, %c0_72] : memref<128x32xbf16, #tpu.memory_space<vmem>>, vector<8x32xbf16>
    tpu.vector_store %arg10[%c72_71, %c0_72], %58 {strides = array<i32>} : memref<128x32xbf16, #tpu.memory_space<vmem>>, vector<8x32xbf16>,
    %c20 = arith.constant 20 : index
    %c0_73 = arith.constant 0 : index
    %c0_74 = arith.constant 0 : index
    %60 = vector.load %arg1[%c20, %c0_73, %c0_74] : memref<32x8x32xbf16, #tpu.memory_space<vmem>>, vector<1x8x32xbf16>
    %61 = vector.shape_cast %60 : vector<1x8x32xbf16> to vector<8x32xbf16>
    %c80 = arith.constant 80 : index
    %c0_75 = arith.constant 0 : index
    %62 = vector.load %arg9[%c80, %c0_75] : memref<128x32xbf16, #tpu.memory_space<vmem>>, vector<8x32xbf16>
    tpu.vector_store %arg9[%c80, %c0_75], %61 {strides = array<i32>} : memref<128x32xbf16, #tpu.memory_space<vmem>>, vector<8x32xbf16>,
    %c21 = arith.constant 21 : index
    %c0_76 = arith.constant 0 : index
    %c0_77 = arith.constant 0 : index
    %63 = vector.load %arg1[%c21, %c0_76, %c0_77] : memref<32x8x32xbf16, #tpu.memory_space<vmem>>, vector<1x8x32xbf16>
    %64 = vector.shape_cast %63 : vector<1x8x32xbf16> to vector<8x32xbf16>
    %c80_78 = arith.constant 80 : index
    %c0_79 = arith.constant 0 : index
    %65 = vector.load %arg10[%c80_78, %c0_79] : memref<128x32xbf16, #tpu.memory_space<vmem>>, vector<8x32xbf16>
    tpu.vector_store %arg10[%c80_78, %c0_79], %64 {strides = array<i32>} : memref<128x32xbf16, #tpu.memory_space<vmem>>, vector<8x32xbf16>,
    %c22 = arith.constant 22 : index
    %c0_80 = arith.constant 0 : index
    %c0_81 = arith.constant 0 : index
    %66 = vector.load %arg1[%c22, %c0_80, %c0_81] : memref<32x8x32xbf16, #tpu.memory_space<vmem>>, vector<1x8x32xbf16>
    %67 = vector.shape_cast %66 : vector<1x8x32xbf16> to vector<8x32xbf16>
    %c88 = arith.constant 88 : index
    %c0_82 = arith.constant 0 : index
    %68 = vector.load %arg9[%c88, %c0_82] : memref<128x32xbf16, #tpu.memory_space<vmem>>, vector<8x32xbf16>
    tpu.vector_store %arg9[%c88, %c0_82], %67 {strides = array<i32>} : memref<128x32xbf16, #tpu.memory_space<vmem>>, vector<8x32xbf16>,
    %c23 = arith.constant 23 : index
    %c0_83 = arith.constant 0 : index
    %c0_84 = arith.constant 0 : index
    %69 = vector.load %arg1[%c23, %c0_83, %c0_84] : memref<32x8x32xbf16, #tpu.memory_space<vmem>>, vector<1x8x32xbf16>
    %70 = vector.shape_cast %69 : vector<1x8x32xbf16> to vector<8x32xbf16>
    %c88_85 = arith.constant 88 : index
    %c0_86 = arith.constant 0 : index
    %71 = vector.load %arg10[%c88_85, %c0_86] : memref<128x32xbf16, #tpu.memory_space<vmem>>, vector<8x32xbf16>
    tpu.vector_store %arg10[%c88_85, %c0_86], %70 {strides = array<i32>} : memref<128x32xbf16, #tpu.memory_space<vmem>>, vector<8x32xbf16>,
    %c24_87 = arith.constant 24 : index
    %c0_88 = arith.constant 0 : index
    %c0_89 = arith.constant 0 : index
    %72 = vector.load %arg1[%c24_87, %c0_88, %c0_89] : memref<32x8x32xbf16, #tpu.memory_space<vmem>>, vector<1x8x32xbf16>
    %73 = vector.shape_cast %72 : vector<1x8x32xbf16> to vector<8x32xbf16>
    %c96 = arith.constant 96 : index
    %c0_90 = arith.constant 0 : index
    %74 = vector.load %arg9[%c96, %c0_90] : memref<128x32xbf16, #tpu.memory_space<vmem>>, vector<8x32xbf16>
    tpu.vector_store %arg9[%c96, %c0_90], %73 {strides = array<i32>} : memref<128x32xbf16, #tpu.memory_space<vmem>>, vector<8x32xbf16>,
    %c25 = arith.constant 25 : index
    %c0_91 = arith.constant 0 : index
    %c0_92 = arith.constant 0 : index
    %75 = vector.load %arg1[%c25, %c0_91, %c0_92] : memref<32x8x32xbf16, #tpu.memory_space<vmem>>, vector<1x8x32xbf16>
    %76 = vector.shape_cast %75 : vector<1x8x32xbf16> to vector<8x32xbf16>
    %c96_93 = arith.constant 96 : index
    %c0_94 = arith.constant 0 : index
    %77 = vector.load %arg10[%c96_93, %c0_94] : memref<128x32xbf16, #tpu.memory_space<vmem>>, vector<8x32xbf16>
    tpu.vector_store %arg10[%c96_93, %c0_94], %76 {strides = array<i32>} : memref<128x32xbf16, #tpu.memory_space<vmem>>, vector<8x32xbf16>,
    %c26 = arith.constant 26 : index
    %c0_95 = arith.constant 0 : index
    %c0_96 = arith.constant 0 : index
    %78 = vector.load %arg1[%c26, %c0_95, %c0_96] : memref<32x8x32xbf16, #tpu.memory_space<vmem>>, vector<1x8x32xbf16>
    %79 = vector.shape_cast %78 : vector<1x8x32xbf16> to vector<8x32xbf16>
    %c104 = arith.constant 104 : index
    %c0_97 = arith.constant 0 : index
    %80 = vector.load %arg9[%c104, %c0_97] : memref<128x32xbf16, #tpu.memory_space<vmem>>, vector<8x32xbf16>
    tpu.vector_store %arg9[%c104, %c0_97], %79 {strides = array<i32>} : memref<128x32xbf16, #tpu.memory_space<vmem>>, vector<8x32xbf16>,
    %c27 = arith.constant 27 : index
    %c0_98 = arith.constant 0 : index
    %c0_99 = arith.constant 0 : index
    %81 = vector.load %arg1[%c27, %c0_98, %c0_99] : memref<32x8x32xbf16, #tpu.memory_space<vmem>>, vector<1x8x32xbf16>
    %82 = vector.shape_cast %81 : vector<1x8x32xbf16> to vector<8x32xbf16>
    %c104_100 = arith.constant 104 : index
    %c0_101 = arith.constant 0 : index
    %83 = vector.load %arg10[%c104_100, %c0_101] : memref<128x32xbf16, #tpu.memory_space<vmem>>, vector<8x32xbf16>
    tpu.vector_store %arg10[%c104_100, %c0_101], %82 {strides = array<i32>} : memref<128x32xbf16, #tpu.memory_space<vmem>>, vector<8x32xbf16>,
    %c28 = arith.constant 28 : index
    %c0_102 = arith.constant 0 : index
    %c0_103 = arith.constant 0 : index
    %84 = vector.load %arg1[%c28, %c0_102, %c0_103] : memref<32x8x32xbf16, #tpu.memory_space<vmem>>, vector<1x8x32xbf16>
    %85 = vector.shape_cast %84 : vector<1x8x32xbf16> to vector<8x32xbf16>
    %c112 = arith.constant 112 : index
    %c0_104 = arith.constant 0 : index
    %86 = vector.load %arg9[%c112, %c0_104] : memref<128x32xbf16, #tpu.memory_space<vmem>>, vector<8x32xbf16>
    tpu.vector_store %arg9[%c112, %c0_104], %85 {strides = array<i32>} : memref<128x32xbf16, #tpu.memory_space<vmem>>, vector<8x32xbf16>,
    %c29 = arith.constant 29 : index
    %c0_105 = arith.constant 0 : index
    %c0_106 = arith.constant 0 : index
    %87 = vector.load %arg1[%c29, %c0_105, %c0_106] : memref<32x8x32xbf16, #tpu.memory_space<vmem>>, vector<1x8x32xbf16>
    %88 = vector.shape_cast %87 : vector<1x8x32xbf16> to vector<8x32xbf16>
    %c112_107 = arith.constant 112 : index
    %c0_108 = arith.constant 0 : index
    %89 = vector.load %arg10[%c112_107, %c0_108] : memref<128x32xbf16, #tpu.memory_space<vmem>>, vector<8x32xbf16>
    tpu.vector_store %arg10[%c112_107, %c0_108], %88 {strides = array<i32>} : memref<128x32xbf16, #tpu.memory_space<vmem>>, vector<8x32xbf16>,
    %c30 = arith.constant 30 : index
    %c0_109 = arith.constant 0 : index
    %c0_110 = arith.constant 0 : index
    %90 = vector.load %arg1[%c30, %c0_109, %c0_110] : memref<32x8x32xbf16, #tpu.memory_space<vmem>>, vector<1x8x32xbf16>
    %91 = vector.shape_cast %90 : vector<1x8x32xbf16> to vector<8x32xbf16>
    %c120 = arith.constant 120 : index
    %c0_111 = arith.constant 0 : index
    %92 = vector.load %arg9[%c120, %c0_111] : memref<128x32xbf16, #tpu.memory_space<vmem>>, vector<8x32xbf16>
    tpu.vector_store %arg9[%c120, %c0_111], %91 {strides = array<i32>} : memref<128x32xbf16, #tpu.memory_space<vmem>>, vector<8x32xbf16>,
    %c31 = arith.constant 31 : index
    %c0_112 = arith.constant 0 : index
    %c0_113 = arith.constant 0 : index
    %93 = vector.load %arg1[%c31, %c0_112, %c0_113] : memref<32x8x32xbf16, #tpu.memory_space<vmem>>, vector<1x8x32xbf16>
    %94 = vector.shape_cast %93 : vector<1x8x32xbf16> to vector<8x32xbf16>
    %c120_114 = arith.constant 120 : index
    %c0_115 = arith.constant 0 : index
    %95 = vector.load %arg10[%c120_114, %c0_115] : memref<128x32xbf16, #tpu.memory_space<vmem>>, vector<8x32xbf16>
    tpu.vector_store %arg10[%c120_114, %c0_115], %94 {strides = array<i32>} : memref<128x32xbf16, #tpu.memory_space<vmem>>, vector<8x32xbf16>,
    %c0_116 = arith.constant 0 : index
    %c0_117 = arith.constant 0 : index
    %96 = vector.load %arg9[%c0_116, %c0_117] : memref<128x32xbf16, #tpu.memory_space<vmem>>, vector<112x32xbf16>
    %c0_118 = arith.constant 0 : index
    %c0_119 = arith.constant 0 : index
    %97 = vector.load %arg10[%c0_118, %c0_119] : memref<128x32xbf16, #tpu.memory_space<vmem>>, vector<112x32xbf16>
    %c8_120 = arith.constant 8 : index
    %c0_121 = arith.constant 0 : index
    %98 = vector.load %arg9[%c8_120, %c0_121] : memref<128x32xbf16, #tpu.memory_space<vmem>>, vector<112x32xbf16>
    %c8_122 = arith.constant 8 : index
    %c0_123 = arith.constant 0 : index
    %99 = vector.load %arg10[%c8_122, %c0_123] : memref<128x32xbf16, #tpu.memory_space<vmem>>, vector<112x32xbf16>
    %c16_124 = arith.constant 16 : index
    %c0_125 = arith.constant 0 : index
    %100 = vector.load %arg9[%c16_124, %c0_125] : memref<128x32xbf16, #tpu.memory_space<vmem>>, vector<112x32xbf16>
    %101 = tpu.concatenate %96, %97, %98, %99, %100 in 1 : vector<112x32xbf16>, vector<112x32xbf16>, vector<112x32xbf16>, vector<112x32xbf16>, vector<112x32xbf16> -> vector<112x160xbf16>
    %c0_126 = arith.constant 0 : index
    %c0_127 = arith.constant 0 : index
    %c0_128 = arith.constant 0 : index
    %102 = vector.load %arg2[%c0_126, %c0_127, %c0_128] : memref<2x160x256xbf16, #tpu.memory_space<vmem>>, vector<1x160x256xbf16>
    %103 = vector.shape_cast %102 : vector<1x160x256xbf16> to vector<160x256xbf16>
    %cst = arith.constant dense<0.000000e+00> : vector<112x256xf32>
    %104 = tpu.matmul %101, %103, %cst {dimension_numbers = #tpu.dot_dimension_numbers<[1], [0], [0], [1], [0, 0, 1, 1], [], []>} : vector<112x160xbf16>, vector<160x256xbf16>, vector<112x256xf32> -> vector<112x256xf32>
    %c1_129 = arith.constant 1 : index
    %c0_130 = arith.constant 0 : index
    %c0_131 = arith.constant 0 : index
    %105 = vector.load %arg2[%c1_129, %c0_130, %c0_131] : memref<2x160x256xbf16, #tpu.memory_space<vmem>>, vector<1x160x256xbf16>
    %106 = vector.shape_cast %105 : vector<1x160x256xbf16> to vector<160x256xbf16>
    %cst_132 = arith.constant dense<0.000000e+00> : vector<112x256xf32>
    %107 = tpu.matmul %101, %106, %cst_132 {dimension_numbers = #tpu.dot_dimension_numbers<[1], [0], [0], [1], [0, 0, 1, 1], [], []>} : vector<112x160xbf16>, vector<160x256xbf16>, vector<112x256xf32> -> vector<112x256xf32>
    %108 = arith.maximumf %104, %107 : vector<112x256xf32>
    %c0_133 = arith.constant 0 : index
    %c0_134 = arith.constant 0 : index
    %109 = vector.load %arg10[%c0_133, %c0_134] : memref<128x32xbf16, #tpu.memory_space<vmem>>, vector<112x32xbf16>
    %c8_135 = arith.constant 8 : index
    %c0_136 = arith.constant 0 : index
    %110 = vector.load %arg9[%c8_135, %c0_136] : memref<128x32xbf16, #tpu.memory_space<vmem>>, vector<112x32xbf16>
    %c8_137 = arith.constant 8 : index
    %c0_138 = arith.constant 0 : index
    %111 = vector.load %arg10[%c8_137, %c0_138] : memref<128x32xbf16, #tpu.memory_space<vmem>>, vector<112x32xbf16>
    %c16_139 = arith.constant 16 : index
    %c0_140 = arith.constant 0 : index
    %112 = vector.load %arg9[%c16_139, %c0_140] : memref<128x32xbf16, #tpu.memory_space<vmem>>, vector<112x32xbf16>
    %c16_141 = arith.constant 16 : index
    %c0_142 = arith.constant 0 : index
    %113 = vector.load %arg10[%c16_141, %c0_142] : memref<128x32xbf16, #tpu.memory_space<vmem>>, vector<112x32xbf16>
    %114 = tpu.concatenate %109, %110, %111, %112, %113 in 1 : vector<112x32xbf16>, vector<112x32xbf16>, vector<112x32xbf16>, vector<112x32xbf16>, vector<112x32xbf16> -> vector<112x160xbf16>
    %c0_143 = arith.constant 0 : index
    %c0_144 = arith.constant 0 : index
    %c0_145 = arith.constant 0 : index
    %115 = vector.load %arg2[%c0_143, %c0_144, %c0_145] : memref<2x160x256xbf16, #tpu.memory_space<vmem>>, vector<1x160x256xbf16>
    %116 = vector.shape_cast %115 : vector<1x160x256xbf16> to vector<160x256xbf16>
    %cst_146 = arith.constant dense<0.000000e+00> : vector<112x256xf32>
    %117 = tpu.matmul %114, %116, %cst_146 {dimension_numbers = #tpu.dot_dimension_numbers<[1], [0], [0], [1], [0, 0, 1, 1], [], []>} : vector<112x160xbf16>, vector<160x256xbf16>, vector<112x256xf32> -> vector<112x256xf32>
    %118 = arith.maximumf %108, %117 : vector<112x256xf32>
    %c1_147 = arith.constant 1 : index
    %c0_148 = arith.constant 0 : index
    %c0_149 = arith.constant 0 : index
    %119 = vector.load %arg2[%c1_147, %c0_148, %c0_149] : memref<2x160x256xbf16, #tpu.memory_space<vmem>>, vector<1x160x256xbf16>
    %120 = vector.shape_cast %119 : vector<1x160x256xbf16> to vector<160x256xbf16>
    %cst_150 = arith.constant dense<0.000000e+00> : vector<112x256xf32>
    %121 = tpu.matmul %114, %120, %cst_150 {dimension_numbers = #tpu.dot_dimension_numbers<[1], [0], [0], [1], [0, 0, 1, 1], [], []>} : vector<112x160xbf16>, vector<160x256xbf16>, vector<112x256xf32> -> vector<112x256xf32>
    %122 = arith.maximumf %118, %121 : vector<112x256xf32>
    %c0_151 = arith.constant 0 : index
    %c0_152 = arith.constant 0 : index
    %123 = vector.load %arg3[%c0_151, %c0_152] : memref<1x256xf32, #tpu.memory_space<vmem>>, vector<1x256xf32>
    %124 = vector.broadcast %123 : vector<1x256xf32> to vector<112x256xf32>
    %125 = arith.addf %122, %124 : vector<112x256xf32>
    %cst_153 = arith.constant 0.000000e+00 : f32
    %126 = vector.broadcast %cst_153 : f32 to vector<112x256xf32>
    %127 = arith.maximumf %125, %126 : vector<112x256xf32>
    %cst_154 = arith.constant 0.000000e+00 : bf16
    %128 = vector.broadcast %cst_154 : bf16 to vector<8x256xbf16>
    %c0_155 = arith.constant 0 : index
    %c0_156 = arith.constant 0 : index
    %129 = vector.load %arg11[%c0_155, %c0_156] : memref<72x256xbf16, #tpu.memory_space<vmem>>, vector<8x256xbf16>
    tpu.vector_store %arg11[%c0_155, %c0_156], %128 {strides = array<i32>} : memref<72x256xbf16, #tpu.memory_space<vmem>>, vector<8x256xbf16>,
    %c64_157 = arith.constant 64 : index
    %c0_158 = arith.constant 0 : index
    %130 = vector.load %arg11[%c64_157, %c0_158] : memref<72x256xbf16, #tpu.memory_space<vmem>>, vector<8x256xbf16>
    tpu.vector_store %arg11[%c64_157, %c0_158], %128 {strides = array<i32>} : memref<72x256xbf16, #tpu.memory_space<vmem>>, vector<8x256xbf16>,
    %c0_159 = arith.constant 0 : index
    %c0_160 = arith.constant 0 : index
    %131 = vector.load %arg12[%c0_159, %c0_160] : memref<72x256xbf16, #tpu.memory_space<vmem>>, vector<8x256xbf16>
    tpu.vector_store %arg12[%c0_159, %c0_160], %128 {strides = array<i32>} : memref<72x256xbf16, #tpu.memory_space<vmem>>, vector<8x256xbf16>,
    %c64_161 = arith.constant 64 : index
    %c0_162 = arith.constant 0 : index
    %132 = vector.load %arg12[%c64_161, %c0_162] : memref<72x256xbf16, #tpu.memory_space<vmem>>, vector<8x256xbf16>
    tpu.vector_store %arg12[%c64_161, %c0_162], %128 {strides = array<i32>} : memref<72x256xbf16, #tpu.memory_space<vmem>>, vector<8x256xbf16>,
    %133 = vector.extract_strided_slice %127 {offsets = [0, 0], sizes = [8, 256], strides = [1, 1]} : vector<112x256xf32> to vector<8x256xf32>
    %134 = arith.truncf %133 : vector<8x256xf32> to vector<8x256xbf16>
    %c8_163 = arith.constant 8 : index
    %c0_164 = arith.constant 0 : index
    %135 = vector.load %arg11[%c8_163, %c0_164] : memref<72x256xbf16, #tpu.memory_space<vmem>>, vector<8x256xbf16>
    tpu.vector_store %arg11[%c8_163, %c0_164], %134 {strides = array<i32>} : memref<72x256xbf16, #tpu.memory_space<vmem>>, vector<8x256xbf16>,
    %136 = vector.extract_strided_slice %127 {offsets = [8, 0], sizes = [8, 256], strides = [1, 1]} : vector<112x256xf32> to vector<8x256xf32>
    %137 = arith.truncf %136 : vector<8x256xf32> to vector<8x256xbf16>
    %c8_165 = arith.constant 8 : index
    %c0_166 = arith.constant 0 : index
    %138 = vector.load %arg12[%c8_165, %c0_166] : memref<72x256xbf16, #tpu.memory_space<vmem>>, vector<8x256xbf16>
    tpu.vector_store %arg12[%c8_165, %c0_166], %137 {strides = array<i32>} : memref<72x256xbf16, #tpu.memory_space<vmem>>, vector<8x256xbf16>,
    %139 = vector.extract_strided_slice %127 {offsets = [16, 0], sizes = [8, 256], strides = [1, 1]} : vector<112x256xf32> to vector<8x256xf32>
    %140 = arith.truncf %139 : vector<8x256xf32> to vector<8x256xbf16>
    %c16_167 = arith.constant 16 : index
    %c0_168 = arith.constant 0 : index
    %141 = vector.load %arg11[%c16_167, %c0_168] : memref<72x256xbf16, #tpu.memory_space<vmem>>, vector<8x256xbf16>
    tpu.vector_store %arg11[%c16_167, %c0_168], %140 {strides = array<i32>} : memref<72x256xbf16, #tpu.memory_space<vmem>>, vector<8x256xbf16>,
    %142 = vector.extract_strided_slice %127 {offsets = [24, 0], sizes = [8, 256], strides = [1, 1]} : vector<112x256xf32> to vector<8x256xf32>
    %143 = arith.truncf %142 : vector<8x256xf32> to vector<8x256xbf16>
    %c16_169 = arith.constant 16 : index
    %c0_170 = arith.constant 0 : index
    %144 = vector.load %arg12[%c16_169, %c0_170] : memref<72x256xbf16, #tpu.memory_space<vmem>>, vector<8x256xbf16>
    tpu.vector_store %arg12[%c16_169, %c0_170], %143 {strides = array<i32>} : memref<72x256xbf16, #tpu.memory_space<vmem>>, vector<8x256xbf16>,
    %145 = vector.extract_strided_slice %127 {offsets = [32, 0], sizes = [8, 256], strides = [1, 1]} : vector<112x256xf32> to vector<8x256xf32>
    %146 = arith.truncf %145 : vector<8x256xf32> to vector<8x256xbf16>
    %c24_171 = arith.constant 24 : index
    %c0_172 = arith.constant 0 : index
    %147 = vector.load %arg11[%c24_171, %c0_172] : memref<72x256xbf16, #tpu.memory_space<vmem>>, vector<8x256xbf16>
    tpu.vector_store %arg11[%c24_171, %c0_172], %146 {strides = array<i32>} : memref<72x256xbf16, #tpu.memory_space<vmem>>, vector<8x256xbf16>,
    %148 = vector.extract_strided_slice %127 {offsets = [40, 0], sizes = [8, 256], strides = [1, 1]} : vector<112x256xf32> to vector<8x256xf32>
    %149 = arith.truncf %148 : vector<8x256xf32> to vector<8x256xbf16>
    %c24_173 = arith.constant 24 : index
    %c0_174 = arith.constant 0 : index
    %150 = vector.load %arg12[%c24_173, %c0_174] : memref<72x256xbf16, #tpu.memory_space<vmem>>, vector<8x256xbf16>
    tpu.vector_store %arg12[%c24_173, %c0_174], %149 {strides = array<i32>} : memref<72x256xbf16, #tpu.memory_space<vmem>>, vector<8x256xbf16>,
    %151 = vector.extract_strided_slice %127 {offsets = [48, 0], sizes = [8, 256], strides = [1, 1]} : vector<112x256xf32> to vector<8x256xf32>
    %152 = arith.truncf %151 : vector<8x256xf32> to vector<8x256xbf16>
    %c32_175 = arith.constant 32 : index
    %c0_176 = arith.constant 0 : index
    %153 = vector.load %arg11[%c32_175, %c0_176] : memref<72x256xbf16, #tpu.memory_space<vmem>>, vector<8x256xbf16>
    tpu.vector_store %arg11[%c32_175, %c0_176], %152 {strides = array<i32>} : memref<72x256xbf16, #tpu.memory_space<vmem>>, vector<8x256xbf16>,
    %154 = vector.extract_strided_slice %127 {offsets = [56, 0], sizes = [8, 256], strides = [1, 1]} : vector<112x256xf32> to vector<8x256xf32>
    %155 = arith.truncf %154 : vector<8x256xf32> to vector<8x256xbf16>
    %c32_177 = arith.constant 32 : index
    %c0_178 = arith.constant 0 : index
    %156 = vector.load %arg12[%c32_177, %c0_178] : memref<72x256xbf16, #tpu.memory_space<vmem>>, vector<8x256xbf16>
    tpu.vector_store %arg12[%c32_177, %c0_178], %155 {strides = array<i32>} : memref<72x256xbf16, #tpu.memory_space<vmem>>, vector<8x256xbf16>,
    %157 = vector.extract_strided_slice %127 {offsets = [64, 0], sizes = [8, 256], strides = [1, 1]} : vector<112x256xf32> to vector<8x256xf32>
    %158 = arith.truncf %157 : vector<8x256xf32> to vector<8x256xbf16>
    %c40_179 = arith.constant 40 : index
    %c0_180 = arith.constant 0 : index
    %159 = vector.load %arg11[%c40_179, %c0_180] : memref<72x256xbf16, #tpu.memory_space<vmem>>, vector<8x256xbf16>
    tpu.vector_store %arg11[%c40_179, %c0_180], %158 {strides = array<i32>} : memref<72x256xbf16, #tpu.memory_space<vmem>>, vector<8x256xbf16>,
    %160 = vector.extract_strided_slice %127 {offsets = [72, 0], sizes = [8, 256], strides = [1, 1]} : vector<112x256xf32> to vector<8x256xf32>
    %161 = arith.truncf %160 : vector<8x256xf32> to vector<8x256xbf16>
    %c40_181 = arith.constant 40 : index
    %c0_182 = arith.constant 0 : index
    %162 = vector.load %arg12[%c40_181, %c0_182] : memref<72x256xbf16, #tpu.memory_space<vmem>>, vector<8x256xbf16>
    tpu.vector_store %arg12[%c40_181, %c0_182], %161 {strides = array<i32>} : memref<72x256xbf16, #tpu.memory_space<vmem>>, vector<8x256xbf16>,
    %163 = vector.extract_strided_slice %127 {offsets = [80, 0], sizes = [8, 256], strides = [1, 1]} : vector<112x256xf32> to vector<8x256xf32>
    %164 = arith.truncf %163 : vector<8x256xf32> to vector<8x256xbf16>
    %c48_183 = arith.constant 48 : index
    %c0_184 = arith.constant 0 : index
    %165 = vector.load %arg11[%c48_183, %c0_184] : memref<72x256xbf16, #tpu.memory_space<vmem>>, vector<8x256xbf16>
    tpu.vector_store %arg11[%c48_183, %c0_184], %164 {strides = array<i32>} : memref<72x256xbf16, #tpu.memory_space<vmem>>, vector<8x256xbf16>,
    %166 = vector.extract_strided_slice %127 {offsets = [88, 0], sizes = [8, 256], strides = [1, 1]} : vector<112x256xf32> to vector<8x256xf32>
    %167 = arith.truncf %166 : vector<8x256xf32> to vector<8x256xbf16>
    %c48_185 = arith.constant 48 : index
    %c0_186 = arith.constant 0 : index
    %168 = vector.load %arg12[%c48_185, %c0_186] : memref<72x256xbf16, #tpu.memory_space<vmem>>, vector<8x256xbf16>
    tpu.vector_store %arg12[%c48_185, %c0_186], %167 {strides = array<i32>} : memref<72x256xbf16, #tpu.memory_space<vmem>>, vector<8x256xbf16>,
    %169 = vector.extract_strided_slice %127 {offsets = [96, 0], sizes = [8, 256], strides = [1, 1]} : vector<112x256xf32> to vector<8x256xf32>
    %170 = arith.truncf %169 : vector<8x256xf32> to vector<8x256xbf16>
    %c56_187 = arith.constant 56 : index
    %c0_188 = arith.constant 0 : index
    %171 = vector.load %arg11[%c56_187, %c0_188] : memref<72x256xbf16, #tpu.memory_space<vmem>>, vector<8x256xbf16>
    tpu.vector_store %arg11[%c56_187, %c0_188], %170 {strides = array<i32>} : memref<72x256xbf16, #tpu.memory_space<vmem>>, vector<8x256xbf16>,
    %172 = vector.extract_strided_slice %127 {offsets = [104, 0], sizes = [8, 256], strides = [1, 1]} : vector<112x256xf32> to vector<8x256xf32>
    %173 = arith.truncf %172 : vector<8x256xf32> to vector<8x256xbf16>
    %c56_189 = arith.constant 56 : index
    %c0_190 = arith.constant 0 : index
    %174 = vector.load %arg12[%c56_189, %c0_190] : memref<72x256xbf16, #tpu.memory_space<vmem>>, vector<8x256xbf16>
    tpu.vector_store %arg12[%c56_189, %c0_190], %173 {strides = array<i32>} : memref<72x256xbf16, #tpu.memory_space<vmem>>, vector<8x256xbf16>,
    %c0_191 = arith.constant 0 : index
    %c0_192 = arith.constant 0 : index
    %175 = vector.load %arg11[%c0_191, %c0_192] : memref<72x256xbf16, #tpu.memory_space<vmem>>, vector<56x256xbf16>
    %c0_193 = arith.constant 0 : index
    %c0_194 = arith.constant 0 : index
    %176 = vector.load %arg12[%c0_193, %c0_194] : memref<72x256xbf16, #tpu.memory_space<vmem>>, vector<56x256xbf16>
    %c8_195 = arith.constant 8 : index
    %c0_196 = arith.constant 0 : index
    %177 = vector.load %arg11[%c8_195, %c0_196] : memref<72x256xbf16, #tpu.memory_space<vmem>>, vector<56x256xbf16>
    %c8_197 = arith.constant 8 : index
    %c0_198 = arith.constant 0 : index
    %178 = vector.load %arg12[%c8_197, %c0_198] : memref<72x256xbf16, #tpu.memory_space<vmem>>, vector<56x256xbf16>
    %c16_199 = arith.constant 16 : index
    %c0_200 = arith.constant 0 : index
    %179 = vector.load %arg11[%c16_199, %c0_200] : memref<72x256xbf16, #tpu.memory_space<vmem>>, vector<56x256xbf16>
    %c0_201 = arith.constant 0 : index
    %c0_202 = arith.constant 0 : index
    %c0_203 = arith.constant 0 : index
    %c0_204 = arith.constant 0 : index
    %180 = vector.load %arg4[%c0_201, %c0_202, %c0_203, %c0_204] : memref<2x5x256x256xbf16, #tpu.memory_space<vmem>>, vector<1x1x256x256xbf16>
    %181 = vector.shape_cast %180 : vector<1x1x256x256xbf16> to vector<256x256xbf16>
    %cst_205 = arith.constant dense<0.000000e+00> : vector<56x256xf32>
    %182 = tpu.matmul %175, %181, %cst_205 {dimension_numbers = #tpu.dot_dimension_numbers<[1], [0], [0], [1], [0, 0, 1, 1], [], []>} : vector<56x256xbf16>, vector<256x256xbf16>, vector<56x256xf32> -> vector<56x256xf32>
    %c0_206 = arith.constant 0 : index
    %c1_207 = arith.constant 1 : index
    %c0_208 = arith.constant 0 : index
    %c0_209 = arith.constant 0 : index
    %183 = vector.load %arg4[%c0_206, %c1_207, %c0_208, %c0_209] : memref<2x5x256x256xbf16, #tpu.memory_space<vmem>>, vector<1x1x256x256xbf16>
    %184 = vector.shape_cast %183 : vector<1x1x256x256xbf16> to vector<256x256xbf16>
    %cst_210 = arith.constant dense<0.000000e+00> : vector<56x256xf32>
    %185 = tpu.matmul %176, %184, %cst_210 {dimension_numbers = #tpu.dot_dimension_numbers<[1], [0], [0], [1], [0, 0, 1, 1], [], []>} : vector<56x256xbf16>, vector<256x256xbf16>, vector<56x256xf32> -> vector<56x256xf32>
    %186 = arith.addf %182, %185 : vector<56x256xf32>
    %c0_211 = arith.constant 0 : index
    %c2_212 = arith.constant 2 : index
    %c0_213 = arith.constant 0 : index
    %c0_214 = arith.constant 0 : index
    %187 = vector.load %arg4[%c0_211, %c2_212, %c0_213, %c0_214] : memref<2x5x256x256xbf16, #tpu.memory_space<vmem>>, vector<1x1x256x256xbf16>
    %188 = vector.shape_cast %187 : vector<1x1x256x256xbf16> to vector<256x256xbf16>
    %cst_215 = arith.constant dense<0.000000e+00> : vector<56x256xf32>
    %189 = tpu.matmul %177, %188, %cst_215 {dimension_numbers = #tpu.dot_dimension_numbers<[1], [0], [0], [1], [0, 0, 1, 1], [], []>} : vector<56x256xbf16>, vector<256x256xbf16>, vector<56x256xf32> -> vector<56x256xf32>
    %190 = arith.addf %186, %189 : vector<56x256xf32>
    %c0_216 = arith.constant 0 : index
    %c3_217 = arith.constant 3 : index
    %c0_218 = arith.constant 0 : index
    %c0_219 = arith.constant 0 : index
    %191 = vector.load %arg4[%c0_216, %c3_217, %c0_218, %c0_219] : memref<2x5x256x256xbf16, #tpu.memory_space<vmem>>, vector<1x1x256x256xbf16>
    %192 = vector.shape_cast %191 : vector<1x1x256x256xbf16> to vector<256x256xbf16>
    %cst_220 = arith.constant dense<0.000000e+00> : vector<56x256xf32>
    %193 = tpu.matmul %178, %192, %cst_220 {dimension_numbers = #tpu.dot_dimension_numbers<[1], [0], [0], [1], [0, 0, 1, 1], [], []>} : vector<56x256xbf16>, vector<256x256xbf16>, vector<56x256xf32> -> vector<56x256xf32>
    %194 = arith.addf %190, %193 : vector<56x256xf32>
    %c0_221 = arith.constant 0 : index
    %c4_222 = arith.constant 4 : index
    %c0_223 = arith.constant 0 : index
    %c0_224 = arith.constant 0 : index
    %195 = vector.load %arg4[%c0_221, %c4_222, %c0_223, %c0_224] : memref<2x5x256x256xbf16, #tpu.memory_space<vmem>>, vector<1x1x256x256xbf16>
    %196 = vector.shape_cast %195 : vector<1x1x256x256xbf16> to vector<256x256xbf16>
    %cst_225 = arith.constant dense<0.000000e+00> : vector<56x256xf32>
    %197 = tpu.matmul %179, %196, %cst_225 {dimension_numbers = #tpu.dot_dimension_numbers<[1], [0], [0], [1], [0, 0, 1, 1], [], []>} : vector<56x256xbf16>, vector<256x256xbf16>, vector<56x256xf32> -> vector<56x256xf32>
    %198 = arith.addf %194, %197 : vector<56x256xf32>
    %c1_226 = arith.constant 1 : index
    %c0_227 = arith.constant 0 : index
    %c0_228 = arith.constant 0 : index
    %c0_229 = arith.constant 0 : index
    %199 = vector.load %arg4[%c1_226, %c0_227, %c0_228, %c0_229] : memref<2x5x256x256xbf16, #tpu.memory_space<vmem>>, vector<1x1x256x256xbf16>
    %200 = vector.shape_cast %199 : vector<1x1x256x256xbf16> to vector<256x256xbf16>
    %cst_230 = arith.constant dense<0.000000e+00> : vector<56x256xf32>
    %201 = tpu.matmul %175, %200, %cst_230 {dimension_numbers = #tpu.dot_dimension_numbers<[1], [0], [0], [1], [0, 0, 1, 1], [], []>} : vector<56x256xbf16>, vector<256x256xbf16>, vector<56x256xf32> -> vector<56x256xf32>
    %c1_231 = arith.constant 1 : index
    %c1_232 = arith.constant 1 : index
    %c0_233 = arith.constant 0 : index
    %c0_234 = arith.constant 0 : index
    %202 = vector.load %arg4[%c1_231, %c1_232, %c0_233, %c0_234] : memref<2x5x256x256xbf16, #tpu.memory_space<vmem>>, vector<1x1x256x256xbf16>
    %203 = vector.shape_cast %202 : vector<1x1x256x256xbf16> to vector<256x256xbf16>
    %cst_235 = arith.constant dense<0.000000e+00> : vector<56x256xf32>
    %204 = tpu.matmul %176, %203, %cst_235 {dimension_numbers = #tpu.dot_dimension_numbers<[1], [0], [0], [1], [0, 0, 1, 1], [], []>} : vector<56x256xbf16>, vector<256x256xbf16>, vector<56x256xf32> -> vector<56x256xf32>
    %205 = arith.addf %201, %204 : vector<56x256xf32>
    %c1_236 = arith.constant 1 : index
    %c2_237 = arith.constant 2 : index
    %c0_238 = arith.constant 0 : index
    %c0_239 = arith.constant 0 : index
    %206 = vector.load %arg4[%c1_236, %c2_237, %c0_238, %c0_239] : memref<2x5x256x256xbf16, #tpu.memory_space<vmem>>, vector<1x1x256x256xbf16>
    %207 = vector.shape_cast %206 : vector<1x1x256x256xbf16> to vector<256x256xbf16>
    %cst_240 = arith.constant dense<0.000000e+00> : vector<56x256xf32>
    %208 = tpu.matmul %177, %207, %cst_240 {dimension_numbers = #tpu.dot_dimension_numbers<[1], [0], [0], [1], [0, 0, 1, 1], [], []>} : vector<56x256xbf16>, vector<256x256xbf16>, vector<56x256xf32> -> vector<56x256xf32>
    %209 = arith.addf %205, %208 : vector<56x256xf32>
    %c1_241 = arith.constant 1 : index
    %c3_242 = arith.constant 3 : index
    %c0_243 = arith.constant 0 : index
    %c0_244 = arith.constant 0 : index
    %210 = vector.load %arg4[%c1_241, %c3_242, %c0_243, %c0_244] : memref<2x5x256x256xbf16, #tpu.memory_space<vmem>>, vector<1x1x256x256xbf16>
    %211 = vector.shape_cast %210 : vector<1x1x256x256xbf16> to vector<256x256xbf16>
    %cst_245 = arith.constant dense<0.000000e+00> : vector<56x256xf32>
    %212 = tpu.matmul %178, %211, %cst_245 {dimension_numbers = #tpu.dot_dimension_numbers<[1], [0], [0], [1], [0, 0, 1, 1], [], []>} : vector<56x256xbf16>, vector<256x256xbf16>, vector<56x256xf32> -> vector<56x256xf32>
    %213 = arith.addf %209, %212 : vector<56x256xf32>
    %c1_246 = arith.constant 1 : index
    %c4_247 = arith.constant 4 : index
    %c0_248 = arith.constant 0 : index
    %c0_249 = arith.constant 0 : index
    %214 = vector.load %arg4[%c1_246, %c4_247, %c0_248, %c0_249] : memref<2x5x256x256xbf16, #tpu.memory_space<vmem>>, vector<1x1x256x256xbf16>
    %215 = vector.shape_cast %214 : vector<1x1x256x256xbf16> to vector<256x256xbf16>
    %cst_250 = arith.constant dense<0.000000e+00> : vector<56x256xf32>
    %216 = tpu.matmul %179, %215, %cst_250 {dimension_numbers = #tpu.dot_dimension_numbers<[1], [0], [0], [1], [0, 0, 1, 1], [], []>} : vector<56x256xbf16>, vector<256x256xbf16>, vector<56x256xf32> -> vector<56x256xf32>
    %217 = arith.addf %213, %216 : vector<56x256xf32>
    %218 = arith.maximumf %198, %217 : vector<56x256xf32>
    %c0_251 = arith.constant 0 : index
    %c0_252 = arith.constant 0 : index
    %219 = vector.load %arg12[%c0_251, %c0_252] : memref<72x256xbf16, #tpu.memory_space<vmem>>, vector<56x256xbf16>
    %c8_253 = arith.constant 8 : index
    %c0_254 = arith.constant 0 : index
    %220 = vector.load %arg11[%c8_253, %c0_254] : memref<72x256xbf16, #tpu.memory_space<vmem>>, vector<56x256xbf16>
    %c8_255 = arith.constant 8 : index
    %c0_256 = arith.constant 0 : index
    %221 = vector.load %arg12[%c8_255, %c0_256] : memref<72x256xbf16, #tpu.memory_space<vmem>>, vector<56x256xbf16>
    %c16_257 = arith.constant 16 : index
    %c0_258 = arith.constant 0 : index
    %222 = vector.load %arg11[%c16_257, %c0_258] : memref<72x256xbf16, #tpu.memory_space<vmem>>, vector<56x256xbf16>
    %c16_259 = arith.constant 16 : index
    %c0_260 = arith.constant 0 : index
    %223 = vector.load %arg12[%c16_259, %c0_260] : memref<72x256xbf16, #tpu.memory_space<vmem>>, vector<56x256xbf16>
    %c0_261 = arith.constant 0 : index
    %c0_262 = arith.constant 0 : index
    %c0_263 = arith.constant 0 : index
    %c0_264 = arith.constant 0 : index
    %224 = vector.load %arg4[%c0_261, %c0_262, %c0_263, %c0_264] : memref<2x5x256x256xbf16, #tpu.memory_space<vmem>>, vector<1x1x256x256xbf16>
    %225 = vector.shape_cast %224 : vector<1x1x256x256xbf16> to vector<256x256xbf16>
    %cst_265 = arith.constant dense<0.000000e+00> : vector<56x256xf32>
    %226 = tpu.matmul %219, %225, %cst_265 {dimension_numbers = #tpu.dot_dimension_numbers<[1], [0], [0], [1], [0, 0, 1, 1], [], []>} : vector<56x256xbf16>, vector<256x256xbf16>, vector<56x256xf32> -> vector<56x256xf32>
    %c0_266 = arith.constant 0 : index
    %c1_267 = arith.constant 1 : index
    %c0_268 = arith.constant 0 : index
    %c0_269 = arith.constant 0 : index
    %227 = vector.load %arg4[%c0_266, %c1_267, %c0_268, %c0_269] : memref<2x5x256x256xbf16, #tpu.memory_space<vmem>>, vector<1x1x256x256xbf16>
    %228 = vector.shape_cast %227 : vector<1x1x256x256xbf16> to vector<256x256xbf16>
    %cst_270 = arith.constant dense<0.000000e+00> : vector<56x256xf32>
    %229 = tpu.matmul %220, %228, %cst_270 {dimension_numbers = #tpu.dot_dimension_numbers<[1], [0], [0], [1], [0, 0, 1, 1], [], []>} : vector<56x256xbf16>, vector<256x256xbf16>, vector<56x256xf32> -> vector<56x256xf32>
    %230 = arith.addf %226, %229 : vector<56x256xf32>
    %c0_271 = arith.constant 0 : index
    %c2_272 = arith.constant 2 : index
    %c0_273 = arith.constant 0 : index
    %c0_274 = arith.constant 0 : index
    %231 = vector.load %arg4[%c0_271, %c2_272, %c0_273, %c0_274] : memref<2x5x256x256xbf16, #tpu.memory_space<vmem>>, vector<1x1x256x256xbf16>
    %232 = vector.shape_cast %231 : vector<1x1x256x256xbf16> to vector<256x256xbf16>
    %cst_275 = arith.constant dense<0.000000e+00> : vector<56x256xf32>
    %233 = tpu.matmul %221, %232, %cst_275 {dimension_numbers = #tpu.dot_dimension_numbers<[1], [0], [0], [1], [0, 0, 1, 1], [], []>} : vector<56x256xbf16>, vector<256x256xbf16>, vector<56x256xf32> -> vector<56x256xf32>
    %234 = arith.addf %230, %233 : vector<56x256xf32>
    %c0_276 = arith.constant 0 : index
    %c3_277 = arith.constant 3 : index
    %c0_278 = arith.constant 0 : index
    %c0_279 = arith.constant 0 : index
    %235 = vector.load %arg4[%c0_276, %c3_277, %c0_278, %c0_279] : memref<2x5x256x256xbf16, #tpu.memory_space<vmem>>, vector<1x1x256x256xbf16>
    %236 = vector.shape_cast %235 : vector<1x1x256x256xbf16> to vector<256x256xbf16>
    %cst_280 = arith.constant dense<0.000000e+00> : vector<56x256xf32>
    %237 = tpu.matmul %222, %236, %cst_280 {dimension_numbers = #tpu.dot_dimension_numbers<[1], [0], [0], [1], [0, 0, 1, 1], [], []>} : vector<56x256xbf16>, vector<256x256xbf16>, vector<56x256xf32> -> vector<56x256xf32>
    %238 = arith.addf %234, %237 : vector<56x256xf32>
    %c0_281 = arith.constant 0 : index
    %c4_282 = arith.constant 4 : index
    %c0_283 = arith.constant 0 : index
    %c0_284 = arith.constant 0 : index
    %239 = vector.load %arg4[%c0_281, %c4_282, %c0_283, %c0_284] : memref<2x5x256x256xbf16, #tpu.memory_space<vmem>>, vector<1x1x256x256xbf16>
    %240 = vector.shape_cast %239 : vector<1x1x256x256xbf16> to vector<256x256xbf16>
    %cst_285 = arith.constant dense<0.000000e+00> : vector<56x256xf32>
    %241 = tpu.matmul %223, %240, %cst_285 {dimension_numbers = #tpu.dot_dimension_numbers<[1], [0], [0], [1], [0, 0, 1, 1], [], []>} : vector<56x256xbf16>, vector<256x256xbf16>, vector<56x256xf32> -> vector<56x256xf32>
    %242 = arith.addf %238, %241 : vector<56x256xf32>
    %243 = arith.maximumf %218, %242 : vector<56x256xf32>
    %c1_286 = arith.constant 1 : index
    %c0_287 = arith.constant 0 : index
    %c0_288 = arith.constant 0 : index
    %c0_289 = arith.constant 0 : index
    %244 = vector.load %arg4[%c1_286, %c0_287, %c0_288, %c0_289] : memref<2x5x256x256xbf16, #tpu.memory_space<vmem>>, vector<1x1x256x256xbf16>
    %245 = vector.shape_cast %244 : vector<1x1x256x256xbf16> to vector<256x256xbf16>
    %cst_290 = arith.constant dense<0.000000e+00> : vector<56x256xf32>
    %246 = tpu.matmul %219, %245, %cst_290 {dimension_numbers = #tpu.dot_dimension_numbers<[1], [0], [0], [1], [0, 0, 1, 1], [], []>} : vector<56x256xbf16>, vector<256x256xbf16>, vector<56x256xf32> -> vector<56x256xf32>
    %c1_291 = arith.constant 1 : index
    %c1_292 = arith.constant 1 : index
    %c0_293 = arith.constant 0 : index
    %c0_294 = arith.constant 0 : index
    %247 = vector.load %arg4[%c1_291, %c1_292, %c0_293, %c0_294] : memref<2x5x256x256xbf16, #tpu.memory_space<vmem>>, vector<1x1x256x256xbf16>
    %248 = vector.shape_cast %247 : vector<1x1x256x256xbf16> to vector<256x256xbf16>
    %cst_295 = arith.constant dense<0.000000e+00> : vector<56x256xf32>
    %249 = tpu.matmul %220, %248, %cst_295 {dimension_numbers = #tpu.dot_dimension_numbers<[1], [0], [0], [1], [0, 0, 1, 1], [], []>} : vector<56x256xbf16>, vector<256x256xbf16>, vector<56x256xf32> -> vector<56x256xf32>
    %250 = arith.addf %246, %249 : vector<56x256xf32>
    %c1_296 = arith.constant 1 : index
    %c2_297 = arith.constant 2 : index
    %c0_298 = arith.constant 0 : index
    %c0_299 = arith.constant 0 : index
    %251 = vector.load %arg4[%c1_296, %c2_297, %c0_298, %c0_299] : memref<2x5x256x256xbf16, #tpu.memory_space<vmem>>, vector<1x1x256x256xbf16>
    %252 = vector.shape_cast %251 : vector<1x1x256x256xbf16> to vector<256x256xbf16>
    %cst_300 = arith.constant dense<0.000000e+00> : vector<56x256xf32>
    %253 = tpu.matmul %221, %252, %cst_300 {dimension_numbers = #tpu.dot_dimension_numbers<[1], [0], [0], [1], [0, 0, 1, 1], [], []>} : vector<56x256xbf16>, vector<256x256xbf16>, vector<56x256xf32> -> vector<56x256xf32>
    %254 = arith.addf %250, %253 : vector<56x256xf32>
    %c1_301 = arith.constant 1 : index
    %c3_302 = arith.constant 3 : index
    %c0_303 = arith.constant 0 : index
    %c0_304 = arith.constant 0 : index
    %255 = vector.load %arg4[%c1_301, %c3_302, %c0_303, %c0_304] : memref<2x5x256x256xbf16, #tpu.memory_space<vmem>>, vector<1x1x256x256xbf16>
    %256 = vector.shape_cast %255 : vector<1x1x256x256xbf16> to vector<256x256xbf16>
    %cst_305 = arith.constant dense<0.000000e+00> : vector<56x256xf32>
    %257 = tpu.matmul %222, %256, %cst_305 {dimension_numbers = #tpu.dot_dimension_numbers<[1], [0], [0], [1], [0, 0, 1, 1], [], []>} : vector<56x256xbf16>, vector<256x256xbf16>, vector<56x256xf32> -> vector<56x256xf32>
    %258 = arith.addf %254, %257 : vector<56x256xf32>
    %c1_306 = arith.constant 1 : index
    %c4_307 = arith.constant 4 : index
    %c0_308 = arith.constant 0 : index
    %c0_309 = arith.constant 0 : index
    %259 = vector.load %arg4[%c1_306, %c4_307, %c0_308, %c0_309] : memref<2x5x256x256xbf16, #tpu.memory_space<vmem>>, vector<1x1x256x256xbf16>
    %260 = vector.shape_cast %259 : vector<1x1x256x256xbf16> to vector<256x256xbf16>
    %cst_310 = arith.constant dense<0.000000e+00> : vector<56x256xf32>
    %261 = tpu.matmul %223, %260, %cst_310 {dimension_numbers = #tpu.dot_dimension_numbers<[1], [0], [0], [1], [0, 0, 1, 1], [], []>} : vector<56x256xbf16>, vector<256x256xbf16>, vector<56x256xf32> -> vector<56x256xf32>
    %262 = arith.addf %258, %261 : vector<56x256xf32>
    %263 = arith.maximumf %243, %262 : vector<56x256xf32>
    %c0_311 = arith.constant 0 : index
    %c0_312 = arith.constant 0 : index
    %264 = vector.load %arg5[%c0_311, %c0_312] : memref<1x256xf32, #tpu.memory_space<vmem>>, vector<1x256xf32>
    %265 = vector.broadcast %264 : vector<1x256xf32> to vector<56x256xf32>
    %266 = arith.addf %263, %265 : vector<56x256xf32>
    %cst_313 = arith.constant 0.000000e+00 : f32
    %267 = vector.broadcast %cst_313 : f32 to vector<56x256xf32>
    %268 = arith.maximumf %266, %267 : vector<56x256xf32>
    %269 = vector.extract_strided_slice %268 {offsets = [0, 0], sizes = [8, 256], strides = [1, 1]} : vector<56x256xf32> to vector<8x256xf32>
    %c0_314 = arith.constant 0 : index
    %c0_315 = arith.constant 0 : index
    %c0_316 = arith.constant 0 : index
    %270 = vector.load %arg6[%c0_314, %c0_315, %c0_316] : memref<7x256x10xf32, #tpu.memory_space<vmem>>, vector<1x256x10xf32>
    %271 = vector.shape_cast %270 : vector<1x256x10xf32> to vector<256x10xf32>
    %cst_317 = arith.constant dense<0.000000e+00> : vector<8x10xf32>
    %272 = tpu.matmul %269, %271, %cst_317 {dimension_numbers = #tpu.dot_dimension_numbers<[1], [0], [0], [1], [0, 0, 1, 1], [], []>} : vector<8x256xf32>, vector<256x10xf32>, vector<8x10xf32> -> vector<8x10xf32>
    %273 = vector.extract_strided_slice %268 {offsets = [8, 0], sizes = [8, 256], strides = [1, 1]} : vector<56x256xf32> to vector<8x256xf32>
    %c1_318 = arith.constant 1 : index
    %c0_319 = arith.constant 0 : index
    %c0_320 = arith.constant 0 : index
    %274 = vector.load %arg6[%c1_318, %c0_319, %c0_320] : memref<7x256x10xf32, #tpu.memory_space<vmem>>, vector<1x256x10xf32>
    %275 = vector.shape_cast %274 : vector<1x256x10xf32> to vector<256x10xf32>
    %cst_321 = arith.constant dense<0.000000e+00> : vector<8x10xf32>
    %276 = tpu.matmul %273, %275, %cst_321 {dimension_numbers = #tpu.dot_dimension_numbers<[1], [0], [0], [1], [0, 0, 1, 1], [], []>} : vector<8x256xf32>, vector<256x10xf32>, vector<8x10xf32> -> vector<8x10xf32>
    %277 = arith.addf %272, %276 : vector<8x10xf32>
    %278 = vector.extract_strided_slice %268 {offsets = [16, 0], sizes = [8, 256], strides = [1, 1]} : vector<56x256xf32> to vector<8x256xf32>
    %c2_322 = arith.constant 2 : index
    %c0_323 = arith.constant 0 : index
    %c0_324 = arith.constant 0 : index
    %279 = vector.load %arg6[%c2_322, %c0_323, %c0_324] : memref<7x256x10xf32, #tpu.memory_space<vmem>>, vector<1x256x10xf32>
    %280 = vector.shape_cast %279 : vector<1x256x10xf32> to vector<256x10xf32>
    %cst_325 = arith.constant dense<0.000000e+00> : vector<8x10xf32>
    %281 = tpu.matmul %278, %280, %cst_325 {dimension_numbers = #tpu.dot_dimension_numbers<[1], [0], [0], [1], [0, 0, 1, 1], [], []>} : vector<8x256xf32>, vector<256x10xf32>, vector<8x10xf32> -> vector<8x10xf32>
    %282 = arith.addf %277, %281 : vector<8x10xf32>
    %283 = vector.extract_strided_slice %268 {offsets = [24, 0], sizes = [8, 256], strides = [1, 1]} : vector<56x256xf32> to vector<8x256xf32>
    %c3_326 = arith.constant 3 : index
    %c0_327 = arith.constant 0 : index
    %c0_328 = arith.constant 0 : index
    %284 = vector.load %arg6[%c3_326, %c0_327, %c0_328] : memref<7x256x10xf32, #tpu.memory_space<vmem>>, vector<1x256x10xf32>
    %285 = vector.shape_cast %284 : vector<1x256x10xf32> to vector<256x10xf32>
    %cst_329 = arith.constant dense<0.000000e+00> : vector<8x10xf32>
    %286 = tpu.matmul %283, %285, %cst_329 {dimension_numbers = #tpu.dot_dimension_numbers<[1], [0], [0], [1], [0, 0, 1, 1], [], []>} : vector<8x256xf32>, vector<256x10xf32>, vector<8x10xf32> -> vector<8x10xf32>
    %287 = arith.addf %282, %286 : vector<8x10xf32>
    %288 = vector.extract_strided_slice %268 {offsets = [32, 0], sizes = [8, 256], strides = [1, 1]} : vector<56x256xf32> to vector<8x256xf32>
    %c4_330 = arith.constant 4 : index
    %c0_331 = arith.constant 0 : index
    %c0_332 = arith.constant 0 : index
    %289 = vector.load %arg6[%c4_330, %c0_331, %c0_332] : memref<7x256x10xf32, #tpu.memory_space<vmem>>, vector<1x256x10xf32>
    %290 = vector.shape_cast %289 : vector<1x256x10xf32> to vector<256x10xf32>
    %cst_333 = arith.constant dense<0.000000e+00> : vector<8x10xf32>
    %291 = tpu.matmul %288, %290, %cst_333 {dimension_numbers = #tpu.dot_dimension_numbers<[1], [0], [0], [1], [0, 0, 1, 1], [], []>} : vector<8x256xf32>, vector<256x10xf32>, vector<8x10xf32> -> vector<8x10xf32>
    %292 = arith.addf %287, %291 : vector<8x10xf32>
    %293 = vector.extract_strided_slice %268 {offsets = [40, 0], sizes = [8, 256], strides = [1, 1]} : vector<56x256xf32> to vector<8x256xf32>
    %c5_334 = arith.constant 5 : index
    %c0_335 = arith.constant 0 : index
    %c0_336 = arith.constant 0 : index
    %294 = vector.load %arg6[%c5_334, %c0_335, %c0_336] : memref<7x256x10xf32, #tpu.memory_space<vmem>>, vector<1x256x10xf32>
    %295 = vector.shape_cast %294 : vector<1x256x10xf32> to vector<256x10xf32>
    %cst_337 = arith.constant dense<0.000000e+00> : vector<8x10xf32>
    %296 = tpu.matmul %293, %295, %cst_337 {dimension_numbers = #tpu.dot_dimension_numbers<[1], [0], [0], [1], [0, 0, 1, 1], [], []>} : vector<8x256xf32>, vector<256x10xf32>, vector<8x10xf32> -> vector<8x10xf32>
    %297 = arith.addf %292, %296 : vector<8x10xf32>
    %298 = vector.extract_strided_slice %268 {offsets = [48, 0], sizes = [8, 256], strides = [1, 1]} : vector<56x256xf32> to vector<8x256xf32>
    %c6_338 = arith.constant 6 : index
    %c0_339 = arith.constant 0 : index
    %c0_340 = arith.constant 0 : index
    %299 = vector.load %arg6[%c6_338, %c0_339, %c0_340] : memref<7x256x10xf32, #tpu.memory_space<vmem>>, vector<1x256x10xf32>
    %300 = vector.shape_cast %299 : vector<1x256x10xf32> to vector<256x10xf32>
    %cst_341 = arith.constant dense<0.000000e+00> : vector<8x10xf32>
    %301 = tpu.matmul %298, %300, %cst_341 {dimension_numbers = #tpu.dot_dimension_numbers<[1], [0], [0], [1], [0, 0, 1, 1], [], []>} : vector<8x256xf32>, vector<256x10xf32>, vector<8x10xf32> -> vector<8x10xf32>
    %302 = arith.addf %297, %301 : vector<8x10xf32>
    %c0_342 = arith.constant 0 : index
    %c0_343 = arith.constant 0 : index
    %303 = vector.load %arg7[%c0_342, %c0_343] : memref<1x10xf32, #tpu.memory_space<vmem>>, vector<1x10xf32>
    %304 = vector.broadcast %303 : vector<1x10xf32> to vector<8x10xf32>
    %305 = arith.addf %302, %304 : vector<8x10xf32>
    %cst_344 = arith.constant dense<0xFF800000> : vector<8xf32>
    %306 = vector.multi_reduction <maximumf>, %305, %cst_344 [1] : vector<8x10xf32> to vector<8xf32>
    %307 = vector.shape_cast %306 : vector<8xf32> to vector<8x1xf32>
    %308 = vector.broadcast %307 : vector<8x1xf32> to vector<8x10xf32>
    %309 = arith.subf %305, %308 : vector<8x10xf32>
    %310 = math.exp %309 : vector<8x10xf32>
    %cst_345 = arith.constant dense<0.000000e+00> : vector<8xf32>
    %311 = vector.multi_reduction <add>, %310, %cst_345 [1] : vector<8x10xf32> to vector<8xf32>
    %312 = vector.shape_cast %311 : vector<8xf32> to vector<8x1xf32>
    %313 = math.log %312 : vector<8x1xf32>
    %314 = vector.broadcast %313 : vector<8x1xf32> to vector<8x10xf32>
    %315 = arith.subf %309, %314 : vector<8x10xf32>
    %c0_346 = arith.constant 0 : index
    %c0_347 = arith.constant 0 : index
    %316 = vector.load %arg8[%c0_346, %c0_347] : memref<8x10xf32, #tpu.memory_space<vmem>>, vector<8x10xf32>
    tpu.vector_store %arg8[%c0_346, %c0_347], %315 {strides = array<i32>} : memref<8x10xf32, #tpu.memory_space<vmem>>, vector<8x10xf32>,
    return
  }
  func.func @transform_0(%arg0: i32) -> (i32, i32, i32) {
    %c0_i32 = arith.constant 0 : i32
    %c0_i32_0 = arith.constant 0 : i32
    %c0_i32_1 = arith.constant 0 : i32
    return %c0_i32, %arg0, %c0_i32_0 : i32, i32, i32
  }
  func.func @transform_1(%arg0: i32) -> (i32, i32, i32) {
    %c0_i32 = arith.constant 0 : i32
    %c0_i32_0 = arith.constant 0 : i32
    %c0_i32_1 = arith.constant 0 : i32
    %c0_i32_2 = arith.constant 0 : i32
    return %c0_i32, %c0_i32_0, %c0_i32_1 : i32, i32, i32
  }
  func.func @transform_2(%arg0: i32) -> (i32, i32) {
    %c0_i32 = arith.constant 0 : i32
    %c0_i32_0 = arith.constant 0 : i32
    %c0_i32_1 = arith.constant 0 : i32
    return %c0_i32, %c0_i32_0 : i32, i32
  }
  func.func @transform_3(%arg0: i32) -> (i32, i32, i32, i32) {
    %c0_i32 = arith.constant 0 : i32
    %c0_i32_0 = arith.constant 0 : i32
    %c0_i32_1 = arith.constant 0 : i32
    %c0_i32_2 = arith.constant 0 : i32
    %c0_i32_3 = arith.constant 0 : i32
    return %c0_i32, %c0_i32_0, %c0_i32_1, %c0_i32_2 : i32, i32, i32, i32
  }
  func.func @transform_4(%arg0: i32) -> (i32, i32) {
    %c0_i32 = arith.constant 0 : i32
    %c0_i32_0 = arith.constant 0 : i32
    %c0_i32_1 = arith.constant 0 : i32
    return %c0_i32, %c0_i32_0 : i32, i32
  }
  func.func @transform_5(%arg0: i32) -> (i32, i32, i32) {
    %c0_i32 = arith.constant 0 : i32
    %c0_i32_0 = arith.constant 0 : i32
    %c0_i32_1 = arith.constant 0 : i32
    %c0_i32_2 = arith.constant 0 : i32
    return %c0_i32, %c0_i32_0, %c0_i32_1 : i32, i32, i32
  }
  func.func @transform_6(%arg0: i32) -> (i32, i32) {
    %c0_i32 = arith.constant 0 : i32
    %c0_i32_0 = arith.constant 0 : i32
    %c0_i32_1 = arith.constant 0 : i32
    return %c0_i32, %c0_i32_0 : i32, i32
  }
  func.func @transform_7(%arg0: i32) -> (i32, i32) {
    %c0_i32 = arith.constant 0 : i32
    %c0_i32_0 = arith.constant 0 : i32
    return %arg0, %c0_i32 : i32, i32
  }
}

</mosaic_0001>

<bundles_post_ra>
// kernel: my_awesome_model_forward.1
= control target key start
LH: loop header
LB: loop body
LE: loop exit
PB: predicated region body
PF: predicated region fallthrough
CT: control target
= control target key end

     0   :  { %12 = vsyncpa [#allocation7], 0  ;;  %s10809_s0 = inlined_call_operand.vmem [shape: bf16[32,8,32], index: 0, kind: input, shape index: {}]   ;;  %s10810_s1 = inlined_call_operand.hbm [shape: bf16[2,160,256], index: 1, kind: input, shape index: {}]   ;;  %s10811_s2 = inlined_call_operand.hbm [shape: f32[1,256], index: 2, kind: input, shape index: {}]   ;;  %s10812_s3 = inlined_call_operand.hbm [shape: bf16[2,5,256,256], index: 3, kind: input, shape index: {}]   ;;  %s10813_s4 = inlined_call_operand.hbm [shape: f32[1,256], index: 4, kind: input, shape index: {}]   ;;  %s10814_s5 = inlined_call_operand.vmem [shape: f32[7,256,10], index: 5, kind: input, shape index: {}]   ;;  %s10815_s6 = inlined_call_operand.hbm [shape: f32[1,10], index: 6, kind: input, shape index: {}]   ;;  %s10816_s7 = inlined_call_operand.vmem [shape: f32[8,10], index: 7, kind: output, shape index: {}]  }
   0x1   :  { %13 = vsyncpa [#allocation9], 0 }
   0x2   :  { %14 = vsyncpa [#allocation12], 0  ;;  %s8473_s24 = smov [#allocation8]   ;;  %s8474_s26 = smov [#allocation11]  }
   0x3   :  { %s35_s25 = sshll.u32 %s8473_s24, 4  ;;  %s57_s27 = sshll.u32 %s8474_s26, 4  ;;  %s36_s25 = int_to_ptr.vmem [resolvable:$true] %s35_s25  ;;  %s58_s27 = int_to_ptr.vmem [resolvable:$true] %s57_s27 }
   0x4   :  { %s8357_s30 = scalar_lea.hbm %s10811_s2, 32 }
   0x5   :  { %p8358_p0 = scmp.ne.s32.totalorder %s10811_s2, %s8357_s30  ;;  %p8361_p1 = scmp.lt.u32.totalorder %s8357_s30, %s10811_s2 }
   0x7   :  { %p8363_p2 = pnand %p8361_p1, %p8358_p0 }
   0x9   :  { %8366 = shalt.err (!%p8363_p2)
}
   0xa   :  { %s8367_s12 = scalar_lea.vmem %s36_s25, 32  ;;  %p8372_p4 = scmp.lt.s32.totalorder %s36_s25, %s36_s25 }
   0xb   :  { %p8368_p3 = scmp.ne.s32.totalorder %s36_s25, %s8367_s12  ;;  %p8373_p5 = scmp.lt.s32.totalorder %s8367_s12, %s8367_s12 }
   0xd   :  { %p8374_p6 = por %p8373_p5, %p8372_p4 }
   0xf   :  { %p8375_p7 = pnand %p8374_p6, %p8368_p3 }
  0x11   :  { %8378 = shalt.err (!%p8375_p7)
}
  0x12   :  { %38 = dma.hbm_to_vmem [thread:$0]  %s10811_s2, 32, %s36_s25, [#allocation9]  }
  0x13   :  { %s8379_s17 = scalar_lea.hbm %s10813_s4, 32 }
  0x14   :  { %p8380_p8 = scmp.ne.s32.totalorder %s10813_s4, %s8379_s17  ;;  %p8383_p9 = scmp.lt.u32.totalorder %s8379_s17, %s10813_s4 }
  0x16   :  { %p8385_p10 = pnand %p8383_p9, %p8380_p8 }
  0x18   :  { %8388 = shalt.err (!%p8385_p10)
}
  0x19   :  { %s8389_s22 = scalar_lea.vmem %s58_s27, 32  ;;  %p8394_p12 = scmp.lt.s32.totalorder %s58_s27, %s58_s27 }
  0x1a   :  { %p8390_p11 = scmp.ne.s32.totalorder %s58_s27, %s8389_s22  ;;  %p8395_p13 = scmp.lt.s32.totalorder %s8389_s22, %s8389_s22 }
  0x1c   :  { %p8396_p0 = por %p8395_p13, %p8394_p12 }
  0x1e   :  { %p8397_p1 = pnand %p8396_p0, %p8390_p11 }
  0x20   :  { %8400 = shalt.err (!%p8397_p1)
}
  0x21   :  { %60 = dma.hbm_to_vmem [thread:$0]  %s10813_s4, 32, %s58_s27, [#allocation12]  }
  0x22   :  { %s8475_s24 = smov [#allocation6]   ;;  %s8401_s29 = scalar_lea.hbm %s10810_s1, 5120 }
  0x23   :  { %s22_s25 = sshll.u32 %s8475_s24, 4  ;;  %p8402_p2 = scmp.ne.s32.totalorder %s10810_s1, %s8401_s29  ;;  %s23_s25 = int_to_ptr.vmem [resolvable:$true] %s22_s25 }
  0x24   :  { %p8405_p3 = scmp.lt.u32.totalorder %s8401_s29, %s10810_s1 }
  0x26   :  { %p8407_p4 = pnand %p8405_p3, %p8402_p2 }
  0x28   :  { %8410 = shalt.err (!%p8407_p4)
}
  0x29   :  { %s8411_s11 = scalar_lea.vmem %s23_s25, 5120  ;;  %p8416_p6 = scmp.lt.s32.totalorder %s23_s25, %s23_s25 }
  0x2a   :  { %p8412_p5 = scmp.ne.s32.totalorder %s23_s25, %s8411_s11  ;;  %p8417_p7 = scmp.lt.s32.totalorder %s8411_s11, %s8411_s11 }
  0x2c   :  { %p8418_p8 = por %p8417_p7, %p8416_p6 }
  0x2e   :  { %p8419_p9 = pnand %p8418_p8, %p8412_p5 }
  0x30   :  { %8422 = shalt.err (!%p8419_p9)
}
  0x31   :  { %s8476_s4 = smov 128   ;;  %s8477_s27 = smov 8  }
  0x32   :  { %28 = dma.hbm_to_vmem [thread:$0]  %s10810_s1, 5120, %s23_s25, [#allocation7], %s8476_s4, %s8476_s4, %s8477_s27  }
  0x33   :  { %s8478_s14 = smov [#allocation10]   ;;  %s8479_s16 = smov [#allocation13]  }
  0x34   :  { %s44_s15 = sshll.u32 %s8478_s14, 4  ;;  %s69_s17 = sshll.u32 %s8479_s16, 4  ;;  %s45_s15 = int_to_ptr.vmem [resolvable:$true] %s44_s15  ;;  %s70_s17 = int_to_ptr.vmem [resolvable:$true] %s69_s17 }
  0x35   :  { %s8423_s20 = scalar_lea.hbm %s10812_s3, 40960 }
  0x36   :  { %p8424_p10 = scmp.ne.s32.totalorder %s10812_s3, %s8423_s20  ;;  %p8427_p11 = scmp.lt.u32.totalorder %s8423_s20, %s10812_s3 }
  0x38   :  { %p8429_p12 = pnand %p8427_p11, %p8424_p10 }
  0x3a   :  { %8432 = shalt.err (!%p8429_p12)
}
  0x3b   :  { %s8433_s1 = scalar_lea.vmem %s45_s15, 40960  ;;  %p8438_p0 = scmp.lt.s32.totalorder %s45_s15, %s45_s15 }
  0x3c   :  { %p8434_p13 = scmp.ne.s32.totalorder %s45_s15, %s8433_s1  ;;  %p8439_p1 = scmp.lt.s32.totalorder %s8433_s1, %s8433_s1 }
  0x3e   :  { %p8440_p2 = por %p8439_p1, %p8438_p0 }
  0x40   :  { %p8441_p3 = pnand %p8440_p2, %p8434_p13 }
  0x42   :  { %8444 = shalt.err (!%p8441_p3)
}
  0x43   :  { %50 = dma.hbm_to_vmem [thread:$0]  %s10812_s3, 40960, %s45_s15, [#allocation9], %s8476_s4, %s8476_s4, %s8477_s27  }
  0x44   :  { %s8445_s29 = scalar_lea.hbm %s10815_s6, 16 }
  0x45   :  { %p8446_p4 = scmp.ne.s32.totalorder %s10815_s6, %s8445_s29  ;;  %p8449_p5 = scmp.lt.u32.totalorder %s8445_s29, %s10815_s6 }
  0x47   :  { %p8451_p6 = pnand %p8449_p5, %p8446_p4 }
  0x49   :  { %8454 = shalt.err (!%p8451_p6)
}
  0x4a   :  { %s8455_s11 = scalar_lea.vmem %s70_s17, 16  ;;  %s8459_s12 = scalar_lea.vmem %s70_s17, 32 }
  0x4b   :  { %p8456_p7 = scmp.ne.s32.totalorder %s70_s17, %s8455_s11  ;;  %p8460_p8 = scmp.lt.s32.totalorder %s70_s17, %s70_s17 }
  0x4c   :  { %p8461_p9 = scmp.lt.s32.totalorder %s8459_s12, %s8455_s11 }
  0x4e   :  { %p8462_p10 = por %p8461_p9, %p8460_p8 }
  0x50   :  { %p8463_p11 = pnand %p8462_p10, %p8456_p7 }
  0x52   :  { %8466 = shalt.err (!%p8463_p11)
}
  0x53   :  { %72 = dma.hbm_to_vmem [thread:$0]  %s10815_s6, 16, %s70_s17, [#allocation12]  }
  0x54   :  { %8467 = dma.done.wait [#allocation7], 5120  }
  0x55   :  { %8468 = vsyncadd [#allocation7], 4294962176 }
  0x56   :  { %8469 = dma.done.wait [#allocation9], 40992  }
  0x57   :  { %8470 = vsyncadd [#allocation9], 4294926304 }
  0x58   :  { %8471 = dma.done.wait [#allocation12], 48  }
  0x59   :  { %8472 = vsyncadd [#allocation12], 4294967248  ;;  %vm90_vm0 = vcmask 257024   ;;  %vm101_vm1 = vcmask 261124   ;;  %v6052_v0 = vld [vmem:[%s10809_s0 + $0x4] sm:$0xf] }
  0x5a   :  { %v7524_v1 = vld [vmem:[%s10809_s0 + $0xc] ss:$0 sps:$4 sm:$0xff]   ;;  %94 = vst.msk [vmem:[#allocation3] sm:$0xf] %vm90_vm0, %v6052_v0  ;;  %v6058_v2 = vld [vmem:[%s10809_s0 + $0x14] sm:$0xf] }
  0x5b   :  { %v7525_v3 = vld [vmem:[%s10809_s0 + $0x1c] ss:$0 sps:$4 sm:$0xff]   ;;  %109 = vst.msk [vmem:[#allocation3] sm:$0xf0] %vm101_vm1, %v7524_v1  ;;  %vm298_vm2 = vcmask 1043456   ;;  %vm359_vm3 = vcmask 261120  }
  0x5c   :  { %115 = vst.msk [vmem:[#allocation3 + $0x8] sm:$0xf] %vm90_vm0, %v6058_v2  ;;  %v7526_v4 = vld [vmem:[%s10809_s0 + $0x8] ss:$0 sps:$4 sm:$0xff]   ;;  %v6057_v5 = vld [vmem:[%s10809_s0 + $0x10] sm:$0xf] }
  0x5d   :  { %129 = vst.msk [vmem:[#allocation3 + $0x8] sm:$0xf0] %vm101_vm1, %v7525_v3  ;;  %v7527_v6 = vld [vmem:[%s10809_s0 + $0x18] ss:$0 sps:$4 sm:$0xff]   ;;  %v6063_v7 = vld [vmem:[%s10809_s0 + $0x20] sm:$0xf] }
  0x5e   :  { %112 = vst.msk [vmem:[#allocation2 + $0x8] sm:$0xf] %vm90_vm0, %v6057_v5  ;;  %132 = vst.msk [vmem:[#allocation2 + $0x10] sm:$0xf] %vm90_vm0, %v6063_v7  ;;  %v7528_v8 = vld [vmem:[%s10809_s0 + $0x28] ss:$0 sps:$4 sm:$0xff]  }
  0x5f   :  { %102 = vst.msk [vmem:[#allocation2] sm:$0xf0] %vm101_vm1, %v7526_v4  ;;  %v6064_v9 = vld [vmem:[%s10809_s0 + $0x24] sm:$0xf]  ;;  %122 = vst.msk [vmem:[#allocation2 + $0x8] sm:$0xf0] %vm101_vm1, %v7527_v6 }
  0x60   :  { %135 = vst.msk [vmem:[#allocation3 + $0x10] sm:$0xf] %vm90_vm0, %v6064_v9  ;;  %v7529_v10 = vld [vmem:[%s10809_s0 + $0x2c] ss:$0 sps:$4 sm:$0xff]   ;;  %v6069_v11 = vld [vmem:[%s10809_s0 + $0x30] sm:$0xf] }
  0x61   :  { %142 = vst.msk [vmem:[#allocation2 + $0x10] sm:$0xf0] %vm101_vm1, %v7528_v8  ;;  %v7530_v12 = vld [vmem:[%s10809_s0 + $0x38] ss:$0 sps:$4 sm:$0xff]   ;;  %v6070_v13 = vld [vmem:[%s10809_s0 + $0x34] sm:$0xf] }
  0x62   :  { %152 = vst.msk [vmem:[#allocation2 + $0x18] sm:$0xf] %vm90_vm0, %v6069_v11  ;;  %155 = vst.msk [vmem:[#allocation3 + $0x18] sm:$0xf] %vm90_vm0, %v6070_v13  ;;  %v7531_v14 = vld [vmem:[%s10809_s0 + $0x3c] ss:$0 sps:$4 sm:$0xff]  }
  0x63   :  { %149 = vst.msk [vmem:[#allocation3 + $0x10] sm:$0xf0] %vm101_vm1, %v7529_v10  ;;  %v6075_v15 = vld [vmem:[%s10809_s0 + $0x40] sm:$0xf]  ;;  %162 = vst.msk [vmem:[#allocation2 + $0x18] sm:$0xf0] %vm101_vm1, %v7530_v12 }
  0x64   :  { %172 = vst.msk [vmem:[#allocation2 + $0x20] sm:$0xf] %vm90_vm0, %v6075_v15  ;;  %v7532_v16 = vld [vmem:[%s10809_s0 + $0x48] ss:$0 sps:$4 sm:$0xff]   ;;  %v6076_v17 = vld [vmem:[%s10809_s0 + $0x44] sm:$0xf] }
  0x65   :  { %v257_v18 = vld [vmem:[#allocation3] sm:$0xff]  ;;  %169 = vst.msk [vmem:[#allocation3 + $0x18] sm:$0xf0] %vm101_vm1, %v7531_v14  ;;  %s8480_s19 = smov 32   ;;  %v258_v20 = vld [vmem:[#allocation3 + $0x8] sm:$0xff]  ;;  %s8481_s29 = smov 96  }
  0x66   :  { %v266_v19 = vld [vmem:[#allocation3] sm:$0xf0]  ;;  %175 = vst.msk [vmem:[#allocation3 + $0x20] sm:$0xf] %vm90_vm0, %v6076_v17  ;;  %276 = vrot.lane.b32.xlu0 %v257_v18, %s8480_s19  ;;  %v7533_v22 = vld [vmem:[%s10809_s0 + $0x4c] ss:$0 sps:$4 sm:$0xff]  }
  0x67   :  { %v330_v21 = vrot.slane %v266_v19, 4  ;;  %182 = vst.msk [vmem:[#allocation2 + $0x20] sm:$0xf0] %vm101_vm1, %v7532_v16  ;;  %v6081_v23 = vld [vmem:[%s10809_s0 + $0x50] sm:$0xf]  ;;  %v331_v24 = vrot.slane %v258_v20, 4 }
  0x68   :  { %v264_v25 = vld [vmem:[#allocation2] sm:$0xf0]  ;;  %192 = vst.msk [vmem:[#allocation2 + $0x28] sm:$0xf] %vm90_vm0, %v6081_v23  ;;  %v8664_v26 = vld [vmem:[#allocation2 + $0x8] sm:$0xff]  ;;  %v8677_v32 = vld [vmem:[#allocation2 + $0x10] sm:$0xff] }
  0x69   :  { %v299_v27 = vrot.slane %v264_v25, 4  ;;  %189 = vst.msk [vmem:[#allocation3 + $0x20] sm:$0xf0] %vm101_vm1, %v7533_v22  ;;  %v7534_v28 = vld [vmem:[%s10809_s0 + $0x58] ss:$0 sps:$4 sm:$0xff]   ;;  %v8674_v30 = vsel %vm298_vm2, %v330_v21, %v331_v24  ;;  %v300_v31 = vrot.slane %v8664_v26, 4  ;;  %6119 = vmatprep.mubr.msk.bf16.mxu0 %vm359_vm3, %v8664_v26  ;;  %6146 = vmatprep.mubr.msk.bf16.mxu1 %vm359_vm3, %v8664_v26 }
  0x6a   :  { %v6082_v29 = vld [vmem:[%s10809_s0 + $0x54] sm:$0xf]  ;;  %v7535_v33 = vld [vmem:[%s10809_s0 + $0x5c] ss:$0 sps:$4 sm:$0xff]   ;;  %345 = vrot.lane.b32.xlu1 %v8674_v30, %s8481_s29  ;;  %v302_v34 = vrot.slane %v8677_v32, 4  ;;  %s8482_s3 = smov 64  }
  0x6b   :  { %195 = vst.msk [vmem:[#allocation3 + $0x28] sm:$0xf] %vm90_vm0, %v6082_v29  ;;  %v259_v35 = vld [vmem:[#allocation3 + $0x10] sm:$0xff]  ;;  %v6087_v36 = vld [vmem:[%s10809_s0 + $0x60] sm:$0xf]  ;;  %v8695_v37 = vsel %vm298_vm2, %v299_v27, %v300_v31  ;;  %v8707_v41 = vld [vmem:[#allocation2 + $0x18] sm:$0xff] }
  0x6c   :  { %202 = vst.msk [vmem:[#allocation2 + $0x28] sm:$0xf0] %vm101_vm1, %v7534_v28  ;;  %v333_v38 = vrot.slane %v259_v35, 4  ;;  %209 = vst.msk [vmem:[#allocation3 + $0x28] sm:$0xf0] %vm101_vm1, %v7535_v33  ;;  %314 = vrot.lane.b32.xlu0 %v8695_v37, %s8482_s3  ;;  %v8714_v43 = vsel %vm298_vm2, %v300_v31, %v302_v34  ;;  %v260_v44 = vld [vmem:[#allocation3 + $0x18] sm:$0xff] }
  0x6d   :  { %212 = vst.msk [vmem:[#allocation2 + $0x30] sm:$0xf] %vm90_vm0, %v6087_v36  ;;  %v7536_v39 = vld [vmem:[%s10809_s0 + $0x68] ss:$0 sps:$4 sm:$0xff]   ;;  %v6088_v40 = vld [vmem:[%s10809_s0 + $0x64] sm:$0xf] }
  0x6e   :  { %215 = vst.msk [vmem:[#allocation3 + $0x30] sm:$0xf] %vm90_vm0, %v6088_v40  ;;  %v7537_v42 = vld [vmem:[%s10809_s0 + $0x6c] ss:$0 sps:$4 sm:$0xff]   ;;  %v6093_v45 = vld [vmem:[%s10809_s0 + $0x70] sm:$0xf]  ;;  %278 = vrot.lane.b32.xlu1 %v258_v20, %s8480_s19  ;;  %v8732_v49 = vsel %vm298_vm2, %v331_v24, %v333_v38 }
  0x6f   :  { %222 = vst.msk [vmem:[#allocation2 + $0x30] sm:$0xf0] %vm101_vm1, %v7536_v39  ;;  %v6094_v46 = vld [vmem:[%s10809_s0 + $0x74] sm:$0xf]  ;;  %229 = vst.msk [vmem:[#allocation3 + $0x30] sm:$0xf0] %vm101_vm1, %v7537_v42 }
  0x70   :  { %232 = vst.msk [vmem:[#allocation2 + $0x38] sm:$0xf] %vm90_vm0, %v6093_v45  ;;  %235 = vst.msk [vmem:[#allocation3 + $0x38] sm:$0xf] %vm90_vm0, %v6094_v46  ;;  %v8727_v47 = vld [vmem:[#allocation6 + $0x4] ss:$8 sps:$4 sm:$0xff]   ;;  %316 = vrot.lane.b32.xlu0 %v8714_v43, %s8482_s3 }
  0x71   :  { %v8729_v48 = vld [vmem:[#allocation6] ss:$8 sps:$4 sm:$0xff]   ;;  %v304_v50 = vrot.slane %v8707_v41, 4  ;;  %553 = vmatprep.subr.bf16.mxu0 %v8727_v47  ;;  %v8738_v51 = vld [vmem:[#allocation6 + $0xa4] ss:$8 sps:$4 sm:$0xff]   ;;  %v335_v53 = vrot.slane %v260_v44, 4 }
  0x72   :  { %v8740_v52 = vld [vmem:[#allocation6 + $0xa0] ss:$8 sps:$4 sm:$0xff]   ;;  %554 = vmatpush1.bf16.msra.mxu0 %v8729_v48  ;;  %v8743_v54 = vld [vmem:[#allocation6 + $0x14] ss:$8 sps:$4 sm:$0xff]   ;;  %347 = vrot.lane.b32.xlu1 %v8732_v49, %s8481_s29  ;;  %v8750_v56 = vld [vmem:[#allocation6 + $0x10] ss:$8 sps:$4 sm:$0xff]  }
  0x73   :  { %v8747_v55 = vld [vmem:[#allocation2 + $0x20] sm:$0xff]  ;;  %777 = vmatprep.subr.bf16.mxu1 %v8738_v51  ;;  %v8753_v57 = vsel %vm298_vm2, %v302_v34, %v304_v50  ;;  %555 = vmatprep.subr.bf16.mxu0 %v8743_v54  ;;  %v8757_v58 = vld [vmem:[#allocation6 + $0xb4] ss:$8 sps:$4 sm:$0xff]   ;;  %v8759_v59 = vld [vmem:[#allocation6 + $0xb0] ss:$8 sps:$4 sm:$0xff]   ;;  %v8763_v61 = vsel %vm298_vm2, %v333_v38, %v335_v53  ;;  %vm381_vm4 = vcmask 523264  }
  0x74   :  { %778 = vmatpush1.bf16.msra.mxu1 %v8740_v52  ;;  %280 = vrot.lane.b32.xlu0 %v259_v35, %s8480_s19  ;;  %v261_v60 = vld [vmem:[#allocation3 + $0x20] sm:$0xff]  ;;  %v306_v62 = vrot.slane %v8747_v55, 4  ;;  %v8770_v63 = vld [vmem:[#allocation2 + $0x28] sm:$0xff]  ;;  %v8789_v7 = vld [vmem:[#allocation6 + $0x34] ss:$8 sps:$4 sm:$0xff]   ;;  %vm396_vm5 = vcmask 785408  }
  0x75   :  { %779 = vmatprep.subr.bf16.mxu1 %v8757_v58  ;;  %v8772_v0 = vld [vmem:[#allocation6 + $0x24] ss:$8 sps:$4 sm:$0xff]   ;;  %v337_v1 = vrot.slane %v261_v60, 4  ;;  %v8775_v2 = vld [vmem:[#allocation6 + $0x20] ss:$8 sps:$4 sm:$0xff]   ;;  %v308_v12 = vrot.slane %v8770_v63, 4 }
  0x76   :  { %556 = vmatpush1.bf16.msra.mxu0 %v8750_v56  ;;  %318 = vrot.lane.b32.xlu1 %v8753_v57, %s8482_s3  ;;  %v8777_v3 = vld [vmem:[#allocation6 + $0xc4] ss:$8 sps:$4 sm:$0xff]   ;;  %v8782_v5 = vld [vmem:[#allocation6 + $0xc0] ss:$8 sps:$4 sm:$0xff]   ;;  %v8785_v6 = vsel %vm298_vm2, %v304_v50, %v306_v62  ;;  %v8791_v8 = vld [vmem:[#allocation6 + $0x30] ss:$8 sps:$4 sm:$0xff]  }
  0x77   :  { %v262_v4 = vld [vmem:[#allocation3 + $0x28] sm:$0xff]  ;;  %557 = vmatprep.subr.bf16.mxu0 %v8772_v0  ;;  %v8794_v9 = vld [vmem:[#allocation6 + $0xd4] ss:$8 sps:$4 sm:$0xff]   ;;  %v8796_v10 = vld [vmem:[#allocation6 + $0xd0] ss:$8 sps:$4 sm:$0xff]   ;;  %v8799_v11 = vsel %vm298_vm2, %v335_v53, %v337_v1  ;;  %v8822_v20 = vsel %vm298_vm2, %v306_v62, %v308_v12  ;;  %vm6031_vm6 = vcmask 80896  }
  0x78   :  { %780 = vmatpush1.bf16.msra.mxu1 %v8759_v59  ;;  %349 = vrot.lane.b32.xlu0 %v8763_v61, %s8481_s29  ;;  %v8804_v13 = vld [vmem:[#allocation6 + $0x44] ss:$8 sps:$4 sm:$0xff]   ;;  %v8808_v14 = vld [vmem:[#allocation2 + $0x30] sm:$0xff]  ;;  %v339_v15 = vrot.slane %v262_v4, 4  ;;  %v8812_v16 = vld [vmem:[#allocation6 + $0x40] ss:$8 sps:$4 sm:$0xff]  }
  0x79   :  { %781 = vmatprep.subr.bf16.mxu1 %v8777_v3  ;;  %v8814_v17 = vld [vmem:[#allocation6 + $0xe4] ss:$8 sps:$4 sm:$0xff]   ;;  %v263_v18 = vld [vmem:[#allocation3 + $0x30] sm:$0xff]  ;;  %v8825_v21 = vld [vmem:[#allocation6 + $0xe0] ss:$8 sps:$4 sm:$0xff]   ;;  %v310_v24 = vrot.slane %v8808_v14, 4 }
  0x7a   :  { %558 = vmatpush1.bf16.msra.mxu0 %v8775_v2  ;;  %282 = vrot.lane.b32.xlu1 %v260_v44, %s8480_s19  ;;  %v8819_v19 = vld [vmem:[#allocation6 + $0x54] ss:$8 sps:$4 sm:$0xff]   ;;  %v8832_v23 = vsel %vm298_vm2, %v337_v1, %v339_v15  ;;  %v8836_v25 = vld [vmem:[#allocation6 + $0x50] ss:$8 sps:$4 sm:$0xff]   ;;  %v8841_v28 = vld [vmem:[#allocation6 + $0x64] ss:$8 sps:$4 sm:$0xff]  }
  0x7b   :  { %559 = vmatprep.subr.bf16.mxu0 %v8789_v7  ;;  %v8829_v22 = vld [vmem:[#allocation6 + $0xf4] ss:$8 sps:$4 sm:$0xff]   ;;  %v265_v27 = vld [vmem:[#allocation2 + $0x38] sm:$0xf]  ;;  %v341_v29 = vrot.slane %v263_v18, 4  ;;  %v8854_v36 = vsel %vm298_vm2, %v308_v12, %v310_v24 }
  0x7c   :  { %782 = vmatpush1.bf16.msra.mxu1 %v8782_v5  ;;  %320 = vrot.lane.b32.xlu0 %v8785_v6, %s8482_s3  ;;  %v8844_v31 = vld [vmem:[#allocation6 + $0xf0] ss:$8 sps:$4 sm:$0xff]   ;;  %v8849_v34 = vld [vmem:[#allocation6 + $0x60] ss:$8 sps:$4 sm:$0xff]   ;;  %v8851_v35 = vld [vmem:[#allocation6 + $0x104] ss:$8 sps:$4 sm:$0xff]  }
  0x7d   :  { %783 = vmatprep.subr.bf16.mxu1 %v8794_v9  ;;  %v267_v33 = vld [vmem:[#allocation3 + $0x38] sm:$0xf]  ;;  %v8857_v38 = vld [vmem:[#allocation6 + $0x100] ss:$8 sps:$4 sm:$0xff]   ;;  %v8864_v40 = vld [vmem:[#allocation6 + $0x74] ss:$8 sps:$4 sm:$0xff]   ;;  %v342_v42 = vsel %vm298_vm2, %v339_v15, %v341_v29 }
  0x7e   :  { %560 = vmatpush1.bf16.msra.mxu0 %v8791_v8  ;;  %351 = vrot.lane.b32.xlu1 %v8799_v11, %s8481_s29  ;;  %v7585_v39 = vld [vmem:[%s10809_s0 + $0x78] ss:$0 sps:$4 sm:$0xff]   ;;  %v312_v44 = vrot.slane %v265_v27, 4  ;;  %v671_v45 = vld [vmem:[#allocation6 + $0x110] sm:$0xff]  ;;  %v89_v53 = vld [vmem:[%s10809_s0] sm:$0xf] }
  0x7f   :  { %561 = vmatprep.subr.bf16.mxu0 %v8804_v13  ;;  %242 = vst.msk [vmem:[#allocation2 + $0x38] sm:$0xf0] %vm101_vm1, %v7585_v39  ;;  %v672_v46 = vld [vmem:[#allocation6 + $0x118] sm:$0xff]  ;;  %v8883_v1 = vld [vmem:[#allocation6 + $0x84] ss:$8 sps:$4 sm:$0xff]  }
  0x80   :  { %784 = vmatpush1.bf16.msra.mxu1 %v8796_v10  ;;  %284 = vrot.lane.b32.xlu0 %v261_v60, %s8480_s19  ;;  %v8872_v50 = vld [vmem:[#allocation6 + $0x114] ss:$8 sps:$4 sm:$0xff]   ;;  %v343_v60 = vrot.slane %v267_v33, 4  ;;  %v8878_v62 = vld [vmem:[#allocation6 + $0x70] ss:$8 sps:$4 sm:$0xff]   ;;  %v8887_v12 = vcombine.low %v671_v45, %v672_v46 }
  0x81   :  { %785 = vmatprep.subr.bf16.mxu1 %v8814_v17  ;;  %91 = vst.msk [vmem:[#allocation2] sm:$0xf] %vm90_vm0, %v89_v53  ;;  %v8889_v15 = vld [vmem:[#allocation6 + $0x80] ss:$8 sps:$4 sm:$0xff]   ;;  %v8891_v27 = vld [vmem:[#allocation6 + $0x124] ss:$8 sps:$4 sm:$0xff]  }
  0x82   :  { %562 = vmatpush1.bf16.msra.mxu0 %v8812_v16  ;;  %322 = vrot.lane.b32.xlu1 %v8822_v20, %s8482_s3  ;;  %v344_v33 = vsel %vm298_vm2, %v341_v29, %v343_v60  ;;  %v8897_v39 = vld [vmem:[#allocation6 + $0x120] ss:$8 sps:$4 sm:$0xff]   ;;  %v8911_v29 = vld [vmem:[#allocation6 + $0x130] ss:$8 sps:$4 sm:$0xff]  }
  0x83   :  { %563 = vmatprep.subr.bf16.mxu0 %v8819_v19 }
  0x84   :  { %786 = vmatpush1.bf16.msra.mxu1 %v8825_v21  ;;  %353 = vrot.lane.b32.xlu0 %v8832_v23, %s8481_s29 }
  0x85   :  { %787 = vmatprep.subr.bf16.mxu1 %v8829_v22 }
  0x86   :  { %564 = vmatpush1.bf16.msra.mxu0 %v8836_v25  ;;  %286 = vrot.lane.b32.xlu1 %v262_v4, %s8480_s19  ;;  %v313_v4 = vsel %vm298_vm2, %v310_v24, %v312_v44  ;;  %v8901_v24 = vld [vmem:[#allocation6 + $0x94] ss:$8 sps:$4 sm:$0xff]   ;;  %v8904_v44 = vld [vmem:[#allocation6 + $0x90] ss:$8 sps:$4 sm:$0xff]  }
  0x87   :  { %565 = vmatprep.subr.bf16.mxu0 %v8841_v28 }
  0x88   :  { %788 = vmatpush1.bf16.msra.mxu1 %v8844_v31  ;;  %324 = vrot.lane.b32.xlu0 %v8854_v36, %s8482_s3 }
  0x89   :  { %789 = vmatprep.subr.bf16.mxu1 %v8851_v35 }
  0x8a   :  { %566 = vmatpush1.bf16.msra.mxu0 %v8849_v34  ;;  %355 = vrot.lane.b32.xlu1 %v342_v42, %s8481_s29 }
  0x8b   :  { %567 = vmatprep.subr.bf16.mxu0 %v8864_v40 }
  0x8c   :  { %790 = vmatpush1.bf16.msra.mxu1 %v8857_v38  ;;  %288 = vrot.lane.b32.xlu0 %v263_v18, %s8480_s19  ;;  %v8908_v18 = vld [vmem:[#allocation6 + $0x134] ss:$8 sps:$4 sm:$0xff]  }
  0x8d   :  { %791 = vmatprep.subr.bf16.mxu1 %v8872_v50 }
  0x8e   :  { %568 = vmatpush1.bf16.msra.mxu0 %v8878_v62  ;;  %326 = vrot.lane.b32.xlu1 %v313_v4, %s8482_s3 }
  0x8f   :  { %569 = vmatprep.subr.bf16.mxu0 %v8883_v1 }
  0x90   :  { %792 = vmatpush1.bf16.msra.mxu1 %v8887_v12  ;;  %357 = vrot.lane.b32.xlu0 %v344_v33, %s8481_s29 }
  0x91   :  { %793 = vmatprep.subr.bf16.mxu1 %v8891_v27 }
  0x92   :  { %570 = vmatpush1.bf16.msra.mxu0 %v8889_v15  ;;  %909 = vrot.lane.b32.xlu1 %v8695_v37, %s8480_s19  ;;  %v7598_v37 = vld [vmem:[%s10809_s0 + $0x7c] ss:$0 sps:$4 sm:$0xff]  }
  0x93   :  { %571 = vmatprep.subr.bf16.mxu0 %v8901_v24  ;;  %249 = vst.msk [vmem:[#allocation3 + $0x38] sm:$0xf0] %vm101_vm1, %v7598_v37 }
  0x94   :  { %794 = vmatpush1.bf16.msra.mxu1 %v8897_v39  ;;  %923 = vrot.lane.b32.xlu0 %v8674_v30, %s8482_s3  ;;  %v8955_v30 = vld [vmem:[#allocation2 + $0x38] sm:$0xff] }
  0x95   :  { %795 = vmatprep.subr.bf16.mxu1 %v8908_v18 }
  0x96   :  { %572 = vmatpush1.bf16.msra.mxu0 %v8904_v44  ;;  %938 = vrot.lane.b32.xlu1 %v8664_v26, %s8481_s29 }
  0x97   :  { %1023 = vmatprep.subr.bf16.mxu0 %v8727_v47 }
  0x98   :  { %796 = vmatpush1.bf16.msra.mxu1 %v8911_v29  ;;  %911 = vrot.lane.b32.xlu0 %v8714_v43, %s8480_s19  ;;  %v250_v43 = vld [vmem:[#allocation2] sm:$0xff] }
  0x99   :  { %1154 = vmatprep.subr.bf16.mxu1 %v8738_v51 }
  0x9a   :  { %925 = vrot.lane.b32.xlu1 %v8732_v49, %s8482_s3 }
  0x9c   :  { %940 = vrot.lane.b32.xlu0 %v8677_v32, %s8481_s29 }
  0x9e   :  { %913 = vrot.lane.b32.xlu1 %v8753_v57, %s8480_s19 }
  0xa0   :  { %927 = vrot.lane.b32.xlu0 %v8763_v61, %s8482_s3 }
  0xa2   :  { %942 = vrot.lane.b32.xlu1 %v8707_v41, %s8481_s29 }
  0xa4   :  { %915 = vrot.lane.b32.xlu0 %v8785_v6, %s8480_s19 }
  0xa6   :  { %929 = vrot.lane.b32.xlu1 %v8799_v11, %s8482_s3 }
  0xa8   :  { %944 = vrot.lane.b32.xlu0 %v8747_v55, %s8481_s29 }
  0xaa   :  { %917 = vrot.lane.b32.xlu1 %v8822_v20, %s8480_s19 }
  0xac   :  { %931 = vrot.lane.b32.xlu0 %v8832_v23, %s8482_s3 }
  0xae   :  { %946 = vrot.lane.b32.xlu1 %v8770_v63, %s8481_s29 }
  0xb0   :  { %919 = vrot.lane.b32.xlu0 %v8854_v36, %s8480_s19 }
  0xb2   :  { %933 = vrot.lane.b32.xlu1 %v342_v42, %s8482_s3 }
  0xb4   :  { %948 = vrot.lane.b32.xlu0 %v8808_v14, %s8481_s29 }
  0xb6   :  { %921 = vrot.lane.b32.xlu1 %v313_v4, %s8480_s19  ;;  %v8089_v4 = vld [vmem:[#allocation3 + $0x8] sm:$0xff] }
  0xb8   :  { %935 = vrot.lane.b32.xlu0 %v344_v33, %s8482_s3 }
  0xba   :  { %950 = vrot.lane.b32.xlu1 %v8955_v30, %s8481_s29 }
  0xd8   :  { %v277_v41 = vpop.permute.xlu0 %276 }
  0xd9   :  { %v362_v49 = vsel %vm359_vm3, %v250_v43, %v277_v41 }
  0xdc   :  { %v346_v47 = vpop.permute.xlu1 %345 }
  0xde   :  { %v315_v51 = vpop.permute.xlu0 %314 }
  0xdf   :  { %v383_v55 = vsel %vm381_vm4, %v362_v49, %v315_v51 }
  0xe0   :  { %v279_v57 = vpop.permute.xlu1 %278  ;;  %v398_v61 = vsel %vm396_vm5, %v383_v55, %v346_v47  ;;  %v8091_v47 = vld [vmem:[#allocation3 + $0x18] sm:$0xff] }
  0xe1   :  { %586 = vmatmul.mubr.bf16.vlgmr.msra.gmra.mrb[0].mxu0 %v398_v61  ;;  %810 = vmatmul.mubr.bf16.vlgmr.msra.gmra.mrb[0].mxu1 %v398_v61  ;;  %v365_v63 = vsel %vm359_vm3, %v8664_v26, %v279_v57 }
  0xe2   :  { %1024 = vmatpush1.bf16.msra.mxu0 %v8729_v48  ;;  %1155 = vmatpush1.bf16.msra.mxu1 %v8740_v52  ;;  %v317_v6 = vpop.permute.xlu0 %316 }
  0xe3   :  { %1025 = vmatprep.subr.bf16.mxu0 %v8743_v54  ;;  %6120 = vmatprep.mubr.msk.bf16.mxu0 %vm359_vm3, %v8677_v32  ;;  %v385_v14 = vsel %vm381_vm4, %v365_v63, %v317_v6  ;;  %v8083_v54 = vld [vmem:[#allocation2 + $0x10] sm:$0xff]  ;;  %v8092_v6 = vld [vmem:[#allocation3 + $0x20] sm:$0xff] }
  0xe4   :  { %v348_v11 = vpop.permute.xlu1 %347  ;;  %6147 = vmatprep.mubr.msk.bf16.mxu1 %vm359_vm3, %v8677_v32  ;;  %1156 = vmatprep.subr.bf16.mxu1 %v8757_v58 }
  0xe5   :  { %v401_v48 = vsel %vm396_vm5, %v385_v14, %v348_v11 }
  0xe6   :  { %1026 = vmatpush1.bf16.msra.mxu0 %v8750_v56  ;;  %1157 = vmatpush1.bf16.msra.mxu1 %v8759_v59  ;;  %v281_v26 = vpop.permute.xlu0 %280  ;;  %v8084_v56 = vld [vmem:[#allocation2 + $0x18] sm:$0xff] }
  0xe7   :  { %1027 = vmatprep.subr.bf16.mxu0 %v8772_v0  ;;  %1158 = vmatprep.subr.bf16.mxu1 %v8777_v3  ;;  %v368_v32 = vsel %vm359_vm3, %v8083_v54, %v281_v26 }
  0xe8   :  { %v319_v52 = vpop.permute.xlu1 %318 }
  0xe9   :  { %596 = vmatmul.mubr.bf16.gmra.mrb[4].mxu0 %v401_v48  ;;  %820 = vmatmul.mubr.bf16.gmra.mrb[4].mxu1 %v401_v48  ;;  %v387_v58 = vsel %vm381_vm4, %v368_v32, %v319_v52  ;;  %v8093_v32 = vld [vmem:[#allocation3 + $0x28] sm:$0xff] }
  0xea   :  { %1028 = vmatpush1.bf16.msra.mxu0 %v8775_v2  ;;  %1159 = vmatpush1.bf16.msra.mxu1 %v8782_v5  ;;  %v350_v59 = vpop.permute.xlu0 %349 }
  0xeb   :  { %6121 = vmatprep.mubr.msk.bf16.mxu0 %vm359_vm3, %v8084_v56  ;;  %6148 = vmatprep.mubr.msk.bf16.mxu1 %vm359_vm3, %v8084_v56  ;;  %v404_v2 = vsel %vm396_vm5, %v387_v58, %v350_v59 }
  0xec   :  { %1029 = vmatprep.subr.bf16.mxu0 %v8789_v7  ;;  %1160 = vmatprep.subr.bf16.mxu1 %v8794_v9  ;;  %v283_v0 = vpop.permute.xlu1 %282  ;;  %v8085_v7 = vld [vmem:[#allocation2 + $0x20] sm:$0xff] }
  0xed   :  { %v371_v5 = vsel %vm359_vm3, %v8084_v56, %v283_v0 }
  0xee   :  { %1030 = vmatpush1.bf16.msra.mxu0 %v8791_v8  ;;  %1161 = vmatpush1.bf16.msra.mxu1 %v8796_v10  ;;  %v321_v3 = vpop.permute.xlu0 %320 }
  0xef   :  { %1031 = vmatprep.subr.bf16.mxu0 %v8804_v13  ;;  %1162 = vmatprep.subr.bf16.mxu1 %v8814_v17  ;;  %v389_v8 = vsel %vm381_vm4, %v371_v5, %v321_v3  ;;  %v8094_v5 = vld [vmem:[#allocation3 + $0x30] sm:$0xff] }
  0xf0   :  { %v352_v9 = vpop.permute.xlu1 %351 }
  0xf1   :  { %606 = vmatmul.mubr.bf16.gmra.mrb[8].mxu0 %v404_v2  ;;  %830 = vmatmul.mubr.bf16.gmra.mrb[8].mxu1 %v404_v2  ;;  %v407_v17 = vsel %vm396_vm5, %v389_v8, %v352_v9  ;;  %v7604_v9 = vld [vmem:[#allocation10 + $0x604] ss:$8 sps:$4 sm:$0xff]  }
  0xf2   :  { %6122 = vmatprep.mubr.msk.bf16.mxu0 %vm359_vm3, %v8085_v7  ;;  %6149 = vmatprep.mubr.msk.bf16.mxu1 %vm359_vm3, %v8085_v7  ;;  %v285_v10 = vpop.permute.xlu0 %284 }
  0xf3   :  { %1032 = vmatpush1.bf16.msra.mxu0 %v8812_v16  ;;  %1163 = vmatpush1.bf16.msra.mxu1 %v8825_v21  ;;  %v374_v16 = vsel %vm359_vm3, %v8085_v7, %v285_v10  ;;  %v7601_v7 = vld [vmem:[#allocation10 + $0x104] ss:$8 sps:$4 sm:$0xff]  }
  0xf4   :  { %1033 = vmatprep.subr.bf16.mxu0 %v8819_v19  ;;  %1164 = vmatprep.subr.bf16.mxu1 %v8829_v22  ;;  %v323_v13 = vpop.permute.xlu1 %322  ;;  %v8086_v19 = vld [vmem:[#allocation2 + $0x28] sm:$0xff] }
  0xf5   :  { %v391_v20 = vsel %vm381_vm4, %v374_v16, %v323_v13  ;;  %v7599_v13 = vld [vmem:[#allocation10 + $0x100] ss:$8 sps:$4 sm:$0xff]  }
  0xf6   :  { %v354_v21 = vpop.permute.xlu0 %353 }
  0xf7   :  { %1034 = vmatpush1.bf16.msra.mxu0 %v8836_v25  ;;  %1165 = vmatpush1.bf16.msra.mxu1 %v8844_v31  ;;  %v410_v23 = vsel %vm396_vm5, %v391_v20, %v354_v21  ;;  %v8087_v31 = vld [vmem:[#allocation2 + $0x30] sm:$0xff] }
  0xf8   :  { %1035 = vmatprep.subr.bf16.mxu0 %v8841_v28  ;;  %1166 = vmatprep.subr.bf16.mxu1 %v8851_v35  ;;  %v287_v22 = vpop.permute.xlu1 %286  ;;  %v7607_v20 = vld [vmem:[#allocation10 + $0x114] ss:$8 sps:$4 sm:$0xff]  }
  0xf9   :  { %616 = vmatmul.mubr.bf16.gmra.mrb[12].mxu0 %v407_v17  ;;  %840 = vmatmul.mubr.bf16.gmra.mrb[12].mxu1 %v407_v17  ;;  %v377_v28 = vsel %vm359_vm3, %v8086_v19, %v287_v22  ;;  %v7602_v17 = vld [vmem:[#allocation10 + $0x600] ss:$8 sps:$4 sm:$0xff]   ;;  %v7610_v21 = vld [vmem:[#allocation10 + $0x614] ss:$8 sps:$4 sm:$0xff]  }
  0xfa   :  { %6123 = vmatprep.mubr.msk.bf16.mxu0 %vm359_vm3, %v8086_v19  ;;  %6150 = vmatprep.mubr.msk.bf16.mxu1 %vm359_vm3, %v8086_v19  ;;  %v325_v25 = vpop.permute.xlu0 %324  ;;  %v908_v22 = vld [vmem:[#allocation3 + $0x38] sm:$0xff] }
  0xfb   :  { %1036 = vmatpush1.bf16.msra.mxu0 %v8849_v34  ;;  %1167 = vmatpush1.bf16.msra.mxu1 %v8857_v38  ;;  %v393_v35 = vsel %vm381_vm4, %v377_v28, %v325_v25  ;;  %v7608_v25 = vld [vmem:[#allocation10 + $0x610] ss:$8 sps:$4 sm:$0xff]  }
  0xfc   :  { %1037 = vmatprep.subr.bf16.mxu0 %v8864_v40  ;;  %1168 = vmatprep.subr.bf16.mxu1 %v8872_v50  ;;  %v356_v34 = vpop.permute.xlu1 %355 }
  0xfd   :  { %v413_v40 = vsel %vm396_vm5, %v393_v35, %v356_v34  ;;  %v7613_v34 = vld [vmem:[#allocation10 + $0x124] ss:$8 sps:$4 sm:$0xff]  }
  0xfe   :  { %v289_v36 = vpop.permute.xlu0 %288  ;;  %v7616_v35 = vld [vmem:[#allocation10 + $0x624] ss:$8 sps:$4 sm:$0xff]  }
  0xff   :  { %1038 = vmatpush1.bf16.msra.mxu0 %v8878_v62  ;;  %1169 = vmatpush1.bf16.msra.mxu1 %v8887_v12  ;;  %v380_v42 = vsel %vm359_vm3, %v8087_v31, %v289_v36  ;;  %v8088_v62 = vld [vmem:[#allocation3] sm:$0xff] }
 0x100   :  { %1039 = vmatprep.subr.bf16.mxu0 %v8883_v1  ;;  %1170 = vmatprep.subr.bf16.mxu1 %v8891_v27  ;;  %v327_v38 = vpop.permute.xlu1 %326 }
 0x101   :  { %626 = vmatmul.mubr.bf16.gmra.mrb[16].mxu0 %v410_v23  ;;  %850 = vmatmul.mubr.bf16.gmra.mrb[16].mxu1 %v410_v23  ;;  %v395_v45 = vsel %vm381_vm4, %v380_v42, %v327_v38  ;;  %v7605_v23 = vld [vmem:[#allocation10 + $0x110] ss:$8 sps:$4 sm:$0xff]   ;;  %v7614_v42 = vld [vmem:[#allocation10 + $0x620] ss:$8 sps:$4 sm:$0xff]  }
 0x102   :  { %6124 = vmatprep.mubr.msk.bf16.mxu0 %vm359_vm3, %v8087_v31  ;;  %6151 = vmatprep.mubr.msk.bf16.mxu1 %vm359_vm3, %v8087_v31  ;;  %v358_v46 = vpop.permute.xlu0 %357 }
 0x103   :  { %1040 = vmatpush1.bf16.msra.mxu0 %v8889_v15  ;;  %1171 = vmatpush1.bf16.msra.mxu1 %v8897_v39  ;;  %v416_v53 = vsel %vm396_vm5, %v395_v45, %v358_v46  ;;  %v7619_v46 = vld [vmem:[#allocation10 + $0x134] ss:$8 sps:$4 sm:$0xff]  }
 0x104   :  { %1041 = vmatprep.subr.bf16.mxu0 %v8901_v24  ;;  %1172 = vmatprep.subr.bf16.mxu1 %v8908_v18  ;;  %v910_v50 = vpop.permute.xlu1 %909 }
 0x105   :  { %v954_v1 = vsel %vm359_vm3, %v8088_v62, %v910_v50  ;;  %v7622_v50 = vld [vmem:[#allocation10 + $0x634] ss:$8 sps:$4 sm:$0xff]   ;;  %v7625_v62 = vld [vmem:[#allocation10 + $0x144] ss:$8 sps:$4 sm:$0xff]  }
 0x106   :  { %v924_v60 = vpop.permute.xlu0 %923 }
 0x107   :  { %1042 = vmatpush1.bf16.msra.mxu0 %v8904_v44  ;;  %1173 = vmatpush1.bf16.msra.mxu1 %v8911_v29  ;;  %v974_v15 = vsel %vm381_vm4, %v954_v1, %v924_v60  ;;  %v8090_v44 = vld [vmem:[#allocation3 + $0x10] sm:$0xff] }
 0x108   :  { %v939_v12 = vpop.permute.xlu1 %938  ;;  %1768 = vmatprep.subr.bf16.mxu0 %v7601_v7  ;;  %3242 = vmatprep.subr.bf16.mxu1 %v7604_v9  ;;  %v7620_v60 = vld [vmem:[#allocation10 + $0x630] ss:$8 sps:$4 sm:$0xff]   ;;  %v7628_v1 = vld [vmem:[#allocation10 + $0x644] ss:$8 sps:$4 sm:$0xff]   ;;  %v7682_v9 = vld [vmem:[#allocation10 + $0x6d4] ss:$8 sps:$4 sm:$0xff]  }
 0x109   :  { %636 = vmatmul.mubr.bf16.gmra.mrb[20].mxu0 %v413_v40  ;;  %860 = vmatmul.mubr.bf16.gmra.mrb[20].mxu1 %v413_v40  ;;  %v988_v39 = vsel %vm396_vm5, %v974_v15, %v939_v12  ;;  %v7611_v40 = vld [vmem:[#allocation10 + $0x120] ss:$8 sps:$4 sm:$0xff]   ;;  %v7631_v15 = vld [vmem:[#allocation10 + $0x154] ss:$8 sps:$4 sm:$0xff]   ;;  %v7680_v7 = vld [vmem:[#allocation10 + $0x6d0] ss:$8 sps:$4 sm:$0xff]  }
 0x10a   :  { %6125 = vmatprep.mubr.msk.bf16.mxu0 %vm359_vm3, %v8955_v30  ;;  %6152 = vmatprep.mubr.msk.bf16.mxu1 %vm359_vm3, %v8955_v30  ;;  %v912_v27 = vpop.permute.xlu0 %911  ;;  %v7626_v12 = vld [vmem:[#allocation10 + $0x640] ss:$8 sps:$4 sm:$0xff]  }
 0x10b   :  { %v957_v24 = vsel %vm359_vm3, %v8089_v4, %v912_v27  ;;  %v7634_v27 = vld [vmem:[#allocation10 + $0x654] ss:$8 sps:$4 sm:$0xff]  }
 0x10c   :  { %v926_v33 = vpop.permute.xlu1 %925 }
 0x10d   :  { %v976_v18 = vsel %vm381_vm4, %v957_v24, %v926_v33  ;;  %v7629_v33 = vld [vmem:[#allocation10 + $0x150] ss:$8 sps:$4 sm:$0xff]   ;;  %v7637_v24 = vld [vmem:[#allocation10 + $0x164] ss:$8 sps:$4 sm:$0xff]  }
 0x10e   :  { %v941_v29 = vpop.permute.xlu0 %940 }
 0x10f   :  { %v991_v37 = vsel %vm396_vm5, %v976_v18, %v941_v29  ;;  %v7635_v18 = vld [vmem:[#allocation10 + $0x160] ss:$8 sps:$4 sm:$0xff]  }
 0x110   :  { %v914_v30 = vpop.permute.xlu1 %913  ;;  %v7638_v29 = vld [vmem:[#allocation10 + $0x660] ss:$8 sps:$4 sm:$0xff]  }
 0x111   :  { %646 = vmatmul.mubr.bf16.gmra.mrb[24].mxu0 %v416_v53  ;;  %870 = vmatmul.mubr.bf16.gmra.mrb[24].mxu1 %v416_v53  ;;  %v960_v43 = vsel %vm359_vm3, %v8090_v44, %v914_v30  ;;  %v7617_v53 = vld [vmem:[#allocation10 + $0x130] ss:$8 sps:$4 sm:$0xff]   ;;  %v7643_v30 = vld [vmem:[#allocation10 + $0x174] ss:$8 sps:$4 sm:$0xff]  }
 0x112   :  { %6153 = vmatprep.mubr.msk.bf16.mxu0 %vm359_vm3, %v8089_v4  ;;  %6160 = vmatprep.mubr.msk.bf16.mxu1 %vm359_vm3, %v8089_v4  ;;  %v928_v41 = vpop.permute.xlu0 %927  ;;  %v7623_v4 = vld [vmem:[#allocation10 + $0x140] ss:$8 sps:$4 sm:$0xff]  }
 0x113   :  { %v978_v49 = vsel %vm381_vm4, %v960_v43, %v928_v41  ;;  %v7641_v41 = vld [vmem:[#allocation10 + $0x170] ss:$8 sps:$4 sm:$0xff]  }
 0x114   :  { %v943_v51 = vpop.permute.xlu1 %942  ;;  %v7644_v43 = vld [vmem:[#allocation10 + $0x670] ss:$8 sps:$4 sm:$0xff]  }
 0x115   :  { %v994_v57 = vsel %vm396_vm5, %v978_v49, %v943_v51  ;;  %v7652_v49 = vld [vmem:[#allocation10 + $0x684] ss:$8 sps:$4 sm:$0xff]   ;;  %v7647_v51 = vld [vmem:[#allocation10 + $0x180] ss:$8 sps:$4 sm:$0xff]  }
 0x116   :  { %v916_v55 = vpop.permute.xlu0 %915 }
 0x117   :  { %v963_v63 = vsel %vm359_vm3, %v8091_v47, %v916_v55  ;;  %v7650_v55 = vld [vmem:[#allocation10 + $0x680] ss:$8 sps:$4 sm:$0xff]  }
 0x118   :  { %v930_v61 = vpop.permute.xlu1 %929 }
 0x119   :  { %1056 = vmatmul.mubr.bf16.vlgmr.msra.gmra.mrb[28].mxu0 %v988_v39  ;;  %1187 = vmatmul.mubr.bf16.vlgmr.msra.gmra.mrb[28].mxu1 %v988_v39  ;;  %v980_v11 = vsel %vm381_vm4, %v963_v63, %v930_v61  ;;  %v7632_v39 = vld [vmem:[#allocation10 + $0x650] ss:$8 sps:$4 sm:$0xff]   ;;  %v7658_v61 = vld [vmem:[#allocation10 + $0x694] ss:$8 sps:$4 sm:$0xff]  }
 0x11a   :  { %6154 = vmatprep.mubr.msk.bf16.mxu0 %vm359_vm3, %v8090_v44  ;;  %6161 = vmatprep.mubr.msk.bf16.mxu1 %vm359_vm3, %v8090_v44  ;;  %v945_v14 = vpop.permute.xlu0 %944  ;;  %v7640_v44 = vld [vmem:[#allocation10 + $0x664] ss:$8 sps:$4 sm:$0xff]   ;;  %v7653_v63 = vld [vmem:[#allocation10 + $0x190] ss:$8 sps:$4 sm:$0xff]  }
 0x11b   :  { %v997_v48 = vsel %vm396_vm5, %v980_v11, %v945_v14  ;;  %1769 = vmatpush1.bf16.msra.mxu0 %v7599_v13  ;;  %3243 = vmatpush1.bf16.msra.mxu1 %v7602_v17  ;;  %v7661_v11 = vld [vmem:[#allocation10 + $0x1a4] ss:$8 sps:$4 sm:$0xff]   ;;  %v7683_v13 = vld [vmem:[#allocation10 + $0x1e0] ss:$8 sps:$4 sm:$0xff]  }
 0x11c   :  { %v918_v26 = vpop.permute.xlu1 %917  ;;  %1770 = vmatprep.subr.bf16.mxu0 %v7607_v20  ;;  %3244 = vmatprep.subr.bf16.mxu1 %v7610_v21  ;;  %v7664_v14 = vld [vmem:[#allocation10 + $0x6a4] ss:$8 sps:$4 sm:$0xff]   ;;  %v7686_v17 = vld [vmem:[#allocation10 + $0x6e0] ss:$8 sps:$4 sm:$0xff]   ;;  %v7689_v20 = vld [vmem:[#allocation10 + $0x1f0] ss:$8 sps:$4 sm:$0xff]  }
 0x11d   :  { %v966_v54 = vsel %vm359_vm3, %v8092_v6, %v918_v26  ;;  %v7659_v26 = vld [vmem:[#allocation10 + $0x1a0] ss:$8 sps:$4 sm:$0xff]   ;;  %v7692_v21 = vld [vmem:[#allocation10 + $0x6f0] ss:$8 sps:$4 sm:$0xff]  }
 0x11e   :  { %v932_v52 = vpop.permute.xlu0 %931 }
 0x11f   :  { %v982_v56 = vsel %vm381_vm4, %v966_v54, %v932_v52  ;;  %1771 = vmatpush1.bf16.msra.mxu0 %v7605_v23  ;;  %3245 = vmatpush1.bf16.msra.mxu1 %v7608_v25  ;;  %v7667_v52 = vld [vmem:[#allocation10 + $0x1b4] ss:$8 sps:$4 sm:$0xff]   ;;  %v7700_v23 = vld [vmem:[#allocation10 + $0x504] ss:$8 sps:$4 sm:$0xff]  }
 0x120   :  { %v947_v58 = vpop.permute.xlu1 %946  ;;  %1772 = vmatprep.subr.bf16.mxu0 %v7613_v34  ;;  %3246 = vmatprep.subr.bf16.mxu1 %v7616_v35  ;;  %v7670_v54 = vld [vmem:[#allocation10 + $0x6b4] ss:$8 sps:$4 sm:$0xff]  }
 0x121   :  { %1066 = vmatmul.mubr.bf16.gmra.mrb[32].mxu0 %v991_v37  ;;  %1197 = vmatmul.mubr.bf16.gmra.mrb[32].mxu1 %v991_v37  ;;  %v1000_v0 = vsel %vm396_vm5, %v982_v56, %v947_v58  ;;  %v7646_v37 = vld [vmem:[#allocation10 + $0x674] ss:$8 sps:$4 sm:$0xff]   ;;  %v7668_v56 = vld [vmem:[#allocation10 + $0x6b0] ss:$8 sps:$4 sm:$0xff]   ;;  %v7673_v58 = vld [vmem:[#allocation10 + $0x1c4] ss:$8 sps:$4 sm:$0xff]  }
 0x122   :  { %6155 = vmatprep.mubr.msk.bf16.mxu0 %vm359_vm3, %v8091_v47  ;;  %6162 = vmatprep.mubr.msk.bf16.mxu1 %vm359_vm3, %v8091_v47  ;;  %v920_v59 = vpop.permute.xlu0 %919  ;;  %v7649_v47 = vld [vmem:[#allocation10 + $0x184] ss:$8 sps:$4 sm:$0xff]  }
 0x123   :  { %v969_v3 = vsel %vm359_vm3, %v8093_v32, %v920_v59  ;;  %1773 = vmatpush1.bf16.msra.mxu0 %v7611_v40  ;;  %3247 = vmatpush1.bf16.msra.mxu1 %v7614_v42  ;;  %v7676_v59 = vld [vmem:[#allocation10 + $0x6c4] ss:$8 sps:$4 sm:$0xff]   ;;  %v1285_v42 = vld [vmem:[#allocation8] sm:$0x3] }
 0x124   :  { %v934_v2 = vpop.permute.xlu1 %933  ;;  %1774 = vmatprep.subr.bf16.mxu0 %v7619_v46  ;;  %3248 = vmatprep.subr.bf16.mxu1 %v7622_v50 }
 0x125   :  { %v984_v8 = vsel %vm381_vm4, %v969_v3, %v934_v2  ;;  %v7674_v2 = vld [vmem:[#allocation10 + $0x6c0] ss:$8 sps:$4 sm:$0xff]   ;;  %v7679_v3 = vld [vmem:[#allocation10 + $0x1d4] ss:$8 sps:$4 sm:$0xff]  }
 0x126   :  { %v949_v10 = vpop.permute.xlu0 %948 }
 0x127   :  { %v1003_v19 = vsel %vm396_vm5, %v984_v8, %v949_v10  ;;  %1775 = vmatpush1.bf16.msra.mxu0 %v7617_v53  ;;  %3249 = vmatpush1.bf16.msra.mxu1 %v7620_v60  ;;  %v7685_v8 = vld [vmem:[#allocation10 + $0x1e4] ss:$8 sps:$4 sm:$0xff]  }
 0x128   :  { %v922_v16 = vpop.permute.xlu1 %921  ;;  %1776 = vmatprep.subr.bf16.mxu0 %v7625_v62  ;;  %3250 = vmatprep.subr.bf16.mxu1 %v7628_v1  ;;  %v7688_v10 = vld [vmem:[#allocation10 + $0x6e4] ss:$8 sps:$4 sm:$0xff]  }
 0x129   :  { %1076 = vmatmul.mubr.bf16.gmra.mrb[36].mxu0 %v994_v57  ;;  %1207 = vmatmul.mubr.bf16.gmra.mrb[36].mxu1 %v994_v57  ;;  %v972_v28 = vsel %vm359_vm3, %v8094_v5, %v922_v16  ;;  %v7655_v57 = vld [vmem:[#allocation10 + $0x194] ss:$8 sps:$4 sm:$0xff]  }
 0x12a   :  { %6156 = vmatprep.mubr.msk.bf16.mxu0 %vm359_vm3, %v8092_v6  ;;  %6163 = vmatprep.mubr.msk.bf16.mxu1 %vm359_vm3, %v8092_v6  ;;  %v936_v31 = vpop.permute.xlu0 %935  ;;  %v7656_v6 = vld [vmem:[#allocation10 + $0x690] ss:$8 sps:$4 sm:$0xff]   ;;  %v7691_v16 = vld [vmem:[#allocation10 + $0x1f4] ss:$8 sps:$4 sm:$0xff]  }
 0x12b   :  { %v986_v36 = vsel %vm381_vm4, %v972_v28, %v936_v31  ;;  %1777 = vmatpush1.bf16.msra.mxu0 %v7623_v4  ;;  %3251 = vmatpush1.bf16.msra.mxu1 %v7626_v12 }
 0x12c   :  { %v951_v38 = vpop.permute.xlu1 %950  ;;  %1778 = vmatprep.subr.bf16.mxu0 %v7631_v15  ;;  %3252 = vmatprep.subr.bf16.mxu1 %v7634_v27 }
 0x12d   :  { %v1006_v45 = vsel %vm396_vm5, %v986_v36, %v951_v38 }
 0x12f   :  { %1779 = vmatpush1.bf16.msra.mxu0 %v7629_v33  ;;  %3253 = vmatpush1.bf16.msra.mxu1 %v7632_v39 }
 0x130   :  { %1780 = vmatprep.subr.bf16.mxu0 %v7637_v24  ;;  %3254 = vmatprep.subr.bf16.mxu1 %v7640_v44 }
 0x131   :  { %1086 = vmatmul.mubr.bf16.gmra.mrb[40].mxu0 %v997_v48  ;;  %1217 = vmatmul.mubr.bf16.gmra.mrb[40].mxu1 %v997_v48  ;;  %v7662_v48 = vld [vmem:[#allocation10 + $0x6a0] ss:$8 sps:$4 sm:$0xff]  }
 0x132   :  { %6157 = vmatprep.mubr.msk.bf16.mxu0 %vm359_vm3, %v8093_v32  ;;  %6164 = vmatprep.mubr.msk.bf16.mxu1 %vm359_vm3, %v8093_v32  ;;  %v7665_v32 = vld [vmem:[#allocation10 + $0x1b0] ss:$8 sps:$4 sm:$0xff]  }
 0x133   :  { %1781 = vmatpush1.bf16.msra.mxu0 %v7635_v18  ;;  %3255 = vmatpush1.bf16.msra.mxu1 %v7638_v29 }
 0x134   :  { %1782 = vmatprep.subr.bf16.mxu0 %v7643_v30  ;;  %3256 = vmatprep.subr.bf16.mxu1 %v7646_v37 }
 0x137   :  { %1783 = vmatpush1.bf16.msra.mxu0 %v7641_v41  ;;  %3257 = vmatpush1.bf16.msra.mxu1 %v7644_v43 }
 0x138   :  { %1784 = vmatprep.subr.bf16.mxu0 %v7649_v47  ;;  %3258 = vmatprep.subr.bf16.mxu1 %v7652_v49 }
 0x139   :  { %1096 = vmatmul.mubr.bf16.gmra.mrb[44].mxu0 %v1000_v0  ;;  %1227 = vmatmul.mubr.bf16.gmra.mrb[44].mxu1 %v1000_v0  ;;  %v7671_v0 = vld [vmem:[#allocation10 + $0x1c0] ss:$8 sps:$4 sm:$0xff]  }
 0x13a   :  { %6158 = vmatprep.mubr.msk.bf16.mxu0 %vm359_vm3, %v8094_v5  ;;  %6165 = vmatprep.mubr.msk.bf16.mxu1 %vm359_vm3, %v8094_v5  ;;  %v7677_v5 = vld [vmem:[#allocation10 + $0x1d0] ss:$8 sps:$4 sm:$0xff]  }
 0x13b   :  { %1785 = vmatpush1.bf16.msra.mxu0 %v7647_v51  ;;  %3259 = vmatpush1.bf16.msra.mxu1 %v7650_v55 }
 0x13c   :  { %1786 = vmatprep.subr.bf16.mxu0 %v7655_v57  ;;  %3260 = vmatprep.subr.bf16.mxu1 %v7658_v61 }
 0x13f   :  { %1787 = vmatpush1.bf16.msra.mxu0 %v7653_v63  ;;  %3261 = vmatpush1.bf16.msra.mxu1 %v7656_v6 }
 0x140   :  { %1788 = vmatprep.subr.bf16.mxu0 %v7661_v11  ;;  %3262 = vmatprep.subr.bf16.mxu1 %v7664_v14  ;;  %v1287_v11 = vlaneseq }
 0x141   :  { %1106 = vmatmul.mubr.bf16.gmra.mrb[48].mxu0 %v1003_v19  ;;  %1237 = vmatmul.mubr.bf16.gmra.mrb[48].mxu1 %v1003_v19  ;;  %v7694_v19 = vld [vmem:[#allocation10 + $0x6f4] ss:$8 sps:$4 sm:$0xff]  }
 0x142   :  { %6159 = vmatprep.mubr.msk.bf16.mxu0 %vm359_vm3, %v908_v22  ;;  %6166 = vmatprep.mubr.msk.bf16.mxu1 %vm359_vm3, %v908_v22  ;;  %v7697_v22 = vld [vmem:[#allocation10 + $0x4] ss:$8 sps:$4 sm:$0xff]  }
 0x143   :  { %1789 = vmatpush1.bf16.msra.mxu0 %v7659_v26  ;;  %3263 = vmatpush1.bf16.msra.mxu1 %v7662_v48 }
 0x144   :  { %1790 = vmatprep.subr.bf16.mxu0 %v7667_v52  ;;  %3264 = vmatprep.subr.bf16.mxu1 %v7670_v54 }
 0x147   :  { %1791 = vmatpush1.bf16.msra.mxu0 %v7665_v32  ;;  %3265 = vmatpush1.bf16.msra.mxu1 %v7668_v56 }
 0x148   :  { %1792 = vmatprep.subr.bf16.mxu0 %v7673_v58  ;;  %3266 = vmatprep.subr.bf16.mxu1 %v7676_v59 }
 0x149   :  { %1116 = vmatmul.mubr.bf16.gmra.mrb[52].mxu0 %v1006_v45  ;;  %1247 = vmatmul.mubr.bf16.gmra.mrb[52].mxu1 %v1006_v45 }
 0x14b   :  { %1793 = vmatpush1.bf16.msra.mxu0 %v7671_v0  ;;  %3267 = vmatpush1.bf16.msra.mxu1 %v7674_v2 }
 0x14c   :  { %1794 = vmatprep.subr.bf16.mxu0 %v7679_v3  ;;  %3268 = vmatprep.subr.bf16.mxu1 %v7682_v9 }
 0x14f   :  { %1795 = vmatpush1.bf16.msra.mxu0 %v7677_v5  ;;  %3269 = vmatpush1.bf16.msra.mxu1 %v7680_v7 }
 0x150   :  { %1796 = vmatprep.subr.bf16.mxu0 %v7685_v8  ;;  %3270 = vmatprep.subr.bf16.mxu1 %v7688_v10 }
 0x153   :  { %1797 = vmatpush1.bf16.msra.mxu0 %v7683_v13  ;;  %3271 = vmatpush1.bf16.msra.mxu1 %v7686_v17 }
 0x154   :  { %1798 = vmatprep.subr.bf16.mxu0 %v7691_v16  ;;  %3272 = vmatprep.subr.bf16.mxu1 %v7694_v19  ;;  %v9230_v19 = vshrl.u32 %v1287_v11, 7 }
 0x156   :  { %10888 = vst [vmem:[#allocation24_spill] sm:$0xff] %v9230_v19  ;;  %v10826_v11 = vsub.s32 0, %v9230_v19  ;;  %v10829_v36 = vsub.s32 1, %v9230_v19  ;;  %v9691_v19 = vld [vmem:[#allocation10 + $0x994] ss:$8 sps:$4 sm:$0xff]  }
 0x157   :  { %1799 = vmatpush1.bf16.msra.mxu0 %v7689_v20  ;;  %3273 = vmatpush1.bf16.msra.mxu1 %v7692_v21  ;;  %10943 = vst [vmem:[#allocation29_spill] sm:$0xff] %v9691_v19 }
 0x158   :  { %2036 = vmatprep.subr.bf16.mxu0 %v7697_v22  ;;  %3473 = vmatprep.subr.bf16.mxu1 %v7700_v23  ;;  %v9253_v12 = vrot.slane %v1285_v42, %v10826_v11 }
 0x1b4   :  { %v9076_v25 = vpop.f32.mrb[0].mxu0  ;;  %v9078_v28 = vpop.f32.mrb[0].mxu1 }
 0x1b5   :  { %v9082_v34 = vpop.f32.mrb[1].mxu0  ;;  %v9084_v35 = vpop.f32.mrb[1].mxu1 }
 0x1b6   :  { %v9088_v38 = vpop.f32.mrb[2].mxu0  ;;  %v9090_v40 = vpop.f32.mrb[2].mxu1  ;;  %v10894_v13 = vmax.f32 %v9082_v34, %v9084_v35 }
 0x1b7   :  { %v9094_v45 = vpop.f32.mrb[3].mxu0  ;;  %v9096_v46 = vpop.f32.mrb[3].mxu1 }
 0x1bc   :  { %v9100_v53 = vpop.f32.mrb[4].mxu0  ;;  %v9102_v60 = vpop.f32.mrb[4].mxu1 }
 0x1bd   :  { %v9106_v1 = vpop.f32.mrb[5].mxu0  ;;  %v9108_v4 = vpop.f32.mrb[5].mxu1 }
 0x1be   :  { %v9112_v15 = vpop.f32.mrb[6].mxu0  ;;  %v9114_v27 = vpop.f32.mrb[6].mxu1 }
 0x1bf   :  { %v9118_v39 = vpop.f32.mrb[7].mxu0  ;;  %v9120_v24 = vpop.f32.mrb[7].mxu1 }
 0x1c4   :  { %v9124_v18 = vpop.f32.mrb[8].mxu0  ;;  %v9126_v29 = vpop.f32.mrb[8].mxu1 }
 0x1c5   :  { %v9130_v37 = vpop.f32.mrb[9].mxu0  ;;  %v9132_v41 = vpop.f32.mrb[9].mxu1 }
 0x1c6   :  { %v9136_v47 = vpop.f32.mrb[10].mxu0  ;;  %v9138_v49 = vpop.f32.mrb[10].mxu1 }
 0x1c7   :  { %v9142_v55 = vpop.f32.mrb[11].mxu0  ;;  %v9144_v57 = vpop.f32.mrb[11].mxu1 }
 0x1cc   :  { %v9148_v63 = vpop.f32.mrb[12].mxu0  ;;  %v9150_v6 = vpop.f32.mrb[12].mxu1 }
 0x1cd   :  { %v9154_v14 = vpop.f32.mrb[13].mxu0  ;;  %v9156_v26 = vpop.f32.mrb[13].mxu1 }
 0x1ce   :  { %v9160_v52 = vpop.f32.mrb[14].mxu0  ;;  %v9162_v54 = vpop.f32.mrb[14].mxu1 }
 0x1cf   :  { %v9166_v56 = vpop.f32.mrb[15].mxu0  ;;  %v9168_v58 = vpop.f32.mrb[15].mxu1 }
 0x1d4   :  { %v9172_v0 = vpop.f32.mrb[16].mxu0  ;;  %v9174_v2 = vpop.f32.mrb[16].mxu1 }
 0x1d5   :  { %v9178_v5 = vpop.f32.mrb[17].mxu0  ;;  %v9180_v7 = vpop.f32.mrb[17].mxu1 }
 0x1d6   :  { %v9184_v8 = vpop.f32.mrb[18].mxu0  ;;  %v9186_v10 = vpop.f32.mrb[18].mxu1 }
 0x1d7   :  { %v9190_v17 = vpop.f32.mrb[19].mxu0  ;;  %v9192_v16 = vpop.f32.mrb[19].mxu1 }
 0x1dc   :  { %v9196_v20 = vpop.f32.mrb[20].mxu0  ;;  %v9198_v21 = vpop.f32.mrb[20].mxu1 }
 0x1dd   :  { %v9202_v23 = vpop.f32.mrb[21].mxu0  ;;  %v9204_v9 = vpop.f32.mrb[21].mxu1 }
 0x1de   :  { %v9208_v3 = vpop.f32.mrb[22].mxu0  ;;  %v9210_v59 = vpop.f32.mrb[22].mxu1 }
 0x1df   :  { %10881 = vst [vmem:[#allocation17_spill] sm:$0xff] %v9210_v59  ;;  %v9214_v32 = vpop.f32.mrb[23].mxu0  ;;  %v9216_v48 = vpop.f32.mrb[23].mxu1 }
 0x1e0   :  { %10882 = vst [vmem:[#allocation18_spill] sm:$0xff] %v9214_v32  ;;  %10883 = vst [vmem:[#allocation19_spill] sm:$0xff] %v9216_v48  ;;  %v10896_v32 = vmax.f32 %v9094_v45, %v9096_v46  ;;  %v10897_v45 = vmax.f32 %v9100_v53, %v9102_v60 }
 0x1e4   :  { %v9220_v61 = vpop.f32.mrb[24].mxu0  ;;  %v9222_v51 = vpop.f32.mrb[24].mxu1 }
 0x1e5   :  { %10884 = vst [vmem:[#allocation20_spill] sm:$0xff] %v9220_v61  ;;  %10885 = vst [vmem:[#allocation21_spill] sm:$0xff] %v9222_v51  ;;  %v9226_v43 = vpop.f32.mrb[25].mxu0  ;;  %v9228_v30 = vpop.f32.mrb[25].mxu1 }
 0x1e6   :  { %10886 = vst [vmem:[#allocation22_spill] sm:$0xff] %v9226_v43  ;;  %10887 = vst [vmem:[#allocation23_spill] sm:$0xff] %v9228_v30  ;;  %v9234_v33 = vpop.f32.mrb[26].mxu0  ;;  %v9236_v22 = vpop.f32.mrb[26].mxu1  ;;  %v10893_v30 = vmax.f32 %v9076_v25, %v9078_v28  ;;  %v10895_v25 = vmax.f32 %v9088_v38, %v9090_v40 }
 0x1e7   :  { %10889 = vst [vmem:[#allocation25_spill] sm:$0xff] %v9234_v33  ;;  %10890 = vst [vmem:[#allocation26_spill] sm:$0xff] %v9236_v22  ;;  %v9240_v62 = vpop.f32.mrb[27].mxu0  ;;  %v9242_v50 = vpop.f32.mrb[27].mxu1 }
 0x1e8   :  { %10891 = vst [vmem:[#allocation27_spill] sm:$0xff] %v9240_v62  ;;  %10892 = vst [vmem:[#allocation28_spill] sm:$0xff] %v9242_v50  ;;  %v9260_v62 = vrot.slane %v1285_v42, %v10829_v36  ;;  %v7712_v36 = vld [vmem:[#allocation10 + $0x524] ss:$8 sps:$4 sm:$0xff]  }
 0x1ec   :  { %v1057_v44 = vpop.f32.mrb[28].mxu0  ;;  %v1188_v31 = vpop.f32.mrb[28].mxu1 }
 0x1ed   :  { %v1126_v43 = vmax.f32 %v10893_v30, %v1057_v44  ;;  %v1059_v22 = vpop.f32.mrb[29].mxu0  ;;  %v1190_v33 = vpop.f32.mrb[29].mxu1 }
 0x1ee   :  { %v1127_v50 = vmax.f32 %v10894_v13, %v1059_v22  ;;  %v1061_v51 = vpop.f32.mrb[30].mxu0  ;;  %v1192_v61 = vpop.f32.mrb[30].mxu1 }
 0x1ef   :  { %v1257_v48 = vmax.f32 %v1126_v43, %v1188_v31  ;;  %v1128_v28 = vmax.f32 %v10895_v25, %v1061_v51  ;;  %v1063_v44 = vpop.f32.mrb[31].mxu0  ;;  %v1194_v30 = vpop.f32.mrb[31].mxu1 }
 0x1f0   :  { %v1258_v11 = vmax.f32 %v1127_v50, %v1190_v33  ;;  %v1129_v59 = vmax.f32 %v10896_v32, %v1063_v44  ;;  %v10899_v44 = vmax.f32 %v9112_v15, %v9114_v27 }
 0x1f1   :  { %v1297_v34 = vadd.f32 %v9253_v12, %v1257_v48  ;;  %v1259_v35 = vmax.f32 %v1128_v28, %v1192_v61 }
 0x1f2   :  { %v1298_v42 = vadd.f32 %v9260_v62, %v1258_v11  ;;  %v1260_v13 = vmax.f32 %v1129_v59, %v1194_v30  ;;  %v10898_v59 = vmax.f32 %v9106_v1, %v9108_v4  ;;  %v10830_v4 = vmov 0  }
 0x1f3   :  { %v1325_v22 = vmax.f32 %v1297_v34, 0.0  ;;  %v1299_v31 = vadd.f32 %v9253_v12, %v1259_v35 }
 0x1f4   :  { %v1326_v43 = vmax.f32 %v1298_v42, 0.0  ;;  %v9272_v38 = vadd.f32 %v9260_v62, %v1260_v13  ;;  %v1067_v40 = vpop.f32.mrb[32].mxu0  ;;  %v1198_v51 = vpop.f32.mrb[32].mxu1  ;;  %v10900_v42 = vmax.f32 %v9118_v39, %v9120_v24 }
 0x1f5   :  { %v1327_v50 = vmax.f32 %v1299_v31, 0.0  ;;  %v1130_v46 = vmax.f32 %v10897_v45, %v1067_v40  ;;  %v1069_v33 = vpop.f32.mrb[33].mxu0  ;;  %v1200_v48 = vpop.f32.mrb[33].mxu1  ;;  %v7695_v45 = vld [vmem:[#allocation10] ss:$8 sps:$4 sm:$0xff]  }
 0x1f6   :  { %v9277_v61 = vpack.c.bf16 %v1326_v43, %v1325_v22  ;;  %v1328_v32 = vmax.f32 %v9272_v38, 0.0  ;;  %v1131_v11 = vmax.f32 %v10898_v59, %v1069_v33  ;;  %v1071_v25 = vpop.f32.mrb[34].mxu0  ;;  %v1202_v28 = vpop.f32.mrb[34].mxu1  ;;  %v7703_v33 = vld [vmem:[#allocation10 + $0x14] ss:$8 sps:$4 sm:$0xff]  }
 0x1f7   :  { %v1132_v30 = vmax.f32 %v10899_v44, %v1071_v25  ;;  %v1261_v34 = vmax.f32 %v1130_v46, %v1198_v51  ;;  %v1073_v35 = vpop.f32.mrb[35].mxu0  ;;  %v1204_v53 = vpop.f32.mrb[35].mxu1  ;;  %v7698_v46 = vld [vmem:[#allocation10 + $0x500] ss:$8 sps:$4 sm:$0xff]  }
 0x1f8   :  { %v6743_v60 = vpack.c.bf16 %v1328_v32, %v1327_v50  ;;  %v1133_v13 = vmax.f32 %v10900_v42, %v1073_v35  ;;  %v1262_v31 = vmax.f32 %v1131_v11, %v1200_v48  ;;  %v7706_v48 = vld [vmem:[#allocation10 + $0x514] ss:$8 sps:$4 sm:$0xff]   ;;  %v7701_v42 = vld [vmem:[#allocation10 + $0x10] ss:$8 sps:$4 sm:$0xff]  }
 0x1f9   :  { %v9290_v38 = vadd.f32 %v9253_v12, %v1261_v34  ;;  %v1263_v1 = vmax.f32 %v1132_v30, %v1202_v28  ;;  %v10901_v34 = vmax.f32 %v9124_v18, %v9126_v29  ;;  %v7704_v29 = vld [vmem:[#allocation10 + $0x510] ss:$8 sps:$4 sm:$0xff]  }
 0x1fa   :  { %v9293_v40 = vcombine.low %v10830_v4, %v6743_v60  ;;  %v9296_v15 = vcombine.high %v10830_v4, %v6743_v60  ;;  %v9299_v27 = vadd.f32 %v9260_v62, %v1262_v31  ;;  %v1264_v51 = vmax.f32 %v1133_v13, %v1204_v53 }
 0x1fb   :  { %v1329_v39 = vmax.f32 %v9290_v38, 0.0  ;;  %v9303_v24 = vadd.f32 %v9253_v12, %v1263_v1 }
 0x1fc   :  { %v1330_v59 = vmax.f32 %v9299_v27, 0.0  ;;  %v9307_v11 = vadd.f32 %v9260_v62, %v1264_v51  ;;  %v1077_v25 = vpop.f32.mrb[36].mxu0  ;;  %1800 = vmatprep.mubr.bf16.mxu0 %v9296_v15  ;;  %3274 = vmatprep.mubr.bf16.mxu1 %v9296_v15  ;;  %v1208_v28 = vpop.f32.mrb[36].mxu1  ;;  %v10903_v51 = vmax.f32 %v9136_v47, %v9138_v49 }
 0x1fd   :  { %v9311_v44 = vpack.c.bf16 %v1329_v39, %v1325_v22  ;;  %v1331_v30 = vmax.f32 %v9303_v24, 0.0  ;;  %v1134_v35 = vmax.f32 %v10901_v34, %v1077_v25  ;;  %v1079_v53 = vpop.f32.mrb[37].mxu0  ;;  %1801 = vmatmul.mubr.bf16.vlgmr.msra.gmra.mrb[56].mxu0 %v9293_v40  ;;  %3275 = vmatmul.mubr.bf16.vlgmr.msra.gmra.mrb[56].mxu1 %v9293_v40  ;;  %v1210_v60 = vpop.f32.mrb[37].mxu1  ;;  %v10902_v22 = vmax.f32 %v9130_v37, %v9132_v41  ;;  %v7709_v34 = vld [vmem:[#allocation10 + $0x24] ss:$8 sps:$4 sm:$0xff]  }
 0x1fe   :  { %v9319_v13 = vpack.c.bf16 %v1330_v59, %v1326_v43  ;;  %v1332_v31 = vmax.f32 %v9307_v11, 0.0  ;;  %2037 = vmatpush1.bf16.msra.mxu0 %v7695_v45  ;;  %3474 = vmatpush1.bf16.msra.mxu1 %v7698_v46  ;;  %v1081_v1 = vpop.f32.mrb[38].mxu0  ;;  %v1212_v18 = vpop.f32.mrb[38].mxu1  ;;  %v10904_v41 = vmax.f32 %v9142_v55, %v9144_v57  ;;  %v7715_v55 = vld [vmem:[#allocation10 + $0x34] ss:$8 sps:$4 sm:$0xff]  }
 0x1ff   :  { %v1135_v38 = vmax.f32 %v10902_v22, %v1079_v53  ;;  %v9325_v27 = vpack.c.bf16 %v1331_v30, %v1327_v50  ;;  %v1136_v24 = vmax.f32 %v10903_v51, %v1081_v1  ;;  %v1265_v25 = vmax.f32 %v1134_v35, %v1208_v28  ;;  %v1083_v43 = vpop.f32.mrb[39].mxu0  ;;  %2038 = vmatprep.subr.bf16.mxu0 %v7703_v33  ;;  %v1214_v11 = vpop.f32.mrb[39].mxu1  ;;  %v7707_v33 = vld [vmem:[#allocation10 + $0x20] ss:$8 sps:$4 sm:$0xff]   ;;  %v7718_v57 = vld [vmem:[#allocation10 + $0x534] ss:$8 sps:$4 sm:$0xff]  }
 0x200   :  { %3475 = vmatprep.subr.bf16.mxu1 %v7706_v48  ;;  %v9330_v37 = vpack.c.bf16 %v1332_v31, %v1328_v32  ;;  %v1137_v45 = vmax.f32 %v10904_v41, %v1083_v43  ;;  %v7710_v48 = vld [vmem:[#allocation10 + $0x520] ss:$8 sps:$4 sm:$0xff]  }
 0x201   :  { %v1266_v46 = vmax.f32 %v1135_v38, %v1210_v60  ;;  %v9336_v50 = vadd.f32 %v9253_v12, %v1265_v25  ;;  %v1267_v53 = vmax.f32 %v1136_v24, %v1212_v18  ;;  %v10905_v18 = vmax.f32 %v9148_v63, %v9150_v6 }
 0x202   :  { %v1268_v49 = vmax.f32 %v1137_v45, %v1214_v11  ;;  %2039 = vmatpush1.bf16.msra.mxu0 %v7701_v42  ;;  %3476 = vmatpush1.bf16.msra.mxu1 %v7704_v29  ;;  %v10906_v11 = vmax.f32 %v9154_v14, %v9156_v26  ;;  %v7716_v45 = vld [vmem:[#allocation10 + $0x530] ss:$8 sps:$4 sm:$0xff]   ;;  %v10907_v63 = vmax.f32 %v9160_v52, %v9162_v54  ;;  %v7721_v52 = vld [vmem:[#allocation10 + $0x44] ss:$8 sps:$4 sm:$0xff]  }
 0x203   :  { %v9339_v47 = vadd.f32 %v9260_v62, %v1266_v46  ;;  %v1333_v32 = vmax.f32 %v9336_v50, 0.0  ;;  %v9343_v28 = vadd.f32 %v9253_v12, %v1267_v53  ;;  %2040 = vmatprep.subr.bf16.mxu0 %v7709_v34  ;;  %3477 = vmatprep.subr.bf16.mxu1 %v7712_v36  ;;  %v7713_v36 = vld [vmem:[#allocation10 + $0x30] ss:$8 sps:$4 sm:$0xff]   ;;  %v10908_v26 = vmax.f32 %v9166_v56, %v9168_v58  ;;  %v7724_v54 = vld [vmem:[#allocation10 + $0x544] ss:$8 sps:$4 sm:$0xff]  }
 0x204   :  { %v9347_v60 = vadd.f32 %v9260_v62, %v1268_v49  ;;  %v1087_v22 = vpop.f32.mrb[40].mxu0  ;;  %v1218_v38 = vpop.f32.mrb[40].mxu1  ;;  %v7727_v58 = vld [vmem:[#allocation10 + $0x54] ss:$8 sps:$4 sm:$0xff]  }
 0x205   :  { %v1334_v35 = vmax.f32 %v9339_v47, 0.0  ;;  %v9349_v42 = vpack.c.bf16 %v1333_v32, %v1329_v39  ;;  %v1335_v1 = vmax.f32 %v9343_v28, 0.0  ;;  %v1138_v29 = vmax.f32 %v10905_v18, %v1087_v22  ;;  %v1089_v51 = vpop.f32.mrb[41].mxu0  ;;  %v1220_v24 = vpop.f32.mrb[41].mxu1  ;;  %v7730_v22 = vld [vmem:[#allocation10 + $0x554] ss:$8 sps:$4 sm:$0xff]  }
 0x206   :  { %v1336_v43 = vmax.f32 %v9347_v60, 0.0  ;;  %v1139_v34 = vmax.f32 %v10906_v11, %v1089_v51  ;;  %2041 = vmatpush1.bf16.msra.mxu0 %v7707_v33  ;;  %3478 = vmatpush1.bf16.msra.mxu1 %v7710_v48  ;;  %v1091_v39 = vpop.f32.mrb[42].mxu0  ;;  %v1222_v41 = vpop.f32.mrb[42].mxu1  ;;  %v10909_v11 = vmax.f32 %v9172_v0, %v9174_v2  ;;  %v10911_v2 = vmax.f32 %v9184_v8, %v9186_v10 }
 0x207   :  { %v9355_v25 = vpack.c.bf16 %v1334_v35, %v1330_v59  ;;  %v9361_v46 = vpack.c.bf16 %v1335_v1, %v1331_v30  ;;  %v1140_v6 = vmax.f32 %v10907_v63, %v1091_v39  ;;  %v1269_v50 = vmax.f32 %v1138_v29, %v1218_v38  ;;  %v1093_v59 = vpop.f32.mrb[43].mxu0  ;;  %2042 = vmatprep.subr.bf16.mxu0 %v7715_v55  ;;  %v1224_v53 = vpop.f32.mrb[43].mxu1  ;;  %v7719_v55 = vld [vmem:[#allocation10 + $0x40] ss:$8 sps:$4 sm:$0xff]  }
 0x208   :  { %3479 = vmatprep.subr.bf16.mxu1 %v7718_v57  ;;  %v9368_v14 = vpack.c.bf16 %v1336_v43, %v1332_v31  ;;  %v1141_v47 = vmax.f32 %v10908_v26, %v1093_v59  ;;  %v1270_v49 = vmax.f32 %v1139_v34, %v1220_v24  ;;  %v7722_v31 = vld [vmem:[#allocation10 + $0x540] ss:$8 sps:$4 sm:$0xff]   ;;  %v7728_v26 = vld [vmem:[#allocation10 + $0x550] ss:$8 sps:$4 sm:$0xff]  }
 0x209   :  { %v9374_v30 = vadd.f32 %v9253_v12, %v1269_v50  ;;  %v1271_v33 = vmax.f32 %v1140_v6, %v1222_v41  ;;  %v10910_v50 = vmax.f32 %v9178_v5, %v9180_v7  ;;  %v10912_v7 = vmax.f32 %v9190_v17, %v9192_v16  ;;  %v7739_v17 = vld [vmem:[#allocation10 + $0x74] ss:$8 sps:$4 sm:$0xff]  }
 0x20a   :  { %v9377_v48 = vadd.f32 %v9260_v62, %v1270_v49  ;;  %v1272_v28 = vmax.f32 %v1141_v47, %v1224_v53  ;;  %2043 = vmatpush1.bf16.msra.mxu0 %v7713_v36  ;;  %3480 = vmatpush1.bf16.msra.mxu1 %v7716_v45  ;;  %v7725_v45 = vld [vmem:[#allocation10 + $0x50] ss:$8 sps:$4 sm:$0xff]   ;;  %v7742_v16 = vld [vmem:[#allocation10 + $0x574] ss:$8 sps:$4 sm:$0xff]  }
 0x20b   :  { %v1337_v57 = vmax.f32 %v9374_v30, 0.0  ;;  %v9381_v56 = vadd.f32 %v9253_v12, %v1271_v33  ;;  %1810 = vmatprep.mubr.bf16.mxu0 %v9368_v14  ;;  %3284 = vmatprep.mubr.bf16.mxu1 %v9368_v14  ;;  %v7733_v33 = vld [vmem:[#allocation10 + $0x64] ss:$8 sps:$4 sm:$0xff]  }
 0x20c   :  { %v1338_v38 = vmax.f32 %v9377_v48, 0.0  ;;  %v9387_v18 = vadd.f32 %v9260_v62, %v1272_v28  ;;  %1811 = vmatmul.mubr.bf16.gmra.mrb[60].mxu0 %v9361_v46  ;;  %3285 = vmatmul.mubr.bf16.gmra.mrb[60].mxu1 %v9361_v46  ;;  %v1097_v29 = vpop.f32.mrb[44].mxu0  ;;  %v1228_v51 = vpop.f32.mrb[44].mxu1 }
 0x20d   :  { %v9391_v24 = vpack.c.bf16 %v1337_v57, %v1333_v32  ;;  %v1339_v36 = vmax.f32 %v9381_v56, 0.0  ;;  %v1142_v34 = vmax.f32 %v10909_v11, %v1097_v29  ;;  %2044 = vmatprep.subr.bf16.mxu0 %v7721_v52  ;;  %3481 = vmatprep.subr.bf16.mxu1 %v7724_v54  ;;  %v1099_v39 = vpop.f32.mrb[45].mxu0  ;;  %v1230_v41 = vpop.f32.mrb[45].mxu1  ;;  %v7736_v52 = vld [vmem:[#allocation10 + $0x564] ss:$8 sps:$4 sm:$0xff]   ;;  %v10913_v11 = vmax.f32 %v9196_v20, %v9198_v21 }
 0x20e   :  { %v9397_v63 = vpack.c.bf16 %v1338_v38, %v1334_v35  ;;  %v1340_v6 = vmax.f32 %v9387_v18, 0.0  ;;  %v1143_v32 = vmax.f32 %v10910_v50, %v1099_v39  ;;  %2045 = vmatpush1.bf16.msra.mxu0 %v7719_v55  ;;  %3482 = vmatpush1.bf16.msra.mxu1 %v7722_v31  ;;  %v1101_v59 = vpop.f32.mrb[46].mxu0  ;;  %v1232_v53 = vpop.f32.mrb[46].mxu1  ;;  %v7731_v55 = vld [vmem:[#allocation10 + $0x60] ss:$8 sps:$4 sm:$0xff]  }
 0x20f   :  { %v9403_v0 = vpack.c.bf16 %v1339_v36, %v1335_v1  ;;  %v1144_v47 = vmax.f32 %v10911_v2, %v1101_v59  ;;  %v1273_v49 = vmax.f32 %v1142_v34, %v1228_v51  ;;  %v1103_v35 = vpop.f32.mrb[47].mxu0  ;;  %2046 = vmatprep.subr.bf16.mxu0 %v7727_v58  ;;  %3483 = vmatprep.subr.bf16.mxu1 %v7730_v22  ;;  %v1234_v30 = vpop.f32.mrb[47].mxu1  ;;  %v7734_v31 = vld [vmem:[#allocation10 + $0x560] ss:$8 sps:$4 sm:$0xff]   ;;  %v7740_v2 = vld [vmem:[#allocation10 + $0x570] ss:$8 sps:$4 sm:$0xff]  }
 0x210   :  { %v9410_v5 = vpack.c.bf16 %v1340_v6, %v1336_v43  ;;  %v1145_v1 = vmax.f32 %v10912_v7, %v1103_v35  ;;  %v1274_v54 = vmax.f32 %v1143_v32, %v1230_v41  ;;  %v10914_v59 = vmax.f32 %v9202_v23, %v9204_v9  ;;  %v10915_v21 = vld [vmem:[#allocation17_spill] sm:$0xff]  ;;  %v10917_v23 = vld [vmem:[#allocation18_spill] sm:$0xff] }
 0x211   :  { %v9416_v48 = vadd.f32 %v9253_v12, %v1273_v49  ;;  %v1275_v8 = vmax.f32 %v1144_v47, %v1232_v53  ;;  %v10916_v47 = vmax.f32 %v9208_v3, %v10915_v21  ;;  %v7748_v3 = vld [vmem:[#allocation10 + $0x584] ss:$8 sps:$4 sm:$0xff]  }
 0x212   :  { %v9419_v10 = vadd.f32 %v9260_v62, %v1274_v54  ;;  %v1276_v28 = vmax.f32 %v1145_v1, %v1234_v30  ;;  %2047 = vmatpush1.bf16.msra.mxu0 %v7725_v45  ;;  %3484 = vmatpush1.bf16.msra.mxu1 %v7728_v26  ;;  %v7737_v45 = vld [vmem:[#allocation10 + $0x70] ss:$8 sps:$4 sm:$0xff]  }
 0x213   :  { %v1341_v60 = vmax.f32 %v9416_v48, 0.0  ;;  %v9423_v43 = vadd.f32 %v9253_v12, %v1275_v8  ;;  %2048 = vmatprep.subr.bf16.mxu0 %v7733_v33  ;;  %3485 = vmatprep.subr.bf16.mxu1 %v7736_v52  ;;  %v10918_v33 = vld [vmem:[#allocation19_spill] sm:$0xff]  ;;  %v7745_v8 = vld [vmem:[#allocation10 + $0x84] ss:$8 sps:$4 sm:$0xff]  }
 0x214   :  { %v1342_v56 = vmax.f32 %v9419_v10, 0.0  ;;  %v9427_v58 = vadd.f32 %v9260_v62, %v1276_v28  ;;  %v1107_v22 = vpop.f32.mrb[48].mxu0  ;;  %v1238_v18 = vpop.f32.mrb[48].mxu1  ;;  %v10919_v52 = vmax.f32 %v10917_v23, %v10918_v33  ;;  %v10927_v48 = vld [vmem:[#allocation26_spill] sm:$0xff] }
 0x215   :  { %v9431_v29 = vpack.c.bf16 %v1341_v60, %v1337_v57  ;;  %v1343_v51 = vmax.f32 %v9423_v43, 0.0  ;;  %v1146_v34 = vmax.f32 %v10913_v11, %v1107_v22  ;;  %v1109_v39 = vpop.f32.mrb[49].mxu0  ;;  %v1240_v41 = vpop.f32.mrb[49].mxu1  ;;  %v7751_v22 = vld [vmem:[#allocation10 + $0x94] ss:$8 sps:$4 sm:$0xff]   ;;  %v6222_v43 = vcombine.high %v10830_v4, %v9277_v61 }
 0x216   :  { %v9439_v50 = vpack.c.bf16 %v1342_v56, %v1338_v38  ;;  %v1344_v32 = vmax.f32 %v9427_v58, 0.0  ;;  %v1147_v57 = vmax.f32 %v10914_v59, %v1109_v39  ;;  %2049 = vmatpush1.bf16.msra.mxu0 %v7731_v55  ;;  %3486 = vmatpush1.bf16.msra.mxu1 %v7734_v31  ;;  %v1111_v53 = vpop.f32.mrb[50].mxu0  ;;  %v1242_v26 = vpop.f32.mrb[50].mxu1  ;;  %v7743_v31 = vld [vmem:[#allocation10 + $0x80] ss:$8 sps:$4 sm:$0xff]  }
 0x217   :  { %v9447_v20 = vpack.c.bf16 %v1343_v51, %v1339_v36  ;;  %v1148_v38 = vmax.f32 %v10916_v47, %v1111_v53  ;;  %v1277_v49 = vmax.f32 %v1146_v34, %v1238_v18  ;;  %v1113_v35 = vpop.f32.mrb[51].mxu0  ;;  %2050 = vmatprep.subr.bf16.mxu0 %v7739_v17  ;;  %3487 = vmatprep.subr.bf16.mxu1 %v7742_v16  ;;  %v1244_v30 = vpop.f32.mrb[51].mxu1  ;;  %v7746_v17 = vld [vmem:[#allocation10 + $0x580] ss:$8 sps:$4 sm:$0xff]   ;;  %v7754_v18 = vld [vmem:[#allocation10 + $0x594] ss:$8 sps:$4 sm:$0xff]  }
 0x218   :  { %v9454_v9 = vpack.c.bf16 %v1344_v32, %v1340_v6  ;;  %v1149_v7 = vmax.f32 %v10919_v52, %v1113_v35  ;;  %v1278_v1 = vmax.f32 %v1147_v57, %v1240_v41  ;;  %v10920_v59 = vld [vmem:[#allocation20_spill] sm:$0xff]  ;;  %v10921_v57 = vld [vmem:[#allocation21_spill] sm:$0xff]  ;;  %v7749_v47 = vld [vmem:[#allocation10 + $0x90] ss:$8 sps:$4 sm:$0xff]  }
 0x219   :  { %v1317_v36 = vadd.f32 %v9253_v12, %v1277_v49  ;;  %v1279_v54 = vmax.f32 %v1148_v38, %v1242_v26  ;;  %v10922_v53 = vmax.f32 %v10920_v59, %v10921_v57  ;;  %v10923_v35 = vld [vmem:[#allocation22_spill] sm:$0xff] }
 0x21a   :  { %v1318_v28 = vadd.f32 %v9260_v62, %v1278_v1  ;;  %v1280_v55 = vmax.f32 %v1149_v7, %v1244_v30  ;;  %2051 = vmatpush1.bf16.msra.mxu0 %v7737_v45  ;;  %3488 = vmatpush1.bf16.msra.mxu1 %v7740_v2  ;;  %v10924_v30 = vld [vmem:[#allocation23_spill] sm:$0xff] }
 0x21b   :  { %v9461_v16 = vmax.f32 %v1317_v36, 0.0  ;;  %v1319_v6 = vadd.f32 %v9253_v12, %v1279_v54  ;;  %1820 = vmatprep.mubr.bf16.mxu0 %v9454_v9  ;;  %3294 = vmatprep.mubr.bf16.mxu1 %v9454_v9  ;;  %v10925_v23 = vmax.f32 %v10923_v35, %v10924_v30  ;;  %v7752_v1 = vld [vmem:[#allocation10 + $0x590] ss:$8 sps:$4 sm:$0xff]   ;;  %v10926_v54 = vld [vmem:[#allocation25_spill] sm:$0xff]  ;;  %v7763_v30 = vld [vmem:[#allocation10 + $0xb4] ss:$8 sps:$4 sm:$0xff]  }
 0x21c   :  { %v9466_v11 = vmax.f32 %v1318_v28, 0.0  ;;  %v1320_v34 = vadd.f32 %v9260_v62, %v1280_v55  ;;  %1821 = vmatmul.mubr.bf16.gmra.mrb[64].mxu0 %v9447_v20  ;;  %3295 = vmatmul.mubr.bf16.gmra.mrb[64].mxu1 %v9447_v20  ;;  %v1117_v39 = vpop.f32.mrb[52].mxu0  ;;  %v1248_v41 = vpop.f32.mrb[52].mxu1 }
 0x21d   :  { %v1347_v45 = vmax.f32 %v1319_v6, 0.0  ;;  %v1150_v26 = vmax.f32 %v10922_v53, %v1117_v39  ;;  %2052 = vmatprep.subr.bf16.mxu0 %v7745_v8  ;;  %3489 = vmatprep.subr.bf16.mxu1 %v7748_v3  ;;  %v1119_v2 = vpop.f32.mrb[53].mxu0  ;;  %v1250_v21 = vpop.f32.mrb[53].mxu1  ;;  %v9477_v38 = vpack.c.bf16 %v9461_v16, %v1341_v60  ;;  %v10928_v8 = vmax.f32 %v10926_v54, %v10927_v48  ;;  %v10929_v6 = vld [vmem:[#allocation27_spill] sm:$0xff]  ;;  %v7757_v53 = vld [vmem:[#allocation10 + $0xa4] ss:$8 sps:$4 sm:$0xff]  }
 0x21e   :  { %v1348_v49 = vmax.f32 %v1320_v34, 0.0  ;;  %v1151_v33 = vmax.f32 %v10925_v23, %v1119_v2  ;;  %2053 = vmatpush1.bf16.msra.mxu0 %v7743_v31  ;;  %3490 = vmatpush1.bf16.msra.mxu1 %v7746_v17  ;;  %v1121_v52 = vpop.f32.mrb[54].mxu0  ;;  %v1252_v7 = vpop.f32.mrb[54].mxu1  ;;  %v9485_v36 = vpack.c.bf16 %v9466_v11, %v1342_v56  ;;  %v10930_v31 = vld [vmem:[#allocation28_spill] sm:$0xff]  ;;  %v7760_v2 = vld [vmem:[#allocation10 + $0x5a4] ss:$8 sps:$4 sm:$0xff]  }
 0x21f   :  { %v1152_v60 = vmax.f32 %v10928_v8, %v1121_v52  ;;  %v1281_v3 = vmax.f32 %v1150_v26, %v1248_v41  ;;  %v1123_v28 = vpop.f32.mrb[55].mxu0  ;;  %2054 = vmatprep.subr.bf16.mxu0 %v7751_v22  ;;  %3491 = vmatprep.subr.bf16.mxu1 %v7754_v18  ;;  %v1254_v55 = vpop.f32.mrb[55].mxu1  ;;  %v10931_v17 = vmax.f32 %v10929_v6, %v10930_v31  ;;  %v7766_v23 = vld [vmem:[#allocation10 + $0x5b4] ss:$8 sps:$4 sm:$0xff]   ;;  %v7769_v48 = vld [vmem:[#allocation10 + $0xc4] ss:$8 sps:$4 sm:$0xff]  }
 0x220   :  { %v1282_v39 = vmax.f32 %v1151_v33, %v1250_v21  ;;  %v9493_v59 = vpack.c.bf16 %v1348_v49, %v1348_v49  ;;  %v9497_v10 = vpack.c.bf16 %v1348_v49, %v1344_v32  ;;  %v9502_v22 = vpack.c.bf16 %v1347_v45, %v1343_v51  ;;  %v7755_v32 = vld [vmem:[#allocation10 + $0xa0] ss:$8 sps:$4 sm:$0xff]   ;;  %v7772_v8 = vld [vmem:[#allocation10 + $0x5c4] ss:$8 sps:$4 sm:$0xff]   ;;  %v7778_v6 = vld [vmem:[#allocation10 + $0x5d4] ss:$8 sps:$4 sm:$0xff]  }
 0x221   :  { %v1153_v34 = vmax.f32 %v10931_v17, %v1123_v28  ;;  %v1321_v56 = vadd.f32 %v9253_v12, %v1281_v3  ;;  %v1283_v57 = vmax.f32 %v1152_v60, %v1252_v7  ;;  %v9505_v26 = vpack.c.bf16 %v1347_v45, %v1347_v45  ;;  %v7758_v51 = vld [vmem:[#allocation10 + $0x5a0] ss:$8 sps:$4 sm:$0xff]   ;;  %v7773_v31 = vld [vmem:[#allocation10 + $0xd0] ss:$8 sps:$4 sm:$0xff]   ;;  %v7781_v17 = vld [vmem:[#allocation10 + $0xe4] ss:$8 sps:$4 sm:$0xff]  }
 0x222   :  { %v1322_v18 = vadd.f32 %v9260_v62, %v1282_v39  ;;  %2055 = vmatpush1.bf16.msra.mxu0 %v7749_v47  ;;  %3492 = vmatpush1.bf16.msra.mxu1 %v7752_v1  ;;  %v7764_v1 = vld [vmem:[#allocation10 + $0x5b0] ss:$8 sps:$4 sm:$0xff]   ;;  %v7767_v3 = vld [vmem:[#allocation10 + $0xc0] ss:$8 sps:$4 sm:$0xff]  }
 0x223   :  { %v1284_v41 = vmax.f32 %v1153_v34, %v1254_v55  ;;  %v9507_v21 = vmax.f32 %v1321_v56, 0.0  ;;  %v1323_v58 = vadd.f32 %v9253_v12, %v1283_v57  ;;  %1830 = vmatprep.mubr.bf16.mxu0 %v9493_v59  ;;  %3304 = vmatprep.mubr.bf16.mxu1 %v9493_v59  ;;  %v7770_v28 = vld [vmem:[#allocation10 + $0x5c0] ss:$8 sps:$4 sm:$0xff]   ;;  %v7775_v55 = vld [vmem:[#allocation10 + $0xd4] ss:$8 sps:$4 sm:$0xff]  }
 0x224   :  { %v9514_v35 = vmax.f32 %v1322_v18, 0.0  ;;  %1831 = vmatmul.mubr.bf16.gmra.mrb[68].mxu0 %v9505_v26  ;;  %3305 = vmatmul.mubr.bf16.gmra.mrb[68].mxu1 %v9505_v26  ;;  %v7784_v34 = vld [vmem:[#allocation10 + $0x5e4] ss:$8 sps:$4 sm:$0xff]   ;;  %v7782_v39 = vld [vmem:[#allocation10 + $0x5e0] ss:$8 sps:$4 sm:$0xff]  }
 0x225   :  { %v1324_v47 = vadd.f32 %v9260_v62, %v1284_v41  ;;  %v9521_v12 = vpack.c.bf16 %v9507_v21, %v9461_v16  ;;  %v9523_v33 = vmax.f32 %v1323_v58, 0.0  ;;  %2056 = vmatprep.subr.bf16.mxu0 %v7757_v53  ;;  %2068 = vmatprep.mubr.bf16.mxu0 %v6222_v43  ;;  %v7761_v62 = vld [vmem:[#allocation10 + $0xb0] ss:$8 sps:$4 sm:$0xff]   ;;  %v7787_v56 = vld [vmem:[#allocation10 + $0xf4] ss:$8 sps:$4 sm:$0xff]  }
 0x226   :  { %v9527_v52 = vpack.c.bf16 %v9514_v35, %v9466_v11  ;;  %3493 = vmatprep.subr.bf16.mxu1 %v7760_v2  ;;  %3505 = vmatprep.mubr.bf16.mxu1 %v6222_v43  ;;  %v7790_v57 = vld [vmem:[#allocation10 + $0x5f4] ss:$8 sps:$4 sm:$0xff]   ;;  %v7785_v53 = vld [vmem:[#allocation10 + $0xf0] ss:$8 sps:$4 sm:$0xff]   ;;  %v7793_v41 = vld [vmem:[#allocation10 + $0x204] ss:$8 sps:$4 sm:$0xff]  }
 0x227   :  { %v9529_v7 = vmax.f32 %v1324_v47, 0.0  ;;  %2057 = vmatpush1.bf16.msra.mxu0 %v7755_v32  ;;  %3494 = vmatpush1.bf16.msra.mxu1 %v7758_v51  ;;  %v9532_v54 = vpack.c.bf16 %v9523_v33, %v1347_v45  ;;  %v7776_v45 = vld [vmem:[#allocation10 + $0x5d0] ss:$8 sps:$4 sm:$0xff]   ;;  %v7796_v2 = vld [vmem:[#allocation10 + $0x704] ss:$8 sps:$4 sm:$0xff]   ;;  %v6221_v32 = vcombine.low %v10830_v4, %v9277_v61 }
 0x228   :  { %2058 = vmatprep.subr.bf16.mxu0 %v7763_v30  ;;  %3495 = vmatprep.subr.bf16.mxu1 %v7766_v23  ;;  %v7788_v18 = vld [vmem:[#allocation10 + $0x5f0] ss:$8 sps:$4 sm:$0xff]   ;;  %v7791_v58 = vld [vmem:[#allocation10 + $0x200] ss:$8 sps:$4 sm:$0xff]   ;;  %v7799_v51 = vld [vmem:[#allocation10 + $0x214] ss:$8 sps:$4 sm:$0xff]  }
 0x229   :  { %10932 = vst [vmem:[#allocation17_spill] sm:$0xff] %v9532_v54  ;;  %v9535_v60 = vpack.c.bf16 %v9529_v7, %v1348_v49  ;;  %v7779_v49 = vld [vmem:[#allocation10 + $0xe0] ss:$8 sps:$4 sm:$0xff]   ;;  %v7802_v47 = vld [vmem:[#allocation10 + $0x714] ss:$8 sps:$4 sm:$0xff]  }
 0x22a   :  { %v7794_v43 = vld [vmem:[#allocation10 + $0x700] ss:$8 sps:$4 sm:$0xff]   ;;  %v7797_v30 = vld [vmem:[#allocation10 + $0x210] ss:$8 sps:$4 sm:$0xff]   ;;  %v9688_v4 = vld [vmem:[#allocation10 + $0x494] ss:$8 sps:$4 sm:$0xff]  }
 0x22b   :  { %10933 = vst [vmem:[#allocation18_spill] sm:$0xff] %v9535_v60  ;;  %2059 = vmatpush1.bf16.msra.mxu0 %v7761_v62  ;;  %3496 = vmatpush1.bf16.msra.mxu1 %v7764_v1  ;;  %v7800_v23 = vld [vmem:[#allocation10 + $0x710] ss:$8 sps:$4 sm:$0xff]   ;;  %v7805_v62 = vld [vmem:[#allocation10 + $0x224] ss:$8 sps:$4 sm:$0xff]   ;;  %10942 = vst [vmem:[#allocation28_spill] sm:$0xff] %v9688_v4 }
 0x22c   :  { %2060 = vmatprep.subr.bf16.mxu0 %v7769_v48  ;;  %3497 = vmatprep.subr.bf16.mxu1 %v7772_v8  ;;  %v7808_v1 = vld [vmem:[#allocation10 + $0x724] ss:$8 sps:$4 sm:$0xff]   ;;  %v7803_v61 = vld [vmem:[#allocation10 + $0x220] ss:$8 sps:$4 sm:$0xff]   ;;  %v7811_v8 = vld [vmem:[#allocation10 + $0x234] ss:$8 sps:$4 sm:$0xff]  }
 0x22d   :  { %v7806_v48 = vld [vmem:[#allocation10 + $0x720] ss:$8 sps:$4 sm:$0xff]   ;;  %v9694_v54 = vld [vmem:[#allocation10 + $0x490] ss:$8 sps:$4 sm:$0xff]  }
 0x22e   :  { %10944 = vst [vmem:[#allocation30_spill] sm:$0xff] %v9694_v54  ;;  %v9698_v60 = vld [vmem:[#allocation10 + $0x990] ss:$8 sps:$4 sm:$0xff]  }
 0x22f   :  { %2061 = vmatpush1.bf16.msra.mxu0 %v7767_v3  ;;  %3498 = vmatpush1.bf16.msra.mxu1 %v7770_v28  ;;  %v7814_v3 = vld [vmem:[#allocation10 + $0x734] ss:$8 sps:$4 sm:$0xff]   ;;  %v7809_v28 = vld [vmem:[#allocation10 + $0x230] ss:$8 sps:$4 sm:$0xff]   ;;  %10945 = vst [vmem:[#allocation31_spill] sm:$0xff] %v9698_v60 }
 0x230   :  { %2062 = vmatprep.subr.bf16.mxu0 %v7775_v55  ;;  %3499 = vmatprep.subr.bf16.mxu1 %v7778_v6  ;;  %v7812_v55 = vld [vmem:[#allocation10 + $0x730] ss:$8 sps:$4 sm:$0xff]   ;;  %v7817_v6 = vld [vmem:[#allocation10 + $0x244] ss:$8 sps:$4 sm:$0xff]  }
 0x233   :  { %2063 = vmatpush1.bf16.msra.mxu0 %v7773_v31  ;;  %3500 = vmatpush1.bf16.msra.mxu1 %v7776_v45  ;;  %v7820_v31 = vld [vmem:[#allocation10 + $0x744] ss:$8 sps:$4 sm:$0xff]   ;;  %v7815_v45 = vld [vmem:[#allocation10 + $0x240] ss:$8 sps:$4 sm:$0xff]  }
 0x234   :  { %2064 = vmatprep.subr.bf16.mxu0 %v7781_v17  ;;  %3501 = vmatprep.subr.bf16.mxu1 %v7784_v34  ;;  %v7818_v17 = vld [vmem:[#allocation10 + $0x740] ss:$8 sps:$4 sm:$0xff]   ;;  %v6767_v34 = vpack.c.bf16 %v9466_v11, %v9466_v11  ;;  %v6766_v11 = vpack.c.bf16 %v9461_v16, %v9461_v16 }
 0x235   :  { %v7839_v16 = vld [vmem:[#allocation10 + $0x280] ss:$8 sps:$4 sm:$0xff]  }
 0x237   :  { %2065 = vmatpush1.bf16.msra.mxu0 %v7779_v49  ;;  %3502 = vmatpush1.bf16.msra.mxu1 %v7782_v39  ;;  %v7823_v49 = vld [vmem:[#allocation10 + $0x254] ss:$8 sps:$4 sm:$0xff]  }
 0x238   :  { %2066 = vmatprep.subr.bf16.mxu0 %v7787_v56  ;;  %3503 = vmatprep.subr.bf16.mxu1 %v7790_v57  ;;  %v7826_v39 = vld [vmem:[#allocation10 + $0x754] ss:$8 sps:$4 sm:$0xff]   ;;  %v7821_v56 = vld [vmem:[#allocation10 + $0x250] ss:$8 sps:$4 sm:$0xff]  }
 0x239   :  { %v7824_v57 = vld [vmem:[#allocation10 + $0x750] ss:$8 sps:$4 sm:$0xff]  }
 0x23b   :  { %2067 = vmatpush1.bf16.msra.mxu0 %v7785_v53  ;;  %3504 = vmatpush1.bf16.msra.mxu1 %v7788_v18  ;;  %v7829_v53 = vld [vmem:[#allocation10 + $0x264] ss:$8 sps:$4 sm:$0xff]  }
 0x23c   :  { %2319 = vmatprep.subr.bf16.mxu0 %v7793_v41  ;;  %3737 = vmatprep.subr.bf16.mxu1 %v7796_v2  ;;  %v7832_v18 = vld [vmem:[#allocation10 + $0x764] ss:$8 sps:$4 sm:$0xff]   ;;  %v7827_v41 = vld [vmem:[#allocation10 + $0x260] ss:$8 sps:$4 sm:$0xff]  }
 0x23d   :  { %v7830_v2 = vld [vmem:[#allocation10 + $0x760] ss:$8 sps:$4 sm:$0xff]  }
 0x23e   :  { %2069 = vmatmul.mubr.bf16.vlgmr.msra.gmra.mrb[56].mxu0 %v6221_v32  ;;  %3506 = vmatmul.mubr.bf16.vlgmr.msra.gmra.mrb[56].mxu1 %v6221_v32  ;;  %v7838_v32 = vld [vmem:[#allocation10 + $0x774] ss:$8 sps:$4 sm:$0xff]  }
 0x23f   :  { %2078 = vmatprep.mubr.bf16.mxu0 %v9355_v25  ;;  %2320 = vmatpush1.bf16.msra.mxu0 %v7791_v58  ;;  %v7835_v58 = vld [vmem:[#allocation10 + $0x274] ss:$8 sps:$4 sm:$0xff]  }
 0x240   :  { %3515 = vmatprep.mubr.bf16.mxu1 %v9355_v25  ;;  %3738 = vmatpush1.bf16.msra.mxu1 %v7794_v43  ;;  %v7833_v43 = vld [vmem:[#allocation10 + $0x270] ss:$8 sps:$4 sm:$0xff]  }
 0x241   :  { %2321 = vmatprep.subr.bf16.mxu0 %v7799_v51  ;;  %3739 = vmatprep.subr.bf16.mxu1 %v7802_v47  ;;  %v7836_v51 = vld [vmem:[#allocation10 + $0x770] ss:$8 sps:$4 sm:$0xff]   ;;  %v7841_v47 = vld [vmem:[#allocation10 + $0x284] ss:$8 sps:$4 sm:$0xff]  }
 0x243   :  { %2322 = vmatpush1.bf16.msra.mxu0 %v7797_v30  ;;  %v7844_v30 = vld [vmem:[#allocation10 + $0x784] ss:$8 sps:$4 sm:$0xff]  }
 0x244   :  { %3740 = vmatpush1.bf16.msra.mxu1 %v7800_v23  ;;  %2323 = vmatprep.subr.bf16.mxu0 %v7805_v62  ;;  %v7842_v23 = vld [vmem:[#allocation10 + $0x780] ss:$8 sps:$4 sm:$0xff]   ;;  %v7847_v62 = vld [vmem:[#allocation10 + $0x294] ss:$8 sps:$4 sm:$0xff]  }
 0x245   :  { %3741 = vmatprep.subr.bf16.mxu1 %v7808_v1  ;;  %v7850_v1 = vld [vmem:[#allocation10 + $0x794] ss:$8 sps:$4 sm:$0xff]  }
 0x246   :  { %2079 = vmatmul.mubr.bf16.gmra.mrb[60].mxu0 %v9349_v42  ;;  %3516 = vmatmul.mubr.bf16.gmra.mrb[60].mxu1 %v9349_v42 }
 0x247   :  { %2088 = vmatprep.mubr.bf16.mxu0 %v9439_v50  ;;  %2324 = vmatpush1.bf16.msra.mxu0 %v7803_v61  ;;  %v7845_v61 = vld [vmem:[#allocation10 + $0x290] ss:$8 sps:$4 sm:$0xff]  }
 0x248   :  { %3525 = vmatprep.mubr.bf16.mxu1 %v9439_v50  ;;  %3742 = vmatpush1.bf16.msra.mxu1 %v7806_v48  ;;  %v7848_v48 = vld [vmem:[#allocation10 + $0x790] ss:$8 sps:$4 sm:$0xff]  }
 0x249   :  { %2325 = vmatprep.subr.bf16.mxu0 %v7811_v8  ;;  %3743 = vmatprep.subr.bf16.mxu1 %v7814_v3  ;;  %v7853_v8 = vld [vmem:[#allocation10 + $0x2a4] ss:$8 sps:$4 sm:$0xff]  }
 0x24a   :  { %v7856_v3 = vld [vmem:[#allocation10 + $0x7a4] ss:$8 sps:$4 sm:$0xff]  }
 0x24b   :  { %2326 = vmatpush1.bf16.msra.mxu0 %v7809_v28  ;;  %v7851_v28 = vld [vmem:[#allocation10 + $0x2a0] ss:$8 sps:$4 sm:$0xff]  }
 0x24c   :  { %3744 = vmatpush1.bf16.msra.mxu1 %v7812_v55  ;;  %2327 = vmatprep.subr.bf16.mxu0 %v7817_v6  ;;  %v7854_v55 = vld [vmem:[#allocation10 + $0x7a0] ss:$8 sps:$4 sm:$0xff]   ;;  %v7859_v6 = vld [vmem:[#allocation10 + $0x2b4] ss:$8 sps:$4 sm:$0xff]  }
 0x24d   :  { %3745 = vmatprep.subr.bf16.mxu1 %v7820_v31  ;;  %v7862_v31 = vld [vmem:[#allocation10 + $0x7b4] ss:$8 sps:$4 sm:$0xff]  }
 0x24e   :  { %2089 = vmatmul.mubr.bf16.gmra.mrb[64].mxu0 %v9431_v29  ;;  %3526 = vmatmul.mubr.bf16.gmra.mrb[64].mxu1 %v9431_v29 }
 0x24f   :  { %2098 = vmatprep.mubr.bf16.mxu0 %v6767_v34  ;;  %2328 = vmatpush1.bf16.msra.mxu0 %v7815_v45  ;;  %v7857_v45 = vld [vmem:[#allocation10 + $0x2b0] ss:$8 sps:$4 sm:$0xff]  }
 0x250   :  { %3535 = vmatprep.mubr.bf16.mxu1 %v6767_v34  ;;  %3746 = vmatpush1.bf16.msra.mxu1 %v7818_v17  ;;  %v7860_v17 = vld [vmem:[#allocation10 + $0x7b0] ss:$8 sps:$4 sm:$0xff]   ;;  %v7865_v34 = vld [vmem:[#allocation10 + $0x2c4] ss:$8 sps:$4 sm:$0xff]  }
 0x251   :  { %2329 = vmatprep.subr.bf16.mxu0 %v7823_v49  ;;  %3747 = vmatprep.subr.bf16.mxu1 %v7826_v39  ;;  %v7868_v49 = vld [vmem:[#allocation10 + $0x7c4] ss:$8 sps:$4 sm:$0xff]   ;;  %v7863_v39 = vld [vmem:[#allocation10 + $0x2c0] ss:$8 sps:$4 sm:$0xff]  }
 0x253   :  { %2330 = vmatpush1.bf16.msra.mxu0 %v7821_v56  ;;  %v7866_v56 = vld [vmem:[#allocation10 + $0x7c0] ss:$8 sps:$4 sm:$0xff]  }
 0x254   :  { %3748 = vmatpush1.bf16.msra.mxu1 %v7824_v57  ;;  %2331 = vmatprep.subr.bf16.mxu0 %v7829_v53  ;;  %v7871_v57 = vld [vmem:[#allocation10 + $0x2d4] ss:$8 sps:$4 sm:$0xff]  }
 0x255   :  { %3749 = vmatprep.subr.bf16.mxu1 %v7832_v18  ;;  %v7874_v53 = vld [vmem:[#allocation10 + $0x7d4] ss:$8 sps:$4 sm:$0xff]   ;;  %v7869_v18 = vld [vmem:[#allocation10 + $0x2d0] ss:$8 sps:$4 sm:$0xff]  }
 0x256   :  { %2099 = vmatmul.mubr.bf16.gmra.mrb[68].mxu0 %v6766_v11  ;;  %3536 = vmatmul.mubr.bf16.gmra.mrb[68].mxu1 %v6766_v11  ;;  %v7877_v11 = vld [vmem:[#allocation10 + $0x2e4] ss:$8 sps:$4 sm:$0xff]  }
 0x257   :  { %2332 = vmatpush1.bf16.msra.mxu0 %v7827_v41  ;;  %2351 = vmatprep.mubr.bf16.mxu0 %v9319_v13  ;;  %v7872_v41 = vld [vmem:[#allocation10 + $0x7d0] ss:$8 sps:$4 sm:$0xff]  }
 0x258   :  { %3750 = vmatpush1.bf16.msra.mxu1 %v7830_v2  ;;  %3769 = vmatprep.mubr.bf16.mxu1 %v9319_v13  ;;  %v7880_v2 = vld [vmem:[#allocation10 + $0x7e4] ss:$8 sps:$4 sm:$0xff]  }
 0x259   :  { %2333 = vmatprep.subr.bf16.mxu0 %v7835_v58  ;;  %3751 = vmatprep.subr.bf16.mxu1 %v7838_v32  ;;  %v7875_v58 = vld [vmem:[#allocation10 + $0x2e0] ss:$8 sps:$4 sm:$0xff]  }
 0x25a   :  { %v7878_v32 = vld [vmem:[#allocation10 + $0x7e0] ss:$8 sps:$4 sm:$0xff]  }
 0x25b   :  { %2334 = vmatpush1.bf16.msra.mxu0 %v7833_v43  ;;  %v7883_v43 = vld [vmem:[#allocation10 + $0x2f4] ss:$8 sps:$4 sm:$0xff]  }
 0x25c   :  { %3752 = vmatpush1.bf16.msra.mxu1 %v7836_v51  ;;  %2335 = vmatprep.subr.bf16.mxu0 %v7841_v47  ;;  %v7886_v51 = vld [vmem:[#allocation10 + $0x7f4] ss:$8 sps:$4 sm:$0xff]   ;;  %v7881_v47 = vld [vmem:[#allocation10 + $0x2f0] ss:$8 sps:$4 sm:$0xff]  }
 0x25d   :  { %3753 = vmatprep.subr.bf16.mxu1 %v7844_v30  ;;  %v7884_v30 = vld [vmem:[#allocation10 + $0x7f0] ss:$8 sps:$4 sm:$0xff]  }
 0x25f   :  { %2336 = vmatpush1.bf16.msra.mxu0 %v7839_v16  ;;  %v7889_v16 = vld [vmem:[#allocation10 + $0x304] ss:$8 sps:$4 sm:$0xff]  }
 0x260   :  { %3754 = vmatpush1.bf16.msra.mxu1 %v7842_v23  ;;  %2337 = vmatprep.subr.bf16.mxu0 %v7847_v62  ;;  %v7892_v23 = vld [vmem:[#allocation10 + $0x804] ss:$8 sps:$4 sm:$0xff]   ;;  %v7887_v62 = vld [vmem:[#allocation10 + $0x300] ss:$8 sps:$4 sm:$0xff]  }
 0x261   :  { %3755 = vmatprep.subr.bf16.mxu1 %v7850_v1  ;;  %v7890_v1 = vld [vmem:[#allocation10 + $0x800] ss:$8 sps:$4 sm:$0xff]  }
 0x263   :  { %2338 = vmatpush1.bf16.msra.mxu0 %v7845_v61  ;;  %v7895_v61 = vld [vmem:[#allocation10 + $0x314] ss:$8 sps:$4 sm:$0xff]  }
 0x264   :  { %3756 = vmatpush1.bf16.msra.mxu1 %v7848_v48  ;;  %2339 = vmatprep.subr.bf16.mxu0 %v7853_v8  ;;  %v7898_v48 = vld [vmem:[#allocation10 + $0x814] ss:$8 sps:$4 sm:$0xff]   ;;  %v7893_v8 = vld [vmem:[#allocation10 + $0x310] ss:$8 sps:$4 sm:$0xff]  }
 0x265   :  { %3757 = vmatprep.subr.bf16.mxu1 %v7856_v3  ;;  %v7896_v3 = vld [vmem:[#allocation10 + $0x810] ss:$8 sps:$4 sm:$0xff]  }
 0x267   :  { %2340 = vmatpush1.bf16.msra.mxu0 %v7851_v28  ;;  %v7901_v28 = vld [vmem:[#allocation10 + $0x324] ss:$8 sps:$4 sm:$0xff]  }
 0x268   :  { %3758 = vmatpush1.bf16.msra.mxu1 %v7854_v55  ;;  %2341 = vmatprep.subr.bf16.mxu0 %v7859_v6  ;;  %v7904_v55 = vld [vmem:[#allocation10 + $0x824] ss:$8 sps:$4 sm:$0xff]   ;;  %v7899_v6 = vld [vmem:[#allocation10 + $0x320] ss:$8 sps:$4 sm:$0xff]  }
 0x269   :  { %3759 = vmatprep.subr.bf16.mxu1 %v7862_v31  ;;  %v7902_v31 = vld [vmem:[#allocation10 + $0x820] ss:$8 sps:$4 sm:$0xff]  }
 0x26b   :  { %2342 = vmatpush1.bf16.msra.mxu0 %v7857_v45  ;;  %v7907_v45 = vld [vmem:[#allocation10 + $0x334] ss:$8 sps:$4 sm:$0xff]  }
 0x26c   :  { %3760 = vmatpush1.bf16.msra.mxu1 %v7860_v17  ;;  %2343 = vmatprep.subr.bf16.mxu0 %v7865_v34  ;;  %v7910_v17 = vld [vmem:[#allocation10 + $0x834] ss:$8 sps:$4 sm:$0xff]   ;;  %v7905_v34 = vld [vmem:[#allocation10 + $0x330] ss:$8 sps:$4 sm:$0xff]  }
 0x26d   :  { %3761 = vmatprep.subr.bf16.mxu1 %v7868_v49  ;;  %v7908_v49 = vld [vmem:[#allocation10 + $0x830] ss:$8 sps:$4 sm:$0xff]  }
 0x26f   :  { %2344 = vmatpush1.bf16.msra.mxu0 %v7863_v39  ;;  %v7913_v39 = vld [vmem:[#allocation10 + $0x344] ss:$8 sps:$4 sm:$0xff]  }
 0x270   :  { %3762 = vmatpush1.bf16.msra.mxu1 %v7866_v56  ;;  %2345 = vmatprep.subr.bf16.mxu0 %v7871_v57  ;;  %v7916_v56 = vld [vmem:[#allocation10 + $0x844] ss:$8 sps:$4 sm:$0xff]   ;;  %v7911_v57 = vld [vmem:[#allocation10 + $0x340] ss:$8 sps:$4 sm:$0xff]  }
 0x271   :  { %3763 = vmatprep.subr.bf16.mxu1 %v7874_v53  ;;  %v9563_v53 = vpack.c.bf16 %v9514_v35, %v9514_v35  ;;  %v7920_v35 = vld [vmem:[#allocation10 + $0x850] ss:$8 sps:$4 sm:$0xff]  }
 0x273   :  { %2346 = vmatpush1.bf16.msra.mxu0 %v7869_v18  ;;  %v7914_v18 = vld [vmem:[#allocation10 + $0x840] ss:$8 sps:$4 sm:$0xff]  }
 0x274   :  { %3764 = vmatpush1.bf16.msra.mxu1 %v7872_v41  ;;  %2347 = vmatprep.subr.bf16.mxu0 %v7877_v11  ;;  %v7919_v41 = vld [vmem:[#allocation10 + $0x354] ss:$8 sps:$4 sm:$0xff]  }
 0x275   :  { %3765 = vmatprep.subr.bf16.mxu1 %v7880_v2  ;;  %v7922_v11 = vld [vmem:[#allocation10 + $0x854] ss:$8 sps:$4 sm:$0xff]   ;;  %v7917_v2 = vld [vmem:[#allocation10 + $0x350] ss:$8 sps:$4 sm:$0xff]  }
 0x277   :  { %2348 = vmatpush1.bf16.msra.mxu0 %v7875_v58  ;;  %v7925_v58 = vld [vmem:[#allocation10 + $0x364] ss:$8 sps:$4 sm:$0xff]  }
 0x278   :  { %3766 = vmatpush1.bf16.msra.mxu1 %v7878_v32  ;;  %2349 = vmatprep.subr.bf16.mxu0 %v7883_v43  ;;  %v7928_v32 = vld [vmem:[#allocation10 + $0x864] ss:$8 sps:$4 sm:$0xff]   ;;  %v9571_v43 = vpack.c.bf16 %v9507_v21, %v9507_v21  ;;  %v7932_v21 = vld [vmem:[#allocation10 + $0x870] ss:$8 sps:$4 sm:$0xff]  }
 0x279   :  { %3767 = vmatprep.subr.bf16.mxu1 %v7886_v51  ;;  %v7923_v51 = vld [vmem:[#allocation10 + $0x360] ss:$8 sps:$4 sm:$0xff]  }
 0x27b   :  { %2350 = vmatpush1.bf16.msra.mxu0 %v7881_v47  ;;  %v7926_v47 = vld [vmem:[#allocation10 + $0x860] ss:$8 sps:$4 sm:$0xff]  }
 0x27c   :  { %3768 = vmatpush1.bf16.msra.mxu1 %v7884_v30  ;;  %2616 = vmatprep.subr.bf16.mxu0 %v7889_v16  ;;  %v7931_v30 = vld [vmem:[#allocation10 + $0x374] ss:$8 sps:$4 sm:$0xff]  }
 0x27d   :  { %4015 = vmatprep.subr.bf16.mxu1 %v7892_v23  ;;  %v7934_v16 = vld [vmem:[#allocation10 + $0x874] ss:$8 sps:$4 sm:$0xff]   ;;  %v7929_v23 = vld [vmem:[#allocation10 + $0x370] ss:$8 sps:$4 sm:$0xff]  }
 0x27e   :  { %2352 = vmatmul.mubr.bf16.vlgmr.msra.gmra.mrb[56].mxu0 %v9311_v44 }
 0x27f   :  { %3770 = vmatmul.mubr.bf16.vlgmr.msra.gmra.mrb[56].mxu1 %v9311_v44  ;;  %2361 = vmatprep.mubr.bf16.mxu0 %v9397_v63 }
 0x280   :  { %2617 = vmatpush1.bf16.msra.mxu0 %v7887_v62  ;;  %3779 = vmatprep.mubr.bf16.mxu1 %v9397_v63  ;;  %v7937_v62 = vld [vmem:[#allocation10 + $0x384] ss:$8 sps:$4 sm:$0xff]  }
 0x281   :  { %4016 = vmatpush1.bf16.msra.mxu1 %v7890_v1  ;;  %2618 = vmatprep.subr.bf16.mxu0 %v7895_v61  ;;  %v7940_v1 = vld [vmem:[#allocation10 + $0x884] ss:$8 sps:$4 sm:$0xff]   ;;  %v7935_v61 = vld [vmem:[#allocation10 + $0x380] ss:$8 sps:$4 sm:$0xff]  }
 0x282   :  { %4017 = vmatprep.subr.bf16.mxu1 %v7898_v48  ;;  %v7938_v48 = vld [vmem:[#allocation10 + $0x880] ss:$8 sps:$4 sm:$0xff]  }
 0x284   :  { %2619 = vmatpush1.bf16.msra.mxu0 %v7893_v8  ;;  %v7943_v8 = vld [vmem:[#allocation10 + $0x394] ss:$8 sps:$4 sm:$0xff]  }
 0x285   :  { %4018 = vmatpush1.bf16.msra.mxu1 %v7896_v3  ;;  %2620 = vmatprep.subr.bf16.mxu0 %v7901_v28  ;;  %v7946_v3 = vld [vmem:[#allocation10 + $0x894] ss:$8 sps:$4 sm:$0xff]   ;;  %v7941_v28 = vld [vmem:[#allocation10 + $0x390] ss:$8 sps:$4 sm:$0xff]  }
 0x286   :  { %2362 = vmatmul.mubr.bf16.gmra.mrb[60].mxu0 %v9391_v24  ;;  %4019 = vmatprep.subr.bf16.mxu1 %v7904_v55  ;;  %v7944_v55 = vld [vmem:[#allocation10 + $0x890] ss:$8 sps:$4 sm:$0xff]  }
 0x287   :  { %3780 = vmatmul.mubr.bf16.gmra.mrb[60].mxu1 %v9391_v24  ;;  %2371 = vmatprep.mubr.bf16.mxu0 %v9485_v36 }
 0x288   :  { %2621 = vmatpush1.bf16.msra.mxu0 %v7899_v6  ;;  %3789 = vmatprep.mubr.bf16.mxu1 %v9485_v36  ;;  %v7949_v6 = vld [vmem:[#allocation10 + $0x3a4] ss:$8 sps:$4 sm:$0xff]  }
 0x289   :  { %4020 = vmatpush1.bf16.msra.mxu1 %v7902_v31  ;;  %2622 = vmatprep.subr.bf16.mxu0 %v7907_v45  ;;  %v7952_v31 = vld [vmem:[#allocation10 + $0x8a4] ss:$8 sps:$4 sm:$0xff]   ;;  %v7947_v45 = vld [vmem:[#allocation10 + $0x3a0] ss:$8 sps:$4 sm:$0xff]  }
 0x28a   :  { %4021 = vmatprep.subr.bf16.mxu1 %v7910_v17  ;;  %v7950_v17 = vld [vmem:[#allocation10 + $0x8a0] ss:$8 sps:$4 sm:$0xff]  }
 0x28c   :  { %2623 = vmatpush1.bf16.msra.mxu0 %v7905_v34  ;;  %v7955_v34 = vld [vmem:[#allocation10 + $0x3b4] ss:$8 sps:$4 sm:$0xff]  }
 0x28d   :  { %4022 = vmatpush1.bf16.msra.mxu1 %v7908_v49  ;;  %2624 = vmatprep.subr.bf16.mxu0 %v7913_v39  ;;  %v7958_v49 = vld [vmem:[#allocation10 + $0x8b4] ss:$8 sps:$4 sm:$0xff]   ;;  %v7953_v39 = vld [vmem:[#allocation10 + $0x3b0] ss:$8 sps:$4 sm:$0xff]  }
 0x28e   :  { %2372 = vmatmul.mubr.bf16.gmra.mrb[64].mxu0 %v9477_v38  ;;  %4023 = vmatprep.subr.bf16.mxu1 %v7916_v56  ;;  %v7956_v56 = vld [vmem:[#allocation10 + $0x8b0] ss:$8 sps:$4 sm:$0xff]  }
 0x28f   :  { %3790 = vmatmul.mubr.bf16.gmra.mrb[64].mxu1 %v9477_v38  ;;  %2381 = vmatprep.mubr.bf16.mxu0 %v9563_v53 }
 0x290   :  { %2625 = vmatpush1.bf16.msra.mxu0 %v7911_v57  ;;  %3799 = vmatprep.mubr.bf16.mxu1 %v9563_v53  ;;  %v7961_v57 = vld [vmem:[#allocation10 + $0x3c4] ss:$8 sps:$4 sm:$0xff]  }
 0x291   :  { %4024 = vmatpush1.bf16.msra.mxu1 %v7914_v18  ;;  %2626 = vmatprep.subr.bf16.mxu0 %v7919_v41  ;;  %v7964_v18 = vld [vmem:[#allocation10 + $0x8c4] ss:$8 sps:$4 sm:$0xff]   ;;  %v7959_v41 = vld [vmem:[#allocation10 + $0x3c0] ss:$8 sps:$4 sm:$0xff]  }
 0x292   :  { %4025 = vmatprep.subr.bf16.mxu1 %v7922_v11  ;;  %v7962_v11 = vld [vmem:[#allocation10 + $0x8c0] ss:$8 sps:$4 sm:$0xff]  }
 0x294   :  { %2627 = vmatpush1.bf16.msra.mxu0 %v7917_v2  ;;  %v7967_v2 = vld [vmem:[#allocation10 + $0x3d4] ss:$8 sps:$4 sm:$0xff]  }
 0x295   :  { %4026 = vmatpush1.bf16.msra.mxu1 %v7920_v35  ;;  %2628 = vmatprep.subr.bf16.mxu0 %v7925_v58  ;;  %v7970_v35 = vld [vmem:[#allocation10 + $0x8d4] ss:$8 sps:$4 sm:$0xff]   ;;  %v7965_v58 = vld [vmem:[#allocation10 + $0x3d0] ss:$8 sps:$4 sm:$0xff]  }
 0x296   :  { %2382 = vmatmul.mubr.bf16.gmra.mrb[68].mxu0 %v9571_v43  ;;  %4027 = vmatprep.subr.bf16.mxu1 %v7928_v32  ;;  %v7968_v32 = vld [vmem:[#allocation10 + $0x8d0] ss:$8 sps:$4 sm:$0xff]  }
 0x297   :  { %3800 = vmatmul.mubr.bf16.gmra.mrb[68].mxu1 %v9571_v43  ;;  %2648 = vmatprep.mubr.bf16.mxu0 %v9330_v37 }
 0x298   :  { %2629 = vmatpush1.bf16.msra.mxu0 %v7923_v51  ;;  %4047 = vmatprep.mubr.bf16.mxu1 %v9330_v37  ;;  %v7973_v51 = vld [vmem:[#allocation10 + $0x3e4] ss:$8 sps:$4 sm:$0xff]  }
 0x299   :  { %4028 = vmatpush1.bf16.msra.mxu1 %v7926_v47  ;;  %2630 = vmatprep.subr.bf16.mxu0 %v7931_v30  ;;  %v7976_v47 = vld [vmem:[#allocation10 + $0x8e4] ss:$8 sps:$4 sm:$0xff]   ;;  %v7971_v30 = vld [vmem:[#allocation10 + $0x3e0] ss:$8 sps:$4 sm:$0xff]  }
 0x29a   :  { %4029 = vmatprep.subr.bf16.mxu1 %v7934_v16  ;;  %v7974_v16 = vld [vmem:[#allocation10 + $0x8e0] ss:$8 sps:$4 sm:$0xff]  }
 0x29c   :  { %2631 = vmatpush1.bf16.msra.mxu0 %v7929_v23  ;;  %v7979_v23 = vld [vmem:[#allocation10 + $0x3f4] ss:$8 sps:$4 sm:$0xff]  }
 0x29d   :  { %4030 = vmatpush1.bf16.msra.mxu1 %v7932_v21  ;;  %2632 = vmatprep.subr.bf16.mxu0 %v7937_v62  ;;  %v7982_v21 = vld [vmem:[#allocation10 + $0x8f4] ss:$8 sps:$4 sm:$0xff]   ;;  %v7977_v62 = vld [vmem:[#allocation10 + $0x3f0] ss:$8 sps:$4 sm:$0xff]  }
 0x29e   :  { %4031 = vmatprep.subr.bf16.mxu1 %v7940_v1  ;;  %v7980_v1 = vld [vmem:[#allocation10 + $0x8f0] ss:$8 sps:$4 sm:$0xff]  }
 0x2a0   :  { %2633 = vmatpush1.bf16.msra.mxu0 %v7935_v61  ;;  %v7985_v61 = vld [vmem:[#allocation10 + $0x404] ss:$8 sps:$4 sm:$0xff]  }
 0x2a1   :  { %4032 = vmatpush1.bf16.msra.mxu1 %v7938_v48  ;;  %2634 = vmatprep.subr.bf16.mxu0 %v7943_v8  ;;  %v7988_v48 = vld [vmem:[#allocation10 + $0x904] ss:$8 sps:$4 sm:$0xff]   ;;  %v7983_v8 = vld [vmem:[#allocation10 + $0x400] ss:$8 sps:$4 sm:$0xff]  }
 0x2a2   :  { %4033 = vmatprep.subr.bf16.mxu1 %v7946_v3  ;;  %v7986_v3 = vld [vmem:[#allocation10 + $0x900] ss:$8 sps:$4 sm:$0xff]  }
 0x2a4   :  { %2635 = vmatpush1.bf16.msra.mxu0 %v7941_v28  ;;  %v7991_v28 = vld [vmem:[#allocation10 + $0x414] ss:$8 sps:$4 sm:$0xff]  }
 0x2a5   :  { %4034 = vmatpush1.bf16.msra.mxu1 %v7944_v55  ;;  %2636 = vmatprep.subr.bf16.mxu0 %v7949_v6  ;;  %v7994_v55 = vld [vmem:[#allocation10 + $0x914] ss:$8 sps:$4 sm:$0xff]   ;;  %v9581_v6 = vld [vmem:[#allocation10 + $0x410] ss:$8 sps:$4 sm:$0xff]  }
 0x2a6   :  { %4035 = vmatprep.subr.bf16.mxu1 %v7952_v31  ;;  %v9583_v31 = vld [vmem:[#allocation10 + $0x910] ss:$8 sps:$4 sm:$0xff]  }
 0x2a8   :  { %2637 = vmatpush1.bf16.msra.mxu0 %v7947_v45  ;;  %v9585_v45 = vld [vmem:[#allocation10 + $0x424] ss:$8 sps:$4 sm:$0xff]  }
 0x2a9   :  { %4036 = vmatpush1.bf16.msra.mxu1 %v7950_v17  ;;  %2638 = vmatprep.subr.bf16.mxu0 %v7955_v34  ;;  %v9587_v17 = vld [vmem:[#allocation10 + $0x924] ss:$8 sps:$4 sm:$0xff]   ;;  %v9590_v34 = vld [vmem:[#allocation10 + $0x420] ss:$8 sps:$4 sm:$0xff]  }
 0x2aa   :  { %4037 = vmatprep.subr.bf16.mxu1 %v7958_v49  ;;  %v9594_v49 = vld [vmem:[#allocation10 + $0x920] ss:$8 sps:$4 sm:$0xff]  }
 0x2ac   :  { %2639 = vmatpush1.bf16.msra.mxu0 %v7953_v39  ;;  %v9596_v39 = vld [vmem:[#allocation10 + $0x434] ss:$8 sps:$4 sm:$0xff]  }
 0x2ad   :  { %4038 = vmatpush1.bf16.msra.mxu1 %v7956_v56  ;;  %2640 = vmatprep.subr.bf16.mxu0 %v7961_v57  ;;  %v9600_v56 = vld [vmem:[#allocation10 + $0x934] ss:$8 sps:$4 sm:$0xff]   ;;  %v9606_v57 = vld [vmem:[#allocation10 + $0x430] ss:$8 sps:$4 sm:$0xff]  }
 0x2ae   :  { %4039 = vmatprep.subr.bf16.mxu1 %v7964_v18  ;;  %v9610_v18 = vld [vmem:[#allocation10 + $0x930] ss:$8 sps:$4 sm:$0xff]  }
 0x2b0   :  { %2641 = vmatpush1.bf16.msra.mxu0 %v7959_v41  ;;  %v9612_v41 = vld [vmem:[#allocation10 + $0x444] ss:$8 sps:$4 sm:$0xff]  }
 0x2b1   :  { %4040 = vmatpush1.bf16.msra.mxu1 %v7962_v11  ;;  %2642 = vmatprep.subr.bf16.mxu0 %v7967_v2  ;;  %v9615_v11 = vld [vmem:[#allocation10 + $0x944] ss:$8 sps:$4 sm:$0xff]   ;;  %v9618_v2 = vld [vmem:[#allocation10 + $0x440] ss:$8 sps:$4 sm:$0xff]  }
 0x2b2   :  { %4041 = vmatprep.subr.bf16.mxu1 %v7970_v35  ;;  %v9622_v35 = vpack.c.bf16 %v9529_v7, %v9529_v7  ;;  %v9638_v7 = vld [vmem:[#allocation10 + $0x450] ss:$8 sps:$4 sm:$0xff]  }
 0x2b4   :  { %2643 = vmatpush1.bf16.msra.mxu0 %v7965_v58  ;;  %v9626_v58 = vld [vmem:[#allocation10 + $0x940] ss:$8 sps:$4 sm:$0xff]  }
 0x2b5   :  { %4042 = vmatpush1.bf16.msra.mxu1 %v7968_v32  ;;  %2644 = vmatprep.subr.bf16.mxu0 %v7973_v51  ;;  %v9628_v32 = vld [vmem:[#allocation10 + $0x454] ss:$8 sps:$4 sm:$0xff]  }
 0x2b6   :  { %4043 = vmatprep.subr.bf16.mxu1 %v7976_v47  ;;  %v9632_v51 = vld [vmem:[#allocation10 + $0x954] ss:$8 sps:$4 sm:$0xff]   ;;  %v9642_v47 = vld [vmem:[#allocation10 + $0x950] ss:$8 sps:$4 sm:$0xff]  }
 0x2b8   :  { %2645 = vmatpush1.bf16.msra.mxu0 %v7971_v30  ;;  %v9644_v30 = vld [vmem:[#allocation10 + $0x464] ss:$8 sps:$4 sm:$0xff]  }
 0x2b9   :  { %4044 = vmatpush1.bf16.msra.mxu1 %v7974_v16  ;;  %2646 = vmatprep.subr.bf16.mxu0 %v7979_v23  ;;  %v9647_v16 = vld [vmem:[#allocation10 + $0x964] ss:$8 sps:$4 sm:$0xff]   ;;  %v9651_v23 = vpack.c.bf16 %v9523_v33, %v9523_v33  ;;  %v9670_v33 = vld [vmem:[#allocation10 + $0x470] ss:$8 sps:$4 sm:$0xff]  }
 0x2ba   :  { %4045 = vmatprep.subr.bf16.mxu1 %v7982_v21  ;;  %v9654_v21 = vld [vmem:[#allocation10 + $0x460] ss:$8 sps:$4 sm:$0xff]   ;;  %10936 = vst [vmem:[#allocation21_spill] sm:$0xff] %v9670_v33 }
 0x2bc   :  { %2647 = vmatpush1.bf16.msra.mxu0 %v7977_v62  ;;  %v9658_v62 = vld [vmem:[#allocation10 + $0x960] ss:$8 sps:$4 sm:$0xff]  }
 0x2bd   :  { %4046 = vmatpush1.bf16.msra.mxu1 %v7980_v1  ;;  %2931 = vmatprep.subr.bf16.mxu0 %v7985_v61  ;;  %v9660_v1 = vld [vmem:[#allocation10 + $0x474] ss:$8 sps:$4 sm:$0xff]  }
 0x2be   :  { %4293 = vmatprep.subr.bf16.mxu1 %v7988_v48  ;;  %10934 = vst [vmem:[#allocation19_spill] sm:$0xff] %v9660_v1  ;;  %v9664_v61 = vld [vmem:[#allocation10 + $0x974] ss:$8 sps:$4 sm:$0xff]   ;;  %v9674_v48 = vld [vmem:[#allocation10 + $0x970] ss:$8 sps:$4 sm:$0xff]  }
 0x2bf   :  { %2649 = vmatmul.mubr.bf16.vlgmr.msra.gmra.mrb[56].mxu0 %v9325_v27  ;;  %10935 = vst [vmem:[#allocation20_spill] sm:$0xff] %v9664_v61  ;;  %10937 = vst [vmem:[#allocation22_spill] sm:$0xff] %v9674_v48 }
 0x2c0   :  { %4048 = vmatmul.mubr.bf16.vlgmr.msra.gmra.mrb[56].mxu1 %v9325_v27  ;;  %2658 = vmatprep.mubr.bf16.mxu0 %v9410_v5 }
 0x2c1   :  { %2932 = vmatpush1.bf16.msra.mxu0 %v7983_v8  ;;  %4057 = vmatprep.mubr.bf16.mxu1 %v9410_v5  ;;  %v9676_v8 = vld [vmem:[#allocation10 + $0x484] ss:$8 sps:$4 sm:$0xff]  }
 0x2c2   :  { %4294 = vmatpush1.bf16.msra.mxu1 %v7986_v3  ;;  %2933 = vmatprep.subr.bf16.mxu0 %v7991_v28  ;;  %10938 = vst [vmem:[#allocation23_spill] sm:$0xff] %v9676_v8  ;;  %v9679_v3 = vld [vmem:[#allocation10 + $0x984] ss:$8 sps:$4 sm:$0xff]   ;;  %v9682_v28 = vld [vmem:[#allocation10 + $0x480] ss:$8 sps:$4 sm:$0xff]  }
 0x2c3   :  { %4295 = vmatprep.subr.bf16.mxu1 %v7994_v55  ;;  %10939 = vst [vmem:[#allocation25_spill] sm:$0xff] %v9679_v3  ;;  %10940 = vst [vmem:[#allocation26_spill] sm:$0xff] %v9682_v28  ;;  %v9686_v55 = vld [vmem:[#allocation10 + $0x980] ss:$8 sps:$4 sm:$0xff]  }
 0x2c4   :  { %10941 = vst [vmem:[#allocation27_spill] sm:$0xff] %v9686_v55 }
 0x2c5   :  { %2934 = vmatpush1.bf16.msra.mxu0 %v9581_v6 }
 0x2c6   :  { %4296 = vmatpush1.bf16.msra.mxu1 %v9583_v31  ;;  %2935 = vmatprep.subr.bf16.mxu0 %v9585_v45 }
 0x2c7   :  { %2659 = vmatmul.mubr.bf16.gmra.mrb[60].mxu0 %v9403_v0  ;;  %4297 = vmatprep.subr.bf16.mxu1 %v9587_v17 }
 0x2c8   :  { %4058 = vmatmul.mubr.bf16.gmra.mrb[60].mxu1 %v9403_v0  ;;  %2668 = vmatprep.mubr.bf16.mxu0 %v9497_v10 }
 0x2c9   :  { %2936 = vmatpush1.bf16.msra.mxu0 %v9590_v34  ;;  %4067 = vmatprep.mubr.bf16.mxu1 %v9497_v10 }
 0x2ca   :  { %4298 = vmatpush1.bf16.msra.mxu1 %v9594_v49  ;;  %2937 = vmatprep.subr.bf16.mxu0 %v9596_v39 }
 0x2cb   :  { %4299 = vmatprep.subr.bf16.mxu1 %v9600_v56 }
 0x2cd   :  { %2938 = vmatpush1.bf16.msra.mxu0 %v9606_v57 }
 0x2ce   :  { %4300 = vmatpush1.bf16.msra.mxu1 %v9610_v18  ;;  %2939 = vmatprep.subr.bf16.mxu0 %v9612_v41 }
 0x2cf   :  { %2669 = vmatmul.mubr.bf16.gmra.mrb[64].mxu0 %v9502_v22  ;;  %4301 = vmatprep.subr.bf16.mxu1 %v9615_v11 }
 0x2d0   :  { %4068 = vmatmul.mubr.bf16.gmra.mrb[64].mxu1 %v9502_v22  ;;  %2678 = vmatprep.mubr.bf16.mxu0 %v9622_v35 }
 0x2d1   :  { %2940 = vmatpush1.bf16.msra.mxu0 %v9618_v2  ;;  %4077 = vmatprep.mubr.bf16.mxu1 %v9622_v35 }
 0x2d2   :  { %4302 = vmatpush1.bf16.msra.mxu1 %v9626_v58  ;;  %2941 = vmatprep.subr.bf16.mxu0 %v9628_v32 }
 0x2d3   :  { %4303 = vmatprep.subr.bf16.mxu1 %v9632_v51 }
 0x2d5   :  { %2942 = vmatpush1.bf16.msra.mxu0 %v9638_v7 }
 0x2d6   :  { %4304 = vmatpush1.bf16.msra.mxu1 %v9642_v47  ;;  %2943 = vmatprep.subr.bf16.mxu0 %v9644_v30 }
 0x2d7   :  { %2679 = vmatmul.mubr.bf16.gmra.mrb[68].mxu0 %v9651_v23  ;;  %4305 = vmatprep.subr.bf16.mxu1 %v9647_v16 }
 0x2d8   :  { %4078 = vmatmul.mubr.bf16.gmra.mrb[68].mxu1 %v9651_v23  ;;  %2963 = vmatprep.mubr.bf16.mxu0 %v9355_v25 }
 0x2d9   :  { %2944 = vmatpush1.bf16.msra.mxu0 %v9654_v21  ;;  %4325 = vmatprep.mubr.bf16.mxu1 %v9355_v25 }
 0x2da   :  { %4306 = vmatpush1.bf16.msra.mxu1 %v9658_v62  ;;  %2945 = vmatprep.subr.bf16.mxu0 %v9660_v1  ;;  %v8130_v1 = vld [vmem:[#allocation10 + $0x680] ss:$8 sps:$4 sm:$0xff]  }
 0x2db   :  { %4307 = vmatprep.subr.bf16.mxu1 %v9664_v61  ;;  %v8129_v61 = vld [vmem:[#allocation10 + $0x180] ss:$8 sps:$4 sm:$0xff]  }
 0x2dd   :  { %2946 = vmatpush1.bf16.msra.mxu0 %v9670_v33  ;;  %v8112_v33 = vld [vmem:[#allocation10 + $0x644] ss:$8 sps:$4 sm:$0xff]  }
 0x2de   :  { %4308 = vmatpush1.bf16.msra.mxu1 %v9674_v48  ;;  %2947 = vmatprep.subr.bf16.mxu0 %v9676_v8  ;;  %v9700_v48 = vld [vmem:[#allocation10 + $0x4a4] ss:$8 sps:$4 sm:$0xff]  }
 0x2df   :  { %4309 = vmatprep.subr.bf16.mxu1 %v9679_v3  ;;  %10946 = vst [vmem:[#allocation32_spill] sm:$0xff] %v9700_v48  ;;  %v9703_v8 = vld [vmem:[#allocation10 + $0x9a4] ss:$8 sps:$4 sm:$0xff]   ;;  %v9706_v3 = vld [vmem:[#allocation10 + $0x4a0] ss:$8 sps:$4 sm:$0xff]  }
 0x2e0   :  { %10947 = vst [vmem:[#allocation33_spill] sm:$0xff] %v9703_v8  ;;  %10948 = vst [vmem:[#allocation34_spill] sm:$0xff] %v9706_v3 }
 0x2e1   :  { %2948 = vmatpush1.bf16.msra.mxu0 %v9682_v28  ;;  %v9710_v28 = vld [vmem:[#allocation10 + $0x9a0] ss:$8 sps:$4 sm:$0xff]  }
 0x2e2   :  { %4310 = vmatpush1.bf16.msra.mxu1 %v9686_v55  ;;  %2949 = vmatprep.subr.bf16.mxu0 %v9688_v4  ;;  %10949 = vst [vmem:[#allocation35_spill] sm:$0xff] %v9710_v28  ;;  %v9712_v55 = vld [vmem:[#allocation10 + $0x4b4] ss:$8 sps:$4 sm:$0xff]  }
 0x2e3   :  { %4311 = vmatprep.subr.bf16.mxu1 %v9691_v19  ;;  %10950 = vst [vmem:[#allocation36_spill] sm:$0xff] %v9712_v55  ;;  %v9715_v4 = vld [vmem:[#allocation10 + $0x9b4] ss:$8 sps:$4 sm:$0xff]   ;;  %v9718_v19 = vld [vmem:[#allocation10 + $0x4b0] ss:$8 sps:$4 sm:$0xff]  }
 0x2e4   :  { %10951 = vst [vmem:[#allocation37_spill] sm:$0xff] %v9715_v4  ;;  %10952 = vst [vmem:[#allocation38_spill] sm:$0xff] %v9718_v19 }
 0x2e5   :  { %2950 = vmatpush1.bf16.msra.mxu0 %v9694_v54  ;;  %v9722_v54 = vld [vmem:[#allocation10 + $0x9b0] ss:$8 sps:$4 sm:$0xff]  }
 0x2e6   :  { %4312 = vmatpush1.bf16.msra.mxu1 %v9698_v60  ;;  %2951 = vmatprep.subr.bf16.mxu0 %v9700_v48  ;;  %10953 = vst [vmem:[#allocation39_spill] sm:$0xff] %v9722_v54  ;;  %v9724_v60 = vld [vmem:[#allocation10 + $0x4c4] ss:$8 sps:$4 sm:$0xff]  }
 0x2e7   :  { %4313 = vmatprep.subr.bf16.mxu1 %v9703_v8  ;;  %10954 = vst [vmem:[#allocation40_spill] sm:$0xff] %v9724_v60  ;;  %v9727_v48 = vld [vmem:[#allocation10 + $0x9c4] ss:$8 sps:$4 sm:$0xff]   ;;  %v9730_v8 = vld [vmem:[#allocation10 + $0x4c0] ss:$8 sps:$4 sm:$0xff]  }
 0x2e8   :  { %10955 = vst [vmem:[#allocation41_spill] sm:$0xff] %v9727_v48  ;;  %10956 = vst [vmem:[#allocation42_spill] sm:$0xff] %v9730_v8 }
 0x2e9   :  { %2952 = vmatpush1.bf16.msra.mxu0 %v9706_v3  ;;  %v9734_v3 = vld [vmem:[#allocation10 + $0x9c0] ss:$8 sps:$4 sm:$0xff]  }
 0x2ea   :  { %4314 = vmatpush1.bf16.msra.mxu1 %v9710_v28  ;;  %2953 = vmatprep.subr.bf16.mxu0 %v9712_v55  ;;  %10957 = vst [vmem:[#allocation43_spill] sm:$0xff] %v9734_v3  ;;  %v9736_v28 = vld [vmem:[#allocation10 + $0x4d4] ss:$8 sps:$4 sm:$0xff]  }
 0x2eb   :  { %4315 = vmatprep.subr.bf16.mxu1 %v9715_v4  ;;  %10958 = vst [vmem:[#allocation44_spill] sm:$0xff] %v9736_v28  ;;  %v9739_v55 = vld [vmem:[#allocation10 + $0x9d4] ss:$8 sps:$4 sm:$0xff]   ;;  %v9742_v4 = vld [vmem:[#allocation10 + $0x4d0] ss:$8 sps:$4 sm:$0xff]  }
 0x2ec   :  { %10959 = vst [vmem:[#allocation45_spill] sm:$0xff] %v9739_v55  ;;  %10960 = vst [vmem:[#allocation46_spill] sm:$0xff] %v9742_v4 }
 0x2ed   :  { %2954 = vmatpush1.bf16.msra.mxu0 %v9718_v19  ;;  %v9746_v19 = vld [vmem:[#allocation10 + $0x9d0] ss:$8 sps:$4 sm:$0xff]  }
 0x2ee   :  { %4316 = vmatpush1.bf16.msra.mxu1 %v9722_v54  ;;  %2955 = vmatprep.subr.bf16.mxu0 %v9724_v60  ;;  %10961 = vst [vmem:[#allocation47_spill] sm:$0xff] %v9746_v19  ;;  %v9748_v54 = vld [vmem:[#allocation10 + $0x4e4] ss:$8 sps:$4 sm:$0xff]  }
 0x2ef   :  { %4317 = vmatprep.subr.bf16.mxu1 %v9727_v48  ;;  %10962 = vst [vmem:[#allocation48_spill] sm:$0xff] %v9748_v54  ;;  %v9751_v60 = vld [vmem:[#allocation10 + $0x9e4] ss:$8 sps:$4 sm:$0xff]   ;;  %v9754_v48 = vld [vmem:[#allocation10 + $0x4e0] ss:$8 sps:$4 sm:$0xff]  }
 0x2f0   :  { %10963 = vst [vmem:[#allocation49_spill] sm:$0xff] %v9751_v60  ;;  %10964 = vst [vmem:[#allocation50_spill] sm:$0xff] %v9754_v48 }
 0x2f1   :  { %2956 = vmatpush1.bf16.msra.mxu0 %v9730_v8  ;;  %v9758_v8 = vld [vmem:[#allocation10 + $0x9e0] ss:$8 sps:$4 sm:$0xff]  }
 0x2f2   :  { %4318 = vmatpush1.bf16.msra.mxu1 %v9734_v3  ;;  %2957 = vmatprep.subr.bf16.mxu0 %v9736_v28  ;;  %10965 = vst [vmem:[#allocation51_spill] sm:$0xff] %v9758_v8  ;;  %v9760_v3 = vld [vmem:[#allocation10 + $0x4f4] ss:$8 sps:$4 sm:$0xff]  }
 0x2f3   :  { %4319 = vmatprep.subr.bf16.mxu1 %v9739_v55  ;;  %10966 = vst [vmem:[#allocation52_spill] sm:$0xff] %v9760_v3  ;;  %v9763_v28 = vld [vmem:[#allocation10 + $0x9f4] ss:$8 sps:$4 sm:$0xff]   ;;  %v9766_v55 = vld [vmem:[#allocation10 + $0x4f0] ss:$8 sps:$4 sm:$0xff]  }
 0x2f4   :  { %10967 = vst [vmem:[#allocation53_spill] sm:$0xff] %v9763_v28  ;;  %10968 = vst [vmem:[#allocation54_spill] sm:$0xff] %v9766_v55 }
 0x2f5   :  { %2958 = vmatpush1.bf16.msra.mxu0 %v9742_v4  ;;  %v9770_v4 = vld [vmem:[#allocation10 + $0x9f0] ss:$8 sps:$4 sm:$0xff]  }
 0x2f6   :  { %4320 = vmatpush1.bf16.msra.mxu1 %v9746_v19  ;;  %2959 = vmatprep.subr.bf16.mxu0 %v9748_v54  ;;  %10969 = vst [vmem:[#allocation55_spill] sm:$0xff] %v9770_v4  ;;  %v8095_v54 = vld [vmem:[#allocation10 + $0x104] ss:$8 sps:$4 sm:$0xff]  }
 0x2f7   :  { %4321 = vmatprep.subr.bf16.mxu1 %v9751_v60  ;;  %v8096_v60 = vld [vmem:[#allocation10 + $0x604] ss:$8 sps:$4 sm:$0xff]  }
 0x2f8   :  { %v8111_v19 = vld [vmem:[#allocation10 + $0x144] ss:$8 sps:$4 sm:$0xff]  }
 0x2f9   :  { %2960 = vmatpush1.bf16.msra.mxu0 %v9754_v48  ;;  %v8104_v48 = vld [vmem:[#allocation10 + $0x624] ss:$8 sps:$4 sm:$0xff]  }
 0x2fa   :  { %4322 = vmatpush1.bf16.msra.mxu1 %v9758_v8  ;;  %2961 = vmatprep.subr.bf16.mxu0 %v9760_v3  ;;  %v8097_v3 = vld [vmem:[#allocation10 + $0x100] ss:$8 sps:$4 sm:$0xff]  }
 0x2fb   :  { %4323 = vmatprep.subr.bf16.mxu1 %v9763_v28  ;;  %v8098_v8 = vld [vmem:[#allocation10 + $0x600] ss:$8 sps:$4 sm:$0xff]   ;;  %v8099_v28 = vld [vmem:[#allocation10 + $0x114] ss:$8 sps:$4 sm:$0xff]  }
 0x2fd   :  { %2962 = vmatpush1.bf16.msra.mxu0 %v9766_v55  ;;  %v8100_v55 = vld [vmem:[#allocation10 + $0x614] ss:$8 sps:$4 sm:$0xff]  }
 0x2fe   :  { %4324 = vmatpush1.bf16.msra.mxu1 %v9770_v4  ;;  %4399 = vmatprep.subr.bf16.mxu0 %v8095_v54  ;;  %v8101_v4 = vld [vmem:[#allocation10 + $0x110] ss:$8 sps:$4 sm:$0xff]  }
 0x2ff   :  { %4847 = vmatprep.subr.bf16.mxu1 %v8096_v60  ;;  %v8102_v54 = vld [vmem:[#allocation10 + $0x610] ss:$8 sps:$4 sm:$0xff]   ;;  %v8103_v60 = vld [vmem:[#allocation10 + $0x124] ss:$8 sps:$4 sm:$0xff]  }
 0x300   :  { %2964 = vmatmul.mubr.bf16.vlgmr.msra.gmra.mrb[56].mxu0 %v9349_v42 }
 0x301   :  { %4326 = vmatmul.mubr.bf16.vlgmr.msra.gmra.mrb[56].mxu1 %v9349_v42  ;;  %2973 = vmatprep.mubr.bf16.mxu0 %v9439_v50 }
 0x302   :  { %4335 = vmatprep.mubr.bf16.mxu1 %v9439_v50  ;;  %4400 = vmatpush1.bf16.msra.mxu0 %v8097_v3  ;;  %v8106_v3 = vld [vmem:[#allocation10 + $0x620] ss:$8 sps:$4 sm:$0xff]  }
 0x303   :  { %4848 = vmatpush1.bf16.msra.mxu1 %v8098_v8  ;;  %4401 = vmatprep.subr.bf16.mxu0 %v8099_v28  ;;  %v8105_v8 = vld [vmem:[#allocation10 + $0x120] ss:$8 sps:$4 sm:$0xff]   ;;  %v8107_v28 = vld [vmem:[#allocation10 + $0x134] ss:$8 sps:$4 sm:$0xff]  }
 0x304   :  { %4849 = vmatprep.subr.bf16.mxu1 %v8100_v55  ;;  %v10970_v55 = vmov 0  }
 0x306   :  { %4402 = vmatpush1.bf16.msra.mxu0 %v8101_v4  ;;  %v8108_v4 = vld [vmem:[#allocation10 + $0x634] ss:$8 sps:$4 sm:$0xff]  }
 0x307   :  { %4850 = vmatpush1.bf16.msra.mxu1 %v8102_v54  ;;  %4403 = vmatprep.subr.bf16.mxu0 %v8103_v60  ;;  %v9785_v54 = vcombine.high %v10970_v55, %v10970_v55  ;;  %v8109_v60 = vld [vmem:[#allocation10 + $0x130] ss:$8 sps:$4 sm:$0xff]  }
 0x308   :  { %2974 = vmatmul.mubr.bf16.gmra.mrb[60].mxu0 %v9431_v29  ;;  %4851 = vmatprep.subr.bf16.mxu1 %v8104_v48  ;;  %v8110_v48 = vld [vmem:[#allocation10 + $0x630] ss:$8 sps:$4 sm:$0xff]  }
 0x309   :  { %4336 = vmatmul.mubr.bf16.gmra.mrb[60].mxu1 %v9431_v29  ;;  %2983 = vmatprep.mubr.bf16.mxu0 %v9527_v52 }
 0x30a   :  { %4345 = vmatprep.mubr.bf16.mxu1 %v9527_v52  ;;  %4404 = vmatpush1.bf16.msra.mxu0 %v8105_v8  ;;  %v8113_v8 = vld [vmem:[#allocation10 + $0x140] ss:$8 sps:$4 sm:$0xff]  }
 0x30b   :  { %4852 = vmatpush1.bf16.msra.mxu1 %v8106_v3  ;;  %4405 = vmatprep.subr.bf16.mxu0 %v8107_v28  ;;  %v8114_v3 = vld [vmem:[#allocation10 + $0x640] ss:$8 sps:$4 sm:$0xff]   ;;  %v8115_v28 = vld [vmem:[#allocation10 + $0x154] ss:$8 sps:$4 sm:$0xff]  }
 0x30c   :  { %4853 = vmatprep.subr.bf16.mxu1 %v8108_v4  ;;  %v8116_v4 = vld [vmem:[#allocation10 + $0x654] ss:$8 sps:$4 sm:$0xff]  }
 0x30e   :  { %4406 = vmatpush1.bf16.msra.mxu0 %v8109_v60  ;;  %v8117_v60 = vld [vmem:[#allocation10 + $0x150] ss:$8 sps:$4 sm:$0xff]  }
 0x30f   :  { %4854 = vmatpush1.bf16.msra.mxu1 %v8110_v48  ;;  %4407 = vmatprep.subr.bf16.mxu0 %v8111_v19  ;;  %v9793_v19 = vcombine.low %v10970_v55, %v10970_v55  ;;  %v8119_v48 = vld [vmem:[#allocation10 + $0x164] ss:$8 sps:$4 sm:$0xff]   ;;  %v8122_v55 = vld [vmem:[#allocation10 + $0x660] ss:$8 sps:$4 sm:$0xff]  }
 0x310   :  { %2984 = vmatmul.mubr.bf16.gmra.mrb[64].mxu0 %v9521_v12  ;;  %4855 = vmatprep.subr.bf16.mxu1 %v8112_v33  ;;  %v8118_v33 = vld [vmem:[#allocation10 + $0x650] ss:$8 sps:$4 sm:$0xff]  }
 0x311   :  { %4346 = vmatmul.mubr.bf16.gmra.mrb[64].mxu1 %v9521_v12  ;;  %2993 = vmatprep.mubr.bf16.mxu0 %v9785_v54 }
 0x312   :  { %4408 = vmatpush1.bf16.msra.mxu0 %v8113_v8  ;;  %4355 = vmatprep.mubr.bf16.mxu1 %v9785_v54  ;;  %v8120_v8 = vld [vmem:[#allocation10 + $0x664] ss:$8 sps:$4 sm:$0xff]  }
 0x313   :  { %4856 = vmatpush1.bf16.msra.mxu1 %v8114_v3  ;;  %4409 = vmatprep.subr.bf16.mxu0 %v8115_v28  ;;  %v8121_v3 = vld [vmem:[#allocation10 + $0x160] ss:$8 sps:$4 sm:$0xff]   ;;  %v8123_v28 = vld [vmem:[#allocation10 + $0x174] ss:$8 sps:$4 sm:$0xff]  }
 0x314   :  { %4857 = vmatprep.subr.bf16.mxu1 %v8116_v4  ;;  %v8124_v4 = vld [vmem:[#allocation10 + $0x674] ss:$8 sps:$4 sm:$0xff]  }
 0x316   :  { %4410 = vmatpush1.bf16.msra.mxu0 %v8117_v60  ;;  %v8125_v60 = vld [vmem:[#allocation10 + $0x170] ss:$8 sps:$4 sm:$0xff]  }
 0x317   :  { %4858 = vmatpush1.bf16.msra.mxu1 %v8118_v33  ;;  %4411 = vmatprep.subr.bf16.mxu0 %v8119_v48  ;;  %v8126_v33 = vld [vmem:[#allocation10 + $0x670] ss:$8 sps:$4 sm:$0xff]   ;;  %v8127_v48 = vld [vmem:[#allocation10 + $0x184] ss:$8 sps:$4 sm:$0xff]  }
 0x318   :  { %2994 = vmatmul.mubr.bf16.gmra.mrb[68].mxu0 %v9793_v19  ;;  %4859 = vmatprep.subr.bf16.mxu1 %v8120_v8  ;;  %v8128_v8 = vld [vmem:[#allocation10 + $0x684] ss:$8 sps:$4 sm:$0xff]  }
 0x319   :  { %4356 = vmatmul.mubr.bf16.gmra.mrb[68].mxu1 %v9793_v19  ;;  %4431 = vmatprep.mubr.bf16.mxu0 %v9319_v13 }
 0x31a   :  { %4412 = vmatpush1.bf16.msra.mxu0 %v8121_v3  ;;  %4879 = vmatprep.mubr.bf16.mxu1 %v9319_v13  ;;  %v8131_v3 = vld [vmem:[#allocation10 + $0x194] ss:$8 sps:$4 sm:$0xff]  }
 0x31b   :  { %4860 = vmatpush1.bf16.msra.mxu1 %v8122_v55  ;;  %4413 = vmatprep.subr.bf16.mxu0 %v8123_v28  ;;  %v8132_v13 = vld [vmem:[#allocation10 + $0x694] ss:$8 sps:$4 sm:$0xff]   ;;  %v8133_v55 = vld [vmem:[#allocation10 + $0x190] ss:$8 sps:$4 sm:$0xff]  }
 0x31c   :  { %4861 = vmatprep.subr.bf16.mxu1 %v8124_v4  ;;  %v8134_v28 = vld [vmem:[#allocation10 + $0x690] ss:$8 sps:$4 sm:$0xff]   ;;  %v8135_v4 = vld [vmem:[#allocation10 + $0x1a4] ss:$8 sps:$4 sm:$0xff]  }
 0x31e   :  { %4414 = vmatpush1.bf16.msra.mxu0 %v8125_v60  ;;  %v8136_v60 = vld [vmem:[#allocation10 + $0x6a4] ss:$8 sps:$4 sm:$0xff]  }
 0x31f   :  { %4862 = vmatpush1.bf16.msra.mxu1 %v8126_v33  ;;  %4415 = vmatprep.subr.bf16.mxu0 %v8127_v48  ;;  %v8137_v33 = vld [vmem:[#allocation10 + $0x1a0] ss:$8 sps:$4 sm:$0xff]  }
 0x320   :  { %4863 = vmatprep.subr.bf16.mxu1 %v8128_v8  ;;  %v8138_v48 = vld [vmem:[#allocation10 + $0x6a0] ss:$8 sps:$4 sm:$0xff]   ;;  %v8139_v8 = vld [vmem:[#allocation10 + $0x1b4] ss:$8 sps:$4 sm:$0xff]  }
 0x322   :  { %4416 = vmatpush1.bf16.msra.mxu0 %v8129_v61  ;;  %v8140_v61 = vld [vmem:[#allocation10 + $0x6b4] ss:$8 sps:$4 sm:$0xff]  }
 0x323   :  { %4864 = vmatpush1.bf16.msra.mxu1 %v8130_v1  ;;  %4417 = vmatprep.subr.bf16.mxu0 %v8131_v3  ;;  %v8141_v1 = vld [vmem:[#allocation10 + $0x1b0] ss:$8 sps:$4 sm:$0xff]  }
 0x324   :  { %4865 = vmatprep.subr.bf16.mxu1 %v8132_v13  ;;  %v8142_v3 = vld [vmem:[#allocation10 + $0x6b0] ss:$8 sps:$4 sm:$0xff]   ;;  %v8143_v13 = vld [vmem:[#allocation10 + $0x1c4] ss:$8 sps:$4 sm:$0xff]  }
 0x326   :  { %4418 = vmatpush1.bf16.msra.mxu0 %v8133_v55  ;;  %v8144_v55 = vld [vmem:[#allocation10 + $0x6c4] ss:$8 sps:$4 sm:$0xff]  }
 0x327   :  { %4866 = vmatpush1.bf16.msra.mxu1 %v8134_v28  ;;  %4419 = vmatprep.subr.bf16.mxu0 %v8135_v4  ;;  %v8145_v28 = vld [vmem:[#allocation10 + $0x1c0] ss:$8 sps:$4 sm:$0xff]  }
 0x328   :  { %4867 = vmatprep.subr.bf16.mxu1 %v8136_v60  ;;  %v8146_v4 = vld [vmem:[#allocation10 + $0x6c0] ss:$8 sps:$4 sm:$0xff]   ;;  %v8147_v60 = vld [vmem:[#allocation10 + $0x1d4] ss:$8 sps:$4 sm:$0xff]  }
 0x32a   :  { %4420 = vmatpush1.bf16.msra.mxu0 %v8137_v33  ;;  %v8148_v33 = vld [vmem:[#allocation10 + $0x6d4] ss:$8 sps:$4 sm:$0xff]  }
 0x32b   :  { %4868 = vmatpush1.bf16.msra.mxu1 %v8138_v48  ;;  %4421 = vmatprep.subr.bf16.mxu0 %v8139_v8  ;;  %v8149_v48 = vld [vmem:[#allocation10 + $0x1d0] ss:$8 sps:$4 sm:$0xff]  }
 0x32c   :  { %4869 = vmatprep.subr.bf16.mxu1 %v8140_v61  ;;  %v8150_v8 = vld [vmem:[#allocation10 + $0x6d0] ss:$8 sps:$4 sm:$0xff]   ;;  %v8151_v61 = vld [vmem:[#allocation10 + $0x1e4] ss:$8 sps:$4 sm:$0xff]  }
 0x32e   :  { %4422 = vmatpush1.bf16.msra.mxu0 %v8141_v1  ;;  %v8152_v1 = vld [vmem:[#allocation10 + $0x6e4] ss:$8 sps:$4 sm:$0xff]  }
 0x32f   :  { %4870 = vmatpush1.bf16.msra.mxu1 %v8142_v3  ;;  %4423 = vmatprep.subr.bf16.mxu0 %v8143_v13  ;;  %v8153_v3 = vld [vmem:[#allocation10 + $0x1e0] ss:$8 sps:$4 sm:$0xff]  }
 0x330   :  { %4871 = vmatprep.subr.bf16.mxu1 %v8144_v55  ;;  %v8154_v13 = vld [vmem:[#allocation10 + $0x6e0] ss:$8 sps:$4 sm:$0xff]   ;;  %v8155_v55 = vld [vmem:[#allocation10 + $0x1f4] ss:$8 sps:$4 sm:$0xff]  }
 0x332   :  { %4424 = vmatpush1.bf16.msra.mxu0 %v8145_v28  ;;  %v8156_v28 = vld [vmem:[#allocation10 + $0x6f4] ss:$8 sps:$4 sm:$0xff]  }
 0x333   :  { %4872 = vmatpush1.bf16.msra.mxu1 %v8146_v4  ;;  %4425 = vmatprep.subr.bf16.mxu0 %v8147_v60  ;;  %v8157_v4 = vld [vmem:[#allocation10 + $0x1f0] ss:$8 sps:$4 sm:$0xff]  }
 0x334   :  { %4873 = vmatprep.subr.bf16.mxu1 %v8148_v33  ;;  %v8158_v60 = vld [vmem:[#allocation10 + $0x6f0] ss:$8 sps:$4 sm:$0xff]   ;;  %v8159_v33 = vld [vmem:[#allocation10 + $0x4] ss:$8 sps:$4 sm:$0xff]  }
 0x336   :  { %4426 = vmatpush1.bf16.msra.mxu0 %v8149_v48  ;;  %v8160_v48 = vld [vmem:[#allocation10 + $0x504] ss:$8 sps:$4 sm:$0xff]  }
 0x337   :  { %4874 = vmatpush1.bf16.msra.mxu1 %v8150_v8  ;;  %4427 = vmatprep.subr.bf16.mxu0 %v8151_v61  ;;  %v8161_v8 = vld [vmem:[#allocation10] ss:$8 sps:$4 sm:$0xff]  }
 0x338   :  { %4875 = vmatprep.subr.bf16.mxu1 %v8152_v1  ;;  %v8162_v61 = vld [vmem:[#allocation10 + $0x500] ss:$8 sps:$4 sm:$0xff]   ;;  %v8163_v1 = vld [vmem:[#allocation10 + $0x14] ss:$8 sps:$4 sm:$0xff]  }
 0x33a   :  { %4428 = vmatpush1.bf16.msra.mxu0 %v8153_v3  ;;  %v8164_v3 = vld [vmem:[#allocation10 + $0x514] ss:$8 sps:$4 sm:$0xff]  }
 0x33b   :  { %4876 = vmatpush1.bf16.msra.mxu1 %v8154_v13  ;;  %4429 = vmatprep.subr.bf16.mxu0 %v8155_v55  ;;  %v8165_v13 = vld [vmem:[#allocation10 + $0x10] ss:$8 sps:$4 sm:$0xff]  }
 0x33c   :  { %4877 = vmatprep.subr.bf16.mxu1 %v8156_v28  ;;  %v8166_v55 = vld [vmem:[#allocation10 + $0x510] ss:$8 sps:$4 sm:$0xff]   ;;  %v8167_v28 = vld [vmem:[#allocation10 + $0x24] ss:$8 sps:$4 sm:$0xff]  }
 0x33e   :  { %4430 = vmatpush1.bf16.msra.mxu0 %v8157_v4  ;;  %v8170_v4 = vld [vmem:[#allocation10 + $0x520] ss:$8 sps:$4 sm:$0xff]  }
 0x33f   :  { %4878 = vmatpush1.bf16.msra.mxu1 %v8158_v60  ;;  %4470 = vmatprep.subr.bf16.mxu0 %v8159_v33  ;;  %v8171_v60 = vld [vmem:[#allocation10 + $0x34] ss:$8 sps:$4 sm:$0xff]  }
 0x340   :  { %4918 = vmatprep.subr.bf16.mxu1 %v8160_v48  ;;  %v8172_v33 = vld [vmem:[#allocation10 + $0x534] ss:$8 sps:$4 sm:$0xff]   ;;  %v8173_v48 = vld [vmem:[#allocation10 + $0x30] ss:$8 sps:$4 sm:$0xff]  }
 0x341   :  { %4432 = vmatmul.mubr.bf16.vlgmr.msra.gmra.mrb[72].mxu0 %v9311_v44 }
 0x342   :  { %4880 = vmatmul.mubr.bf16.vlgmr.msra.gmra.mrb[72].mxu1 %v9311_v44  ;;  %4441 = vmatprep.mubr.bf16.mxu0 %v9397_v63  ;;  %v8168_v44 = vld [vmem:[#allocation10 + $0x524] ss:$8 sps:$4 sm:$0xff]  }
 0x343   :  { %4471 = vmatpush1.bf16.msra.mxu0 %v8161_v8  ;;  %4889 = vmatprep.mubr.bf16.mxu1 %v9397_v63  ;;  %v8169_v63 = vld [vmem:[#allocation10 + $0x20] ss:$8 sps:$4 sm:$0xff]   ;;  %v8174_v8 = vld [vmem:[#allocation10 + $0x530] ss:$8 sps:$4 sm:$0xff]  }
 0x344   :  { %4919 = vmatpush1.bf16.msra.mxu1 %v8162_v61  ;;  %4472 = vmatprep.subr.bf16.mxu0 %v8163_v1  ;;  %v8175_v61 = vld [vmem:[#allocation10 + $0x44] ss:$8 sps:$4 sm:$0xff]   ;;  %v8178_v1 = vld [vmem:[#allocation10 + $0x540] ss:$8 sps:$4 sm:$0xff]  }
 0x345   :  { %4920 = vmatprep.subr.bf16.mxu1 %v8164_v3  ;;  %v8179_v3 = vld [vmem:[#allocation10 + $0x54] ss:$8 sps:$4 sm:$0xff]  }
 0x347   :  { %4473 = vmatpush1.bf16.msra.mxu0 %v8165_v13  ;;  %v8180_v13 = vld [vmem:[#allocation10 + $0x554] ss:$8 sps:$4 sm:$0xff]  }
 0x348   :  { %4921 = vmatpush1.bf16.msra.mxu1 %v8166_v55  ;;  %4474 = vmatprep.subr.bf16.mxu0 %v8167_v28  ;;  %v8181_v55 = vld [vmem:[#allocation10 + $0x50] ss:$8 sps:$4 sm:$0xff]  }
 0x349   :  { %4442 = vmatmul.mubr.bf16.gmra.mrb[76].mxu0 %v9391_v24  ;;  %4922 = vmatprep.subr.bf16.mxu1 %v8168_v44  ;;  %v8182_v28 = vld [vmem:[#allocation10 + $0x550] ss:$8 sps:$4 sm:$0xff]   ;;  %v8183_v44 = vld [vmem:[#allocation10 + $0x64] ss:$8 sps:$4 sm:$0xff]  }
 0x34a   :  { %4890 = vmatmul.mubr.bf16.gmra.mrb[76].mxu1 %v9391_v24  ;;  %4451 = vmatprep.mubr.bf16.mxu0 %v9485_v36  ;;  %v8176_v24 = vld [vmem:[#allocation10 + $0x544] ss:$8 sps:$4 sm:$0xff]  }
 0x34b   :  { %4475 = vmatpush1.bf16.msra.mxu0 %v8169_v63  ;;  %4899 = vmatprep.mubr.bf16.mxu1 %v9485_v36  ;;  %v8177_v36 = vld [vmem:[#allocation10 + $0x40] ss:$8 sps:$4 sm:$0xff]  }
 0x34c   :  { %4923 = vmatpush1.bf16.msra.mxu1 %v8170_v4  ;;  %4476 = vmatprep.subr.bf16.mxu0 %v8171_v60  ;;  %v8186_v63 = vld [vmem:[#allocation10 + $0x560] ss:$8 sps:$4 sm:$0xff]   ;;  %v8187_v4 = vld [vmem:[#allocation10 + $0x74] ss:$8 sps:$4 sm:$0xff]  }
 0x34d   :  { %4924 = vmatprep.subr.bf16.mxu1 %v8172_v33  ;;  %v8188_v60 = vld [vmem:[#allocation10 + $0x574] ss:$8 sps:$4 sm:$0xff]   ;;  %v8189_v33 = vld [vmem:[#allocation10 + $0x70] ss:$8 sps:$4 sm:$0xff]  }
 0x34f   :  { %4477 = vmatpush1.bf16.msra.mxu0 %v8173_v48  ;;  %v8190_v48 = vld [vmem:[#allocation10 + $0x570] ss:$8 sps:$4 sm:$0xff]  }
 0x350   :  { %4925 = vmatpush1.bf16.msra.mxu1 %v8174_v8  ;;  %4478 = vmatprep.subr.bf16.mxu0 %v8175_v61  ;;  %v8191_v8 = vld [vmem:[#allocation10 + $0x84] ss:$8 sps:$4 sm:$0xff]  }
 0x351   :  { %4452 = vmatmul.mubr.bf16.gmra.mrb[80].mxu0 %v9477_v38  ;;  %4926 = vmatprep.subr.bf16.mxu1 %v8176_v24  ;;  %v8192_v61 = vld [vmem:[#allocation10 + $0x584] ss:$8 sps:$4 sm:$0xff]   ;;  %v8194_v24 = vld [vmem:[#allocation10 + $0x580] ss:$8 sps:$4 sm:$0xff]  }
 0x352   :  { %4900 = vmatmul.mubr.bf16.gmra.mrb[80].mxu1 %v9477_v38  ;;  %4461 = vmatprep.mubr.bf16.mxu0 %v9563_v53  ;;  %v8184_v38 = vld [vmem:[#allocation10 + $0x564] ss:$8 sps:$4 sm:$0xff]  }
 0x353   :  { %4479 = vmatpush1.bf16.msra.mxu0 %v8177_v36  ;;  %4909 = vmatprep.mubr.bf16.mxu1 %v9563_v53  ;;  %v8185_v53 = vld [vmem:[#allocation10 + $0x60] ss:$8 sps:$4 sm:$0xff]   ;;  %v8195_v36 = vld [vmem:[#allocation10 + $0x94] ss:$8 sps:$4 sm:$0xff]  }
 0x354   :  { %4927 = vmatpush1.bf16.msra.mxu1 %v8178_v1  ;;  %4480 = vmatprep.subr.bf16.mxu0 %v8179_v3  ;;  %v8197_v1 = vld [vmem:[#allocation10 + $0x90] ss:$8 sps:$4 sm:$0xff]  }
 0x355   :  { %4928 = vmatprep.subr.bf16.mxu1 %v8180_v13  ;;  %v8198_v3 = vld [vmem:[#allocation10 + $0x590] ss:$8 sps:$4 sm:$0xff]   ;;  %v8199_v13 = vld [vmem:[#allocation10 + $0xa4] ss:$8 sps:$4 sm:$0xff]  }
 0x357   :  { %4481 = vmatpush1.bf16.msra.mxu0 %v8181_v55  ;;  %v8200_v55 = vld [vmem:[#allocation10 + $0x5a4] ss:$8 sps:$4 sm:$0xff]  }
 0x358   :  { %4929 = vmatpush1.bf16.msra.mxu1 %v8182_v28  ;;  %4482 = vmatprep.subr.bf16.mxu0 %v8183_v44  ;;  %v8201_v28 = vld [vmem:[#allocation10 + $0xa0] ss:$8 sps:$4 sm:$0xff]  }
 0x359   :  { %4462 = vmatmul.mubr.bf16.gmra.mrb[84].mxu0 %v9571_v43  ;;  %4930 = vmatprep.subr.bf16.mxu1 %v8184_v38  ;;  %v8202_v44 = vld [vmem:[#allocation10 + $0x5a0] ss:$8 sps:$4 sm:$0xff]   ;;  %v8203_v38 = vld [vmem:[#allocation10 + $0xb4] ss:$8 sps:$4 sm:$0xff]  }
 0x35a   :  { %4910 = vmatmul.mubr.bf16.gmra.mrb[84].mxu1 %v9571_v43  ;;  %4502 = vmatprep.mubr.bf16.mxu0 %v9296_v15  ;;  %v8193_v43 = vld [vmem:[#allocation10 + $0x80] ss:$8 sps:$4 sm:$0xff]  }
 0x35b   :  { %4483 = vmatpush1.bf16.msra.mxu0 %v8185_v53  ;;  %4950 = vmatprep.mubr.bf16.mxu1 %v9296_v15  ;;  %v8196_v15 = vld [vmem:[#allocation10 + $0x594] ss:$8 sps:$4 sm:$0xff]  }
 0x35c   :  { %4931 = vmatpush1.bf16.msra.mxu1 %v8186_v63  ;;  %4484 = vmatprep.subr.bf16.mxu0 %v8187_v4  ;;  %v8204_v53 = vld [vmem:[#allocation10 + $0x5b4] ss:$8 sps:$4 sm:$0xff]   ;;  %v8205_v63 = vld [vmem:[#allocation10 + $0xb0] ss:$8 sps:$4 sm:$0xff]  }
 0x35d   :  { %4932 = vmatprep.subr.bf16.mxu1 %v8188_v60  ;;  %v8206_v4 = vld [vmem:[#allocation10 + $0x5b0] ss:$8 sps:$4 sm:$0xff]   ;;  %v8207_v60 = vld [vmem:[#allocation10 + $0xc4] ss:$8 sps:$4 sm:$0xff]  }
 0x35f   :  { %4485 = vmatpush1.bf16.msra.mxu0 %v8189_v33  ;;  %v8208_v33 = vld [vmem:[#allocation10 + $0x5c4] ss:$8 sps:$4 sm:$0xff]  }
 0x360   :  { %4933 = vmatpush1.bf16.msra.mxu1 %v8190_v48  ;;  %4486 = vmatprep.subr.bf16.mxu0 %v8191_v8  ;;  %v8209_v48 = vld [vmem:[#allocation10 + $0xc0] ss:$8 sps:$4 sm:$0xff]  }
 0x361   :  { %4934 = vmatprep.subr.bf16.mxu1 %v8192_v61  ;;  %v8210_v8 = vld [vmem:[#allocation10 + $0x5c0] ss:$8 sps:$4 sm:$0xff]   ;;  %v8211_v61 = vld [vmem:[#allocation10 + $0xd4] ss:$8 sps:$4 sm:$0xff]  }
 0x363   :  { %4487 = vmatpush1.bf16.msra.mxu0 %v8193_v43  ;;  %v8212_v43 = vld [vmem:[#allocation10 + $0x5d4] ss:$8 sps:$4 sm:$0xff]  }
 0x364   :  { %4935 = vmatpush1.bf16.msra.mxu1 %v8194_v24  ;;  %4488 = vmatprep.subr.bf16.mxu0 %v8195_v36  ;;  %v8213_v24 = vld [vmem:[#allocation10 + $0xd0] ss:$8 sps:$4 sm:$0xff]  }
 0x365   :  { %4936 = vmatprep.subr.bf16.mxu1 %v8196_v15  ;;  %v8214_v36 = vld [vmem:[#allocation10 + $0x5d0] ss:$8 sps:$4 sm:$0xff]   ;;  %v8215_v15 = vld [vmem:[#allocation10 + $0xe4] ss:$8 sps:$4 sm:$0xff]  }
 0x367   :  { %4489 = vmatpush1.bf16.msra.mxu0 %v8197_v1  ;;  %v8216_v1 = vld [vmem:[#allocation10 + $0x5e4] ss:$8 sps:$4 sm:$0xff]  }
 0x368   :  { %4937 = vmatpush1.bf16.msra.mxu1 %v8198_v3  ;;  %4490 = vmatprep.subr.bf16.mxu0 %v8199_v13  ;;  %v8217_v3 = vld [vmem:[#allocation10 + $0xe0] ss:$8 sps:$4 sm:$0xff]  }
 0x369   :  { %4938 = vmatprep.subr.bf16.mxu1 %v8200_v55  ;;  %v8218_v13 = vld [vmem:[#allocation10 + $0x5e0] ss:$8 sps:$4 sm:$0xff]   ;;  %v8219_v55 = vld [vmem:[#allocation10 + $0xf4] ss:$8 sps:$4 sm:$0xff]  }
 0x36b   :  { %4491 = vmatpush1.bf16.msra.mxu0 %v8201_v28  ;;  %v8220_v28 = vld [vmem:[#allocation10 + $0x5f4] ss:$8 sps:$4 sm:$0xff]  }
 0x36c   :  { %4939 = vmatpush1.bf16.msra.mxu1 %v8202_v44  ;;  %4492 = vmatprep.subr.bf16.mxu0 %v8203_v38  ;;  %v8221_v44 = vld [vmem:[#allocation10 + $0xf0] ss:$8 sps:$4 sm:$0xff]  }
 0x36d   :  { %4940 = vmatprep.subr.bf16.mxu1 %v8204_v53  ;;  %v8222_v38 = vld [vmem:[#allocation10 + $0x5f0] ss:$8 sps:$4 sm:$0xff]   ;;  %v8223_v53 = vld [vmem:[#allocation10 + $0x204] ss:$8 sps:$4 sm:$0xff]  }
 0x36f   :  { %4493 = vmatpush1.bf16.msra.mxu0 %v8205_v63  ;;  %v8224_v63 = vld [vmem:[#allocation10 + $0x704] ss:$8 sps:$4 sm:$0xff]  }
 0x370   :  { %4941 = vmatpush1.bf16.msra.mxu1 %v8206_v4  ;;  %4494 = vmatprep.subr.bf16.mxu0 %v8207_v60  ;;  %v8225_v4 = vld [vmem:[#allocation10 + $0x200] ss:$8 sps:$4 sm:$0xff]  }
 0x371   :  { %4942 = vmatprep.subr.bf16.mxu1 %v8208_v33  ;;  %v8226_v60 = vld [vmem:[#allocation10 + $0x700] ss:$8 sps:$4 sm:$0xff]   ;;  %v8227_v33 = vld [vmem:[#allocation10 + $0x214] ss:$8 sps:$4 sm:$0xff]  }
 0x373   :  { %4495 = vmatpush1.bf16.msra.mxu0 %v8209_v48  ;;  %v8228_v48 = vld [vmem:[#allocation10 + $0x714] ss:$8 sps:$4 sm:$0xff]  }
 0x374   :  { %4943 = vmatpush1.bf16.msra.mxu1 %v8210_v8  ;;  %4496 = vmatprep.subr.bf16.mxu0 %v8211_v61  ;;  %v8229_v8 = vld [vmem:[#allocation10 + $0x210] ss:$8 sps:$4 sm:$0xff]  }
 0x375   :  { %4944 = vmatprep.subr.bf16.mxu1 %v8212_v43  ;;  %v8230_v61 = vld [vmem:[#allocation10 + $0x710] ss:$8 sps:$4 sm:$0xff]   ;;  %v8231_v43 = vld [vmem:[#allocation10 + $0x224] ss:$8 sps:$4 sm:$0xff]  }
 0x377   :  { %4497 = vmatpush1.bf16.msra.mxu0 %v8213_v24  ;;  %v8233_v24 = vld [vmem:[#allocation10 + $0x220] ss:$8 sps:$4 sm:$0xff]  }
 0x378   :  { %4945 = vmatpush1.bf16.msra.mxu1 %v8214_v36  ;;  %4498 = vmatprep.subr.bf16.mxu0 %v8215_v15  ;;  %v8234_v36 = vld [vmem:[#allocation10 + $0x720] ss:$8 sps:$4 sm:$0xff]   ;;  %v8235_v15 = vld [vmem:[#allocation10 + $0x234] ss:$8 sps:$4 sm:$0xff]  }
 0x379   :  { %4946 = vmatprep.subr.bf16.mxu1 %v8216_v1  ;;  %v8236_v1 = vld [vmem:[#allocation10 + $0x734] ss:$8 sps:$4 sm:$0xff]  }
 0x37b   :  { %4499 = vmatpush1.bf16.msra.mxu0 %v8217_v3  ;;  %v8237_v3 = vld [vmem:[#allocation10 + $0x230] ss:$8 sps:$4 sm:$0xff]  }
 0x37c   :  { %4947 = vmatpush1.bf16.msra.mxu1 %v8218_v13  ;;  %4500 = vmatprep.subr.bf16.mxu0 %v8219_v55  ;;  %v8238_v13 = vld [vmem:[#allocation10 + $0x730] ss:$8 sps:$4 sm:$0xff]   ;;  %v8239_v55 = vld [vmem:[#allocation10 + $0x244] ss:$8 sps:$4 sm:$0xff]  }
 0x37d   :  { %4948 = vmatprep.subr.bf16.mxu1 %v8220_v28  ;;  %v8240_v28 = vld [vmem:[#allocation10 + $0x744] ss:$8 sps:$4 sm:$0xff]  }
 0x37f   :  { %4501 = vmatpush1.bf16.msra.mxu0 %v8221_v44  ;;  %v8241_v44 = vld [vmem:[#allocation10 + $0x240] ss:$8 sps:$4 sm:$0xff]  }
 0x380   :  { %4949 = vmatpush1.bf16.msra.mxu1 %v8222_v38  ;;  %4541 = vmatprep.subr.bf16.mxu0 %v8223_v53  ;;  %v8242_v38 = vld [vmem:[#allocation10 + $0x740] ss:$8 sps:$4 sm:$0xff]   ;;  %v8243_v53 = vld [vmem:[#allocation10 + $0x254] ss:$8 sps:$4 sm:$0xff]  }
 0x381   :  { %4989 = vmatprep.subr.bf16.mxu1 %v8224_v63  ;;  %v8244_v63 = vld [vmem:[#allocation10 + $0x754] ss:$8 sps:$4 sm:$0xff]  }
 0x382   :  { %4503 = vmatmul.mubr.bf16.vlgmr.msra.gmra.mrb[72].mxu0 %v9293_v40 }
 0x383   :  { %4951 = vmatmul.mubr.bf16.vlgmr.msra.gmra.mrb[72].mxu1 %v9293_v40  ;;  %4512 = vmatprep.mubr.bf16.mxu0 %v9368_v14  ;;  %v8232_v40 = vld [vmem:[#allocation10 + $0x724] ss:$8 sps:$4 sm:$0xff]  }
 0x384   :  { %4542 = vmatpush1.bf16.msra.mxu0 %v8225_v4  ;;  %4960 = vmatprep.mubr.bf16.mxu1 %v9368_v14  ;;  %v8245_v4 = vld [vmem:[#allocation10 + $0x250] ss:$8 sps:$4 sm:$0xff]  }
 0x385   :  { %4990 = vmatpush1.bf16.msra.mxu1 %v8226_v60  ;;  %4543 = vmatprep.subr.bf16.mxu0 %v8227_v33  ;;  %v8246_v60 = vld [vmem:[#allocation10 + $0x750] ss:$8 sps:$4 sm:$0xff]   ;;  %v8247_v33 = vld [vmem:[#allocation10 + $0x264] ss:$8 sps:$4 sm:$0xff]  }
 0x386   :  { %4991 = vmatprep.subr.bf16.mxu1 %v8228_v48  ;;  %v8248_v48 = vld [vmem:[#allocation10 + $0x764] ss:$8 sps:$4 sm:$0xff]  }
 0x388   :  { %4544 = vmatpush1.bf16.msra.mxu0 %v8229_v8  ;;  %v8250_v8 = vld [vmem:[#allocation10 + $0x760] ss:$8 sps:$4 sm:$0xff]  }
 0x389   :  { %4992 = vmatpush1.bf16.msra.mxu1 %v8230_v61  ;;  %4545 = vmatprep.subr.bf16.mxu0 %v8231_v43  ;;  %v8251_v61 = vld [vmem:[#allocation10 + $0x274] ss:$8 sps:$4 sm:$0xff]  }
 0x38a   :  { %4513 = vmatmul.mubr.bf16.gmra.mrb[76].mxu0 %v9361_v46  ;;  %4993 = vmatprep.subr.bf16.mxu1 %v8232_v40  ;;  %v8252_v43 = vld [vmem:[#allocation10 + $0x774] ss:$8 sps:$4 sm:$0xff]   ;;  %v8253_v40 = vld [vmem:[#allocation10 + $0x270] ss:$8 sps:$4 sm:$0xff]  }
 0x38b   :  { %4961 = vmatmul.mubr.bf16.gmra.mrb[76].mxu1 %v9361_v46  ;;  %4522 = vmatprep.mubr.bf16.mxu0 %v9454_v9 }
 0x38c   :  { %4546 = vmatpush1.bf16.msra.mxu0 %v8233_v24  ;;  %4970 = vmatprep.mubr.bf16.mxu1 %v9454_v9  ;;  %v8254_v24 = vld [vmem:[#allocation10 + $0x770] ss:$8 sps:$4 sm:$0xff]  }
 0x38d   :  { %4994 = vmatpush1.bf16.msra.mxu1 %v8234_v36  ;;  %4547 = vmatprep.subr.bf16.mxu0 %v8235_v15  ;;  %v8255_v36 = vld [vmem:[#allocation10 + $0x284] ss:$8 sps:$4 sm:$0xff]  }
 0x38e   :  { %4995 = vmatprep.subr.bf16.mxu1 %v8236_v1  ;;  %v8256_v15 = vld [vmem:[#allocation10 + $0x784] ss:$8 sps:$4 sm:$0xff]   ;;  %v8258_v1 = vld [vmem:[#allocation10 + $0x780] ss:$8 sps:$4 sm:$0xff]  }
 0x390   :  { %4548 = vmatpush1.bf16.msra.mxu0 %v8237_v3  ;;  %v8259_v3 = vld [vmem:[#allocation10 + $0x294] ss:$8 sps:$4 sm:$0xff]  }
 0x391   :  { %4996 = vmatpush1.bf16.msra.mxu1 %v8238_v13  ;;  %4549 = vmatprep.subr.bf16.mxu0 %v8239_v55  ;;  %v8261_v13 = vld [vmem:[#allocation10 + $0x290] ss:$8 sps:$4 sm:$0xff]  }
 0x392   :  { %4523 = vmatmul.mubr.bf16.gmra.mrb[80].mxu0 %v9447_v20  ;;  %4997 = vmatprep.subr.bf16.mxu1 %v8240_v28  ;;  %v8262_v55 = vld [vmem:[#allocation10 + $0x790] ss:$8 sps:$4 sm:$0xff]   ;;  %v8263_v28 = vld [vmem:[#allocation10 + $0x2a4] ss:$8 sps:$4 sm:$0xff]  }
 0x393   :  { %4971 = vmatmul.mubr.bf16.gmra.mrb[80].mxu1 %v9447_v20  ;;  %4532 = vmatprep.mubr.bf16.mxu0 %v9493_v59 }
 0x394   :  { %4550 = vmatpush1.bf16.msra.mxu0 %v8241_v44  ;;  %4980 = vmatprep.mubr.bf16.mxu1 %v9493_v59  ;;  %v8249_v59 = vld [vmem:[#allocation10 + $0x260] ss:$8 sps:$4 sm:$0xff]   ;;  %v8264_v44 = vld [vmem:[#allocation10 + $0x7a4] ss:$8 sps:$4 sm:$0xff]  }
 0x395   :  { %4998 = vmatpush1.bf16.msra.mxu1 %v8242_v38  ;;  %4551 = vmatprep.subr.bf16.mxu0 %v8243_v53  ;;  %v8265_v38 = vld [vmem:[#allocation10 + $0x2a0] ss:$8 sps:$4 sm:$0xff]  }
 0x396   :  { %4999 = vmatprep.subr.bf16.mxu1 %v8244_v63  ;;  %v8266_v53 = vld [vmem:[#allocation10 + $0x7a0] ss:$8 sps:$4 sm:$0xff]   ;;  %v8267_v63 = vld [vmem:[#allocation10 + $0x2b4] ss:$8 sps:$4 sm:$0xff]  }
 0x398   :  { %4552 = vmatpush1.bf16.msra.mxu0 %v8245_v4  ;;  %v8268_v4 = vld [vmem:[#allocation10 + $0x7b4] ss:$8 sps:$4 sm:$0xff]  }
 0x399   :  { %5000 = vmatpush1.bf16.msra.mxu1 %v8246_v60  ;;  %4553 = vmatprep.subr.bf16.mxu0 %v8247_v33  ;;  %v8269_v60 = vld [vmem:[#allocation10 + $0x2b0] ss:$8 sps:$4 sm:$0xff]  }
 0x39a   :  { %4533 = vmatmul.mubr.bf16.gmra.mrb[84].mxu0 %v9505_v26  ;;  %5001 = vmatprep.subr.bf16.mxu1 %v8248_v48  ;;  %v8270_v33 = vld [vmem:[#allocation10 + $0x7b0] ss:$8 sps:$4 sm:$0xff]   ;;  %v8271_v48 = vld [vmem:[#allocation10 + $0x2c4] ss:$8 sps:$4 sm:$0xff]  }
 0x39b   :  { %4981 = vmatmul.mubr.bf16.gmra.mrb[84].mxu1 %v9505_v26  ;;  %4573 = vmatprep.mubr.bf16.mxu0 %v9330_v37  ;;  %v8257_v26 = vld [vmem:[#allocation10 + $0x280] ss:$8 sps:$4 sm:$0xff]  }
 0x39c   :  { %4554 = vmatpush1.bf16.msra.mxu0 %v8249_v59  ;;  %5021 = vmatprep.mubr.bf16.mxu1 %v9330_v37  ;;  %v8260_v37 = vld [vmem:[#allocation10 + $0x794] ss:$8 sps:$4 sm:$0xff]   ;;  %v8272_v59 = vld [vmem:[#allocation10 + $0x7c4] ss:$8 sps:$4 sm:$0xff]  }
 0x39d   :  { %5002 = vmatpush1.bf16.msra.mxu1 %v8250_v8  ;;  %4555 = vmatprep.subr.bf16.mxu0 %v8251_v61  ;;  %v8273_v8 = vld [vmem:[#allocation10 + $0x2c0] ss:$8 sps:$4 sm:$0xff]  }
 0x39e   :  { %5003 = vmatprep.subr.bf16.mxu1 %v8252_v43  ;;  %v8274_v61 = vld [vmem:[#allocation10 + $0x7c0] ss:$8 sps:$4 sm:$0xff]   ;;  %v8275_v43 = vld [vmem:[#allocation10 + $0x2d4] ss:$8 sps:$4 sm:$0xff]  }
 0x3a0   :  { %4556 = vmatpush1.bf16.msra.mxu0 %v8253_v40  ;;  %v8276_v40 = vld [vmem:[#allocation10 + $0x7d4] ss:$8 sps:$4 sm:$0xff]  }
 0x3a1   :  { %5004 = vmatpush1.bf16.msra.mxu1 %v8254_v24  ;;  %4557 = vmatprep.subr.bf16.mxu0 %v8255_v36  ;;  %v8277_v24 = vld [vmem:[#allocation10 + $0x2d0] ss:$8 sps:$4 sm:$0xff]  }
 0x3a2   :  { %5005 = vmatprep.subr.bf16.mxu1 %v8256_v15  ;;  %v8278_v36 = vld [vmem:[#allocation10 + $0x7d0] ss:$8 sps:$4 sm:$0xff]   ;;  %v8279_v15 = vld [vmem:[#allocation10 + $0x2e4] ss:$8 sps:$4 sm:$0xff]  }
 0x3a4   :  { %4558 = vmatpush1.bf16.msra.mxu0 %v8257_v26  ;;  %v8280_v26 = vld [vmem:[#allocation10 + $0x7e4] ss:$8 sps:$4 sm:$0xff]  }
 0x3a5   :  { %5006 = vmatpush1.bf16.msra.mxu1 %v8258_v1  ;;  %4559 = vmatprep.subr.bf16.mxu0 %v8259_v3  ;;  %v8281_v1 = vld [vmem:[#allocation10 + $0x2e0] ss:$8 sps:$4 sm:$0xff]  }
 0x3a6   :  { %5007 = vmatprep.subr.bf16.mxu1 %v8260_v37  ;;  %v8282_v3 = vld [vmem:[#allocation10 + $0x7e0] ss:$8 sps:$4 sm:$0xff]   ;;  %v8283_v37 = vld [vmem:[#allocation10 + $0x2f4] ss:$8 sps:$4 sm:$0xff]  }
 0x3a8   :  { %4560 = vmatpush1.bf16.msra.mxu0 %v8261_v13  ;;  %v8284_v13 = vld [vmem:[#allocation10 + $0x7f4] ss:$8 sps:$4 sm:$0xff]  }
 0x3a9   :  { %5008 = vmatpush1.bf16.msra.mxu1 %v8262_v55  ;;  %4561 = vmatprep.subr.bf16.mxu0 %v8263_v28  ;;  %v8285_v55 = vld [vmem:[#allocation10 + $0x2f0] ss:$8 sps:$4 sm:$0xff]  }
 0x3aa   :  { %5009 = vmatprep.subr.bf16.mxu1 %v8264_v44  ;;  %v8286_v28 = vld [vmem:[#allocation10 + $0x7f0] ss:$8 sps:$4 sm:$0xff]   ;;  %v8287_v44 = vld [vmem:[#allocation10 + $0x304] ss:$8 sps:$4 sm:$0xff]  }
 0x3ac   :  { %4562 = vmatpush1.bf16.msra.mxu0 %v8265_v38  ;;  %v8288_v38 = vld [vmem:[#allocation10 + $0x804] ss:$8 sps:$4 sm:$0xff]  }
 0x3ad   :  { %5010 = vmatpush1.bf16.msra.mxu1 %v8266_v53  ;;  %4563 = vmatprep.subr.bf16.mxu0 %v8267_v63  ;;  %v8289_v53 = vld [vmem:[#allocation10 + $0x300] ss:$8 sps:$4 sm:$0xff]  }
 0x3ae   :  { %5011 = vmatprep.subr.bf16.mxu1 %v8268_v4  ;;  %v8290_v63 = vld [vmem:[#allocation10 + $0x800] ss:$8 sps:$4 sm:$0xff]   ;;  %v8291_v4 = vld [vmem:[#allocation10 + $0x314] ss:$8 sps:$4 sm:$0xff]  }
 0x3b0   :  { %4564 = vmatpush1.bf16.msra.mxu0 %v8269_v60  ;;  %v8292_v60 = vld [vmem:[#allocation10 + $0x814] ss:$8 sps:$4 sm:$0xff]  }
 0x3b1   :  { %5012 = vmatpush1.bf16.msra.mxu1 %v8270_v33  ;;  %4565 = vmatprep.subr.bf16.mxu0 %v8271_v48  ;;  %v8293_v33 = vld [vmem:[#allocation10 + $0x310] ss:$8 sps:$4 sm:$0xff]  }
 0x3b2   :  { %5013 = vmatprep.subr.bf16.mxu1 %v8272_v59  ;;  %v8294_v48 = vld [vmem:[#allocation10 + $0x810] ss:$8 sps:$4 sm:$0xff]   ;;  %v8295_v59 = vld [vmem:[#allocation10 + $0x324] ss:$8 sps:$4 sm:$0xff]  }
 0x3b4   :  { %4566 = vmatpush1.bf16.msra.mxu0 %v8273_v8  ;;  %v8298_v8 = vld [vmem:[#allocation10 + $0x820] ss:$8 sps:$4 sm:$0xff]  }
 0x3b5   :  { %5014 = vmatpush1.bf16.msra.mxu1 %v8274_v61  ;;  %4567 = vmatprep.subr.bf16.mxu0 %v8275_v43  ;;  %v8299_v61 = vld [vmem:[#allocation10 + $0x334] ss:$8 sps:$4 sm:$0xff]  }
 0x3b6   :  { %5015 = vmatprep.subr.bf16.mxu1 %v8276_v40  ;;  %v8300_v43 = vld [vmem:[#allocation10 + $0x834] ss:$8 sps:$4 sm:$0xff]   ;;  %v8301_v40 = vld [vmem:[#allocation10 + $0x330] ss:$8 sps:$4 sm:$0xff]  }
 0x3b8   :  { %4568 = vmatpush1.bf16.msra.mxu0 %v8277_v24  ;;  %v8302_v24 = vld [vmem:[#allocation10 + $0x830] ss:$8 sps:$4 sm:$0xff]  }
 0x3b9   :  { %5016 = vmatpush1.bf16.msra.mxu1 %v8278_v36  ;;  %4569 = vmatprep.subr.bf16.mxu0 %v8279_v15  ;;  %v8303_v36 = vld [vmem:[#allocation10 + $0x344] ss:$8 sps:$4 sm:$0xff]  }
 0x3ba   :  { %5017 = vmatprep.subr.bf16.mxu1 %v8280_v26 }
 0x3bc   :  { %4570 = vmatpush1.bf16.msra.mxu0 %v8281_v1  ;;  %v8305_v1 = vld [vmem:[#allocation10 + $0x340] ss:$8 sps:$4 sm:$0xff]  }
 0x3bd   :  { %5018 = vmatpush1.bf16.msra.mxu1 %v8282_v3  ;;  %4571 = vmatprep.subr.bf16.mxu0 %v8283_v37  ;;  %v8326_v3 = vld [vmem:[#allocation10 + $0x890] ss:$8 sps:$4 sm:$0xff]  }
 0x3be   :  { %5019 = vmatprep.subr.bf16.mxu1 %v8284_v13 }
 0x3c0   :  { %4572 = vmatpush1.bf16.msra.mxu0 %v8285_v55  ;;  %v8306_v55 = vld [vmem:[#allocation10 + $0x840] ss:$8 sps:$4 sm:$0xff]  }
 0x3c1   :  { %5020 = vmatpush1.bf16.msra.mxu1 %v8286_v28  ;;  %4626 = vmatprep.subr.bf16.mxu0 %v8287_v44  ;;  %v8307_v28 = vld [vmem:[#allocation10 + $0x354] ss:$8 sps:$4 sm:$0xff]  }
 0x3c2   :  { %5074 = vmatprep.subr.bf16.mxu1 %v8288_v38 }
 0x3c3   :  { %4574 = vmatmul.mubr.bf16.vlgmr.msra.gmra.mrb[72].mxu0 %v9325_v27 }
 0x3c4   :  { %5022 = vmatmul.mubr.bf16.vlgmr.msra.gmra.mrb[72].mxu1 %v9325_v27  ;;  %4583 = vmatprep.mubr.bf16.mxu0 %v9410_v5  ;;  %v8296_v27 = vld [vmem:[#allocation10 + $0x824] ss:$8 sps:$4 sm:$0xff]  }
 0x3c5   :  { %4627 = vmatpush1.bf16.msra.mxu0 %v8289_v53  ;;  %5031 = vmatprep.mubr.bf16.mxu1 %v9410_v5  ;;  %v8297_v5 = vld [vmem:[#allocation10 + $0x320] ss:$8 sps:$4 sm:$0xff]   ;;  %v8308_v53 = vld [vmem:[#allocation10 + $0x854] ss:$8 sps:$4 sm:$0xff]  }
 0x3c6   :  { %5075 = vmatpush1.bf16.msra.mxu1 %v8290_v63  ;;  %4628 = vmatprep.subr.bf16.mxu0 %v8291_v4 }
 0x3c7   :  { %5076 = vmatprep.subr.bf16.mxu1 %v8292_v60  ;;  %v8309_v60 = vld [vmem:[#allocation10 + $0x350] ss:$8 sps:$4 sm:$0xff]  }
 0x3c9   :  { %4629 = vmatpush1.bf16.msra.mxu0 %v8293_v33  ;;  %v8310_v33 = vld [vmem:[#allocation10 + $0x850] ss:$8 sps:$4 sm:$0xff]  }
 0x3ca   :  { %5077 = vmatpush1.bf16.msra.mxu1 %v8294_v48  ;;  %4630 = vmatprep.subr.bf16.mxu0 %v8295_v59  ;;  %v8311_v48 = vld [vmem:[#allocation10 + $0x364] ss:$8 sps:$4 sm:$0xff]  }
 0x3cb   :  { %4584 = vmatmul.mubr.bf16.gmra.mrb[76].mxu0 %v9403_v0  ;;  %5078 = vmatprep.subr.bf16.mxu1 %v8296_v27  ;;  %v8312_v59 = vld [vmem:[#allocation10 + $0x864] ss:$8 sps:$4 sm:$0xff]  }
 0x3cc   :  { %5032 = vmatmul.mubr.bf16.gmra.mrb[76].mxu1 %v9403_v0  ;;  %4593 = vmatprep.mubr.bf16.mxu0 %v9497_v10  ;;  %v8304_v0 = vld [vmem:[#allocation10 + $0x844] ss:$8 sps:$4 sm:$0xff]  }
 0x3cd   :  { %4631 = vmatpush1.bf16.msra.mxu0 %v8297_v5  ;;  %5041 = vmatprep.mubr.bf16.mxu1 %v9497_v10 }
 0x3ce   :  { %5079 = vmatpush1.bf16.msra.mxu1 %v8298_v8  ;;  %4632 = vmatprep.subr.bf16.mxu0 %v8299_v61  ;;  %v8313_v61 = vld [vmem:[#allocation10 + $0x360] ss:$8 sps:$4 sm:$0xff]  }
 0x3cf   :  { %5080 = vmatprep.subr.bf16.mxu1 %v8300_v43 }
 0x3d1   :  { %4633 = vmatpush1.bf16.msra.mxu0 %v8301_v40 }
 0x3d2   :  { %5081 = vmatpush1.bf16.msra.mxu1 %v8302_v24  ;;  %4634 = vmatprep.subr.bf16.mxu0 %v8303_v36  ;;  %v8314_v36 = vld [vmem:[#allocation10 + $0x860] ss:$8 sps:$4 sm:$0xff]  }
 0x3d3   :  { %4594 = vmatmul.mubr.bf16.gmra.mrb[80].mxu0 %v9502_v22  ;;  %5082 = vmatprep.subr.bf16.mxu1 %v8304_v0  ;;  %v9840_v15 = vpop.f32.mrb[56].mxu0  ;;  %v8315_v0 = vld [vmem:[#allocation10 + $0x374] ss:$8 sps:$4 sm:$0xff]  }
 0x3d4   :  { %5042 = vmatmul.mubr.bf16.gmra.mrb[80].mxu1 %v9502_v22  ;;  %4603 = vmatprep.mubr.bf16.mxu0 %v9622_v35  ;;  %v9844_v10 = vpop.f32.mrb[56].mxu1  ;;  %v9846_v26 = vpop.f32.mrb[57].mxu0 }
 0x3d5   :  { %4635 = vmatpush1.bf16.msra.mxu0 %v8305_v1  ;;  %5051 = vmatprep.mubr.bf16.mxu1 %v9622_v35  ;;  %v9851_v37 = vpop.f32.mrb[57].mxu1  ;;  %v9853_v13 = vpop.f32.mrb[58].mxu0  ;;  %v8324_v35 = vld [vmem:[#allocation10 + $0x894] ss:$8 sps:$4 sm:$0xff]  }
 0x3d6   :  { %5083 = vmatpush1.bf16.msra.mxu1 %v8306_v55  ;;  %4636 = vmatprep.subr.bf16.mxu0 %v8307_v28  ;;  %v9857_v44 = vpop.f32.mrb[58].mxu1  ;;  %v9859_v38 = vpop.f32.mrb[59].mxu0  ;;  %v8316_v28 = vld [vmem:[#allocation10 + $0x874] ss:$8 sps:$4 sm:$0xff]  }
 0x3d7   :  { %5084 = vmatprep.subr.bf16.mxu1 %v8308_v53  ;;  %v9863_v63 = vpop.f32.mrb[59].mxu1 }
 0x3d9   :  { %4637 = vmatpush1.bf16.msra.mxu0 %v8309_v60 }
 0x3da   :  { %5085 = vmatpush1.bf16.msra.mxu1 %v8310_v33  ;;  %4638 = vmatprep.subr.bf16.mxu0 %v8311_v48  ;;  %v8317_v33 = vld [vmem:[#allocation10 + $0x370] ss:$8 sps:$4 sm:$0xff]  }
 0x3db   :  { %4604 = vmatmul.mubr.bf16.gmra.mrb[84].mxu0 %v9651_v23  ;;  %5086 = vmatprep.subr.bf16.mxu1 %v8312_v59  ;;  %v9868_v27 = vpop.f32.mrb[60].mxu0  ;;  %v8318_v48 = vld [vmem:[#allocation10 + $0x870] ss:$8 sps:$4 sm:$0xff]   ;;  %v8319_v59 = vld [vmem:[#allocation10 + $0x384] ss:$8 sps:$4 sm:$0xff]  }
 0x3dc   :  { %5052 = vmatmul.mubr.bf16.gmra.mrb[84].mxu1 %v9651_v23  ;;  %4658 = vmatprep.mubr.bf16.mxu0 %v9355_v25  ;;  %v9872_v5 = vpop.f32.mrb[60].mxu1  ;;  %v9874_v8 = vpop.f32.mrb[61].mxu0 }
 0x3dd   :  { %4639 = vmatpush1.bf16.msra.mxu0 %v8313_v61  ;;  %5106 = vmatprep.mubr.bf16.mxu1 %v9355_v25  ;;  %v9879_v40 = vpop.f32.mrb[61].mxu1  ;;  %v9881_v24 = vpop.f32.mrb[62].mxu0  ;;  %v8320_v61 = vld [vmem:[#allocation10 + $0x884] ss:$8 sps:$4 sm:$0xff]   ;;  %v8321_v25 = vld [vmem:[#allocation10 + $0x380] ss:$8 sps:$4 sm:$0xff]  }
 0x3de   :  { %5087 = vmatpush1.bf16.msra.mxu1 %v8314_v36  ;;  %4640 = vmatprep.subr.bf16.mxu0 %v8315_v0  ;;  %v9885_v1 = vpop.f32.mrb[62].mxu1  ;;  %v9887_v55 = vpop.f32.mrb[63].mxu0 }
 0x3df   :  { %5088 = vmatprep.subr.bf16.mxu1 %v8316_v28  ;;  %v9891_v53 = vpop.f32.mrb[63].mxu1 }
 0x3e1   :  { %4641 = vmatpush1.bf16.msra.mxu0 %v8317_v33 }
 0x3e2   :  { %5089 = vmatpush1.bf16.msra.mxu1 %v8318_v48  ;;  %4642 = vmatprep.subr.bf16.mxu0 %v8319_v59  ;;  %v8322_v48 = vld [vmem:[#allocation10 + $0x880] ss:$8 sps:$4 sm:$0xff]   ;;  %v8327_v59 = vld [vmem:[#allocation10 + $0x3a4] ss:$8 sps:$4 sm:$0xff]  }
 0x3e3   :  { %5090 = vmatprep.subr.bf16.mxu1 %v8320_v61  ;;  %v9895_v36 = vpop.f32.mrb[64].mxu0  ;;  %v8323_v61 = vld [vmem:[#allocation10 + $0x394] ss:$8 sps:$4 sm:$0xff]  }
 0x3e4   :  { %10971 = vst [vmem:[#allocation56_spill] sm:$0xff] %v9895_v36  ;;  %v9897_v0 = vpop.f32.mrb[64].mxu1  ;;  %v9899_v28 = vpop.f32.mrb[65].mxu0  ;;  %v8333_v36 = vld [vmem:[#allocation10 + $0x3b0] ss:$8 sps:$4 sm:$0xff]  }
 0x3e5   :  { %10972 = vst [vmem:[#allocation57_spill] sm:$0xff] %v9897_v0  ;;  %10973 = vst [vmem:[#allocation58_spill] sm:$0xff] %v9899_v28  ;;  %4643 = vmatpush1.bf16.msra.mxu0 %v8321_v25  ;;  %v9903_v60 = vpop.f32.mrb[65].mxu1  ;;  %v9905_v33 = vpop.f32.mrb[66].mxu0  ;;  %v8329_v25 = vld [vmem:[#allocation10 + $0x3a0] ss:$8 sps:$4 sm:$0xff]  }
 0x3e6   :  { %10974 = vst [vmem:[#allocation59_spill] sm:$0xff] %v9903_v60  ;;  %10975 = vst [vmem:[#allocation60_spill] sm:$0xff] %v9905_v33  ;;  %5091 = vmatpush1.bf16.msra.mxu1 %v8322_v48  ;;  %4644 = vmatprep.subr.bf16.mxu0 %v8323_v61  ;;  %v9909_v43 = vpop.f32.mrb[66].mxu1  ;;  %v9911_v4 = vpop.f32.mrb[67].mxu0  ;;  %v8325_v48 = vld [vmem:[#allocation10 + $0x390] ss:$8 sps:$4 sm:$0xff]  }
 0x3e7   :  { %10976 = vst [vmem:[#allocation61_spill] sm:$0xff] %v9909_v43  ;;  %10977 = vst [vmem:[#allocation62_spill] sm:$0xff] %v9911_v4  ;;  %5092 = vmatprep.subr.bf16.mxu1 %v8324_v35  ;;  %v9915_v23 = vpop.f32.mrb[67].mxu1  ;;  %v8328_v61 = vld [vmem:[#allocation10 + $0x8a4] ss:$8 sps:$4 sm:$0xff]  }
 0x3e8   :  { %10978 = vst [vmem:[#allocation63_spill] sm:$0xff] %v9915_v23  ;;  %v8330_v23 = vld [vmem:[#allocation10 + $0x8a0] ss:$8 sps:$4 sm:$0xff]   ;;  %v8332_v33 = vld [vmem:[#allocation10 + $0x8b4] ss:$8 sps:$4 sm:$0xff]  }
 0x3e9   :  { %4645 = vmatpush1.bf16.msra.mxu0 %v8325_v48  ;;  %v8335_v43 = vld [vmem:[#allocation10 + $0x3c4] ss:$8 sps:$4 sm:$0xff]  }
 0x3ea   :  { %5093 = vmatpush1.bf16.msra.mxu1 %v8326_v3  ;;  %4646 = vmatprep.subr.bf16.mxu0 %v8327_v59  ;;  %v8331_v59 = vld [vmem:[#allocation10 + $0x3b4] ss:$8 sps:$4 sm:$0xff]  }
 0x3eb   :  { %5094 = vmatprep.subr.bf16.mxu1 %v8328_v61  ;;  %v9919_v60 = vpop.f32.mrb[68].mxu0  ;;  %v8339_v3 = vld [vmem:[#allocation10 + $0x3d4] ss:$8 sps:$4 sm:$0xff]  }
 0x3ec   :  { %v9921_v28 = vpop.f32.mrb[68].mxu1  ;;  %v9923_v35 = vpop.f32.mrb[69].mxu0 }
 0x3ed   :  { %10979 = vst [vmem:[#allocation64_spill] sm:$0xff] %v9921_v28  ;;  %4647 = vmatpush1.bf16.msra.mxu0 %v8329_v25  ;;  %v9927_v22 = vpop.f32.mrb[69].mxu1  ;;  %v2999_v48 = vpop.f32.mrb[70].mxu0  ;;  %v8334_v25 = vld [vmem:[#allocation10 + $0x8b0] ss:$8 sps:$4 sm:$0xff]  }
 0x3ee   :  { %5095 = vmatpush1.bf16.msra.mxu1 %v8330_v23  ;;  %4648 = vmatprep.subr.bf16.mxu0 %v8331_v59  ;;  %v4361_v61 = vpop.f32.mrb[70].mxu1  ;;  %v3000_v4 = vpop.f32.mrb[71].mxu0  ;;  %v8336_v28 = vld [vmem:[#allocation10 + $0x8c4] ss:$8 sps:$4 sm:$0xff]   ;;  %v8337_v48 = vld [vmem:[#allocation10 + $0x3c0] ss:$8 sps:$4 sm:$0xff]  }
 0x3ef   :  { %5096 = vmatprep.subr.bf16.mxu1 %v8332_v33  ;;  %v4362_v0 = vpop.f32.mrb[71].mxu1  ;;  %v8338_v23 = vld [vmem:[#allocation10 + $0x8c0] ss:$8 sps:$4 sm:$0xff]   ;;  %v8340_v59 = vld [vmem:[#allocation10 + $0x8d4] ss:$8 sps:$4 sm:$0xff]  }
 0x3f0   :  { %v8341_v4 = vld [vmem:[#allocation10 + $0x3d0] ss:$8 sps:$4 sm:$0xff]   ;;  %v8343_v0 = vld [vmem:[#allocation10 + $0x3e4] ss:$8 sps:$4 sm:$0xff]   ;;  %v8345_v61 = vld [vmem:[#allocation10 + $0x3e0] ss:$8 sps:$4 sm:$0xff]  }
 0x3f1   :  { %4649 = vmatpush1.bf16.msra.mxu0 %v8333_v36  ;;  %v8342_v33 = vld [vmem:[#allocation10 + $0x8d0] ss:$8 sps:$4 sm:$0xff]   ;;  %v8344_v36 = vld [vmem:[#allocation10 + $0x8e4] ss:$8 sps:$4 sm:$0xff]  }
 0x3f2   :  { %5097 = vmatpush1.bf16.msra.mxu1 %v8334_v25  ;;  %4650 = vmatprep.subr.bf16.mxu0 %v8335_v43  ;;  %v8346_v43 = vld [vmem:[#allocation10 + $0x8e0] ss:$8 sps:$4 sm:$0xff]   ;;  %v8348_v25 = vld [vmem:[#allocation10 + $0x8f4] ss:$8 sps:$4 sm:$0xff]  }
 0x3f3   :  { %5098 = vmatprep.subr.bf16.mxu1 %v8336_v28  ;;  %v8347_v28 = vld [vmem:[#allocation10 + $0x3f4] ss:$8 sps:$4 sm:$0xff]  }
 0x3f5   :  { %4651 = vmatpush1.bf16.msra.mxu0 %v8337_v48  ;;  %v8349_v48 = vld [vmem:[#allocation10 + $0x3f0] ss:$8 sps:$4 sm:$0xff]  }
 0x3f6   :  { %5099 = vmatpush1.bf16.msra.mxu1 %v8338_v23  ;;  %4652 = vmatprep.subr.bf16.mxu0 %v8339_v3  ;;  %v8350_v3 = vld [vmem:[#allocation10 + $0x8f0] ss:$8 sps:$4 sm:$0xff]   ;;  %v8351_v23 = vld [vmem:[#allocation10 + $0x404] ss:$8 sps:$4 sm:$0xff]  }
 0x3f7   :  { %5100 = vmatprep.subr.bf16.mxu1 %v8340_v59  ;;  %v8352_v59 = vld [vmem:[#allocation10 + $0x904] ss:$8 sps:$4 sm:$0xff]  }
 0x3f9   :  { %4653 = vmatpush1.bf16.msra.mxu0 %v8341_v4  ;;  %v8353_v4 = vld [vmem:[#allocation10 + $0x400] ss:$8 sps:$4 sm:$0xff]  }
 0x3fa   :  { %5101 = vmatpush1.bf16.msra.mxu1 %v8342_v33  ;;  %4654 = vmatprep.subr.bf16.mxu0 %v8343_v0  ;;  %v8354_v33 = vld [vmem:[#allocation10 + $0x900] ss:$8 sps:$4 sm:$0xff]   ;;  %v8355_v0 = vld [vmem:[#allocation10 + $0x414] ss:$8 sps:$4 sm:$0xff]  }
 0x3fb   :  { %5102 = vmatprep.subr.bf16.mxu1 %v8344_v36  ;;  %v8356_v36 = vld [vmem:[#allocation10 + $0x914] ss:$8 sps:$4 sm:$0xff]  }
 0x3fd   :  { %4655 = vmatpush1.bf16.msra.mxu0 %v8345_v61  ;;  %v11008_v61 = vld [vmem:[#allocation48_spill] sm:$0xff] }
 0x3fe   :  { %5103 = vmatpush1.bf16.msra.mxu1 %v8346_v43  ;;  %4656 = vmatprep.subr.bf16.mxu0 %v8347_v28  ;;  %v11009_v43 = vld [vmem:[#allocation49_spill] sm:$0xff] }
 0x3ff   :  { %5104 = vmatprep.subr.bf16.mxu1 %v8348_v25  ;;  %v6565_v28 = vld [vmem:[%s10814_s5 + $0x180] sm:$0xff]  ;;  %v6566_v25 = vld [vmem:[%s10814_s5 + $0x188] sm:$0xff] }
 0x401   :  { %4657 = vmatpush1.bf16.msra.mxu0 %v8349_v48  ;;  %v5314_v48 = vld [vmem:[%s10814_s5 + $0x80] sm:$0xff] }
 0x402   :  { %5105 = vmatpush1.bf16.msra.mxu1 %v8350_v3  ;;  %4748 = vmatprep.subr.bf16.mxu0 %v8351_v23  ;;  %v5315_v3 = vld [vmem:[%s10814_s5 + $0x88] sm:$0xff] }
 0x403   :  { %5159 = vmatprep.subr.bf16.mxu1 %v8352_v59  ;;  %v11010_v23 = vld [vmem:[#allocation50_spill] sm:$0xff]  ;;  %v11011_v59 = vld [vmem:[#allocation51_spill] sm:$0xff] }
 0x404   :  { %4659 = vmatmul.mubr.bf16.vlgmr.msra.gmra.mrb[72].mxu0 %v9349_v42 }
 0x405   :  { %5107 = vmatmul.mubr.bf16.vlgmr.msra.gmra.mrb[72].mxu1 %v9349_v42  ;;  %4668 = vmatprep.mubr.bf16.mxu0 %v9439_v50  ;;  %v10980_v42 = vld [vmem:[#allocation19_spill] sm:$0xff] }
 0x406   :  { %4749 = vmatpush1.bf16.msra.mxu0 %v8353_v4  ;;  %5116 = vmatprep.mubr.bf16.mxu1 %v9439_v50  ;;  %v10982_v50 = vld [vmem:[#allocation21_spill] sm:$0xff]  ;;  %v11012_v4 = vld [vmem:[#allocation52_spill] sm:$0xff] }
 0x407   :  { %5160 = vmatpush1.bf16.msra.mxu1 %v8354_v33  ;;  %4750 = vmatprep.subr.bf16.mxu0 %v8355_v0  ;;  %v7033_v33 = vpack.c.bf16 %v6566_v25, %v6565_v28  ;;  %v11013_v0 = vld [vmem:[#allocation53_spill] sm:$0xff]  ;;  %v6571_v28 = vld [vmem:[%s10814_s5 + $0x1b0] sm:$0xff]  ;;  %v6572_v25 = vld [vmem:[%s10814_s5 + $0x1b8] sm:$0xff] }
 0x408   :  { %5161 = vmatprep.subr.bf16.mxu1 %v8356_v36  ;;  %v7065_v36 = vpack.c.bf16 %v5315_v3, %v5314_v48 }
 0x40a   :  { %4751 = vmatpush1.bf16.msra.mxu0 %v9581_v6  ;;  %v10985_v6 = vld [vmem:[#allocation25_spill] sm:$0xff] }
 0x40b   :  { %5162 = vmatpush1.bf16.msra.mxu1 %v9583_v31  ;;  %4752 = vmatprep.subr.bf16.mxu0 %v9585_v45  ;;  %v10986_v31 = vld [vmem:[#allocation26_spill] sm:$0xff]  ;;  %v10987_v45 = vld [vmem:[#allocation27_spill] sm:$0xff] }
 0x40c   :  { %4669 = vmatmul.mubr.bf16.gmra.mrb[76].mxu0 %v9431_v29  ;;  %5163 = vmatprep.subr.bf16.mxu1 %v9587_v17  ;;  %v10988_v17 = vld [vmem:[#allocation28_spill] sm:$0xff] }
 0x40d   :  { %5117 = vmatmul.mubr.bf16.gmra.mrb[76].mxu1 %v9431_v29  ;;  %4678 = vmatprep.mubr.bf16.mxu0 %v9527_v52  ;;  %v10981_v29 = vld [vmem:[#allocation20_spill] sm:$0xff] }
 0x40e   :  { %4753 = vmatpush1.bf16.msra.mxu0 %v9590_v34  ;;  %5126 = vmatprep.mubr.bf16.mxu1 %v9527_v52  ;;  %v10984_v52 = vld [vmem:[#allocation23_spill] sm:$0xff]  ;;  %v10990_v34 = vld [vmem:[#allocation30_spill] sm:$0xff] }
 0x40f   :  { %5164 = vmatpush1.bf16.msra.mxu1 %v9594_v49  ;;  %4754 = vmatprep.subr.bf16.mxu0 %v9596_v39  ;;  %v10991_v49 = vld [vmem:[#allocation31_spill] sm:$0xff]  ;;  %v10992_v39 = vld [vmem:[#allocation32_spill] sm:$0xff] }
 0x410   :  { %5165 = vmatprep.subr.bf16.mxu1 %v9600_v56  ;;  %v10993_v56 = vld [vmem:[#allocation33_spill] sm:$0xff] }
 0x412   :  { %4755 = vmatpush1.bf16.msra.mxu0 %v9606_v57  ;;  %v10994_v57 = vld [vmem:[#allocation34_spill] sm:$0xff] }
 0x413   :  { %5166 = vmatpush1.bf16.msra.mxu1 %v9610_v18  ;;  %4756 = vmatprep.subr.bf16.mxu0 %v9612_v41  ;;  %v10995_v18 = vld [vmem:[#allocation35_spill] sm:$0xff]  ;;  %v10996_v41 = vld [vmem:[#allocation36_spill] sm:$0xff] }
 0x414   :  { %4679 = vmatmul.mubr.bf16.gmra.mrb[80].mxu0 %v9521_v12  ;;  %5167 = vmatprep.subr.bf16.mxu1 %v9615_v11  ;;  %v10997_v11 = vld [vmem:[#allocation37_spill] sm:$0xff] }
 0x415   :  { %5127 = vmatmul.mubr.bf16.gmra.mrb[80].mxu1 %v9521_v12  ;;  %4688 = vmatprep.mubr.bf16.mxu0 %v9785_v54  ;;  %v10983_v12 = vld [vmem:[#allocation22_spill] sm:$0xff] }
 0x416   :  { %4757 = vmatpush1.bf16.msra.mxu0 %v9618_v2  ;;  %5136 = vmatprep.mubr.bf16.mxu1 %v9785_v54  ;;  %v10998_v2 = vld [vmem:[#allocation38_spill] sm:$0xff] }
 0x417   :  { %5168 = vmatpush1.bf16.msra.mxu1 %v9626_v58  ;;  %4758 = vmatprep.subr.bf16.mxu0 %v9628_v32  ;;  %v10999_v58 = vld [vmem:[#allocation39_spill] sm:$0xff]  ;;  %v11000_v32 = vld [vmem:[#allocation40_spill] sm:$0xff] }
 0x418   :  { %5169 = vmatprep.subr.bf16.mxu1 %v9632_v51  ;;  %v11001_v51 = vld [vmem:[#allocation41_spill] sm:$0xff] }
 0x41a   :  { %4759 = vmatpush1.bf16.msra.mxu0 %v9638_v7  ;;  %v11002_v7 = vld [vmem:[#allocation42_spill] sm:$0xff] }
 0x41b   :  { %5170 = vmatpush1.bf16.msra.mxu1 %v9642_v47  ;;  %4760 = vmatprep.subr.bf16.mxu0 %v9644_v30  ;;  %v11003_v47 = vld [vmem:[#allocation43_spill] sm:$0xff]  ;;  %v11004_v30 = vld [vmem:[#allocation44_spill] sm:$0xff] }
 0x41c   :  { %4689 = vmatmul.mubr.bf16.gmra.mrb[84].mxu0 %v9793_v19  ;;  %5171 = vmatprep.subr.bf16.mxu1 %v9647_v16  ;;  %v11005_v16 = vld [vmem:[#allocation45_spill] sm:$0xff] }
 0x41d   :  { %5137 = vmatmul.mubr.bf16.gmra.mrb[84].mxu1 %v9793_v19  ;;  %4780 = vmatprep.mubr.bf16.mxu0 %v9368_v14 }
 0x41e   :  { %4761 = vmatpush1.bf16.msra.mxu0 %v9654_v21  ;;  %5191 = vmatprep.mubr.bf16.mxu1 %v9368_v14  ;;  %v10989_v14 = vld [vmem:[#allocation29_spill] sm:$0xff]  ;;  %v11006_v21 = vld [vmem:[#allocation46_spill] sm:$0xff] }
 0x41f   :  { %5172 = vmatpush1.bf16.msra.mxu1 %v9658_v62  ;;  %4762 = vmatprep.subr.bf16.mxu0 %v10980_v42  ;;  %v11007_v62 = vld [vmem:[#allocation47_spill] sm:$0xff]  ;;  %v5298_v42 = vld [vmem:[%s10814_s5] sm:$0xff] }
 0x420   :  { %5173 = vmatprep.subr.bf16.mxu1 %v10981_v29  ;;  %v5299_v29 = vld [vmem:[%s10814_s5 + $0x8] sm:$0xff] }
 0x422   :  { %4763 = vmatpush1.bf16.msra.mxu0 %v10982_v50  ;;  %v6549_v50 = vld [vmem:[%s10814_s5 + $0x100] sm:$0xff] }
 0x423   :  { %5174 = vmatpush1.bf16.msra.mxu1 %v10983_v12  ;;  %4764 = vmatprep.subr.bf16.mxu0 %v10984_v52  ;;  %v6550_v12 = vld [vmem:[%s10814_s5 + $0x108] sm:$0xff]  ;;  %v5316_v52 = vld [vmem:[%s10814_s5 + $0x90] sm:$0xff] }
 0x424   :  { %5175 = vmatprep.subr.bf16.mxu1 %v10985_v6  ;;  %v5317_v6 = vld [vmem:[%s10814_s5 + $0x98] sm:$0xff] }
 0x426   :  { %4765 = vmatpush1.bf16.msra.mxu0 %v10986_v31  ;;  %v11014_v31 = vld [vmem:[#allocation54_spill] sm:$0xff] }
 0x427   :  { %5176 = vmatpush1.bf16.msra.mxu1 %v10987_v45  ;;  %4766 = vmatprep.subr.bf16.mxu0 %v10988_v17  ;;  %v6567_v45 = vld [vmem:[%s10814_s5 + $0x190] sm:$0xff]  ;;  %v6568_v17 = vld [vmem:[%s10814_s5 + $0x198] sm:$0xff] }
 0x428   :  { %5177 = vmatprep.subr.bf16.mxu1 %v10989_v14  ;;  %v11015_v14 = vld [vmem:[#allocation55_spill] sm:$0xff] }
 0x42a   :  { %4767 = vmatpush1.bf16.msra.mxu0 %v10990_v34  ;;  %v7067_v34 = vpack.c.bf16 %v5299_v29, %v5298_v42  ;;  %v5322_v42 = vld [vmem:[%s10814_s5 + $0xc0] sm:$0xff]  ;;  %v5323_v29 = vld [vmem:[%s10814_s5 + $0xc8] sm:$0xff] }
 0x42b   :  { %5178 = vmatpush1.bf16.msra.mxu1 %v10991_v49  ;;  %4768 = vmatprep.subr.bf16.mxu0 %v10992_v39  ;;  %v7035_v49 = vpack.c.bf16 %v6550_v12, %v6549_v50  ;;  %v7069_v39 = vpack.c.bf16 %v5317_v6, %v5316_v52  ;;  %v11016_v50 = vld [vmem:[#allocation18_spill] sm:$0xff]  ;;  %v6573_v12 = vld [vmem:[%s10814_s5 + $0x1c0] sm:$0xff] }
 0x42c   :  { %5179 = vmatprep.subr.bf16.mxu1 %v10993_v56  ;;  %v5300_v56 = vld [vmem:[%s10814_s5 + $0x10] sm:$0xff]  ;;  %v6574_v52 = vld [vmem:[%s10814_s5 + $0x1c8] sm:$0xff] }
 0x42e   :  { %4769 = vmatpush1.bf16.msra.mxu0 %v10994_v57  ;;  %v5301_v57 = vld [vmem:[%s10814_s5 + $0x18] sm:$0xff] }
 0x42f   :  { %5180 = vmatpush1.bf16.msra.mxu1 %v10995_v18  ;;  %4770 = vmatprep.subr.bf16.mxu0 %v10996_v41  ;;  %v6551_v18 = vld [vmem:[%s10814_s5 + $0x110] sm:$0xff]  ;;  %v7037_v41 = vpack.c.bf16 %v6568_v17, %v6567_v45  ;;  %v7081_v45 = vpack.c.bf16 %v5323_v29, %v5322_v42  ;;  %v5307_v17 = vld [vmem:[%s10814_s5 + $0x48] sm:$0xff] }
 0x430   :  { %5181 = vmatprep.subr.bf16.mxu1 %v10997_v11  ;;  %v6552_v11 = vld [vmem:[%s10814_s5 + $0x118] sm:$0xff]  ;;  %v6579_v29 = vld [vmem:[%s10814_s5 + $0x1f0] sm:$0xff] }
 0x432   :  { %4771 = vmatpush1.bf16.msra.mxu0 %v10998_v2  ;;  %v5318_v2 = vld [vmem:[%s10814_s5 + $0xa0] sm:$0xff] }
 0x433   :  { %5182 = vmatpush1.bf16.msra.mxu1 %v10999_v58  ;;  %4772 = vmatprep.subr.bf16.mxu0 %v11000_v32  ;;  %v5319_v58 = vld [vmem:[%s10814_s5 + $0xa8] sm:$0xff]  ;;  %v6569_v32 = vld [vmem:[%s10814_s5 + $0x1a0] sm:$0xff] }
 0x434   :  { %5183 = vmatprep.subr.bf16.mxu1 %v11001_v51  ;;  %v6570_v51 = vld [vmem:[%s10814_s5 + $0x1a8] sm:$0xff] }
 0x436   :  { %4773 = vmatpush1.bf16.msra.mxu0 %v11002_v7  ;;  %v7071_v7 = vpack.c.bf16 %v5301_v57, %v5300_v56  ;;  %v5325_v56 = vld [vmem:[%s10814_s5 + $0xd8] sm:$0xff] }
 0x437   :  { %5184 = vmatpush1.bf16.msra.mxu1 %v11003_v47  ;;  %4774 = vmatprep.subr.bf16.mxu0 %v11004_v30  ;;  %v7039_v47 = vpack.c.bf16 %v6552_v11, %v6551_v18  ;;  %v7073_v30 = vpack.c.bf16 %v5319_v58, %v5318_v2  ;;  %v5308_v11 = vld [vmem:[%s10814_s5 + $0x50] sm:$0xff]  ;;  %v5309_v2 = vld [vmem:[%s10814_s5 + $0x58] sm:$0xff]  ;;  %v11017_v58 = vld [vmem:[#allocation17_spill] sm:$0xff] }
 0x438   :  { %5185 = vmatprep.subr.bf16.mxu1 %v11005_v16  ;;  %v5303_v16 = vld [vmem:[%s10814_s5 + $0x28] sm:$0xff] }
 0x43a   :  { %4775 = vmatpush1.bf16.msra.mxu0 %v11006_v21  ;;  %v6553_v21 = vld [vmem:[%s10814_s5 + $0x120] sm:$0xff] }
 0x43b   :  { %5186 = vmatpush1.bf16.msra.mxu1 %v11007_v62  ;;  %4776 = vmatprep.subr.bf16.mxu0 %v11008_v61  ;;  %v6554_v62 = vld [vmem:[%s10814_s5 + $0x128] sm:$0xff]  ;;  %v5320_v61 = vld [vmem:[%s10814_s5 + $0xb0] sm:$0xff] }
 0x43c   :  { %5187 = vmatprep.subr.bf16.mxu1 %v11009_v43  ;;  %v5321_v43 = vld [vmem:[%s10814_s5 + $0xb8] sm:$0xff]  ;;  %v7043_v3 = vpack.c.bf16 %v6554_v62, %v6553_v21  ;;  %v5311_v62 = vld [vmem:[%s10814_s5 + $0x68] sm:$0xff] }
 0x43e   :  { %4777 = vmatpush1.bf16.msra.mxu0 %v11010_v23  ;;  %v7077_v23 = vpack.c.bf16 %v5321_v43, %v5320_v61  ;;  %v6577_v43 = vld [vmem:[%s10814_s5 + $0x1e0] sm:$0xff] }
 0x43f   :  { %5188 = vmatpush1.bf16.msra.mxu1 %v11011_v59  ;;  %4778 = vmatprep.subr.bf16.mxu0 %v11012_v4  ;;  %v5304_v59 = vld [vmem:[%s10814_s5 + $0x30] sm:$0xff]  ;;  %v5305_v4 = vld [vmem:[%s10814_s5 + $0x38] sm:$0xff] }
 0x440   :  { %5189 = vmatprep.subr.bf16.mxu1 %v11013_v0  ;;  %v7045_v0 = vpack.c.bf16 %v6572_v25, %v6571_v28  ;;  %v7079_v6 = vpack.c.bf16 %v5305_v4, %v5304_v59  ;;  %v6578_v28 = vld [vmem:[%s10814_s5 + $0x1e8] sm:$0xff]  ;;  %v5328_v59 = vld [vmem:[%s10814_s5 + $0xf0] sm:$0xff]  ;;  %v5329_v4 = vld [vmem:[%s10814_s5 + $0xf8] sm:$0xff] }
 0x441   :  { %v7057_v25 = vpack.c.bf16 %v6578_v28, %v6577_v43  ;;  %v6613_v28 = vld [vmem:[%s10814_s5 + $0x300] sm:$0xff] }
 0x442   :  { %4779 = vmatpush1.bf16.msra.mxu0 %v11014_v31 }
 0x443   :  { %5190 = vmatpush1.bf16.msra.mxu1 %v11015_v14  ;;  %7034 = vmatprep.subr.bf16.mxu0 %v7033_v33  ;;  %v6555_v33 = vld [vmem:[%s10814_s5 + $0x130] sm:$0xff]  ;;  %v6557_v14 = vld [vmem:[%s10814_s5 + $0x140] sm:$0xff] }
 0x444   :  { %7066 = vmatprep.subr.bf16.mxu1 %v7065_v36  ;;  %v6556_v36 = vld [vmem:[%s10814_s5 + $0x138] sm:$0xff] }
 0x445   :  { %4781 = vmatmul.mubr.bf16.vlgmr.msra.gmra.mrb[72].mxu0 %v9361_v46  ;;  %v7047_v31 = vpack.c.bf16 %v6556_v36, %v6555_v33  ;;  %v7093_v33 = vpack.c.bf16 %v5329_v4, %v5328_v59  ;;  %v5313_v36 = vld [vmem:[%s10814_s5 + $0x78] sm:$0xff] }
 0x446   :  { %5192 = vmatmul.mubr.bf16.vlgmr.msra.gmra.mrb[72].mxu1 %v9361_v46  ;;  %4790 = vmatprep.mubr.bf16.mxu0 %v9454_v9  ;;  %v5302_v46 = vld [vmem:[%s10814_s5 + $0x20] sm:$0xff] }
 0x447   :  { %5201 = vmatprep.mubr.bf16.mxu1 %v9454_v9  ;;  %7068 = vmatpush3.bf16.msra.mxu1 %v7067_v34  ;;  %v7041_v9 = vpack.c.bf16 %v6570_v51, %v6569_v32  ;;  %v7075_v48 = vpack.c.bf16 %v5303_v16, %v5302_v46  ;;  %v7049_v34 = vpack.c.bf16 %v6574_v52, %v6573_v12  ;;  %v6575_v51 = vld [vmem:[%s10814_s5 + $0x1d0] sm:$0xff]  ;;  %v5327_v16 = vld [vmem:[%s10814_s5 + $0xe8] sm:$0xff] }
 0x448   :  { %7036 = vmatpush3.bf16.msra.mxu0 %v7035_v49  ;;  %7070 = vmatprep.subr.bf16.mxu1 %v7069_v39  ;;  %v6558_v49 = vld [vmem:[%s10814_s5 + $0x148] sm:$0xff]  ;;  %v5324_v39 = vld [vmem:[%s10814_s5 + $0xd0] sm:$0xff]  ;;  %v7087_v32 = vpack.c.bf16 %v5309_v2, %v5308_v11  ;;  %v11019_v11 = vld [vmem:[#allocation24_spill] sm:$0xff] }
 0x449   :  { %7038 = vmatprep.subr.bf16.mxu0 %v7037_v41  ;;  %v7051_v18 = vpack.c.bf16 %v6558_v49, %v6557_v14  ;;  %v7085_v41 = vpack.c.bf16 %v5325_v56, %v5324_v39  ;;  %v6563_v52 = vld [vmem:[%s10814_s5 + $0x170] sm:$0xff]  ;;  %v6597_v14 = vld [vmem:[%s10814_s5 + $0x280] sm:$0xff]  ;;  %v11020_v2 = vsub.s32 0, %v11019_v11 }
 0x44a   :  { %v5258_v39 = vld [vmem:[#allocation11] sm:$0x3] }
 0x44b   :  { %7072 = vmatpush3.bf16.msra.mxu1 %v7071_v7  ;;  %v6576_v7 = vld [vmem:[%s10814_s5 + $0x1d8] sm:$0xff] }
 0x44c   :  { %7040 = vmatpush3.bf16.msra.mxu0 %v7039_v47  ;;  %7074 = vmatprep.subr.bf16.mxu1 %v7073_v30  ;;  %v7053_v47 = vpack.c.bf16 %v6576_v7, %v6575_v51  ;;  %v6560_v30 = vld [vmem:[%s10814_s5 + $0x158] sm:$0xff]  ;;  %v11021_v51 = vmax.f32 %v9846_v26, %v9851_v37 }
 0x44d   :  { %4791 = vmatmul.mubr.bf16.gmra.mrb[76].mxu0 %v9447_v20  ;;  %7042 = vmatprep.subr.bf16.mxu0 %v7041_v9  ;;  %v5310_v9 = vld [vmem:[%s10814_s5 + $0x60] sm:$0xff] }
 0x44e   :  { %5202 = vmatmul.mubr.bf16.gmra.mrb[76].mxu1 %v9447_v20  ;;  %4800 = vmatprep.mubr.bf16.mxu0 %v11016_v50  ;;  %v5306_v20 = vld [vmem:[%s10814_s5 + $0x40] sm:$0xff]  ;;  %v7091_v61 = vpack.c.bf16 %v5311_v62, %v5310_v9  ;;  %v11024_v62 = vmax.f32 %v9859_v38, %v9863_v63  ;;  %v6631_v38 = vld [vmem:[%s10814_s5 + $0x390] sm:$0xff]  ;;  %v6632_v63 = vld [vmem:[%s10814_s5 + $0x398] sm:$0xff] }
 0x44f   :  { %5211 = vmatprep.mubr.bf16.mxu1 %v11016_v50  ;;  %7076 = vmatpush3.bf16.msra.mxu1 %v7075_v48  ;;  %v7083_v57 = vpack.c.bf16 %v5307_v17, %v5306_v20  ;;  %v6561_v48 = vld [vmem:[%s10814_s5 + $0x160] sm:$0xff]  ;;  %v6580_v50 = vld [vmem:[%s10814_s5 + $0x1f8] sm:$0xff]  ;;  %v6630_v20 = vld [vmem:[%s10814_s5 + $0x388] sm:$0xff] }
 0x450   :  { %7044 = vmatpush3.bf16.msra.mxu0 %v7043_v3  ;;  %7078 = vmatprep.subr.bf16.mxu1 %v7077_v23  ;;  %v6562_v3 = vld [vmem:[%s10814_s5 + $0x168] sm:$0xff]  ;;  %v7061_v12 = vpack.c.bf16 %v6580_v50, %v6579_v29  ;;  %v11025_v50 = vmax.f32 %v9868_v27, %v9872_v5 }
 0x451   :  { %7046 = vmatprep.subr.bf16.mxu0 %v7045_v0  ;;  %v7059_v23 = vpack.c.bf16 %v6562_v3, %v6561_v48  ;;  %v5312_v0 = vld [vmem:[%s10814_s5 + $0x70] sm:$0xff]  ;;  %v6581_v3 = vld [vmem:[%s10814_s5 + $0x200] sm:$0xff] }
 0x452   :  { %v7095_v42 = vpack.c.bf16 %v5313_v36, %v5312_v0  ;;  %v6599_v36 = vld [vmem:[%s10814_s5 + $0x290] sm:$0xff] }
 0x453   :  { %7080 = vmatpush3.bf16.msra.mxu1 %v7079_v6  ;;  %v6564_v6 = vld [vmem:[%s10814_s5 + $0x178] sm:$0xff] }
 0x454   :  { %7048 = vmatpush3.bf16.msra.mxu0 %v7047_v31  ;;  %7082 = vmatprep.subr.bf16.mxu1 %v7081_v45  ;;  %v7063_v31 = vpack.c.bf16 %v6564_v6, %v6563_v52  ;;  %v6629_v45 = vld [vmem:[%s10814_s5 + $0x380] sm:$0xff] }
 0x455   :  { %4801 = vmatmul.mubr.bf16.gmra.mrb[80].mxu0 %v11017_v58  ;;  %7050 = vmatprep.subr.bf16.mxu0 %v7049_v34  ;;  %v7129_v17 = vpack.c.bf16 %v6630_v20, %v6629_v45  ;;  %v6598_v34 = vld [vmem:[%s10814_s5 + $0x288] sm:$0xff]  ;;  %v6615_v45 = vld [vmem:[%s10814_s5 + $0x310] sm:$0xff]  ;;  %v6616_v20 = vld [vmem:[%s10814_s5 + $0x318] sm:$0xff] }
 0x456   :  { %5212 = vmatmul.mubr.bf16.gmra.mrb[80].mxu1 %v11017_v58  ;;  %4810 = vmatprep.mubr.bf16.mxu0 %v9785_v54  ;;  %v7097_v49 = vpack.c.bf16 %v6598_v34, %v6597_v14  ;;  %v10228_v58 = vrot.slane %v5258_v39, %v11020_v2  ;;  %v11026_v14 = vmax.f32 %v9874_v8, %v9879_v40 }
 0x457   :  { %5221 = vmatprep.mubr.bf16.mxu1 %v9785_v54  ;;  %7084 = vmatpush3.bf16.msra.mxu1 %v7083_v57  ;;  %v6559_v54 = vld [vmem:[%s10814_s5 + $0x150] sm:$0xff]  ;;  %v11018_v57 = vmax.f32 %v9840_v15, %v9844_v10  ;;  %v11023_v15 = vmax.f32 %v9853_v13, %v9857_v44  ;;  %v6614_v13 = vld [vmem:[%s10814_s5 + $0x308] sm:$0xff]  ;;  %v11027_v8 = vmax.f32 %v9881_v24, %v9885_v1 }
 0x458   :  { %7052 = vmatpush3.bf16.msra.mxu0 %v7051_v18  ;;  %7086 = vmatprep.subr.bf16.mxu1 %v7085_v41  ;;  %v7055_v46 = vpack.c.bf16 %v6560_v30, %v6559_v54  ;;  %v11022_v54 = vsub.s32 1, %v11019_v11  ;;  %v7131_v0 = vpack.c.bf16 %v6614_v13, %v6613_v28 }
 0x459   :  { %7054 = vmatprep.subr.bf16.mxu0 %v7053_v47 }
 0x45a   :  { %v10235_v30 = vrot.slane %v5258_v39, %v11022_v54  ;;  %v6633_v39 = vld [vmem:[%s10814_s5 + $0x3a0] sm:$0xff]  ;;  %v7135_v54 = vpack.c.bf16 %v6616_v20, %v6615_v45 }
 0x45b   :  { %7088 = vmatpush3.bf16.msra.mxu1 %v7087_v32 }
 0x45c   :  { %7056 = vmatpush3.bf16.msra.mxu0 %v7055_v46 }
 0x45d   :  { %4811 = vmatmul.mubr.bf16.gmra.mrb[84].mxu0 %v9793_v19  ;;  %7058 = vmatprep.subr.bf16.mxu0 %v7057_v25 }
 0x45e   :  { %5222 = vmatmul.mubr.bf16.gmra.mrb[84].mxu1 %v9793_v19  ;;  %v5326_v19 = vld [vmem:[%s10814_s5 + $0xe0] sm:$0xff] }
 0x45f   :  { %v7089_v21 = vpack.c.bf16 %v5327_v16, %v5326_v19 }
 0x460   :  { %7060 = vmatpush3.bf16.msra.mxu0 %v7059_v23  ;;  %v6582_v23 = vld [vmem:[%s10814_s5 + $0x208] sm:$0xff] }
 0x461   :  { %7090 = vmatprep.subr.bf16.mxu1 %v7089_v21  ;;  %7062 = vmatprep.subr.bf16.mxu0 %v7061_v12 }
 0x462   :  { %7092 = vmatpush3.bf16.msra.mxu1 %v7091_v61 }
 0x463   :  { %7094 = vmatprep.subr.bf16.mxu1 %v7093_v33 }
 0x464   :  { %7064 = vmatpush3.bf16.msra.mxu0 %v7063_v31  ;;  %v7133_v31 = vpack.c.bf16 %v6632_v63, %v6631_v38  ;;  %v6603_v38 = vld [vmem:[%s10814_s5 + $0x2b0] sm:$0xff]  ;;  %v6604_v63 = vld [vmem:[%s10814_s5 + $0x2b8] sm:$0xff] }
 0x465   :  { %7098 = vmatprep.subr.bf16.mxu0 %v7097_v49  ;;  %v7099_v49 = vpack.c.bf16 %v6582_v23, %v6581_v3  ;;  %v11030_v3 = vld [vmem:[#allocation57_spill] sm:$0xff] }
 0x466   :  { %7096 = vmatpush3.bf16.msra.mxu1 %v7095_v42  ;;  %v6600_v42 = vld [vmem:[%s10814_s5 + $0x298] sm:$0xff] }
 0x467   :  { %7130 = vmatprep.subr.bf16.mxu1 %v7129_v17  ;;  %v7101_v2 = vpack.c.bf16 %v6600_v42, %v6599_v36  ;;  %v6619_v36 = vld [vmem:[%s10814_s5 + $0x330] sm:$0xff]  ;;  %v6620_v42 = vld [vmem:[%s10814_s5 + $0x338] sm:$0xff] }
 0x518   :  { %v4782_v56 = vpop.f32.mrb[72].mxu0 }
 0x519   :  { %v4833_v18 = vmax.f32 %v11018_v57, %v4782_v56  ;;  %v5193_v41 = vpop.f32.mrb[72].mxu1  ;;  %v4784_v32 = vpop.f32.mrb[73].mxu0  ;;  %v6634_v56 = vld [vmem:[%s10814_s5 + $0x3a8] sm:$0xff] }
 0x51a   :  { %v4834_v7 = vmax.f32 %v11021_v51, %v4784_v32  ;;  %v5195_v47 = vpop.f32.mrb[73].mxu1  ;;  %v4786_v46 = vpop.f32.mrb[74].mxu0  ;;  %v6583_v32 = vld [vmem:[%s10814_s5 + $0x210] sm:$0xff]  ;;  %v6584_v51 = vld [vmem:[%s10814_s5 + $0x218] sm:$0xff] }
 0x51b   :  { %v5244_v19 = vmax.f32 %v4833_v18, %v5193_v41  ;;  %v4835_v10 = vmax.f32 %v11023_v15, %v4786_v46  ;;  %v5197_v16 = vpop.f32.mrb[74].mxu1  ;;  %v4788_v21 = vpop.f32.mrb[75].mxu0  ;;  %v6601_v46 = vld [vmem:[%s10814_s5 + $0x2a0] sm:$0xff] }
 0x51c   :  { %v5245_v9 = vmax.f32 %v4834_v7, %v5195_v47  ;;  %v4836_v61 = vmax.f32 %v11024_v62, %v4788_v21  ;;  %v5199_v26 = vpop.f32.mrb[75].mxu1  ;;  %v11028_v47 = vmax.f32 %v9887_v55, %v9891_v53  ;;  %v6617_v55 = vld [vmem:[%s10814_s5 + $0x320] sm:$0xff]  ;;  %v6618_v53 = vld [vmem:[%s10814_s5 + $0x328] sm:$0xff]  ;;  %v6635_v62 = vld [vmem:[%s10814_s5 + $0x3b0] sm:$0xff] }
 0x51d   :  { %v5270_v37 = vadd.f32 %v10228_v58, %v5244_v19  ;;  %v5246_v43 = vmax.f32 %v4835_v10, %v5197_v16  ;;  %v6602_v19 = vld [vmem:[%s10814_s5 + $0x2a8] sm:$0xff]  ;;  %v7137_v10 = vpack.c.bf16 %v6634_v56, %v6633_v39 }
 0x51e   :  { %v5271_v44 = vadd.f32 %v10235_v30, %v5245_v9  ;;  %v5247_v25 = vmax.f32 %v4836_v61, %v5199_v26  ;;  %v7103_v9 = vpack.c.bf16 %v6584_v51, %v6583_v32  ;;  %v6636_v61 = vld [vmem:[%s10814_s5 + $0x3b8] sm:$0xff]  ;;  %v7105_v26 = vpack.c.bf16 %v6602_v19, %v6601_v46  ;;  %v11036_v39 = vld [vmem:[#allocation61_spill] sm:$0xff]  ;;  %v6587_v32 = vld [vmem:[%s10814_s5 + $0x230] sm:$0xff] }
 0x51f   :  { %v5272_v48 = vadd.f32 %v10228_v58, %v5246_v43  ;;  %v5284_v29 = vmax.f32 %v5270_v37, 0.0  ;;  %v6585_v37 = vld [vmem:[%s10814_s5 + $0x220] sm:$0xff]  ;;  %v6586_v43 = vld [vmem:[%s10814_s5 + $0x228] sm:$0xff]  ;;  %v6588_v51 = vld [vmem:[%s10814_s5 + $0x238] sm:$0xff]  ;;  %v7143_v19 = vpack.c.bf16 %v6620_v42, %v6619_v36 }
 0x520   :  { %v5285_v59 = vmax.f32 %v5271_v44, 0.0  ;;  %v5273_v4 = vadd.f32 %v10235_v30, %v5247_v25  ;;  %v4792_v33 = vpop.f32.mrb[76].mxu0  ;;  %v7139_v25 = vpack.c.bf16 %v6618_v53, %v6617_v55  ;;  %v6606_v55 = vld [vmem:[%s10814_s5 + $0x2c8] sm:$0xff]  ;;  %v6623_v42 = vld [vmem:[%s10814_s5 + $0x350] sm:$0xff] }
 0x521   :  { %v10274_v12 = vmax.f32 %v11025_v50, %v4792_v33  ;;  %v10276_v52 = vpop.f32.mrb[76].mxu1  ;;  %v4794_v6 = vpop.f32.mrb[77].mxu0  ;;  %v5286_v57 = vmax.f32 %v5272_v48, 0.0  ;;  %v11029_v48 = vld [vmem:[#allocation56_spill] sm:$0xff]  ;;  %v11032_v50 = vld [vmem:[#allocation58_spill] sm:$0xff] }
 0x522   :  { %v5287_v17 = vmax.f32 %v5273_v4, 0.0  ;;  %v4838_v34 = vmax.f32 %v11026_v14, %v4794_v6  ;;  %v5205_v27 = vpop.f32.mrb[77].mxu1  ;;  %v4796_v5 = vpop.f32.mrb[78].mxu0  ;;  %5497 = vmatprep.mubr.f32.mxu1 %v5285_v59  ;;  %v11031_v23 = vmax.f32 %v11029_v48, %v11030_v3  ;;  %v11033_v6 = vld [vmem:[#allocation59_spill] sm:$0xff]  ;;  %v7107_v14 = vpack.c.bf16 %v6586_v43, %v6585_v37 }
 0x523   :  { %v5248_v18 = vmax.f32 %v10274_v12, %v10276_v52  ;;  %v10298_v40 = vmax.f32 %v11027_v8, %v4796_v5  ;;  %v10300_v41 = vpop.f32.mrb[78].mxu1  ;;  %v4798_v11 = vpop.f32.mrb[79].mxu0  ;;  %5498 = vmatmul.mubr.f32.vlgmr.msra.gmra.mrb[88].mxu1 %v5284_v29  ;;  %v6639_v37 = vld [vmem:[%s10814_s5 + $0x3d0] sm:$0xff]  ;;  %v6640_v43 = vld [vmem:[%s10814_s5 + $0x3d8] sm:$0xff] }
 0x524   :  { %v5249_v7 = vmax.f32 %v4838_v34, %v5205_v27  ;;  %v4840_v24 = vmax.f32 %v11028_v47, %v4798_v11  ;;  %v5209_v1 = vpop.f32.mrb[79].mxu1  ;;  %7132 = vmatpush3.bf16.msra.mxu1 %v7131_v0  ;;  %5427 = vmatprep.mubr.f32.mxu0 %v5287_v17  ;;  %v7141_v0 = vpack.c.bf16 %v6636_v61, %v6635_v62  ;;  %v6637_v34 = vld [vmem:[%s10814_s5 + $0x3c0] sm:$0xff]  ;;  %v6638_v27 = vld [vmem:[%s10814_s5 + $0x3c8] sm:$0xff]  ;;  %v6607_v48 = vld [vmem:[%s10814_s5 + $0x2d0] sm:$0xff] }
 0x525   :  { %v5250_v15 = vmax.f32 %v10298_v40, %v10300_v41  ;;  %5428 = vmatmul.mubr.f32.vlgmr.msra.gmra.mrb[88].mxu0 %v5286_v57  ;;  %7134 = vmatprep.subr.bf16.mxu1 %v7133_v31  ;;  %v11034_v31 = vmax.f32 %v11032_v50, %v11033_v6  ;;  %v11038_v47 = vld [vmem:[#allocation62_spill] sm:$0xff]  ;;  %v6608_v3 = vld [vmem:[%s10814_s5 + $0x2d8] sm:$0xff]  ;;  %v7149_v36 = vpack.c.bf16 %v6640_v43, %v6639_v37 }
 0x526   :  { %v5275_v16 = vadd.f32 %v10235_v30, %v5249_v7  ;;  %v5251_v21 = vmax.f32 %v4840_v24, %v5209_v1  ;;  %7100 = vmatpush3.bf16.msra.mxu0 %v7099_v49  ;;  %v11035_v49 = vld [vmem:[#allocation60_spill] sm:$0xff]  ;;  %v11039_v24 = vld [vmem:[#allocation63_spill] sm:$0xff]  ;;  %v6622_v62 = vld [vmem:[%s10814_s5 + $0x348] sm:$0xff]  ;;  %v11043_v50 = vmax.f32 %v9923_v35, %v9927_v22 }
 0x527   :  { %7102 = vmatprep.subr.bf16.mxu0 %v7101_v2  ;;  %v11037_v56 = vmax.f32 %v11035_v49, %v11036_v39  ;;  %v7109_v2 = vpack.c.bf16 %v6604_v63, %v6603_v38  ;;  %v11040_v1 = vmax.f32 %v11038_v47, %v11039_v24  ;;  %v7117_v39 = vpack.c.bf16 %v6608_v3, %v6607_v48  ;;  %v6591_v22 = vld [vmem:[%s10814_s5 + $0x250] sm:$0xff]  ;;  %v6592_v35 = vld [vmem:[%s10814_s5 + $0x258] sm:$0xff]  ;;  %v6625_v47 = vld [vmem:[%s10814_s5 + $0x360] sm:$0xff] }
 0x528   :  { %v5289_v28 = vmax.f32 %v5275_v16, 0.0  ;;  %v5277_v13 = vadd.f32 %v10235_v30, %v5251_v21  ;;  %7136 = vmatpush3.bf16.msra.mxu1 %v7135_v54  ;;  %v4802_v44 = vpop.f32.mrb[80].mxu0  ;;  %v7145_v21 = vpack.c.bf16 %v6638_v27, %v6637_v34  ;;  %v6642_v34 = vld [vmem:[%s10814_s5 + $0x3e8] sm:$0xff]  ;;  %v6612_v37 = vld [vmem:[%s10814_s5 + $0x2f8] sm:$0xff]  ;;  %v6595_v3 = vld [vmem:[%s10814_s5 + $0x270] sm:$0xff] }
 0x529   :  { %v4841_v59 = vmax.f32 %v11031_v23, %v4802_v44  ;;  %v5213_v4 = vpop.f32.mrb[80].mxu1  ;;  %v4804_v33 = vpop.f32.mrb[81].mxu0  ;;  %7138 = vmatprep.subr.bf16.mxu1 %v7137_v10  ;;  %v6605_v10 = vld [vmem:[%s10814_s5 + $0x2c0] sm:$0xff]  ;;  %v6626_v24 = vld [vmem:[%s10814_s5 + $0x368] sm:$0xff]  ;;  %v6695_v40 = vld [vmem:[%s10814_s5 + $0x590] sm:$0xff] }
 0x52a   :  { %v5291_v29 = vmax.f32 %v5277_v13, 0.0  ;;  %v10357_v45 = vmax.f32 %v11034_v31, %v4804_v33  ;;  %v10359_v20 = vpop.f32.mrb[81].mxu1  ;;  %7104 = vmatpush3.bf16.msra.mxu0 %v7103_v9  ;;  %v4806_v17 = vpop.f32.mrb[82].mxu0  ;;  %5600 = vmatprep.mubr.f32.mxu0 %v5289_v28  ;;  %v6621_v9 = vld [vmem:[%s10814_s5 + $0x340] sm:$0xff]  ;;  %v7113_v13 = vpack.c.bf16 %v6606_v55, %v6605_v10  ;;  %v6643_v10 = vld [vmem:[%s10814_s5 + $0x3f0] sm:$0xff]  ;;  %v6644_v55 = vld [vmem:[%s10814_s5 + $0x3f8] sm:$0xff] }
 0x52b   :  { %v5252_v5 = vmax.f32 %v4841_v59, %v5213_v4  ;;  %v4843_v57 = vmax.f32 %v11037_v56, %v4806_v17  ;;  %v5217_v8 = vpop.f32.mrb[82].mxu1  ;;  %v4808_v11 = vpop.f32.mrb[83].mxu0  ;;  %7106 = vmatprep.subr.bf16.mxu0 %v7105_v26  ;;  %v7111_v26 = vpack.c.bf16 %v6588_v51, %v6587_v32  ;;  %v6589_v44 = vld [vmem:[%s10814_s5 + $0x240] sm:$0xff]  ;;  %v7147_v63 = vpack.c.bf16 %v6622_v62, %v6621_v9  ;;  %v6594_v9 = vld [vmem:[%s10814_s5 + $0x268] sm:$0xff]  ;;  %v6696_v41 = vld [vmem:[%s10814_s5 + $0x598] sm:$0xff] }
 0x52c   :  { %v5253_v7 = vmax.f32 %v10357_v45, %v10359_v20  ;;  %v10381_v54 = vmax.f32 %v11040_v1, %v4808_v11  ;;  %v10383_v46 = vpop.f32.mrb[83].mxu1  ;;  %7140 = vmatpush3.bf16.msra.mxu1 %v7139_v25  ;;  %5704 = vmatprep.mubr.f32.mxu1 %v5291_v29  ;;  %v6590_v25 = vld [vmem:[%s10814_s5 + $0x248] sm:$0xff]  ;;  %v11041_v23 = vld [vmem:[#allocation64_spill] sm:$0xff]  ;;  %v7155_v62 = vpack.c.bf16 %v6626_v24, %v6625_v47 }
 0x52d   :  { %v10392_v53 = vadd.f32 %v10228_v58, %v5252_v5  ;;  %v5254_v16 = vmax.f32 %v4843_v57, %v5217_v8  ;;  %7142 = vmatprep.subr.bf16.mxu1 %v7141_v0  ;;  %v11042_v59 = vmax.f32 %v9919_v60, %v11041_v23  ;;  %v6624_v29 = vld [vmem:[%s10814_s5 + $0x358] sm:$0xff]  ;;  %v7115_v17 = vpack.c.bf16 %v6590_v25, %v6589_v44  ;;  %v6609_v11 = vld [vmem:[%s10814_s5 + $0x2e0] sm:$0xff] }
 0x52e   :  { %v5255_v61 = vmax.f32 %v10381_v54, %v10383_v46  ;;  %7108 = vmatpush3.bf16.msra.mxu0 %v7107_v14  ;;  %v6641_v14 = vld [vmem:[%s10814_s5 + $0x3e0] sm:$0xff]  ;;  %v7151_v8 = vpack.c.bf16 %v6624_v29, %v6623_v42  ;;  %v7157_v43 = vpack.c.bf16 %v6644_v55, %v6643_v10  ;;  %v6628_v44 = vld [vmem:[%s10814_s5 + $0x378] sm:$0xff]  ;;  %v6678_v29 = vld [vmem:[%s10814_s5 + $0x508] sm:$0xff] }
 0x52f   :  { %v10409_v28 = vadd.f32 %v10228_v58, %v5254_v16  ;;  %7110 = vmatprep.subr.bf16.mxu0 %v7109_v2  ;;  %v6610_v2 = vld [vmem:[%s10814_s5 + $0x2e8] sm:$0xff]  ;;  %v7153_v51 = vpack.c.bf16 %v6642_v34, %v6641_v14  ;;  %v6596_v23 = vld [vmem:[%s10814_s5 + $0x278] sm:$0xff]  ;;  %v6677_v42 = vld [vmem:[%s10814_s5 + $0x500] sm:$0xff] }
 0x530   :  { %7144 = vmatpush3.bf16.msra.mxu1 %v7143_v19  ;;  %v4812_v38 = vpop.f32.mrb[84].mxu0  ;;  %v7119_v19 = vpack.c.bf16 %v6592_v35, %v6591_v22  ;;  %v7121_v16 = vpack.c.bf16 %v6610_v2, %v6609_v11  ;;  %v6645_v54 = vld [vmem:[%s10814_s5 + $0x400] sm:$0xff]  ;;  %v6646_v46 = vld [vmem:[%s10814_s5 + $0x408] sm:$0xff]  ;;  %v6664_v12 = vld [vmem:[%s10814_s5 + $0x498] sm:$0xff] }
 0x531   :  { %v4845_v4 = vmax.f32 %v11042_v59, %v4812_v38  ;;  %v5223_v33 = vpop.f32.mrb[84].mxu1  ;;  %v4814_v0 = vpop.f32.mrb[85].mxu0  ;;  %7146 = vmatprep.subr.bf16.mxu1 %v7145_v21  ;;  %v6593_v21 = vld [vmem:[%s10814_s5 + $0x260] sm:$0xff]  ;;  %v7163_v20 = vpack.c.bf16 %v6646_v46, %v6645_v54  ;;  %v6698_v14 = vld [vmem:[%s10814_s5 + $0x5a8] sm:$0xff]  ;;  %v6700_v47 = vld [vmem:[%s10814_s5 + $0x5b8] sm:$0xff] }
 0x532   :  { %v4846_v6 = vmax.f32 %v11043_v50, %v4814_v0  ;;  %v5225_v31 = vpop.f32.mrb[85].mxu1  ;;  %7112 = vmatpush3.bf16.msra.mxu0 %v7111_v26  ;;  %v4816_v60 = vpop.f32.mrb[86].mxu0  ;;  %v6611_v26 = vld [vmem:[%s10814_s5 + $0x2f0] sm:$0xff]  ;;  %v7123_v25 = vpack.c.bf16 %v6594_v9, %v6593_v21  ;;  %v6693_v38 = vld [vmem:[%s10814_s5 + $0x580] sm:$0xff]  ;;  %v5276_v0 = vadd.f32 %v10228_v58, %v5250_v15  ;;  %v5281_v50 = vadd.f32 %v10235_v30, %v5255_v61  ;;  %v6682_v11 = vld [vmem:[%s10814_s5 + $0x528] sm:$0xff] }
 0x533   :  { %v5256_v27 = vmax.f32 %v4845_v4, %v5223_v33  ;;  %v5227_v5 = vpop.f32.mrb[86].mxu1  ;;  %v4817_v49 = vpop.f32.mrb[87].mxu0  ;;  %7114 = vmatprep.subr.bf16.mxu0 %v7113_v13  ;;  %v6627_v13 = vld [vmem:[%s10814_s5 + $0x370] sm:$0xff]  ;;  %v7125_v48 = vpack.c.bf16 %v6612_v37, %v6611_v26  ;;  %v6661_v4 = vld [vmem:[%s10814_s5 + $0x480] sm:$0xff]  ;;  %v6662_v33 = vld [vmem:[%s10814_s5 + $0x488] sm:$0xff]  ;;  %v5274_v15 = vadd.f32 %v10228_v58, %v5248_v18  ;;  %v5279_v61 = vadd.f32 %v10235_v30, %v5253_v7 }
 0x534   :  { %v5257_v56 = vmax.f32 %v4846_v6, %v5225_v31  ;;  %v5228_v57 = vpop.f32.mrb[87].mxu1  ;;  %7148 = vmatpush3.bf16.msra.mxu1 %v7147_v63  ;;  %v6694_v63 = vld [vmem:[%s10814_s5 + $0x588] sm:$0xff]  ;;  %v7159_v59 = vpack.c.bf16 %v6628_v44, %v6627_v13  ;;  %v7127_v6 = vpack.c.bf16 %v6596_v23, %v6595_v3  ;;  %v7161_v31 = vpack.c.bf16 %v6662_v33, %v6661_v4  ;;  %v6697_v7 = vld [vmem:[%s10814_s5 + $0x5a0] sm:$0xff]  ;;  %v6647_v5 = vld [vmem:[%s10814_s5 + $0x410] sm:$0xff] }
 0x535   :  { %v10454_v32 = vadd.f32 %v10228_v58, %v5256_v27  ;;  %7150 = vmatprep.subr.bf16.mxu1 %v7149_v36  ;;  %v7193_v36 = vpack.c.bf16 %v6694_v63, %v6693_v38  ;;  %v7195_v60 = vpack.c.bf16 %v6678_v29, %v6677_v42  ;;  %v6663_v58 = vld [vmem:[%s10814_s5 + $0x490] sm:$0xff]  ;;  %v5290_v52 = vmax.f32 %v5276_v0, 0.0  ;;  %v6648_v49 = vld [vmem:[%s10814_s5 + $0x418] sm:$0xff]  ;;  %v6665_v35 = vld [vmem:[%s10814_s5 + $0x4a0] sm:$0xff] }
 0x536   :  { %v10463_v1 = vadd.f32 %v10235_v30, %v5257_v56  ;;  %7116 = vmatpush3.bf16.msra.mxu0 %v7115_v17  ;;  %v7197_v18 = vpack.c.bf16 %v6696_v41, %v6695_v40  ;;  %v6679_v17 = vld [vmem:[%s10814_s5 + $0x510] sm:$0xff]  ;;  %v6680_v30 = vld [vmem:[%s10814_s5 + $0x518] sm:$0xff]  ;;  %v5295_v45 = vmax.f32 %v5281_v50, 0.0  ;;  %v5288_v34 = vmax.f32 %v5274_v15, 0.0  ;;  %v6666_v56 = vld [vmem:[%s10814_s5 + $0x4a8] sm:$0xff] }
 0x537   :  { %7118 = vmatprep.subr.bf16.mxu0 %v7117_v39  ;;  %v7165_v27 = vpack.c.bf16 %v6664_v12, %v6663_v58  ;;  %v5293_v39 = vmax.f32 %v5279_v61, 0.0  ;;  %v7199_v22 = vpack.c.bf16 %v6680_v30, %v6679_v17  ;;  %v7201_v57 = vpack.c.bf16 %v6698_v14, %v6697_v7  ;;  %v6650_v10 = vld [vmem:[%s10814_s5 + $0x428] sm:$0xff]  ;;  %v6668_v21 = vld [vmem:[%s10814_s5 + $0x4b8] sm:$0xff]  ;;  %v6703_v0 = vld [vmem:[%s10814_s5 + $0x5d0] sm:$0xff] }
 0x538   :  { %7152 = vmatpush3.bf16.msra.mxu1 %v7151_v8  ;;  %v6681_v8 = vld [vmem:[%s10814_s5 + $0x520] sm:$0xff]  ;;  %v7167_v2 = vpack.c.bf16 %v6648_v49, %v6647_v5  ;;  %v7169_v24 = vpack.c.bf16 %v6666_v56, %v6665_v35  ;;  %v6684_v26 = vld [vmem:[%s10814_s5 + $0x538] sm:$0xff]  ;;  %v6702_v13 = vld [vmem:[%s10814_s5 + $0x5c8] sm:$0xff] }
 0x539   :  { %7154 = vmatprep.subr.bf16.mxu1 %v7153_v51  ;;  %v6699_v51 = vld [vmem:[%s10814_s5 + $0x5b0] sm:$0xff]  ;;  %v7203_v55 = vpack.c.bf16 %v6682_v11, %v6681_v8  ;;  %v6652_v38 = vld [vmem:[%s10814_s5 + $0x438] sm:$0xff]  ;;  %v6670_v3 = vld [vmem:[%s10814_s5 + $0x4c8] sm:$0xff] }
 0x53a   :  { %7120 = vmatpush3.bf16.msra.mxu0 %v7119_v19  ;;  %v6649_v19 = vld [vmem:[%s10814_s5 + $0x420] sm:$0xff]  ;;  %v7205_v9 = vpack.c.bf16 %v6700_v47, %v6699_v51  ;;  %v6686_v4 = vld [vmem:[%s10814_s5 + $0x548] sm:$0xff]  ;;  %v6671_v40 = vld [vmem:[%s10814_s5 + $0x4d0] sm:$0xff] }
 0x53b   :  { %7122 = vmatprep.subr.bf16.mxu0 %v7121_v16  ;;  %v6667_v16 = vld [vmem:[%s10814_s5 + $0x4b0] sm:$0xff]  ;;  %v7171_v37 = vpack.c.bf16 %v6650_v10, %v6649_v19  ;;  %v6653_v29 = vld [vmem:[%s10814_s5 + $0x440] sm:$0xff]  ;;  %v6654_v50 = vld [vmem:[%s10814_s5 + $0x448] sm:$0xff] }
 0x53c   :  { %7156 = vmatpush3.bf16.msra.mxu1 %v7155_v62  ;;  %v6683_v62 = vld [vmem:[%s10814_s5 + $0x530] sm:$0xff]  ;;  %v7173_v44 = vpack.c.bf16 %v6668_v21, %v6667_v16  ;;  %v6672_v41 = vld [vmem:[%s10814_s5 + $0x4d8] sm:$0xff]  ;;  %v7179_v46 = vpack.c.bf16 %v6654_v50, %v6653_v29  ;;  %v6705_v61 = vld [vmem:[%s10814_s5 + $0x5e0] sm:$0xff] }
 0x53d   :  { %7158 = vmatprep.subr.bf16.mxu1 %v7157_v43  ;;  %v6701_v43 = vld [vmem:[%s10814_s5 + $0x5c0] sm:$0xff]  ;;  %v7207_v63 = vpack.c.bf16 %v6684_v26, %v6683_v62  ;;  %v6688_v54 = vld [vmem:[%s10814_s5 + $0x558] sm:$0xff]  ;;  %v7181_v58 = vpack.c.bf16 %v6672_v41, %v6671_v40  ;;  %v6655_v12 = vld [vmem:[%s10814_s5 + $0x450] sm:$0xff] }
 0x53e   :  { %7124 = vmatpush3.bf16.msra.mxu0 %v7123_v25  ;;  %v6651_v25 = vld [vmem:[%s10814_s5 + $0x430] sm:$0xff]  ;;  %v7209_v23 = vpack.c.bf16 %v6702_v13, %v6701_v43  ;;  %v6673_v17 = vld [vmem:[%s10814_s5 + $0x4e0] sm:$0xff]  ;;  %v6674_v30 = vld [vmem:[%s10814_s5 + $0x4e8] sm:$0xff]  ;;  %v5294_v43 = vmax.f32 %v10409_v28, 0.0 }
 0x53f   :  { %7126 = vmatprep.subr.bf16.mxu0 %v7125_v48  ;;  %v6669_v48 = vld [vmem:[%s10814_s5 + $0x4c0] sm:$0xff]  ;;  %v7175_v33 = vpack.c.bf16 %v6652_v38, %v6651_v25  ;;  %v6690_v7 = vld [vmem:[%s10814_s5 + $0x568] sm:$0xff]  ;;  %v7185_v5 = vpack.c.bf16 %v6674_v30, %v6673_v17  ;;  %v6675_v35 = vld [vmem:[%s10814_s5 + $0x4f0] sm:$0xff] }
 0x540   :  { %7160 = vmatpush3.bf16.msra.mxu1 %v7159_v59  ;;  %v6685_v59 = vld [vmem:[%s10814_s5 + $0x540] sm:$0xff]  ;;  %v7177_v42 = vpack.c.bf16 %v6670_v3, %v6669_v48  ;;  %v6676_v56 = vld [vmem:[%s10814_s5 + $0x4f8] sm:$0xff]  ;;  %v6691_v8 = vld [vmem:[%s10814_s5 + $0x570] sm:$0xff]  ;;  %v5297_v48 = vmax.f32 %v10463_v1, 0.0 }
 0x541   :  { %7194 = vmatprep.subr.bf16.mxu1 %v7193_v36  ;;  %v6704_v36 = vld [vmem:[%s10814_s5 + $0x5d8] sm:$0xff]  ;;  %v6657_v49 = vld [vmem:[%s10814_s5 + $0x460] sm:$0xff]  ;;  %v7189_v51 = vpack.c.bf16 %v6676_v56, %v6675_v35  ;;  %v6659_v47 = vld [vmem:[%s10814_s5 + $0x470] sm:$0xff] }
 0x542   :  { %7128 = vmatpush3.bf16.msra.mxu0 %v7127_v6  ;;  %v7211_v6 = vpack.c.bf16 %v6686_v4, %v6685_v59  ;;  %v7213_v15 = vpack.c.bf16 %v6704_v36, %v6703_v0  ;;  %v6692_v11 = vld [vmem:[%s10814_s5 + $0x578] sm:$0xff]  ;;  %v6725_v10 = vld [vmem:[%s10814_s5 + $0x680] sm:$0xff]  ;;  %v6710_v62 = vld [vmem:[%s10814_s5 + $0x608] sm:$0xff] }
 0x543   :  { %5705 = vmatmul.mubr.f32.vlgmr.msra.gmra.mrb[90].mxu1 %v5290_v52  ;;  %7162 = vmatprep.subr.bf16.mxu0 %v7161_v31  ;;  %v6687_v31 = vld [vmem:[%s10814_s5 + $0x550] sm:$0xff]  ;;  %v6656_v52 = vld [vmem:[%s10814_s5 + $0x458] sm:$0xff]  ;;  %v7223_v19 = vpack.c.bf16 %v6692_v11, %v6691_v8  ;;  %v6729_v28 = vld [vmem:[%s10814_s5 + $0x6a0] sm:$0xff] }
 0x544   :  { %7196 = vmatpush3.bf16.msra.mxu1 %v7195_v60  ;;  %5912 = vmatprep.mubr.f32.mxu1 %v5295_v45  ;;  %v6706_v60 = vld [vmem:[%s10814_s5 + $0x5e8] sm:$0xff]  ;;  %v7183_v14 = vpack.c.bf16 %v6656_v52, %v6655_v12  ;;  %v6727_v26 = vld [vmem:[%s10814_s5 + $0x690] sm:$0xff]  ;;  %v6713_v59 = vld [vmem:[%s10814_s5 + $0x620] sm:$0xff] }
 0x545   :  { %5601 = vmatmul.mubr.f32.vlgmr.msra.gmra.mrb[90].mxu0 %v5288_v34  ;;  %7198 = vmatprep.subr.bf16.mxu1 %v7197_v18  ;;  %v7215_v18 = vpack.c.bf16 %v6688_v54, %v6687_v31  ;;  %v7217_v45 = vpack.c.bf16 %v6706_v60, %v6705_v61  ;;  %v6707_v34 = vld [vmem:[%s10814_s5 + $0x5f0] sm:$0xff]  ;;  %v6714_v1 = vld [vmem:[%s10814_s5 + $0x628] sm:$0xff]  ;;  %v6716_v29 = vld [vmem:[%s10814_s5 + $0x638] sm:$0xff] }
 0x546   :  { %7164 = vmatpush3.bf16.msra.mxu0 %v7163_v20  ;;  %5808 = vmatprep.mubr.f32.mxu0 %v5293_v39  ;;  %v6689_v20 = vld [vmem:[%s10814_s5 + $0x560] sm:$0xff]  ;;  %v6658_v39 = vld [vmem:[%s10814_s5 + $0x468] sm:$0xff]  ;;  %v6711_v38 = vld [vmem:[%s10814_s5 + $0x610] sm:$0xff]  ;;  %v7235_v0 = vpack.c.bf16 %v6714_v1, %v6713_v59 }
 0x547   :  { %7166 = vmatprep.subr.bf16.mxu0 %v7165_v27  ;;  %v6708_v27 = vld [vmem:[%s10814_s5 + $0x5f8] sm:$0xff]  ;;  %v6731_v4 = vld [vmem:[%s10814_s5 + $0x6b0] sm:$0xff]  ;;  %v6733_v50 = vld [vmem:[%s10814_s5 + $0x6c0] sm:$0xff] }
 0x548   :  { %7200 = vmatpush3.bf16.msra.mxu1 %v7199_v22  ;;  %v7219_v22 = vpack.c.bf16 %v6690_v7, %v6689_v20  ;;  %v6718_v31 = vld [vmem:[%s10814_s5 + $0x648] sm:$0xff]  ;;  %v6735_v54 = vld [vmem:[%s10814_s5 + $0x6d0] sm:$0xff]  ;;  %v6720_v12 = vld [vmem:[%s10814_s5 + $0x658] sm:$0xff] }
 0x549   :  { %7202 = vmatprep.subr.bf16.mxu1 %v7201_v57  ;;  %v7221_v57 = vpack.c.bf16 %v6708_v27, %v6707_v34  ;;  %v6737_v52 = vld [vmem:[%s10814_s5 + $0x6e0] sm:$0xff]  ;;  %v6722_v20 = vld [vmem:[%s10814_s5 + $0x668] sm:$0xff]  ;;  %v6739_v7 = vld [vmem:[%s10814_s5 + $0x6f0] sm:$0xff] }
 0x54a   :  { %7168 = vmatpush3.bf16.msra.mxu0 %v7167_v2  ;;  %v7187_v2 = vpack.c.bf16 %v6658_v39, %v6657_v49  ;;  %v6724_v49 = vld [vmem:[%s10814_s5 + $0x678] sm:$0xff] }
 0x54b   :  { %7170 = vmatprep.subr.bf16.mxu0 %v7169_v24  ;;  %v6660_v24 = vld [vmem:[%s10814_s5 + $0x478] sm:$0xff] }
 0x54c   :  { %7204 = vmatpush3.bf16.msra.mxu1 %v7203_v55  ;;  %v6726_v55 = vld [vmem:[%s10814_s5 + $0x688] sm:$0xff]  ;;  %v7191_v16 = vpack.c.bf16 %v6660_v24, %v6659_v47 }
 0x54d   :  { %7206 = vmatprep.subr.bf16.mxu1 %v7205_v9  ;;  %v7225_v21 = vpack.c.bf16 %v6726_v55, %v6725_v10  ;;  %v6709_v9 = vld [vmem:[%s10814_s5 + $0x600] sm:$0xff] }
 0x54e   :  { %7172 = vmatpush3.bf16.msra.mxu0 %v7171_v37  ;;  %v6728_v37 = vld [vmem:[%s10814_s5 + $0x698] sm:$0xff]  ;;  %v7227_v13 = vpack.c.bf16 %v6710_v62, %v6709_v9 }
 0x54f   :  { %7174 = vmatprep.subr.bf16.mxu0 %v7173_v44  ;;  %v5292_v44 = vmax.f32 %v10392_v53, 0.0  ;;  %v7229_v25 = vpack.c.bf16 %v6728_v37, %v6727_v26  ;;  %v6730_v53 = vld [vmem:[%s10814_s5 + $0x6a8] sm:$0xff] }
 0x550   :  { %7208 = vmatpush3.bf16.msra.mxu1 %v7207_v63  ;;  %v6712_v63 = vld [vmem:[%s10814_s5 + $0x618] sm:$0xff] }
 0x551   :  { %7210 = vmatprep.subr.bf16.mxu1 %v7209_v23  ;;  %v7231_v3 = vpack.c.bf16 %v6712_v63, %v6711_v38  ;;  %v7233_v23 = vpack.c.bf16 %v6730_v53, %v6729_v28  ;;  %v6741_v28 = vld [vmem:[#allocation13] ss:$0 sm:$0xff] }
 0x552   :  { %7176 = vmatpush3.bf16.msra.mxu0 %v7175_v33  ;;  %v6732_v33 = vld [vmem:[%s10814_s5 + $0x6b8] sm:$0xff] }
 0x553   :  { %7178 = vmatprep.subr.bf16.mxu0 %v7177_v42  ;;  %v7237_v36 = vpack.c.bf16 %v6732_v33, %v6731_v4  ;;  %v6715_v42 = vld [vmem:[%s10814_s5 + $0x630] sm:$0xff] }
 0x554   :  { %7212 = vmatpush3.bf16.msra.mxu1 %v7211_v6  ;;  %v6734_v6 = vld [vmem:[%s10814_s5 + $0x6c8] sm:$0xff]  ;;  %v7239_v40 = vpack.c.bf16 %v6716_v29, %v6715_v42 }
 0x555   :  { %7214 = vmatprep.subr.bf16.mxu1 %v7213_v15  ;;  %v7241_v41 = vpack.c.bf16 %v6734_v6, %v6733_v50  ;;  %v6717_v15 = vld [vmem:[%s10814_s5 + $0x640] sm:$0xff] }
 0x556   :  { %7180 = vmatpush3.bf16.msra.mxu0 %v7179_v46  ;;  %v6736_v46 = vld [vmem:[%s10814_s5 + $0x6d8] sm:$0xff]  ;;  %v7243_v61 = vpack.c.bf16 %v6718_v31, %v6717_v15 }
 0x557   :  { %7182 = vmatprep.subr.bf16.mxu0 %v7181_v58  ;;  %v7245_v60 = vpack.c.bf16 %v6736_v46, %v6735_v54  ;;  %v6719_v58 = vld [vmem:[%s10814_s5 + $0x650] sm:$0xff] }
 0x558   :  { %7216 = vmatpush3.bf16.msra.mxu1 %v7215_v18  ;;  %v6738_v18 = vld [vmem:[%s10814_s5 + $0x6e8] sm:$0xff]  ;;  %v7247_v17 = vpack.c.bf16 %v6720_v12, %v6719_v58 }
 0x559   :  { %7218 = vmatprep.subr.bf16.mxu1 %v7217_v45  ;;  %v7249_v30 = vpack.c.bf16 %v6738_v18, %v6737_v52  ;;  %v6721_v45 = vld [vmem:[%s10814_s5 + $0x660] sm:$0xff] }
 0x55a   :  { %7184 = vmatpush3.bf16.msra.mxu0 %v7183_v14  ;;  %v6740_v14 = vld [vmem:[%s10814_s5 + $0x6f8] sm:$0xff]  ;;  %v7251_v34 = vpack.c.bf16 %v6722_v20, %v6721_v45 }
 0x55b   :  { %7186 = vmatprep.subr.bf16.mxu0 %v7185_v5  ;;  %v7253_v27 = vpack.c.bf16 %v6740_v14, %v6739_v7  ;;  %v6723_v5 = vld [vmem:[%s10814_s5 + $0x670] sm:$0xff] }
 0x55c   :  { %7220 = vmatpush3.bf16.msra.mxu1 %v7219_v22  ;;  %v7255_v39 = vpack.c.bf16 %v6724_v49, %v6723_v5  ;;  %v5296_v22 = vmax.f32 %v10454_v32, 0.0 }
 0x55d   :  { %7222 = vmatprep.subr.bf16.mxu1 %v7221_v57 }
 0x55e   :  { %7188 = vmatpush3.bf16.msra.mxu0 %v7187_v2 }
 0x55f   :  { %7190 = vmatprep.subr.bf16.mxu0 %v7189_v51 }
 0x560   :  { %7224 = vmatpush3.bf16.msra.mxu1 %v7223_v19 }
 0x562   :  { %7192 = vmatpush3.bf16.msra.mxu0 %v7191_v16 }
 0x563   :  { %5913 = vmatmul.mubr.f32.vlgmr.msra.gmra.mrb[92].mxu1 %v5294_v43  ;;  %7226 = vmatprep.subr.bf16.mxu0 %v7225_v21 }
 0x565   :  { %5809 = vmatmul.mubr.f32.vlgmr.msra.gmra.mrb[92].mxu0 %v5292_v44 }
 0x566   :  { %7228 = vmatpush3.bf16.msra.mxu0 %v7227_v13  ;;  %6016 = vmatprep.mubr.f32.mxu0 %v5297_v48 }
 0x567   :  { %7230 = vmatprep.subr.bf16.mxu0 %v7229_v25 }
 0x56a   :  { %7232 = vmatpush3.bf16.msra.mxu0 %v7231_v3 }
 0x56b   :  { %7234 = vmatprep.subr.bf16.mxu0 %v7233_v23 }
 0x56e   :  { %7236 = vmatpush3.bf16.msra.mxu0 %v7235_v0 }
 0x56f   :  { %7238 = vmatprep.subr.bf16.mxu0 %v7237_v36 }
 0x572   :  { %7240 = vmatpush3.bf16.msra.mxu0 %v7239_v40 }
 0x573   :  { %7242 = vmatprep.subr.bf16.mxu0 %v7241_v41 }
 0x576   :  { %7244 = vmatpush3.bf16.msra.mxu0 %v7243_v61 }
 0x577   :  { %7246 = vmatprep.subr.bf16.mxu0 %v7245_v60 }
 0x57a   :  { %7248 = vmatpush3.bf16.msra.mxu0 %v7247_v17 }
 0x57b   :  { %7250 = vmatprep.subr.bf16.mxu0 %v7249_v30 }
 0x57e   :  { %7252 = vmatpush3.bf16.msra.mxu0 %v7251_v34 }
 0x57f   :  { %7254 = vmatprep.subr.bf16.mxu0 %v7253_v27 }
 0x582   :  { %7256 = vmatpush3.bf16.msra.mxu0 %v7255_v39 }
 0x585   :  { %6017 = vmatmul.mubr.f32.vlgmr.msra.gmra.mrb[94].mxu0 %v5296_v22 }
 0x5f6   :  { %v6855_v35 = vpop.f32.mrb[88].mxu1 }
 0x5f7   :  { %v6856_v56 = vpop.f32.mrb[89].mxu1 }
 0x5f8   :  { %v6857_v57 = vadd.f32 %v6856_v56, %v6855_v35  ;;  %v6820_v8 = vpop.f32.mrb[88].mxu0 }
 0x5f9   :  { %v6821_v11 = vpop.f32.mrb[89].mxu0 }
 0x5fa   :  { %v6822_v2 = vadd.f32 %v6821_v11, %v6820_v8 }
 0x5fc   :  { %v5500_v51 = vadd.f32 %v6857_v57, %v6822_v2 }
 0x616   :  { %v6925_v47 = vpop.f32.mrb[90].mxu1 }
 0x617   :  { %v6926_v24 = vpop.f32.mrb[91].mxu1 }
 0x618   :  { %v6927_v19 = vadd.f32 %v6926_v24, %v6925_v47  ;;  %v6890_v10 = vpop.f32.mrb[90].mxu0 }
 0x619   :  { %v6891_v55 = vpop.f32.mrb[91].mxu0 }
 0x61a   :  { %v6892_v16 = vadd.f32 %v6891_v55, %v6890_v10 }
 0x61c   :  { %v5606_v21 = vadd.f32 %v6892_v16, %v5500_v51 }
 0x61e   :  { %v5710_v9 = vadd.f32 %v6927_v19, %v5606_v21 }
 0x636   :  { %v6995_v62 = vpop.f32.mrb[92].mxu1 }
 0x637   :  { %v6996_v26 = vpop.f32.mrb[93].mxu1 }
 0x638   :  { %v6997_v37 = vadd.f32 %v6996_v26, %v6995_v62  ;;  %v6960_v32 = vpop.f32.mrb[92].mxu0 }
 0x639   :  { %v6961_v43 = vpop.f32.mrb[93].mxu0 }
 0x63a   :  { %v6962_v13 = vadd.f32 %v6961_v43, %v6960_v32 }
 0x63c   :  { %v5814_v44 = vadd.f32 %v6962_v13, %v5710_v9 }
 0x63e   :  { %v5918_v25 = vadd.f32 %v6997_v37, %v5814_v44 }
 0x658   :  { %v7030_v38 = vpop.f32.mrb[94].mxu0 }
 0x659   :  { %v7031_v63 = vpop.f32.mrb[95].mxu0 }
 0x65a   :  { %v7032_v48 = vadd.f32 %v7031_v63, %v7030_v38 }
 0x65c   :  { %v6022_v53 = vadd.f32 %v7032_v48, %v5918_v25 }
 0x65e   :  { %v6030_v3 = vadd.f32 %v6741_v28, %v6022_v53 }
 0x660   :  { %v6032_v23 = vsel %vm6031_vm6, %v6030_v3, -inf }
 0x661   :  { %6033 = vmax.xlane.f32.xlu0 %v6032_v23 }
 0x6ee   :  { %v6034_v59 = vpop.xlane.xlu0 %6033 }
 0x6ef   :  { %v6035_v1 = vsub.f32 %v6030_v3, %v6034_v59 }
 0x6f1   :  { %v6036_v4 = vmul.f32 1.442695, %v6035_v1 }
 0x6f3   :  { %8079 = vpow2.f32 %v6036_v4 }
 0x6fd   :  { %v8080_v33 = vpop.eup %8079 }
 0x6fe   :  { %v6038_v0 = vsel %vm6031_vm6, %v8080_v33, 0.0 }
 0x6ff   :  { %6039 = vadd.xlane.f32.xlu1 %v6038_v0 }
 0x78c   :  { %v6040_v36 = vpop.xlane.xlu1 %6039 }
 0x78d   :  { %8081 = vlog2.f32 %v6040_v36 }
 0x797   :  { %v8082_v42 = vpop.eup %8081 }
 0x798   :  { %v6042_v29 = vmul.f32 0.6931472, %v8082_v42 }
 0x79a   :  { %v6043_v50 = vsub.f32 %v6035_v1, %v6042_v29 }
 0x79c   :  { %6044 = vst.msk [vmem:[%s10816_s7] sm:$0xff] %vm6031_vm6, %v6043_v50 }
 0x79d   :  { %6049 = vsyncpa [#allocation7], 1 }
 0x79e   :  { %6050 = vsyncpa [#allocation9], 1 }
 0x79f   :  { %6051 = vsyncpa [#allocation12], 1 }

</bundles_post_ra>
